<compile_context>
chip_gen: v7x
topology: tpu7x:2x2x1
jax: 0.10.0
libtpu: 0.0.40
codegen_flags: <defaults>
</compile_context>

<pallas_src>
import functools

import jax
import jax.numpy as jnp
from jax import lax
from jax.experimental import pallas as pl
from jax.experimental.pallas import tpu as pltpu


# ----------------------------------------------------------------------------
# Generic dense kernel  (x @ w + b), bf16 operands / f32 accumulation
# ----------------------------------------------------------------------------
def _dense_kernel(x_ref, w_ref, b_ref, o_ref):
    o_ref[...] = (
        jnp.dot(x_ref[...], w_ref[...], preferred_element_type=jnp.float32)
        + b_ref[...]
    )


def pallas_dense(x, w, b=None):
    """(M, K) @ (K, N) + b.  M tiled without padding small M up to 128."""
    M, K = x.shape
    N = w.shape[1]
    if b is None:
        b = jnp.zeros((N,), jnp.float32)
    b2 = b.astype(jnp.float32).reshape(1, N)
    tm = ((M + 7) // 8) * 8 if M <= 256 else 256
    Mp = ((M + tm - 1) // tm) * tm
    xp = x if Mp == M else jnp.pad(x, ((0, Mp - M), (0, 0)))
    out = pl.pallas_call(
        _dense_kernel,
        out_shape=jax.ShapeDtypeStruct((Mp, N), jnp.float32),
        grid=(Mp // tm,),
        in_specs=[
            pl.BlockSpec((tm, K), lambda i: (i, 0)),
            pl.BlockSpec((K, N), lambda i: (0, 0)),
            pl.BlockSpec((1, N), lambda i: (0, 0)),
        ],
        out_specs=pl.BlockSpec((tm, N), lambda i: (i, 0)),
        compiler_params=pltpu.CompilerParams(dimension_semantics=("parallel",)),
    )(xp, w, b2)
    return out if Mp == M else out[:M]


# ----------------------------------------------------------------------------
# Fused conv block: 3x3 conv (pad=1) + bias with BN-eval folded in.
# Reads the padded image once; 9 shifted in-VMEM slices -> 9 accumulated matmuls.
# ----------------------------------------------------------------------------
def _conv3x3_kernel(x_ref, w_ref, b_ref, o_ref, *, wp):
    # x_ref: (Hp*Wp + 8, C) padded flat image (bf16);  w_ref: (9, C, O) (bf16)
    # o_ref: (H*Wp, O) f32  -- width-padded rows; junk columns sliced off outside.
    nrows = o_ref.shape[0]
    o_ref[...] = jnp.zeros_like(o_ref) + b_ref[...]
    for j in range(9):
        off = (j // 3) * wp + (j % 3)
        xs = x_ref[pl.ds(off, nrows), :]
        o_ref[...] += jnp.dot(xs, w_ref[j], preferred_element_type=jnp.float32)


def conv_block_pallas(x_nhwc, w_oihw, b, bn_scale):
    """Conv3x3(pad=1) + BN(eval, folded) in Pallas; MaxPool2x2 + ReLU in XLA."""
    N, H, W, C = x_nhwc.shape
    O = w_oihw.shape[0]
    Hp, Wp = H + 2, W + 2
    Cp = max(C, 8)                                     # pad tiny channel counts
    xp = jnp.pad(x_nhwc, ((0, 0), (1, 1), (1, 1), (0, Cp - C)))
    xflat = xp.reshape(N, Hp * Wp, Cp)
    xflat = jnp.pad(xflat, ((0, 0), (0, 8), (0, 0))).astype(jnp.bfloat16)
    rows_in = Hp * Wp + 8
    nrows = H * Wp

    wk = jnp.transpose(w_oihw, (2, 3, 1, 0)).reshape(9, C, O)   # (dy,dx,c,o)
    wk = jnp.pad(wk, ((0, 0), (0, Cp - C), (0, 0)))
    wk = (wk * bn_scale).astype(jnp.bfloat16)
    bk = (b * bn_scale).astype(jnp.float32).reshape(1, O)

    y = pl.pallas_call(
        functools.partial(_conv3x3_kernel, wp=Wp),
        out_shape=jax.ShapeDtypeStruct((N, nrows, O), jnp.float32),
        grid=(N,),
        in_specs=[
            pl.BlockSpec((None, rows_in, Cp), lambda n: (n, 0, 0)),
            pl.BlockSpec((9, Cp, O), lambda n: (0, 0, 0)),
            pl.BlockSpec((1, O), lambda n: (0, 0)),
        ],
        out_specs=pl.BlockSpec((None, nrows, O), lambda n: (n, 0, 0)),
        compiler_params=pltpu.CompilerParams(dimension_semantics=("parallel",)),
    )(xflat, wk, bk)

    y = y.reshape(N, H, Wp, O)[:, :, :W, :]                     # drop junk columns
    y = y.reshape(N, H // 2, 2, W // 2, 2, O).max(axis=(2, 4))  # maxpool 2x2
    return jnp.maximum(y, 0.0)                                  # dropout(eval)=id; ReLU
    # TODO(synk): maxpool/ReLU kept in XLA (tiny tensors); could be fused in-kernel.


# ----------------------------------------------------------------------------
# Fused FastFFlayer: LN + slow projections + delta rule + out proj + residual.
# Heads are stacked along the lane axis: per batch element the fast weights are
# one block-diagonal (num_head*dim_head)^2 matrix; updates are masked so heads
# never mix.  Grid = batch (independent -> "parallel").
# ----------------------------------------------------------------------------
def _fast_ff_kernel(x_ref, xT_ref, lng_ref, lnb_ref, lngc_ref, lnbc_ref,
                    wq_ref, wkT_ref, wv_ref, wb_ref, bmat_ref, mask_ref,
                    wout_ref, o_ref, dout_scr):
    f32 = jnp.float32
    S = x_ref.shape[0]
    Dp = mask_ref.shape[0]

    # LayerNorm, row-major orientation (for q, v, beta)
    x = x_ref[...]                                              # (S, H)
    mu = jnp.mean(x, axis=-1, keepdims=True)
    var = jnp.mean(jnp.square(x - mu), axis=-1, keepdims=True)
    ln = (x - mu) * lax.rsqrt(var + 1e-5) * lng_ref[...] + lnb_ref[...]

    # Same LayerNorm in transposed orientation (produces k directly as columns,
    # so no in-kernel transpose and no duplicated k in HBM).
    xT = xT_ref[...]                                            # (H, S)
    muT = jnp.mean(xT, axis=0, keepdims=True)
    varT = jnp.mean(jnp.square(xT - muT), axis=0, keepdims=True)
    lnT = (xT - muT) * lax.rsqrt(varT + 1e-5) * lngc_ref[...] + lnbc_ref[...]

    mask = mask_ref[...]                                        # (Dp, Dp) head blocks

    q = jnp.dot(ln, wq_ref[...], preferred_element_type=f32)    # (S, Dp)
    v = jnp.dot(ln, wv_ref[...], preferred_element_type=f32)    # (S, Dp)
    bz = jnp.dot(ln, wb_ref[...], preferred_element_type=f32)   # (S, nh)
    beta = 1.0 / (1.0 + jnp.exp(-bz))
    bb = jnp.dot(beta, bmat_ref[...], preferred_element_type=f32)   # (S, Dp) per-head
    kT = jnp.dot(wkT_ref[...], lnT, preferred_element_type=f32)     # (Dp, S)

    # elu(x)+1, then per-head sum normalization (head sums via block-diag mask matmul)
    q = jnp.where(q > 0.0, q + 1.0, jnp.exp(q))
    q = q / jnp.dot(q, mask, preferred_element_type=f32)
    kT = jnp.where(kT > 0.0, kT + 1.0, jnp.exp(kT))
    kT = kT / jnp.dot(mask, kT, preferred_element_type=f32)

    # Sequential delta rule (f32 state), fully unrolled over the short static slen.
    W = jnp.zeros((Dp, Dp), f32)
    for t in range(S):
        k_col = kT[:, t:t + 1]                                  # (Dp, 1)
        v_t = v[t:t + 1, :]                                     # (1, Dp)
        b_t = bb[t:t + 1, :]
        q_t = q[t:t + 1, :]
        v_old = jnp.sum(k_col * W, axis=0, keepdims=True)       # k_t @ W (block-diag)
        u = b_t * (v_t - v_old)
        W = W + mask * (k_col * u)                              # masked rank-1 update
        dout_scr[pl.ds(t, 1), :] = jnp.dot(q_t, W, preferred_element_type=f32)

    o_ref[...] = x + jnp.dot(dout_scr[...], wout_ref[...], preferred_element_type=f32)


def _split_slow_weights(w_slow, num_head, dim_head):
    Hh = w_slow.shape[0]
    ws = w_slow.reshape(Hh, num_head, 3 * dim_head + 1)
    wq = ws[:, :, :dim_head].reshape(Hh, num_head * dim_head)
    wk = ws[:, :, dim_head:2 * dim_head].reshape(Hh, num_head * dim_head)
    wv = ws[:, :, 2 * dim_head:3 * dim_head].reshape(Hh, num_head * dim_head)
    wb = ws[:, :, 3 * dim_head]                                  # (H, num_head)
    return wq, wk, wv, wb


def fast_ff_layer(x, p, *, num_head, dim_head):
    """x: (bsz, slen, H) residual stream -> same shape."""
    bsz, slen, H = x.shape
    Dp = num_head * dim_head
    wq, wk, wv, wb = _split_slow_weights(p["w_slow"], num_head, dim_head)
    head_id = jnp.arange(Dp, dtype=jnp.int32) // dim_head
    mask = (head_id[:, None] == head_id[None, :]).astype(jnp.float32)     # (Dp, Dp)
    bmat = (jnp.arange(num_head, dtype=jnp.int32)[:, None]
            == head_id[None, :]).astype(jnp.float32)                      # (nh, Dp)
    xT = jnp.transpose(x, (0, 2, 1))                                      # (bsz, H, slen)
    lng = p["ln_g"].reshape(1, H)
    lnb = p["ln_b"].reshape(1, H)
    lngc = p["ln_g"].reshape(H, 1)
    lnbc = p["ln_b"].reshape(H, 1)

    return pl.pallas_call(
        _fast_ff_kernel,
        out_shape=jax.ShapeDtypeStruct((bsz, slen, H), jnp.float32),
        grid=(bsz,),
        in_specs=[
            pl.BlockSpec((None, slen, H), lambda b: (b, 0, 0)),      # x
            pl.BlockSpec((None, H, slen), lambda b: (b, 0, 0)),      # x^T
            pl.BlockSpec((1, H), lambda b: (0, 0)),                  # ln gamma (row)
            pl.BlockSpec((1, H), lambda b: (0, 0)),                  # ln beta  (row)
            pl.BlockSpec((H, 1), lambda b: (0, 0)),                  # ln gamma (col)
            pl.BlockSpec((H, 1), lambda b: (0, 0)),                  # ln beta  (col)
            pl.BlockSpec((H, Dp), lambda b: (0, 0)),                 # Wq
            pl.BlockSpec((Dp, H), lambda b: (0, 0)),                 # Wk^T
            pl.BlockSpec((H, Dp), lambda b: (0, 0)),                 # Wv
            pl.BlockSpec((H, num_head), lambda b: (0, 0)),           # Wbeta
            pl.BlockSpec((num_head, Dp), lambda b: (0, 0)),          # beta broadcast mat
            pl.BlockSpec((Dp, Dp), lambda b: (0, 0)),                # head block mask
            pl.BlockSpec((Dp, H), lambda b: (0, 0)),                 # Wout
        ],
        out_specs=pl.BlockSpec((None, slen, H), lambda b: (b, 0, 0)),
        scratch_shapes=[pltpu.VMEM((slen, Dp), jnp.float32)],
        compiler_params=pltpu.CompilerParams(dimension_semantics=("parallel",)),
    )(x, xT, lng, lnb, lngc, lnbc, wq, wk.T, wv, wb, bmat, mask, p["w_out"])


# ----------------------------------------------------------------------------
# Fused TransformerFFlayers: LN + W1 + ReLU + W2 + residual in one kernel.
# ----------------------------------------------------------------------------
def _tff_kernel(x_ref, lng_ref, lnb_ref, w1_ref, b1_ref, w2_ref, b2_ref, o_ref):
    x = x_ref[...]
    mu = jnp.mean(x, axis=-1, keepdims=True)
    var = jnp.mean(jnp.square(x - mu), axis=-1, keepdims=True)
    ln = (x - mu) * lax.rsqrt(var + 1e-5) * lng_ref[...] + lnb_ref[...]
    h = jnp.dot(ln, w1_ref[...], preferred_element_type=jnp.float32) + b1_ref[...]
    h = jnp.maximum(h, 0.0)
    o_ref[...] = x + jnp.dot(h, w2_ref[...], preferred_element_type=jnp.float32) + b2_ref[...]


def transformer_ff_layer(x, p):
    bsz, slen, H = x.shape
    dF = p["w1"].shape[1]
    return pl.pallas_call(
        _tff_kernel,
        out_shape=jax.ShapeDtypeStruct((bsz, slen, H), jnp.float32),
        grid=(bsz,),
        in_specs=[
            pl.BlockSpec((None, slen, H), lambda b: (b, 0, 0)),
            pl.BlockSpec((1, H), lambda b: (0, 0)),
            pl.BlockSpec((1, H), lambda b: (0, 0)),
            pl.BlockSpec((H, dF), lambda b: (0, 0)),
            pl.BlockSpec((1, dF), lambda b: (0, 0)),
            pl.BlockSpec((dF, H), lambda b: (0, 0)),
            pl.BlockSpec((1, H), lambda b: (0, 0)),
        ],
        out_specs=pl.BlockSpec((None, slen, H), lambda b: (b, 0, 0)),
        compiler_params=pltpu.CompilerParams(dimension_semantics=("parallel",)),
    )(x, p["ln_g"].reshape(1, H), p["ln_b"].reshape(1, H),
      p["w1"], p["b1"].reshape(1, dF), p["w2"], p["b2"].reshape(1, H))


# ----------------------------------------------------------------------------
# Full forward
# ----------------------------------------------------------------------------
@functools.partial(jax.jit, static_argnames=("num_classes", "num_head", "dim_head"))
def conv_delta_forward(params, x, fb, *, num_classes, num_head, dim_head):
    slen, bsz, C, hs, ws = x.shape
    h = jnp.transpose(x.reshape(slen * bsz, C, hs, ws), (0, 2, 3, 1))   # NCHW -> NHWC
    bn_scale = (1.0 + 1e-5) ** -0.5                                     # BN eval, default stats
    for (w, b) in params["conv"]:
        h = conv_block_pallas(h, w, b, bn_scale)

    feat = h.reshape(slen, bsz, -1)                                     # conv features
    emb = jax.nn.one_hot(fb, num_classes, dtype=jnp.float32)
    out = jnp.concatenate([feat, emb], axis=-1)
    M = slen * bsz
    hid = pallas_dense(out.reshape(M, -1).astype(jnp.bfloat16),
                       params["in_proj_w"].astype(jnp.bfloat16),
                       params["in_proj_b"])
    H = hid.shape[-1]
    hid = jnp.transpose(hid.reshape(slen, bsz, H), (1, 0, 2))           # (bsz, slen, H)

    for layer in params["layers"]:
        hid = fast_ff_layer(hid, layer["fast"], num_head=num_head, dim_head=dim_head)
        hid = transformer_ff_layer(hid, layer["tff"])

    # lane-dense logits: pad N to 128 inside the matmul, slice outside
    npad = ((num_classes + 127) // 128) * 128
    ow = jnp.pad(params["out_w"], ((0, 0), (0, npad - num_classes))).astype(jnp.bfloat16)
    ob = jnp.pad(params["out_b"], ((0, npad - num_classes),))
    logits = pallas_dense(hid.reshape(bsz * slen, H).astype(jnp.bfloat16), ow, ob)
    logits = logits[:, :num_classes].reshape(bsz, slen, num_classes)
    logits = jnp.transpose(logits, (1, 0, 2))                           # (slen, bsz, C)
    return logits, None


# ----------------------------------------------------------------------------
# Deterministic parameter init (shapes follow ConvDeltaModel.__init__)
# ----------------------------------------------------------------------------
def init_params(key, *, hidden, num_classes, num_layers, num_head, dim_head,
                dim_ff, input_channels=1, out_channels=64):
    keys = iter(jax.random.split(key, 128))

    def nrm(shape, scale=0.05):
        return scale * jax.random.normal(next(keys), shape, dtype=jnp.float32)

    conv = []
    cin = input_channels
    for _ in range(4):
        conv.append((nrm((out_channels, cin, 3, 3)), nrm((out_channels,))))
        cin = out_channels
    conv_feat = out_channels  # 1x1 spatial after four 2x2 pools on a 16x16 input

    params = dict(
        conv=conv,
        in_proj_w=nrm((conv_feat + num_classes, hidden)),
        in_proj_b=nrm((hidden,)),
        layers=[],
        out_w=nrm((hidden, num_classes)),
        out_b=nrm((num_classes,)),
    )
    for _ in range(num_layers):
        fast = dict(
            ln_g=jnp.ones((hidden,), jnp.float32),
            ln_b=jnp.zeros((hidden,), jnp.float32),
            w_slow=nrm((hidden, num_head * (3 * dim_head + 1))),   # no bias
            w_out=nrm((num_head * dim_head, hidden)),              # no bias
        )
        tff = dict(
            ln_g=jnp.ones((hidden,), jnp.float32),
            ln_b=jnp.zeros((hidden,), jnp.float32),
            w1=nrm((hidden, dim_ff)), b1=nrm((dim_ff,)),
            w2=nrm((dim_ff, hidden)), b2=nrm((hidden,)),
        )
        params["layers"].append(dict(fast=fast, tff=tff))
    return params


if __name__ == "__main__":
    key = jax.random.PRNGKey(0)
    slen, bsz, hs, ws = 8, 2, 16, 16          # omniglot-style: 1 input channel
    hidden, num_classes = 32, 5
    num_layers, num_head, dim_head, dim_ff = 1, 2, 16, 64

    kx, kf, kp = jax.random.split(key, 3)
    x = jax.random.normal(kx, (slen, bsz, 1, hs, ws), dtype=jnp.float32)
    fb = jax.random.randint(kf, (slen, bsz), 0, num_classes)
    params = init_params(
        kp, hidden=hidden, num_classes=num_classes, num_layers=num_layers,
        num_head=num_head, dim_head=dim_head, dim_ff=dim_ff,
    )

    out, state = conv_delta_forward(
        params, x, fb, num_classes=num_classes, num_head=num_head, dim_head=dim_head
    )
    out = jax.block_until_ready(out)
    assert out.shape == (slen, bsz, num_classes)
    assert state is None
    assert bool(jnp.all(jnp.isfinite(out)))
    print("KERNEL_OK")
</pallas_src>

<mosaic_0001>
module attributes {stable_mosaic.version = 11 : i64} {
  func.func @_conv3x3_kernel(%arg0: i32, %arg1: memref<1x332x8xbf16, #tpu.memory_space<vmem>>, %arg2: memref<9x8x64xbf16, #tpu.memory_space<vmem>>, %arg3: memref<1x64xf32, #tpu.memory_space<vmem>>, %arg4: memref<1x288x64xf32, #tpu.memory_space<vmem>>) attributes {dimension_semantics = [#tpu.dimension_semantics<parallel>], iteration_bounds = array<i64: 16>, scalar_prefetch = 0 : i64, scratch_operands = 0 : i64, tpu.core_type = #tpu.core_type<tc>, window_params = [{transform_indices = @transform_0, window_bounds = array<i64: 1, 332, 8>}, {pipeline_mode = #tpu.pipeline_mode<synchronous>, transform_indices = @transform_1, window_bounds = array<i64: 9, 8, 64>}, {pipeline_mode = #tpu.pipeline_mode<synchronous>, transform_indices = @transform_2, window_bounds = array<i64: 1, 64>}, {transform_indices = @transform_3, window_bounds = array<i64: 1, 288, 64>}]} {
    %cst = arith.constant 0.000000e+00 : f32
    %0 = vector.broadcast %cst : f32 to vector<288x64xf32>
    %c0 = arith.constant 0 : index
    %c0_0 = arith.constant 0 : index
    %1 = vector.load %arg3[%c0, %c0_0] : memref<1x64xf32, #tpu.memory_space<vmem>>, vector<1x64xf32>
    %2 = vector.broadcast %1 : vector<1x64xf32> to vector<288x64xf32>
    %3 = arith.addf %0, %2 : vector<288x64xf32>
    %c0_1 = arith.constant 0 : index
    %c0_2 = arith.constant 0 : index
    %c0_3 = arith.constant 0 : index
    %4 = vector.load %arg4[%c0_1, %c0_2, %c0_3] : memref<1x288x64xf32, #tpu.memory_space<vmem>>, vector<1x288x64xf32>
    %5 = vector.shape_cast %4 : vector<1x288x64xf32> to vector<288x64xf32>
    %6 = vector.shape_cast %3 : vector<288x64xf32> to vector<1x288x64xf32>
    tpu.vector_store %arg4[%c0_1, %c0_2, %c0_3], %6 {strides = array<i32>} : memref<1x288x64xf32, #tpu.memory_space<vmem>>, vector<1x288x64xf32>,
    %c0_4 = arith.constant 0 : index
    %c0_5 = arith.constant 0 : index
    %c0_6 = arith.constant 0 : index
    %7 = vector.load %arg1[%c0_4, %c0_5, %c0_6] : memref<1x332x8xbf16, #tpu.memory_space<vmem>>, vector<1x288x8xbf16>
    %8 = vector.shape_cast %7 : vector<1x288x8xbf16> to vector<288x8xbf16>
    %c0_7 = arith.constant 0 : index
    %c0_8 = arith.constant 0 : index
    %c0_9 = arith.constant 0 : index
    %9 = vector.load %arg4[%c0_7, %c0_8, %c0_9] : memref<1x288x64xf32, #tpu.memory_space<vmem>>, vector<1x288x64xf32>
    %10 = vector.shape_cast %9 : vector<1x288x64xf32> to vector<288x64xf32>
    %c0_10 = arith.constant 0 : index
    %c0_11 = arith.constant 0 : index
    %c0_12 = arith.constant 0 : index
    %11 = vector.load %arg2[%c0_10, %c0_11, %c0_12] : memref<9x8x64xbf16, #tpu.memory_space<vmem>>, vector<1x8x64xbf16>
    %12 = vector.shape_cast %11 : vector<1x8x64xbf16> to vector<8x64xbf16>
    %cst_13 = arith.constant dense<0.000000e+00> : vector<288x64xf32>
    %13 = tpu.matmul %8, %12, %cst_13 {dimension_numbers = #tpu.dot_dimension_numbers<[1], [0], [0], [1], [0, 0, 1, 1], [], []>} : vector<288x8xbf16>, vector<8x64xbf16>, vector<288x64xf32> -> vector<288x64xf32>
    %14 = arith.addf %10, %13 : vector<288x64xf32>
    %c0_14 = arith.constant 0 : index
    %c0_15 = arith.constant 0 : index
    %c0_16 = arith.constant 0 : index
    %15 = vector.load %arg4[%c0_14, %c0_15, %c0_16] : memref<1x288x64xf32, #tpu.memory_space<vmem>>, vector<1x288x64xf32>
    %16 = vector.shape_cast %15 : vector<1x288x64xf32> to vector<288x64xf32>
    %17 = vector.shape_cast %14 : vector<288x64xf32> to vector<1x288x64xf32>
    tpu.vector_store %arg4[%c0_14, %c0_15, %c0_16], %17 {strides = array<i32>} : memref<1x288x64xf32, #tpu.memory_space<vmem>>, vector<1x288x64xf32>,
    %c0_17 = arith.constant 0 : index
    %c1 = arith.constant 1 : index
    %c0_18 = arith.constant 0 : index
    %18 = vector.load %arg1[%c0_17, %c1, %c0_18] : memref<1x332x8xbf16, #tpu.memory_space<vmem>>, vector<1x288x8xbf16>
    %19 = vector.shape_cast %18 : vector<1x288x8xbf16> to vector<288x8xbf16>
    %c0_19 = arith.constant 0 : index
    %c0_20 = arith.constant 0 : index
    %c0_21 = arith.constant 0 : index
    %20 = vector.load %arg4[%c0_19, %c0_20, %c0_21] : memref<1x288x64xf32, #tpu.memory_space<vmem>>, vector<1x288x64xf32>
    %21 = vector.shape_cast %20 : vector<1x288x64xf32> to vector<288x64xf32>
    %c1_22 = arith.constant 1 : index
    %c0_23 = arith.constant 0 : index
    %c0_24 = arith.constant 0 : index
    %22 = vector.load %arg2[%c1_22, %c0_23, %c0_24] : memref<9x8x64xbf16, #tpu.memory_space<vmem>>, vector<1x8x64xbf16>
    %23 = vector.shape_cast %22 : vector<1x8x64xbf16> to vector<8x64xbf16>
    %cst_25 = arith.constant dense<0.000000e+00> : vector<288x64xf32>
    %24 = tpu.matmul %19, %23, %cst_25 {dimension_numbers = #tpu.dot_dimension_numbers<[1], [0], [0], [1], [0, 0, 1, 1], [], []>} : vector<288x8xbf16>, vector<8x64xbf16>, vector<288x64xf32> -> vector<288x64xf32>
    %25 = arith.addf %21, %24 : vector<288x64xf32>
    %c0_26 = arith.constant 0 : index
    %c0_27 = arith.constant 0 : index
    %c0_28 = arith.constant 0 : index
    %26 = vector.load %arg4[%c0_26, %c0_27, %c0_28] : memref<1x288x64xf32, #tpu.memory_space<vmem>>, vector<1x288x64xf32>
    %27 = vector.shape_cast %26 : vector<1x288x64xf32> to vector<288x64xf32>
    %28 = vector.shape_cast %25 : vector<288x64xf32> to vector<1x288x64xf32>
    tpu.vector_store %arg4[%c0_26, %c0_27, %c0_28], %28 {strides = array<i32>} : memref<1x288x64xf32, #tpu.memory_space<vmem>>, vector<1x288x64xf32>,
    %c0_29 = arith.constant 0 : index
    %c2 = arith.constant 2 : index
    %c0_30 = arith.constant 0 : index
    %29 = vector.load %arg1[%c0_29, %c2, %c0_30] : memref<1x332x8xbf16, #tpu.memory_space<vmem>>, vector<1x288x8xbf16>
    %30 = vector.shape_cast %29 : vector<1x288x8xbf16> to vector<288x8xbf16>
    %c0_31 = arith.constant 0 : index
    %c0_32 = arith.constant 0 : index
    %c0_33 = arith.constant 0 : index
    %31 = vector.load %arg4[%c0_31, %c0_32, %c0_33] : memref<1x288x64xf32, #tpu.memory_space<vmem>>, vector<1x288x64xf32>
    %32 = vector.shape_cast %31 : vector<1x288x64xf32> to vector<288x64xf32>
    %c2_34 = arith.constant 2 : index
    %c0_35 = arith.constant 0 : index
    %c0_36 = arith.constant 0 : index
    %33 = vector.load %arg2[%c2_34, %c0_35, %c0_36] : memref<9x8x64xbf16, #tpu.memory_space<vmem>>, vector<1x8x64xbf16>
    %34 = vector.shape_cast %33 : vector<1x8x64xbf16> to vector<8x64xbf16>
    %cst_37 = arith.constant dense<0.000000e+00> : vector<288x64xf32>
    %35 = tpu.matmul %30, %34, %cst_37 {dimension_numbers = #tpu.dot_dimension_numbers<[1], [0], [0], [1], [0, 0, 1, 1], [], []>} : vector<288x8xbf16>, vector<8x64xbf16>, vector<288x64xf32> -> vector<288x64xf32>
    %36 = arith.addf %32, %35 : vector<288x64xf32>
    %c0_38 = arith.constant 0 : index
    %c0_39 = arith.constant 0 : index
    %c0_40 = arith.constant 0 : index
    %37 = vector.load %arg4[%c0_38, %c0_39, %c0_40] : memref<1x288x64xf32, #tpu.memory_space<vmem>>, vector<1x288x64xf32>
    %38 = vector.shape_cast %37 : vector<1x288x64xf32> to vector<288x64xf32>
    %39 = vector.shape_cast %36 : vector<288x64xf32> to vector<1x288x64xf32>
    tpu.vector_store %arg4[%c0_38, %c0_39, %c0_40], %39 {strides = array<i32>} : memref<1x288x64xf32, #tpu.memory_space<vmem>>, vector<1x288x64xf32>,
    %c0_41 = arith.constant 0 : index
    %c18 = arith.constant 18 : index
    %c0_42 = arith.constant 0 : index
    %40 = vector.load %arg1[%c0_41, %c18, %c0_42] : memref<1x332x8xbf16, #tpu.memory_space<vmem>>, vector<1x288x8xbf16>
    %41 = vector.shape_cast %40 : vector<1x288x8xbf16> to vector<288x8xbf16>
    %c0_43 = arith.constant 0 : index
    %c0_44 = arith.constant 0 : index
    %c0_45 = arith.constant 0 : index
    %42 = vector.load %arg4[%c0_43, %c0_44, %c0_45] : memref<1x288x64xf32, #tpu.memory_space<vmem>>, vector<1x288x64xf32>
    %43 = vector.shape_cast %42 : vector<1x288x64xf32> to vector<288x64xf32>
    %c3 = arith.constant 3 : index
    %c0_46 = arith.constant 0 : index
    %c0_47 = arith.constant 0 : index
    %44 = vector.load %arg2[%c3, %c0_46, %c0_47] : memref<9x8x64xbf16, #tpu.memory_space<vmem>>, vector<1x8x64xbf16>
    %45 = vector.shape_cast %44 : vector<1x8x64xbf16> to vector<8x64xbf16>
    %cst_48 = arith.constant dense<0.000000e+00> : vector<288x64xf32>
    %46 = tpu.matmul %41, %45, %cst_48 {dimension_numbers = #tpu.dot_dimension_numbers<[1], [0], [0], [1], [0, 0, 1, 1], [], []>} : vector<288x8xbf16>, vector<8x64xbf16>, vector<288x64xf32> -> vector<288x64xf32>
    %47 = arith.addf %43, %46 : vector<288x64xf32>
    %c0_49 = arith.constant 0 : index
    %c0_50 = arith.constant 0 : index
    %c0_51 = arith.constant 0 : index
    %48 = vector.load %arg4[%c0_49, %c0_50, %c0_51] : memref<1x288x64xf32, #tpu.memory_space<vmem>>, vector<1x288x64xf32>
    %49 = vector.shape_cast %48 : vector<1x288x64xf32> to vector<288x64xf32>
    %50 = vector.shape_cast %47 : vector<288x64xf32> to vector<1x288x64xf32>
    tpu.vector_store %arg4[%c0_49, %c0_50, %c0_51], %50 {strides = array<i32>} : memref<1x288x64xf32, #tpu.memory_space<vmem>>, vector<1x288x64xf32>,
    %c0_52 = arith.constant 0 : index
    %c19 = arith.constant 19 : index
    %c0_53 = arith.constant 0 : index
    %51 = vector.load %arg1[%c0_52, %c19, %c0_53] : memref<1x332x8xbf16, #tpu.memory_space<vmem>>, vector<1x288x8xbf16>
    %52 = vector.shape_cast %51 : vector<1x288x8xbf16> to vector<288x8xbf16>
    %c0_54 = arith.constant 0 : index
    %c0_55 = arith.constant 0 : index
    %c0_56 = arith.constant 0 : index
    %53 = vector.load %arg4[%c0_54, %c0_55, %c0_56] : memref<1x288x64xf32, #tpu.memory_space<vmem>>, vector<1x288x64xf32>
    %54 = vector.shape_cast %53 : vector<1x288x64xf32> to vector<288x64xf32>
    %c4 = arith.constant 4 : index
    %c0_57 = arith.constant 0 : index
    %c0_58 = arith.constant 0 : index
    %55 = vector.load %arg2[%c4, %c0_57, %c0_58] : memref<9x8x64xbf16, #tpu.memory_space<vmem>>, vector<1x8x64xbf16>
    %56 = vector.shape_cast %55 : vector<1x8x64xbf16> to vector<8x64xbf16>
    %cst_59 = arith.constant dense<0.000000e+00> : vector<288x64xf32>
    %57 = tpu.matmul %52, %56, %cst_59 {dimension_numbers = #tpu.dot_dimension_numbers<[1], [0], [0], [1], [0, 0, 1, 1], [], []>} : vector<288x8xbf16>, vector<8x64xbf16>, vector<288x64xf32> -> vector<288x64xf32>
    %58 = arith.addf %54, %57 : vector<288x64xf32>
    %c0_60 = arith.constant 0 : index
    %c0_61 = arith.constant 0 : index
    %c0_62 = arith.constant 0 : index
    %59 = vector.load %arg4[%c0_60, %c0_61, %c0_62] : memref<1x288x64xf32, #tpu.memory_space<vmem>>, vector<1x288x64xf32>
    %60 = vector.shape_cast %59 : vector<1x288x64xf32> to vector<288x64xf32>
    %61 = vector.shape_cast %58 : vector<288x64xf32> to vector<1x288x64xf32>
    tpu.vector_store %arg4[%c0_60, %c0_61, %c0_62], %61 {strides = array<i32>} : memref<1x288x64xf32, #tpu.memory_space<vmem>>, vector<1x288x64xf32>,
    %c0_63 = arith.constant 0 : index
    %c20 = arith.constant 20 : index
    %c0_64 = arith.constant 0 : index
    %62 = vector.load %arg1[%c0_63, %c20, %c0_64] : memref<1x332x8xbf16, #tpu.memory_space<vmem>>, vector<1x288x8xbf16>
    %63 = vector.shape_cast %62 : vector<1x288x8xbf16> to vector<288x8xbf16>
    %c0_65 = arith.constant 0 : index
    %c0_66 = arith.constant 0 : index
    %c0_67 = arith.constant 0 : index
    %64 = vector.load %arg4[%c0_65, %c0_66, %c0_67] : memref<1x288x64xf32, #tpu.memory_space<vmem>>, vector<1x288x64xf32>
    %65 = vector.shape_cast %64 : vector<1x288x64xf32> to vector<288x64xf32>
    %c5 = arith.constant 5 : index
    %c0_68 = arith.constant 0 : index
    %c0_69 = arith.constant 0 : index
    %66 = vector.load %arg2[%c5, %c0_68, %c0_69] : memref<9x8x64xbf16, #tpu.memory_space<vmem>>, vector<1x8x64xbf16>
    %67 = vector.shape_cast %66 : vector<1x8x64xbf16> to vector<8x64xbf16>
    %cst_70 = arith.constant dense<0.000000e+00> : vector<288x64xf32>
    %68 = tpu.matmul %63, %67, %cst_70 {dimension_numbers = #tpu.dot_dimension_numbers<[1], [0], [0], [1], [0, 0, 1, 1], [], []>} : vector<288x8xbf16>, vector<8x64xbf16>, vector<288x64xf32> -> vector<288x64xf32>
    %69 = arith.addf %65, %68 : vector<288x64xf32>
    %c0_71 = arith.constant 0 : index
    %c0_72 = arith.constant 0 : index
    %c0_73 = arith.constant 0 : index
    %70 = vector.load %arg4[%c0_71, %c0_72, %c0_73] : memref<1x288x64xf32, #tpu.memory_space<vmem>>, vector<1x288x64xf32>
    %71 = vector.shape_cast %70 : vector<1x288x64xf32> to vector<288x64xf32>
    %72 = vector.shape_cast %69 : vector<288x64xf32> to vector<1x288x64xf32>
    tpu.vector_store %arg4[%c0_71, %c0_72, %c0_73], %72 {strides = array<i32>} : memref<1x288x64xf32, #tpu.memory_space<vmem>>, vector<1x288x64xf32>,
    %c0_74 = arith.constant 0 : index
    %c36 = arith.constant 36 : index
    %c0_75 = arith.constant 0 : index
    %73 = vector.load %arg1[%c0_74, %c36, %c0_75] : memref<1x332x8xbf16, #tpu.memory_space<vmem>>, vector<1x288x8xbf16>
    %74 = vector.shape_cast %73 : vector<1x288x8xbf16> to vector<288x8xbf16>
    %c0_76 = arith.constant 0 : index
    %c0_77 = arith.constant 0 : index
    %c0_78 = arith.constant 0 : index
    %75 = vector.load %arg4[%c0_76, %c0_77, %c0_78] : memref<1x288x64xf32, #tpu.memory_space<vmem>>, vector<1x288x64xf32>
    %76 = vector.shape_cast %75 : vector<1x288x64xf32> to vector<288x64xf32>
    %c6 = arith.constant 6 : index
    %c0_79 = arith.constant 0 : index
    %c0_80 = arith.constant 0 : index
    %77 = vector.load %arg2[%c6, %c0_79, %c0_80] : memref<9x8x64xbf16, #tpu.memory_space<vmem>>, vector<1x8x64xbf16>
    %78 = vector.shape_cast %77 : vector<1x8x64xbf16> to vector<8x64xbf16>
    %cst_81 = arith.constant dense<0.000000e+00> : vector<288x64xf32>
    %79 = tpu.matmul %74, %78, %cst_81 {dimension_numbers = #tpu.dot_dimension_numbers<[1], [0], [0], [1], [0, 0, 1, 1], [], []>} : vector<288x8xbf16>, vector<8x64xbf16>, vector<288x64xf32> -> vector<288x64xf32>
    %80 = arith.addf %76, %79 : vector<288x64xf32>
    %c0_82 = arith.constant 0 : index
    %c0_83 = arith.constant 0 : index
    %c0_84 = arith.constant 0 : index
    %81 = vector.load %arg4[%c0_82, %c0_83, %c0_84] : memref<1x288x64xf32, #tpu.memory_space<vmem>>, vector<1x288x64xf32>
    %82 = vector.shape_cast %81 : vector<1x288x64xf32> to vector<288x64xf32>
    %83 = vector.shape_cast %80 : vector<288x64xf32> to vector<1x288x64xf32>
    tpu.vector_store %arg4[%c0_82, %c0_83, %c0_84], %83 {strides = array<i32>} : memref<1x288x64xf32, #tpu.memory_space<vmem>>, vector<1x288x64xf32>,
    %c0_85 = arith.constant 0 : index
    %c37 = arith.constant 37 : index
    %c0_86 = arith.constant 0 : index
    %84 = vector.load %arg1[%c0_85, %c37, %c0_86] : memref<1x332x8xbf16, #tpu.memory_space<vmem>>, vector<1x288x8xbf16>
    %85 = vector.shape_cast %84 : vector<1x288x8xbf16> to vector<288x8xbf16>
    %c0_87 = arith.constant 0 : index
    %c0_88 = arith.constant 0 : index
    %c0_89 = arith.constant 0 : index
    %86 = vector.load %arg4[%c0_87, %c0_88, %c0_89] : memref<1x288x64xf32, #tpu.memory_space<vmem>>, vector<1x288x64xf32>
    %87 = vector.shape_cast %86 : vector<1x288x64xf32> to vector<288x64xf32>
    %c7 = arith.constant 7 : index
    %c0_90 = arith.constant 0 : index
    %c0_91 = arith.constant 0 : index
    %88 = vector.load %arg2[%c7, %c0_90, %c0_91] : memref<9x8x64xbf16, #tpu.memory_space<vmem>>, vector<1x8x64xbf16>
    %89 = vector.shape_cast %88 : vector<1x8x64xbf16> to vector<8x64xbf16>
    %cst_92 = arith.constant dense<0.000000e+00> : vector<288x64xf32>
    %90 = tpu.matmul %85, %89, %cst_92 {dimension_numbers = #tpu.dot_dimension_numbers<[1], [0], [0], [1], [0, 0, 1, 1], [], []>} : vector<288x8xbf16>, vector<8x64xbf16>, vector<288x64xf32> -> vector<288x64xf32>
    %91 = arith.addf %87, %90 : vector<288x64xf32>
    %c0_93 = arith.constant 0 : index
    %c0_94 = arith.constant 0 : index
    %c0_95 = arith.constant 0 : index
    %92 = vector.load %arg4[%c0_93, %c0_94, %c0_95] : memref<1x288x64xf32, #tpu.memory_space<vmem>>, vector<1x288x64xf32>
    %93 = vector.shape_cast %92 : vector<1x288x64xf32> to vector<288x64xf32>
    %94 = vector.shape_cast %91 : vector<288x64xf32> to vector<1x288x64xf32>
    tpu.vector_store %arg4[%c0_93, %c0_94, %c0_95], %94 {strides = array<i32>} : memref<1x288x64xf32, #tpu.memory_space<vmem>>, vector<1x288x64xf32>,
    %c0_96 = arith.constant 0 : index
    %c38 = arith.constant 38 : index
    %c0_97 = arith.constant 0 : index
    %95 = vector.load %arg1[%c0_96, %c38, %c0_97] : memref<1x332x8xbf16, #tpu.memory_space<vmem>>, vector<1x288x8xbf16>
    %96 = vector.shape_cast %95 : vector<1x288x8xbf16> to vector<288x8xbf16>
    %c0_98 = arith.constant 0 : index
    %c0_99 = arith.constant 0 : index
    %c0_100 = arith.constant 0 : index
    %97 = vector.load %arg4[%c0_98, %c0_99, %c0_100] : memref<1x288x64xf32, #tpu.memory_space<vmem>>, vector<1x288x64xf32>
    %98 = vector.shape_cast %97 : vector<1x288x64xf32> to vector<288x64xf32>
    %c8 = arith.constant 8 : index
    %c0_101 = arith.constant 0 : index
    %c0_102 = arith.constant 0 : index
    %99 = vector.load %arg2[%c8, %c0_101, %c0_102] : memref<9x8x64xbf16, #tpu.memory_space<vmem>>, vector<1x8x64xbf16>
    %100 = vector.shape_cast %99 : vector<1x8x64xbf16> to vector<8x64xbf16>
    %cst_103 = arith.constant dense<0.000000e+00> : vector<288x64xf32>
    %101 = tpu.matmul %96, %100, %cst_103 {dimension_numbers = #tpu.dot_dimension_numbers<[1], [0], [0], [1], [0, 0, 1, 1], [], []>} : vector<288x8xbf16>, vector<8x64xbf16>, vector<288x64xf32> -> vector<288x64xf32>
    %102 = arith.addf %98, %101 : vector<288x64xf32>
    %c0_104 = arith.constant 0 : index
    %c0_105 = arith.constant 0 : index
    %c0_106 = arith.constant 0 : index
    %103 = vector.load %arg4[%c0_104, %c0_105, %c0_106] : memref<1x288x64xf32, #tpu.memory_space<vmem>>, vector<1x288x64xf32>
    %104 = vector.shape_cast %103 : vector<1x288x64xf32> to vector<288x64xf32>
    %105 = vector.shape_cast %102 : vector<288x64xf32> to vector<1x288x64xf32>
    tpu.vector_store %arg4[%c0_104, %c0_105, %c0_106], %105 {strides = array<i32>} : memref<1x288x64xf32, #tpu.memory_space<vmem>>, vector<1x288x64xf32>,
    return
  }
  func.func @transform_0(%arg0: i32) -> (i32, i32, i32) {
    %c0_i32 = arith.constant 0 : i32
    %c0_i32_0 = arith.constant 0 : i32
    %c0_i32_1 = arith.constant 0 : i32
    return %arg0, %c0_i32, %c0_i32_0 : i32, i32, i32
  }
  func.func @transform_1(%arg0: i32) -> (i32, i32, i32) {
    %c0_i32 = arith.constant 0 : i32
    %c0_i32_0 = arith.constant 0 : i32
    %c0_i32_1 = arith.constant 0 : i32
    %c0_i32_2 = arith.constant 0 : i32
    return %c0_i32, %c0_i32_0, %c0_i32_1 : i32, i32, i32
  }
  func.func @transform_2(%arg0: i32) -> (i32, i32) {
    %c0_i32 = arith.constant 0 : i32
    %c0_i32_0 = arith.constant 0 : i32
    %c0_i32_1 = arith.constant 0 : i32
    return %c0_i32, %c0_i32_0 : i32, i32
  }
  func.func @transform_3(%arg0: i32) -> (i32, i32, i32) {
    %c0_i32 = arith.constant 0 : i32
    %c0_i32_0 = arith.constant 0 : i32
    %c0_i32_1 = arith.constant 0 : i32
    return %arg0, %c0_i32, %c0_i32_0 : i32, i32, i32
  }
}

module attributes {stable_mosaic.version = 11 : i64} {
  func.func @_conv3x3_kernel(%arg0: i32, %arg1: memref<1x108x64xbf16, #tpu.memory_space<vmem>>, %arg2: memref<9x64x64xbf16, #tpu.memory_space<vmem>>, %arg3: memref<1x64xf32, #tpu.memory_space<vmem>>, %arg4: memref<1x80x64xf32, #tpu.memory_space<vmem>>) attributes {dimension_semantics = [#tpu.dimension_semantics<parallel>], iteration_bounds = array<i64: 16>, scalar_prefetch = 0 : i64, scratch_operands = 0 : i64, tpu.core_type = #tpu.core_type<tc>, window_params = [{transform_indices = @transform_0, window_bounds = array<i64: 1, 108, 64>}, {pipeline_mode = #tpu.pipeline_mode<synchronous>, transform_indices = @transform_1, window_bounds = array<i64: 9, 64, 64>}, {pipeline_mode = #tpu.pipeline_mode<synchronous>, transform_indices = @transform_2, window_bounds = array<i64: 1, 64>}, {transform_indices = @transform_3, window_bounds = array<i64: 1, 80, 64>}]} {
    %cst = arith.constant 0.000000e+00 : f32
    %0 = vector.broadcast %cst : f32 to vector<80x64xf32>
    %c0 = arith.constant 0 : index
    %c0_0 = arith.constant 0 : index
    %1 = vector.load %arg3[%c0, %c0_0] : memref<1x64xf32, #tpu.memory_space<vmem>>, vector<1x64xf32>
    %2 = vector.broadcast %1 : vector<1x64xf32> to vector<80x64xf32>
    %3 = arith.addf %0, %2 : vector<80x64xf32>
    %c0_1 = arith.constant 0 : index
    %c0_2 = arith.constant 0 : index
    %c0_3 = arith.constant 0 : index
    %4 = vector.load %arg4[%c0_1, %c0_2, %c0_3] : memref<1x80x64xf32, #tpu.memory_space<vmem>>, vector<1x80x64xf32>
    %5 = vector.shape_cast %4 : vector<1x80x64xf32> to vector<80x64xf32>
    %6 = vector.shape_cast %3 : vector<80x64xf32> to vector<1x80x64xf32>
    tpu.vector_store %arg4[%c0_1, %c0_2, %c0_3], %6 {strides = array<i32>} : memref<1x80x64xf32, #tpu.memory_space<vmem>>, vector<1x80x64xf32>,
    %c0_4 = arith.constant 0 : index
    %c0_5 = arith.constant 0 : index
    %c0_6 = arith.constant 0 : index
    %7 = vector.load %arg1[%c0_4, %c0_5, %c0_6] : memref<1x108x64xbf16, #tpu.memory_space<vmem>>, vector<1x80x64xbf16>
    %8 = vector.shape_cast %7 : vector<1x80x64xbf16> to vector<80x64xbf16>
    %c0_7 = arith.constant 0 : index
    %c0_8 = arith.constant 0 : index
    %c0_9 = arith.constant 0 : index
    %9 = vector.load %arg4[%c0_7, %c0_8, %c0_9] : memref<1x80x64xf32, #tpu.memory_space<vmem>>, vector<1x80x64xf32>
    %10 = vector.shape_cast %9 : vector<1x80x64xf32> to vector<80x64xf32>
    %c0_10 = arith.constant 0 : index
    %c0_11 = arith.constant 0 : index
    %c0_12 = arith.constant 0 : index
    %11 = vector.load %arg2[%c0_10, %c0_11, %c0_12] : memref<9x64x64xbf16, #tpu.memory_space<vmem>>, vector<1x64x64xbf16>
    %12 = vector.shape_cast %11 : vector<1x64x64xbf16> to vector<64x64xbf16>
    %cst_13 = arith.constant dense<0.000000e+00> : vector<80x64xf32>
    %13 = tpu.matmul %8, %12, %cst_13 {dimension_numbers = #tpu.dot_dimension_numbers<[1], [0], [0], [1], [0, 0, 1, 1], [], []>} : vector<80x64xbf16>, vector<64x64xbf16>, vector<80x64xf32> -> vector<80x64xf32>
    %14 = arith.addf %10, %13 : vector<80x64xf32>
    %c0_14 = arith.constant 0 : index
    %c0_15 = arith.constant 0 : index
    %c0_16 = arith.constant 0 : index
    %15 = vector.load %arg4[%c0_14, %c0_15, %c0_16] : memref<1x80x64xf32, #tpu.memory_space<vmem>>, vector<1x80x64xf32>
    %16 = vector.shape_cast %15 : vector<1x80x64xf32> to vector<80x64xf32>
    %17 = vector.shape_cast %14 : vector<80x64xf32> to vector<1x80x64xf32>
    tpu.vector_store %arg4[%c0_14, %c0_15, %c0_16], %17 {strides = array<i32>} : memref<1x80x64xf32, #tpu.memory_space<vmem>>, vector<1x80x64xf32>,
    %c0_17 = arith.constant 0 : index
    %c1 = arith.constant 1 : index
    %c0_18 = arith.constant 0 : index
    %18 = vector.load %arg1[%c0_17, %c1, %c0_18] : memref<1x108x64xbf16, #tpu.memory_space<vmem>>, vector<1x80x64xbf16>
    %19 = vector.shape_cast %18 : vector<1x80x64xbf16> to vector<80x64xbf16>
    %c0_19 = arith.constant 0 : index
    %c0_20 = arith.constant 0 : index
    %c0_21 = arith.constant 0 : index
    %20 = vector.load %arg4[%c0_19, %c0_20, %c0_21] : memref<1x80x64xf32, #tpu.memory_space<vmem>>, vector<1x80x64xf32>
    %21 = vector.shape_cast %20 : vector<1x80x64xf32> to vector<80x64xf32>
    %c1_22 = arith.constant 1 : index
    %c0_23 = arith.constant 0 : index
    %c0_24 = arith.constant 0 : index
    %22 = vector.load %arg2[%c1_22, %c0_23, %c0_24] : memref<9x64x64xbf16, #tpu.memory_space<vmem>>, vector<1x64x64xbf16>
    %23 = vector.shape_cast %22 : vector<1x64x64xbf16> to vector<64x64xbf16>
    %cst_25 = arith.constant dense<0.000000e+00> : vector<80x64xf32>
    %24 = tpu.matmul %19, %23, %cst_25 {dimension_numbers = #tpu.dot_dimension_numbers<[1], [0], [0], [1], [0, 0, 1, 1], [], []>} : vector<80x64xbf16>, vector<64x64xbf16>, vector<80x64xf32> -> vector<80x64xf32>
    %25 = arith.addf %21, %24 : vector<80x64xf32>
    %c0_26 = arith.constant 0 : index
    %c0_27 = arith.constant 0 : index
    %c0_28 = arith.constant 0 : index
    %26 = vector.load %arg4[%c0_26, %c0_27, %c0_28] : memref<1x80x64xf32, #tpu.memory_space<vmem>>, vector<1x80x64xf32>
    %27 = vector.shape_cast %26 : vector<1x80x64xf32> to vector<80x64xf32>
    %28 = vector.shape_cast %25 : vector<80x64xf32> to vector<1x80x64xf32>
    tpu.vector_store %arg4[%c0_26, %c0_27, %c0_28], %28 {strides = array<i32>} : memref<1x80x64xf32, #tpu.memory_space<vmem>>, vector<1x80x64xf32>,
    %c0_29 = arith.constant 0 : index
    %c2 = arith.constant 2 : index
    %c0_30 = arith.constant 0 : index
    %29 = vector.load %arg1[%c0_29, %c2, %c0_30] : memref<1x108x64xbf16, #tpu.memory_space<vmem>>, vector<1x80x64xbf16>
    %30 = vector.shape_cast %29 : vector<1x80x64xbf16> to vector<80x64xbf16>
    %c0_31 = arith.constant 0 : index
    %c0_32 = arith.constant 0 : index
    %c0_33 = arith.constant 0 : index
    %31 = vector.load %arg4[%c0_31, %c0_32, %c0_33] : memref<1x80x64xf32, #tpu.memory_space<vmem>>, vector<1x80x64xf32>
    %32 = vector.shape_cast %31 : vector<1x80x64xf32> to vector<80x64xf32>
    %c2_34 = arith.constant 2 : index
    %c0_35 = arith.constant 0 : index
    %c0_36 = arith.constant 0 : index
    %33 = vector.load %arg2[%c2_34, %c0_35, %c0_36] : memref<9x64x64xbf16, #tpu.memory_space<vmem>>, vector<1x64x64xbf16>
    %34 = vector.shape_cast %33 : vector<1x64x64xbf16> to vector<64x64xbf16>
    %cst_37 = arith.constant dense<0.000000e+00> : vector<80x64xf32>
    %35 = tpu.matmul %30, %34, %cst_37 {dimension_numbers = #tpu.dot_dimension_numbers<[1], [0], [0], [1], [0, 0, 1, 1], [], []>} : vector<80x64xbf16>, vector<64x64xbf16>, vector<80x64xf32> -> vector<80x64xf32>
    %36 = arith.addf %32, %35 : vector<80x64xf32>
    %c0_38 = arith.constant 0 : index
    %c0_39 = arith.constant 0 : index
    %c0_40 = arith.constant 0 : index
    %37 = vector.load %arg4[%c0_38, %c0_39, %c0_40] : memref<1x80x64xf32, #tpu.memory_space<vmem>>, vector<1x80x64xf32>
    %38 = vector.shape_cast %37 : vector<1x80x64xf32> to vector<80x64xf32>
    %39 = vector.shape_cast %36 : vector<80x64xf32> to vector<1x80x64xf32>
    tpu.vector_store %arg4[%c0_38, %c0_39, %c0_40], %39 {strides = array<i32>} : memref<1x80x64xf32, #tpu.memory_space<vmem>>, vector<1x80x64xf32>,
    %c0_41 = arith.constant 0 : index
    %c10 = arith.constant 10 : index
    %c0_42 = arith.constant 0 : index
    %40 = vector.load %arg1[%c0_41, %c10, %c0_42] : memref<1x108x64xbf16, #tpu.memory_space<vmem>>, vector<1x80x64xbf16>
    %41 = vector.shape_cast %40 : vector<1x80x64xbf16> to vector<80x64xbf16>
    %c0_43 = arith.constant 0 : index
    %c0_44 = arith.constant 0 : index
    %c0_45 = arith.constant 0 : index
    %42 = vector.load %arg4[%c0_43, %c0_44, %c0_45] : memref<1x80x64xf32, #tpu.memory_space<vmem>>, vector<1x80x64xf32>
    %43 = vector.shape_cast %42 : vector<1x80x64xf32> to vector<80x64xf32>
    %c3 = arith.constant 3 : index
    %c0_46 = arith.constant 0 : index
    %c0_47 = arith.constant 0 : index
    %44 = vector.load %arg2[%c3, %c0_46, %c0_47] : memref<9x64x64xbf16, #tpu.memory_space<vmem>>, vector<1x64x64xbf16>
    %45 = vector.shape_cast %44 : vector<1x64x64xbf16> to vector<64x64xbf16>
    %cst_48 = arith.constant dense<0.000000e+00> : vector<80x64xf32>
    %46 = tpu.matmul %41, %45, %cst_48 {dimension_numbers = #tpu.dot_dimension_numbers<[1], [0], [0], [1], [0, 0, 1, 1], [], []>} : vector<80x64xbf16>, vector<64x64xbf16>, vector<80x64xf32> -> vector<80x64xf32>
    %47 = arith.addf %43, %46 : vector<80x64xf32>
    %c0_49 = arith.constant 0 : index
    %c0_50 = arith.constant 0 : index
    %c0_51 = arith.constant 0 : index
    %48 = vector.load %arg4[%c0_49, %c0_50, %c0_51] : memref<1x80x64xf32, #tpu.memory_space<vmem>>, vector<1x80x64xf32>
    %49 = vector.shape_cast %48 : vector<1x80x64xf32> to vector<80x64xf32>
    %50 = vector.shape_cast %47 : vector<80x64xf32> to vector<1x80x64xf32>
    tpu.vector_store %arg4[%c0_49, %c0_50, %c0_51], %50 {strides = array<i32>} : memref<1x80x64xf32, #tpu.memory_space<vmem>>, vector<1x80x64xf32>,
    %c0_52 = arith.constant 0 : index
    %c11 = arith.constant 11 : index
    %c0_53 = arith.constant 0 : index
    %51 = vector.load %arg1[%c0_52, %c11, %c0_53] : memref<1x108x64xbf16, #tpu.memory_space<vmem>>, vector<1x80x64xbf16>
    %52 = vector.shape_cast %51 : vector<1x80x64xbf16> to vector<80x64xbf16>
    %c0_54 = arith.constant 0 : index
    %c0_55 = arith.constant 0 : index
    %c0_56 = arith.constant 0 : index
    %53 = vector.load %arg4[%c0_54, %c0_55, %c0_56] : memref<1x80x64xf32, #tpu.memory_space<vmem>>, vector<1x80x64xf32>
    %54 = vector.shape_cast %53 : vector<1x80x64xf32> to vector<80x64xf32>
    %c4 = arith.constant 4 : index
    %c0_57 = arith.constant 0 : index
    %c0_58 = arith.constant 0 : index
    %55 = vector.load %arg2[%c4, %c0_57, %c0_58] : memref<9x64x64xbf16, #tpu.memory_space<vmem>>, vector<1x64x64xbf16>
    %56 = vector.shape_cast %55 : vector<1x64x64xbf16> to vector<64x64xbf16>
    %cst_59 = arith.constant dense<0.000000e+00> : vector<80x64xf32>
    %57 = tpu.matmul %52, %56, %cst_59 {dimension_numbers = #tpu.dot_dimension_numbers<[1], [0], [0], [1], [0, 0, 1, 1], [], []>} : vector<80x64xbf16>, vector<64x64xbf16>, vector<80x64xf32> -> vector<80x64xf32>
    %58 = arith.addf %54, %57 : vector<80x64xf32>
    %c0_60 = arith.constant 0 : index
    %c0_61 = arith.constant 0 : index
    %c0_62 = arith.constant 0 : index
    %59 = vector.load %arg4[%c0_60, %c0_61, %c0_62] : memref<1x80x64xf32, #tpu.memory_space<vmem>>, vector<1x80x64xf32>
    %60 = vector.shape_cast %59 : vector<1x80x64xf32> to vector<80x64xf32>
    %61 = vector.shape_cast %58 : vector<80x64xf32> to vector<1x80x64xf32>
    tpu.vector_store %arg4[%c0_60, %c0_61, %c0_62], %61 {strides = array<i32>} : memref<1x80x64xf32, #tpu.memory_space<vmem>>, vector<1x80x64xf32>,
    %c0_63 = arith.constant 0 : index
    %c12 = arith.constant 12 : index
    %c0_64 = arith.constant 0 : index
    %62 = vector.load %arg1[%c0_63, %c12, %c0_64] : memref<1x108x64xbf16, #tpu.memory_space<vmem>>, vector<1x80x64xbf16>
    %63 = vector.shape_cast %62 : vector<1x80x64xbf16> to vector<80x64xbf16>
    %c0_65 = arith.constant 0 : index
    %c0_66 = arith.constant 0 : index
    %c0_67 = arith.constant 0 : index
    %64 = vector.load %arg4[%c0_65, %c0_66, %c0_67] : memref<1x80x64xf32, #tpu.memory_space<vmem>>, vector<1x80x64xf32>
    %65 = vector.shape_cast %64 : vector<1x80x64xf32> to vector<80x64xf32>
    %c5 = arith.constant 5 : index
    %c0_68 = arith.constant 0 : index
    %c0_69 = arith.constant 0 : index
    %66 = vector.load %arg2[%c5, %c0_68, %c0_69] : memref<9x64x64xbf16, #tpu.memory_space<vmem>>, vector<1x64x64xbf16>
    %67 = vector.shape_cast %66 : vector<1x64x64xbf16> to vector<64x64xbf16>
    %cst_70 = arith.constant dense<0.000000e+00> : vector<80x64xf32>
    %68 = tpu.matmul %63, %67, %cst_70 {dimension_numbers = #tpu.dot_dimension_numbers<[1], [0], [0], [1], [0, 0, 1, 1], [], []>} : vector<80x64xbf16>, vector<64x64xbf16>, vector<80x64xf32> -> vector<80x64xf32>
    %69 = arith.addf %65, %68 : vector<80x64xf32>
    %c0_71 = arith.constant 0 : index
    %c0_72 = arith.constant 0 : index
    %c0_73 = arith.constant 0 : index
    %70 = vector.load %arg4[%c0_71, %c0_72, %c0_73] : memref<1x80x64xf32, #tpu.memory_space<vmem>>, vector<1x80x64xf32>
    %71 = vector.shape_cast %70 : vector<1x80x64xf32> to vector<80x64xf32>
    %72 = vector.shape_cast %69 : vector<80x64xf32> to vector<1x80x64xf32>
    tpu.vector_store %arg4[%c0_71, %c0_72, %c0_73], %72 {strides = array<i32>} : memref<1x80x64xf32, #tpu.memory_space<vmem>>, vector<1x80x64xf32>,
    %c0_74 = arith.constant 0 : index
    %c20 = arith.constant 20 : index
    %c0_75 = arith.constant 0 : index
    %73 = vector.load %arg1[%c0_74, %c20, %c0_75] : memref<1x108x64xbf16, #tpu.memory_space<vmem>>, vector<1x80x64xbf16>
    %74 = vector.shape_cast %73 : vector<1x80x64xbf16> to vector<80x64xbf16>
    %c0_76 = arith.constant 0 : index
    %c0_77 = arith.constant 0 : index
    %c0_78 = arith.constant 0 : index
    %75 = vector.load %arg4[%c0_76, %c0_77, %c0_78] : memref<1x80x64xf32, #tpu.memory_space<vmem>>, vector<1x80x64xf32>
    %76 = vector.shape_cast %75 : vector<1x80x64xf32> to vector<80x64xf32>
    %c6 = arith.constant 6 : index
    %c0_79 = arith.constant 0 : index
    %c0_80 = arith.constant 0 : index
    %77 = vector.load %arg2[%c6, %c0_79, %c0_80] : memref<9x64x64xbf16, #tpu.memory_space<vmem>>, vector<1x64x64xbf16>
    %78 = vector.shape_cast %77 : vector<1x64x64xbf16> to vector<64x64xbf16>
    %cst_81 = arith.constant dense<0.000000e+00> : vector<80x64xf32>
    %79 = tpu.matmul %74, %78, %cst_81 {dimension_numbers = #tpu.dot_dimension_numbers<[1], [0], [0], [1], [0, 0, 1, 1], [], []>} : vector<80x64xbf16>, vector<64x64xbf16>, vector<80x64xf32> -> vector<80x64xf32>
    %80 = arith.addf %76, %79 : vector<80x64xf32>
    %c0_82 = arith.constant 0 : index
    %c0_83 = arith.constant 0 : index
    %c0_84 = arith.constant 0 : index
    %81 = vector.load %arg4[%c0_82, %c0_83, %c0_84] : memref<1x80x64xf32, #tpu.memory_space<vmem>>, vector<1x80x64xf32>
    %82 = vector.shape_cast %81 : vector<1x80x64xf32> to vector<80x64xf32>
    %83 = vector.shape_cast %80 : vector<80x64xf32> to vector<1x80x64xf32>
    tpu.vector_store %arg4[%c0_82, %c0_83, %c0_84], %83 {strides = array<i32>} : memref<1x80x64xf32, #tpu.memory_space<vmem>>, vector<1x80x64xf32>,
    %c0_85 = arith.constant 0 : index
    %c21 = arith.constant 21 : index
    %c0_86 = arith.constant 0 : index
    %84 = vector.load %arg1[%c0_85, %c21, %c0_86] : memref<1x108x64xbf16, #tpu.memory_space<vmem>>, vector<1x80x64xbf16>
    %85 = vector.shape_cast %84 : vector<1x80x64xbf16> to vector<80x64xbf16>
    %c0_87 = arith.constant 0 : index
    %c0_88 = arith.constant 0 : index
    %c0_89 = arith.constant 0 : index
    %86 = vector.load %arg4[%c0_87, %c0_88, %c0_89] : memref<1x80x64xf32, #tpu.memory_space<vmem>>, vector<1x80x64xf32>
    %87 = vector.shape_cast %86 : vector<1x80x64xf32> to vector<80x64xf32>
    %c7 = arith.constant 7 : index
    %c0_90 = arith.constant 0 : index
    %c0_91 = arith.constant 0 : index
    %88 = vector.load %arg2[%c7, %c0_90, %c0_91] : memref<9x64x64xbf16, #tpu.memory_space<vmem>>, vector<1x64x64xbf16>
    %89 = vector.shape_cast %88 : vector<1x64x64xbf16> to vector<64x64xbf16>
    %cst_92 = arith.constant dense<0.000000e+00> : vector<80x64xf32>
    %90 = tpu.matmul %85, %89, %cst_92 {dimension_numbers = #tpu.dot_dimension_numbers<[1], [0], [0], [1], [0, 0, 1, 1], [], []>} : vector<80x64xbf16>, vector<64x64xbf16>, vector<80x64xf32> -> vector<80x64xf32>
    %91 = arith.addf %87, %90 : vector<80x64xf32>
    %c0_93 = arith.constant 0 : index
    %c0_94 = arith.constant 0 : index
    %c0_95 = arith.constant 0 : index
    %92 = vector.load %arg4[%c0_93, %c0_94, %c0_95] : memref<1x80x64xf32, #tpu.memory_space<vmem>>, vector<1x80x64xf32>
    %93 = vector.shape_cast %92 : vector<1x80x64xf32> to vector<80x64xf32>
    %94 = vector.shape_cast %91 : vector<80x64xf32> to vector<1x80x64xf32>
    tpu.vector_store %arg4[%c0_93, %c0_94, %c0_95], %94 {strides = array<i32>} : memref<1x80x64xf32, #tpu.memory_space<vmem>>, vector<1x80x64xf32>,
    %c0_96 = arith.constant 0 : index
    %c22 = arith.constant 22 : index
    %c0_97 = arith.constant 0 : index
    %95 = vector.load %arg1[%c0_96, %c22, %c0_97] : memref<1x108x64xbf16, #tpu.memory_space<vmem>>, vector<1x80x64xbf16>
    %96 = vector.shape_cast %95 : vector<1x80x64xbf16> to vector<80x64xbf16>
    %c0_98 = arith.constant 0 : index
    %c0_99 = arith.constant 0 : index
    %c0_100 = arith.constant 0 : index
    %97 = vector.load %arg4[%c0_98, %c0_99, %c0_100] : memref<1x80x64xf32, #tpu.memory_space<vmem>>, vector<1x80x64xf32>
    %98 = vector.shape_cast %97 : vector<1x80x64xf32> to vector<80x64xf32>
    %c8 = arith.constant 8 : index
    %c0_101 = arith.constant 0 : index
    %c0_102 = arith.constant 0 : index
    %99 = vector.load %arg2[%c8, %c0_101, %c0_102] : memref<9x64x64xbf16, #tpu.memory_space<vmem>>, vector<1x64x64xbf16>
    %100 = vector.shape_cast %99 : vector<1x64x64xbf16> to vector<64x64xbf16>
    %cst_103 = arith.constant dense<0.000000e+00> : vector<80x64xf32>
    %101 = tpu.matmul %96, %100, %cst_103 {dimension_numbers = #tpu.dot_dimension_numbers<[1], [0], [0], [1], [0, 0, 1, 1], [], []>} : vector<80x64xbf16>, vector<64x64xbf16>, vector<80x64xf32> -> vector<80x64xf32>
    %102 = arith.addf %98, %101 : vector<80x64xf32>
    %c0_104 = arith.constant 0 : index
    %c0_105 = arith.constant 0 : index
    %c0_106 = arith.constant 0 : index
    %103 = vector.load %arg4[%c0_104, %c0_105, %c0_106] : memref<1x80x64xf32, #tpu.memory_space<vmem>>, vector<1x80x64xf32>
    %104 = vector.shape_cast %103 : vector<1x80x64xf32> to vector<80x64xf32>
    %105 = vector.shape_cast %102 : vector<80x64xf32> to vector<1x80x64xf32>
    tpu.vector_store %arg4[%c0_104, %c0_105, %c0_106], %105 {strides = array<i32>} : memref<1x80x64xf32, #tpu.memory_space<vmem>>, vector<1x80x64xf32>,
    return
  }
  func.func @transform_0(%arg0: i32) -> (i32, i32, i32) {
    %c0_i32 = arith.constant 0 : i32
    %c0_i32_0 = arith.constant 0 : i32
    %c0_i32_1 = arith.constant 0 : i32
    return %arg0, %c0_i32, %c0_i32_0 : i32, i32, i32
  }
  func.func @transform_1(%arg0: i32) -> (i32, i32, i32) {
    %c0_i32 = arith.constant 0 : i32
    %c0_i32_0 = arith.constant 0 : i32
    %c0_i32_1 = arith.constant 0 : i32
    %c0_i32_2 = arith.constant 0 : i32
    return %c0_i32, %c0_i32_0, %c0_i32_1 : i32, i32, i32
  }
  func.func @transform_2(%arg0: i32) -> (i32, i32) {
    %c0_i32 = arith.constant 0 : i32
    %c0_i32_0 = arith.constant 0 : i32
    %c0_i32_1 = arith.constant 0 : i32
    return %c0_i32, %c0_i32_0 : i32, i32
  }
  func.func @transform_3(%arg0: i32) -> (i32, i32, i32) {
    %c0_i32 = arith.constant 0 : i32
    %c0_i32_0 = arith.constant 0 : i32
    %c0_i32_1 = arith.constant 0 : i32
    return %arg0, %c0_i32, %c0_i32_0 : i32, i32, i32
  }
}

module attributes {stable_mosaic.version = 11 : i64} {
  func.func @_conv3x3_kernel(%arg0: i32, %arg1: memref<1x44x64xbf16, #tpu.memory_space<vmem>>, %arg2: memref<9x64x64xbf16, #tpu.memory_space<vmem>>, %arg3: memref<1x64xf32, #tpu.memory_space<vmem>>, %arg4: memref<1x24x64xf32, #tpu.memory_space<vmem>>) attributes {dimension_semantics = [#tpu.dimension_semantics<parallel>], iteration_bounds = array<i64: 16>, scalar_prefetch = 0 : i64, scratch_operands = 0 : i64, tpu.core_type = #tpu.core_type<tc>, window_params = [{transform_indices = @transform_0, window_bounds = array<i64: 1, 44, 64>}, {pipeline_mode = #tpu.pipeline_mode<synchronous>, transform_indices = @transform_1, window_bounds = array<i64: 9, 64, 64>}, {pipeline_mode = #tpu.pipeline_mode<synchronous>, transform_indices = @transform_2, window_bounds = array<i64: 1, 64>}, {transform_indices = @transform_3, window_bounds = array<i64: 1, 24, 64>}]} {
    %cst = arith.constant 0.000000e+00 : f32
    %0 = vector.broadcast %cst : f32 to vector<24x64xf32>
    %c0 = arith.constant 0 : index
    %c0_0 = arith.constant 0 : index
    %1 = vector.load %arg3[%c0, %c0_0] : memref<1x64xf32, #tpu.memory_space<vmem>>, vector<1x64xf32>
    %2 = vector.broadcast %1 : vector<1x64xf32> to vector<24x64xf32>
    %3 = arith.addf %0, %2 : vector<24x64xf32>
    %c0_1 = arith.constant 0 : index
    %c0_2 = arith.constant 0 : index
    %c0_3 = arith.constant 0 : index
    %4 = vector.load %arg4[%c0_1, %c0_2, %c0_3] : memref<1x24x64xf32, #tpu.memory_space<vmem>>, vector<1x24x64xf32>
    %5 = vector.shape_cast %4 : vector<1x24x64xf32> to vector<24x64xf32>
    %6 = vector.shape_cast %3 : vector<24x64xf32> to vector<1x24x64xf32>
    tpu.vector_store %arg4[%c0_1, %c0_2, %c0_3], %6 {strides = array<i32>} : memref<1x24x64xf32, #tpu.memory_space<vmem>>, vector<1x24x64xf32>,
    %c0_4 = arith.constant 0 : index
    %c0_5 = arith.constant 0 : index
    %c0_6 = arith.constant 0 : index
    %7 = vector.load %arg1[%c0_4, %c0_5, %c0_6] : memref<1x44x64xbf16, #tpu.memory_space<vmem>>, vector<1x24x64xbf16>
    %8 = vector.shape_cast %7 : vector<1x24x64xbf16> to vector<24x64xbf16>
    %c0_7 = arith.constant 0 : index
    %c0_8 = arith.constant 0 : index
    %c0_9 = arith.constant 0 : index
    %9 = vector.load %arg4[%c0_7, %c0_8, %c0_9] : memref<1x24x64xf32, #tpu.memory_space<vmem>>, vector<1x24x64xf32>
    %10 = vector.shape_cast %9 : vector<1x24x64xf32> to vector<24x64xf32>
    %c0_10 = arith.constant 0 : index
    %c0_11 = arith.constant 0 : index
    %c0_12 = arith.constant 0 : index
    %11 = vector.load %arg2[%c0_10, %c0_11, %c0_12] : memref<9x64x64xbf16, #tpu.memory_space<vmem>>, vector<1x64x64xbf16>
    %12 = vector.shape_cast %11 : vector<1x64x64xbf16> to vector<64x64xbf16>
    %cst_13 = arith.constant dense<0.000000e+00> : vector<24x64xf32>
    %13 = tpu.matmul %8, %12, %cst_13 {dimension_numbers = #tpu.dot_dimension_numbers<[1], [0], [0], [1], [0, 0, 1, 1], [], []>} : vector<24x64xbf16>, vector<64x64xbf16>, vector<24x64xf32> -> vector<24x64xf32>
    %14 = arith.addf %10, %13 : vector<24x64xf32>
    %c0_14 = arith.constant 0 : index
    %c0_15 = arith.constant 0 : index
    %c0_16 = arith.constant 0 : index
    %15 = vector.load %arg4[%c0_14, %c0_15, %c0_16] : memref<1x24x64xf32, #tpu.memory_space<vmem>>, vector<1x24x64xf32>
    %16 = vector.shape_cast %15 : vector<1x24x64xf32> to vector<24x64xf32>
    %17 = vector.shape_cast %14 : vector<24x64xf32> to vector<1x24x64xf32>
    tpu.vector_store %arg4[%c0_14, %c0_15, %c0_16], %17 {strides = array<i32>} : memref<1x24x64xf32, #tpu.memory_space<vmem>>, vector<1x24x64xf32>,
    %c0_17 = arith.constant 0 : index
    %c1 = arith.constant 1 : index
    %c0_18 = arith.constant 0 : index
    %18 = vector.load %arg1[%c0_17, %c1, %c0_18] : memref<1x44x64xbf16, #tpu.memory_space<vmem>>, vector<1x24x64xbf16>
    %19 = vector.shape_cast %18 : vector<1x24x64xbf16> to vector<24x64xbf16>
    %c0_19 = arith.constant 0 : index
    %c0_20 = arith.constant 0 : index
    %c0_21 = arith.constant 0 : index
    %20 = vector.load %arg4[%c0_19, %c0_20, %c0_21] : memref<1x24x64xf32, #tpu.memory_space<vmem>>, vector<1x24x64xf32>
    %21 = vector.shape_cast %20 : vector<1x24x64xf32> to vector<24x64xf32>
    %c1_22 = arith.constant 1 : index
    %c0_23 = arith.constant 0 : index
    %c0_24 = arith.constant 0 : index
    %22 = vector.load %arg2[%c1_22, %c0_23, %c0_24] : memref<9x64x64xbf16, #tpu.memory_space<vmem>>, vector<1x64x64xbf16>
    %23 = vector.shape_cast %22 : vector<1x64x64xbf16> to vector<64x64xbf16>
    %cst_25 = arith.constant dense<0.000000e+00> : vector<24x64xf32>
    %24 = tpu.matmul %19, %23, %cst_25 {dimension_numbers = #tpu.dot_dimension_numbers<[1], [0], [0], [1], [0, 0, 1, 1], [], []>} : vector<24x64xbf16>, vector<64x64xbf16>, vector<24x64xf32> -> vector<24x64xf32>
    %25 = arith.addf %21, %24 : vector<24x64xf32>
    %c0_26 = arith.constant 0 : index
    %c0_27 = arith.constant 0 : index
    %c0_28 = arith.constant 0 : index
    %26 = vector.load %arg4[%c0_26, %c0_27, %c0_28] : memref<1x24x64xf32, #tpu.memory_space<vmem>>, vector<1x24x64xf32>
    %27 = vector.shape_cast %26 : vector<1x24x64xf32> to vector<24x64xf32>
    %28 = vector.shape_cast %25 : vector<24x64xf32> to vector<1x24x64xf32>
    tpu.vector_store %arg4[%c0_26, %c0_27, %c0_28], %28 {strides = array<i32>} : memref<1x24x64xf32, #tpu.memory_space<vmem>>, vector<1x24x64xf32>,
    %c0_29 = arith.constant 0 : index
    %c2 = arith.constant 2 : index
    %c0_30 = arith.constant 0 : index
    %29 = vector.load %arg1[%c0_29, %c2, %c0_30] : memref<1x44x64xbf16, #tpu.memory_space<vmem>>, vector<1x24x64xbf16>
    %30 = vector.shape_cast %29 : vector<1x24x64xbf16> to vector<24x64xbf16>
    %c0_31 = arith.constant 0 : index
    %c0_32 = arith.constant 0 : index
    %c0_33 = arith.constant 0 : index
    %31 = vector.load %arg4[%c0_31, %c0_32, %c0_33] : memref<1x24x64xf32, #tpu.memory_space<vmem>>, vector<1x24x64xf32>
    %32 = vector.shape_cast %31 : vector<1x24x64xf32> to vector<24x64xf32>
    %c2_34 = arith.constant 2 : index
    %c0_35 = arith.constant 0 : index
    %c0_36 = arith.constant 0 : index
    %33 = vector.load %arg2[%c2_34, %c0_35, %c0_36] : memref<9x64x64xbf16, #tpu.memory_space<vmem>>, vector<1x64x64xbf16>
    %34 = vector.shape_cast %33 : vector<1x64x64xbf16> to vector<64x64xbf16>
    %cst_37 = arith.constant dense<0.000000e+00> : vector<24x64xf32>
    %35 = tpu.matmul %30, %34, %cst_37 {dimension_numbers = #tpu.dot_dimension_numbers<[1], [0], [0], [1], [0, 0, 1, 1], [], []>} : vector<24x64xbf16>, vector<64x64xbf16>, vector<24x64xf32> -> vector<24x64xf32>
    %36 = arith.addf %32, %35 : vector<24x64xf32>
    %c0_38 = arith.constant 0 : index
    %c0_39 = arith.constant 0 : index
    %c0_40 = arith.constant 0 : index
    %37 = vector.load %arg4[%c0_38, %c0_39, %c0_40] : memref<1x24x64xf32, #tpu.memory_space<vmem>>, vector<1x24x64xf32>
    %38 = vector.shape_cast %37 : vector<1x24x64xf32> to vector<24x64xf32>
    %39 = vector.shape_cast %36 : vector<24x64xf32> to vector<1x24x64xf32>
    tpu.vector_store %arg4[%c0_38, %c0_39, %c0_40], %39 {strides = array<i32>} : memref<1x24x64xf32, #tpu.memory_space<vmem>>, vector<1x24x64xf32>,
    %c0_41 = arith.constant 0 : index
    %c6 = arith.constant 6 : index
    %c0_42 = arith.constant 0 : index
    %40 = vector.load %arg1[%c0_41, %c6, %c0_42] : memref<1x44x64xbf16, #tpu.memory_space<vmem>>, vector<1x24x64xbf16>
    %41 = vector.shape_cast %40 : vector<1x24x64xbf16> to vector<24x64xbf16>
    %c0_43 = arith.constant 0 : index
    %c0_44 = arith.constant 0 : index
    %c0_45 = arith.constant 0 : index
    %42 = vector.load %arg4[%c0_43, %c0_44, %c0_45] : memref<1x24x64xf32, #tpu.memory_space<vmem>>, vector<1x24x64xf32>
    %43 = vector.shape_cast %42 : vector<1x24x64xf32> to vector<24x64xf32>
    %c3 = arith.constant 3 : index
    %c0_46 = arith.constant 0 : index
    %c0_47 = arith.constant 0 : index
    %44 = vector.load %arg2[%c3, %c0_46, %c0_47] : memref<9x64x64xbf16, #tpu.memory_space<vmem>>, vector<1x64x64xbf16>
    %45 = vector.shape_cast %44 : vector<1x64x64xbf16> to vector<64x64xbf16>
    %cst_48 = arith.constant dense<0.000000e+00> : vector<24x64xf32>
    %46 = tpu.matmul %41, %45, %cst_48 {dimension_numbers = #tpu.dot_dimension_numbers<[1], [0], [0], [1], [0, 0, 1, 1], [], []>} : vector<24x64xbf16>, vector<64x64xbf16>, vector<24x64xf32> -> vector<24x64xf32>
    %47 = arith.addf %43, %46 : vector<24x64xf32>
    %c0_49 = arith.constant 0 : index
    %c0_50 = arith.constant 0 : index
    %c0_51 = arith.constant 0 : index
    %48 = vector.load %arg4[%c0_49, %c0_50, %c0_51] : memref<1x24x64xf32, #tpu.memory_space<vmem>>, vector<1x24x64xf32>
    %49 = vector.shape_cast %48 : vector<1x24x64xf32> to vector<24x64xf32>
    %50 = vector.shape_cast %47 : vector<24x64xf32> to vector<1x24x64xf32>
    tpu.vector_store %arg4[%c0_49, %c0_50, %c0_51], %50 {strides = array<i32>} : memref<1x24x64xf32, #tpu.memory_space<vmem>>, vector<1x24x64xf32>,
    %c0_52 = arith.constant 0 : index
    %c7 = arith.constant 7 : index
    %c0_53 = arith.constant 0 : index
    %51 = vector.load %arg1[%c0_52, %c7, %c0_53] : memref<1x44x64xbf16, #tpu.memory_space<vmem>>, vector<1x24x64xbf16>
    %52 = vector.shape_cast %51 : vector<1x24x64xbf16> to vector<24x64xbf16>
    %c0_54 = arith.constant 0 : index
    %c0_55 = arith.constant 0 : index
    %c0_56 = arith.constant 0 : index
    %53 = vector.load %arg4[%c0_54, %c0_55, %c0_56] : memref<1x24x64xf32, #tpu.memory_space<vmem>>, vector<1x24x64xf32>
    %54 = vector.shape_cast %53 : vector<1x24x64xf32> to vector<24x64xf32>
    %c4 = arith.constant 4 : index
    %c0_57 = arith.constant 0 : index
    %c0_58 = arith.constant 0 : index
    %55 = vector.load %arg2[%c4, %c0_57, %c0_58] : memref<9x64x64xbf16, #tpu.memory_space<vmem>>, vector<1x64x64xbf16>
    %56 = vector.shape_cast %55 : vector<1x64x64xbf16> to vector<64x64xbf16>
    %cst_59 = arith.constant dense<0.000000e+00> : vector<24x64xf32>
    %57 = tpu.matmul %52, %56, %cst_59 {dimension_numbers = #tpu.dot_dimension_numbers<[1], [0], [0], [1], [0, 0, 1, 1], [], []>} : vector<24x64xbf16>, vector<64x64xbf16>, vector<24x64xf32> -> vector<24x64xf32>
    %58 = arith.addf %54, %57 : vector<24x64xf32>
    %c0_60 = arith.constant 0 : index
    %c0_61 = arith.constant 0 : index
    %c0_62 = arith.constant 0 : index
    %59 = vector.load %arg4[%c0_60, %c0_61, %c0_62] : memref<1x24x64xf32, #tpu.memory_space<vmem>>, vector<1x24x64xf32>
    %60 = vector.shape_cast %59 : vector<1x24x64xf32> to vector<24x64xf32>
    %61 = vector.shape_cast %58 : vector<24x64xf32> to vector<1x24x64xf32>
    tpu.vector_store %arg4[%c0_60, %c0_61, %c0_62], %61 {strides = array<i32>} : memref<1x24x64xf32, #tpu.memory_space<vmem>>, vector<1x24x64xf32>,
    %c0_63 = arith.constant 0 : index
    %c8 = arith.constant 8 : index
    %c0_64 = arith.constant 0 : index
    %62 = vector.load %arg1[%c0_63, %c8, %c0_64] : memref<1x44x64xbf16, #tpu.memory_space<vmem>>, vector<1x24x64xbf16>
    %63 = vector.shape_cast %62 : vector<1x24x64xbf16> to vector<24x64xbf16>
    %c0_65 = arith.constant 0 : index
    %c0_66 = arith.constant 0 : index
    %c0_67 = arith.constant 0 : index
    %64 = vector.load %arg4[%c0_65, %c0_66, %c0_67] : memref<1x24x64xf32, #tpu.memory_space<vmem>>, vector<1x24x64xf32>
    %65 = vector.shape_cast %64 : vector<1x24x64xf32> to vector<24x64xf32>
    %c5 = arith.constant 5 : index
    %c0_68 = arith.constant 0 : index
    %c0_69 = arith.constant 0 : index
    %66 = vector.load %arg2[%c5, %c0_68, %c0_69] : memref<9x64x64xbf16, #tpu.memory_space<vmem>>, vector<1x64x64xbf16>
    %67 = vector.shape_cast %66 : vector<1x64x64xbf16> to vector<64x64xbf16>
    %cst_70 = arith.constant dense<0.000000e+00> : vector<24x64xf32>
    %68 = tpu.matmul %63, %67, %cst_70 {dimension_numbers = #tpu.dot_dimension_numbers<[1], [0], [0], [1], [0, 0, 1, 1], [], []>} : vector<24x64xbf16>, vector<64x64xbf16>, vector<24x64xf32> -> vector<24x64xf32>
    %69 = arith.addf %65, %68 : vector<24x64xf32>
    %c0_71 = arith.constant 0 : index
    %c0_72 = arith.constant 0 : index
    %c0_73 = arith.constant 0 : index
    %70 = vector.load %arg4[%c0_71, %c0_72, %c0_73] : memref<1x24x64xf32, #tpu.memory_space<vmem>>, vector<1x24x64xf32>
    %71 = vector.shape_cast %70 : vector<1x24x64xf32> to vector<24x64xf32>
    %72 = vector.shape_cast %69 : vector<24x64xf32> to vector<1x24x64xf32>
    tpu.vector_store %arg4[%c0_71, %c0_72, %c0_73], %72 {strides = array<i32>} : memref<1x24x64xf32, #tpu.memory_space<vmem>>, vector<1x24x64xf32>,
    %c0_74 = arith.constant 0 : index
    %c12 = arith.constant 12 : index
    %c0_75 = arith.constant 0 : index
    %73 = vector.load %arg1[%c0_74, %c12, %c0_75] : memref<1x44x64xbf16, #tpu.memory_space<vmem>>, vector<1x24x64xbf16>
    %74 = vector.shape_cast %73 : vector<1x24x64xbf16> to vector<24x64xbf16>
    %c0_76 = arith.constant 0 : index
    %c0_77 = arith.constant 0 : index
    %c0_78 = arith.constant 0 : index
    %75 = vector.load %arg4[%c0_76, %c0_77, %c0_78] : memref<1x24x64xf32, #tpu.memory_space<vmem>>, vector<1x24x64xf32>
    %76 = vector.shape_cast %75 : vector<1x24x64xf32> to vector<24x64xf32>
    %c6_79 = arith.constant 6 : index
    %c0_80 = arith.constant 0 : index
    %c0_81 = arith.constant 0 : index
    %77 = vector.load %arg2[%c6_79, %c0_80, %c0_81] : memref<9x64x64xbf16, #tpu.memory_space<vmem>>, vector<1x64x64xbf16>
    %78 = vector.shape_cast %77 : vector<1x64x64xbf16> to vector<64x64xbf16>
    %cst_82 = arith.constant dense<0.000000e+00> : vector<24x64xf32>
    %79 = tpu.matmul %74, %78, %cst_82 {dimension_numbers = #tpu.dot_dimension_numbers<[1], [0], [0], [1], [0, 0, 1, 1], [], []>} : vector<24x64xbf16>, vector<64x64xbf16>, vector<24x64xf32> -> vector<24x64xf32>
    %80 = arith.addf %76, %79 : vector<24x64xf32>
    %c0_83 = arith.constant 0 : index
    %c0_84 = arith.constant 0 : index
    %c0_85 = arith.constant 0 : index
    %81 = vector.load %arg4[%c0_83, %c0_84, %c0_85] : memref<1x24x64xf32, #tpu.memory_space<vmem>>, vector<1x24x64xf32>
    %82 = vector.shape_cast %81 : vector<1x24x64xf32> to vector<24x64xf32>
    %83 = vector.shape_cast %80 : vector<24x64xf32> to vector<1x24x64xf32>
    tpu.vector_store %arg4[%c0_83, %c0_84, %c0_85], %83 {strides = array<i32>} : memref<1x24x64xf32, #tpu.memory_space<vmem>>, vector<1x24x64xf32>,
    %c0_86 = arith.constant 0 : index
    %c13 = arith.constant 13 : index
    %c0_87 = arith.constant 0 : index
    %84 = vector.load %arg1[%c0_86, %c13, %c0_87] : memref<1x44x64xbf16, #tpu.memory_space<vmem>>, vector<1x24x64xbf16>
    %85 = vector.shape_cast %84 : vector<1x24x64xbf16> to vector<24x64xbf16>
    %c0_88 = arith.constant 0 : index
    %c0_89 = arith.constant 0 : index
    %c0_90 = arith.constant 0 : index
    %86 = vector.load %arg4[%c0_88, %c0_89, %c0_90] : memref<1x24x64xf32, #tpu.memory_space<vmem>>, vector<1x24x64xf32>
    %87 = vector.shape_cast %86 : vector<1x24x64xf32> to vector<24x64xf32>
    %c7_91 = arith.constant 7 : index
    %c0_92 = arith.constant 0 : index
    %c0_93 = arith.constant 0 : index
    %88 = vector.load %arg2[%c7_91, %c0_92, %c0_93] : memref<9x64x64xbf16, #tpu.memory_space<vmem>>, vector<1x64x64xbf16>
    %89 = vector.shape_cast %88 : vector<1x64x64xbf16> to vector<64x64xbf16>
    %cst_94 = arith.constant dense<0.000000e+00> : vector<24x64xf32>
    %90 = tpu.matmul %85, %89, %cst_94 {dimension_numbers = #tpu.dot_dimension_numbers<[1], [0], [0], [1], [0, 0, 1, 1], [], []>} : vector<24x64xbf16>, vector<64x64xbf16>, vector<24x64xf32> -> vector<24x64xf32>
    %91 = arith.addf %87, %90 : vector<24x64xf32>
    %c0_95 = arith.constant 0 : index
    %c0_96 = arith.constant 0 : index
    %c0_97 = arith.constant 0 : index
    %92 = vector.load %arg4[%c0_95, %c0_96, %c0_97] : memref<1x24x64xf32, #tpu.memory_space<vmem>>, vector<1x24x64xf32>
    %93 = vector.shape_cast %92 : vector<1x24x64xf32> to vector<24x64xf32>
    %94 = vector.shape_cast %91 : vector<24x64xf32> to vector<1x24x64xf32>
    tpu.vector_store %arg4[%c0_95, %c0_96, %c0_97], %94 {strides = array<i32>} : memref<1x24x64xf32, #tpu.memory_space<vmem>>, vector<1x24x64xf32>,
    %c0_98 = arith.constant 0 : index
    %c14 = arith.constant 14 : index
    %c0_99 = arith.constant 0 : index
    %95 = vector.load %arg1[%c0_98, %c14, %c0_99] : memref<1x44x64xbf16, #tpu.memory_space<vmem>>, vector<1x24x64xbf16>
    %96 = vector.shape_cast %95 : vector<1x24x64xbf16> to vector<24x64xbf16>
    %c0_100 = arith.constant 0 : index
    %c0_101 = arith.constant 0 : index
    %c0_102 = arith.constant 0 : index
    %97 = vector.load %arg4[%c0_100, %c0_101, %c0_102] : memref<1x24x64xf32, #tpu.memory_space<vmem>>, vector<1x24x64xf32>
    %98 = vector.shape_cast %97 : vector<1x24x64xf32> to vector<24x64xf32>
    %c8_103 = arith.constant 8 : index
    %c0_104 = arith.constant 0 : index
    %c0_105 = arith.constant 0 : index
    %99 = vector.load %arg2[%c8_103, %c0_104, %c0_105] : memref<9x64x64xbf16, #tpu.memory_space<vmem>>, vector<1x64x64xbf16>
    %100 = vector.shape_cast %99 : vector<1x64x64xbf16> to vector<64x64xbf16>
    %cst_106 = arith.constant dense<0.000000e+00> : vector<24x64xf32>
    %101 = tpu.matmul %96, %100, %cst_106 {dimension_numbers = #tpu.dot_dimension_numbers<[1], [0], [0], [1], [0, 0, 1, 1], [], []>} : vector<24x64xbf16>, vector<64x64xbf16>, vector<24x64xf32> -> vector<24x64xf32>
    %102 = arith.addf %98, %101 : vector<24x64xf32>
    %c0_107 = arith.constant 0 : index
    %c0_108 = arith.constant 0 : index
    %c0_109 = arith.constant 0 : index
    %103 = vector.load %arg4[%c0_107, %c0_108, %c0_109] : memref<1x24x64xf32, #tpu.memory_space<vmem>>, vector<1x24x64xf32>
    %104 = vector.shape_cast %103 : vector<1x24x64xf32> to vector<24x64xf32>
    %105 = vector.shape_cast %102 : vector<24x64xf32> to vector<1x24x64xf32>
    tpu.vector_store %arg4[%c0_107, %c0_108, %c0_109], %105 {strides = array<i32>} : memref<1x24x64xf32, #tpu.memory_space<vmem>>, vector<1x24x64xf32>,
    return
  }
  func.func @transform_0(%arg0: i32) -> (i32, i32, i32) {
    %c0_i32 = arith.constant 0 : i32
    %c0_i32_0 = arith.constant 0 : i32
    %c0_i32_1 = arith.constant 0 : i32
    return %arg0, %c0_i32, %c0_i32_0 : i32, i32, i32
  }
  func.func @transform_1(%arg0: i32) -> (i32, i32, i32) {
    %c0_i32 = arith.constant 0 : i32
    %c0_i32_0 = arith.constant 0 : i32
    %c0_i32_1 = arith.constant 0 : i32
    %c0_i32_2 = arith.constant 0 : i32
    return %c0_i32, %c0_i32_0, %c0_i32_1 : i32, i32, i32
  }
  func.func @transform_2(%arg0: i32) -> (i32, i32) {
    %c0_i32 = arith.constant 0 : i32
    %c0_i32_0 = arith.constant 0 : i32
    %c0_i32_1 = arith.constant 0 : i32
    return %c0_i32, %c0_i32_0 : i32, i32
  }
  func.func @transform_3(%arg0: i32) -> (i32, i32, i32) {
    %c0_i32 = arith.constant 0 : i32
    %c0_i32_0 = arith.constant 0 : i32
    %c0_i32_1 = arith.constant 0 : i32
    return %arg0, %c0_i32, %c0_i32_0 : i32, i32, i32
  }
}

module attributes {stable_mosaic.version = 11 : i64} {
  func.func @_conv3x3_kernel(%arg0: i32, %arg1: memref<1x24x64xbf16, #tpu.memory_space<vmem>>, %arg2: memref<9x64x64xbf16, #tpu.memory_space<vmem>>, %arg3: memref<1x64xf32, #tpu.memory_space<vmem>>, %arg4: memref<1x8x64xf32, #tpu.memory_space<vmem>>) attributes {dimension_semantics = [#tpu.dimension_semantics<parallel>], iteration_bounds = array<i64: 16>, scalar_prefetch = 0 : i64, scratch_operands = 0 : i64, tpu.core_type = #tpu.core_type<tc>, window_params = [{transform_indices = @transform_0, window_bounds = array<i64: 1, 24, 64>}, {pipeline_mode = #tpu.pipeline_mode<synchronous>, transform_indices = @transform_1, window_bounds = array<i64: 9, 64, 64>}, {pipeline_mode = #tpu.pipeline_mode<synchronous>, transform_indices = @transform_2, window_bounds = array<i64: 1, 64>}, {transform_indices = @transform_3, window_bounds = array<i64: 1, 8, 64>}]} {
    %cst = arith.constant 0.000000e+00 : f32
    %0 = vector.broadcast %cst : f32 to vector<8x64xf32>
    %c0 = arith.constant 0 : index
    %c0_0 = arith.constant 0 : index
    %1 = vector.load %arg3[%c0, %c0_0] : memref<1x64xf32, #tpu.memory_space<vmem>>, vector<1x64xf32>
    %2 = vector.broadcast %1 : vector<1x64xf32> to vector<8x64xf32>
    %3 = arith.addf %0, %2 : vector<8x64xf32>
    %c0_1 = arith.constant 0 : index
    %c0_2 = arith.constant 0 : index
    %c0_3 = arith.constant 0 : index
    %4 = vector.load %arg4[%c0_1, %c0_2, %c0_3] : memref<1x8x64xf32, #tpu.memory_space<vmem>>, vector<1x8x64xf32>
    %5 = vector.shape_cast %4 : vector<1x8x64xf32> to vector<8x64xf32>
    %6 = vector.shape_cast %3 : vector<8x64xf32> to vector<1x8x64xf32>
    tpu.vector_store %arg4[%c0_1, %c0_2, %c0_3], %6 {strides = array<i32>} : memref<1x8x64xf32, #tpu.memory_space<vmem>>, vector<1x8x64xf32>,
    %c0_4 = arith.constant 0 : index
    %c0_5 = arith.constant 0 : index
    %c0_6 = arith.constant 0 : index
    %7 = vector.load %arg1[%c0_4, %c0_5, %c0_6] : memref<1x24x64xbf16, #tpu.memory_space<vmem>>, vector<1x8x64xbf16>
    %8 = vector.shape_cast %7 : vector<1x8x64xbf16> to vector<8x64xbf16>
    %c0_7 = arith.constant 0 : index
    %c0_8 = arith.constant 0 : index
    %c0_9 = arith.constant 0 : index
    %9 = vector.load %arg4[%c0_7, %c0_8, %c0_9] : memref<1x8x64xf32, #tpu.memory_space<vmem>>, vector<1x8x64xf32>
    %10 = vector.shape_cast %9 : vector<1x8x64xf32> to vector<8x64xf32>
    %c0_10 = arith.constant 0 : index
    %c0_11 = arith.constant 0 : index
    %c0_12 = arith.constant 0 : index
    %11 = vector.load %arg2[%c0_10, %c0_11, %c0_12] : memref<9x64x64xbf16, #tpu.memory_space<vmem>>, vector<1x64x64xbf16>
    %12 = vector.shape_cast %11 : vector<1x64x64xbf16> to vector<64x64xbf16>
    %cst_13 = arith.constant dense<0.000000e+00> : vector<8x64xf32>
    %13 = tpu.matmul %8, %12, %cst_13 {dimension_numbers = #tpu.dot_dimension_numbers<[1], [0], [0], [1], [0, 0, 1, 1], [], []>} : vector<8x64xbf16>, vector<64x64xbf16>, vector<8x64xf32> -> vector<8x64xf32>
    %14 = arith.addf %10, %13 : vector<8x64xf32>
    %c0_14 = arith.constant 0 : index
    %c0_15 = arith.constant 0 : index
    %c0_16 = arith.constant 0 : index
    %15 = vector.load %arg4[%c0_14, %c0_15, %c0_16] : memref<1x8x64xf32, #tpu.memory_space<vmem>>, vector<1x8x64xf32>
    %16 = vector.shape_cast %15 : vector<1x8x64xf32> to vector<8x64xf32>
    %17 = vector.shape_cast %14 : vector<8x64xf32> to vector<1x8x64xf32>
    tpu.vector_store %arg4[%c0_14, %c0_15, %c0_16], %17 {strides = array<i32>} : memref<1x8x64xf32, #tpu.memory_space<vmem>>, vector<1x8x64xf32>,
    %c0_17 = arith.constant 0 : index
    %c1 = arith.constant 1 : index
    %c0_18 = arith.constant 0 : index
    %18 = vector.load %arg1[%c0_17, %c1, %c0_18] : memref<1x24x64xbf16, #tpu.memory_space<vmem>>, vector<1x8x64xbf16>
    %19 = vector.shape_cast %18 : vector<1x8x64xbf16> to vector<8x64xbf16>
    %c0_19 = arith.constant 0 : index
    %c0_20 = arith.constant 0 : index
    %c0_21 = arith.constant 0 : index
    %20 = vector.load %arg4[%c0_19, %c0_20, %c0_21] : memref<1x8x64xf32, #tpu.memory_space<vmem>>, vector<1x8x64xf32>
    %21 = vector.shape_cast %20 : vector<1x8x64xf32> to vector<8x64xf32>
    %c1_22 = arith.constant 1 : index
    %c0_23 = arith.constant 0 : index
    %c0_24 = arith.constant 0 : index
    %22 = vector.load %arg2[%c1_22, %c0_23, %c0_24] : memref<9x64x64xbf16, #tpu.memory_space<vmem>>, vector<1x64x64xbf16>
    %23 = vector.shape_cast %22 : vector<1x64x64xbf16> to vector<64x64xbf16>
    %cst_25 = arith.constant dense<0.000000e+00> : vector<8x64xf32>
    %24 = tpu.matmul %19, %23, %cst_25 {dimension_numbers = #tpu.dot_dimension_numbers<[1], [0], [0], [1], [0, 0, 1, 1], [], []>} : vector<8x64xbf16>, vector<64x64xbf16>, vector<8x64xf32> -> vector<8x64xf32>
    %25 = arith.addf %21, %24 : vector<8x64xf32>
    %c0_26 = arith.constant 0 : index
    %c0_27 = arith.constant 0 : index
    %c0_28 = arith.constant 0 : index
    %26 = vector.load %arg4[%c0_26, %c0_27, %c0_28] : memref<1x8x64xf32, #tpu.memory_space<vmem>>, vector<1x8x64xf32>
    %27 = vector.shape_cast %26 : vector<1x8x64xf32> to vector<8x64xf32>
    %28 = vector.shape_cast %25 : vector<8x64xf32> to vector<1x8x64xf32>
    tpu.vector_store %arg4[%c0_26, %c0_27, %c0_28], %28 {strides = array<i32>} : memref<1x8x64xf32, #tpu.memory_space<vmem>>, vector<1x8x64xf32>,
    %c0_29 = arith.constant 0 : index
    %c2 = arith.constant 2 : index
    %c0_30 = arith.constant 0 : index
    %29 = vector.load %arg1[%c0_29, %c2, %c0_30] : memref<1x24x64xbf16, #tpu.memory_space<vmem>>, vector<1x8x64xbf16>
    %30 = vector.shape_cast %29 : vector<1x8x64xbf16> to vector<8x64xbf16>
    %c0_31 = arith.constant 0 : index
    %c0_32 = arith.constant 0 : index
    %c0_33 = arith.constant 0 : index
    %31 = vector.load %arg4[%c0_31, %c0_32, %c0_33] : memref<1x8x64xf32, #tpu.memory_space<vmem>>, vector<1x8x64xf32>
    %32 = vector.shape_cast %31 : vector<1x8x64xf32> to vector<8x64xf32>
    %c2_34 = arith.constant 2 : index
    %c0_35 = arith.constant 0 : index
    %c0_36 = arith.constant 0 : index
    %33 = vector.load %arg2[%c2_34, %c0_35, %c0_36] : memref<9x64x64xbf16, #tpu.memory_space<vmem>>, vector<1x64x64xbf16>
    %34 = vector.shape_cast %33 : vector<1x64x64xbf16> to vector<64x64xbf16>
    %cst_37 = arith.constant dense<0.000000e+00> : vector<8x64xf32>
    %35 = tpu.matmul %30, %34, %cst_37 {dimension_numbers = #tpu.dot_dimension_numbers<[1], [0], [0], [1], [0, 0, 1, 1], [], []>} : vector<8x64xbf16>, vector<64x64xbf16>, vector<8x64xf32> -> vector<8x64xf32>
    %36 = arith.addf %32, %35 : vector<8x64xf32>
    %c0_38 = arith.constant 0 : index
    %c0_39 = arith.constant 0 : index
    %c0_40 = arith.constant 0 : index
    %37 = vector.load %arg4[%c0_38, %c0_39, %c0_40] : memref<1x8x64xf32, #tpu.memory_space<vmem>>, vector<1x8x64xf32>
    %38 = vector.shape_cast %37 : vector<1x8x64xf32> to vector<8x64xf32>
    %39 = vector.shape_cast %36 : vector<8x64xf32> to vector<1x8x64xf32>
    tpu.vector_store %arg4[%c0_38, %c0_39, %c0_40], %39 {strides = array<i32>} : memref<1x8x64xf32, #tpu.memory_space<vmem>>, vector<1x8x64xf32>,
    %c0_41 = arith.constant 0 : index
    %c4 = arith.constant 4 : index
    %c0_42 = arith.constant 0 : index
    %40 = vector.load %arg1[%c0_41, %c4, %c0_42] : memref<1x24x64xbf16, #tpu.memory_space<vmem>>, vector<1x8x64xbf16>
    %41 = vector.shape_cast %40 : vector<1x8x64xbf16> to vector<8x64xbf16>
    %c0_43 = arith.constant 0 : index
    %c0_44 = arith.constant 0 : index
    %c0_45 = arith.constant 0 : index
    %42 = vector.load %arg4[%c0_43, %c0_44, %c0_45] : memref<1x8x64xf32, #tpu.memory_space<vmem>>, vector<1x8x64xf32>
    %43 = vector.shape_cast %42 : vector<1x8x64xf32> to vector<8x64xf32>
    %c3 = arith.constant 3 : index
    %c0_46 = arith.constant 0 : index
    %c0_47 = arith.constant 0 : index
    %44 = vector.load %arg2[%c3, %c0_46, %c0_47] : memref<9x64x64xbf16, #tpu.memory_space<vmem>>, vector<1x64x64xbf16>
    %45 = vector.shape_cast %44 : vector<1x64x64xbf16> to vector<64x64xbf16>
    %cst_48 = arith.constant dense<0.000000e+00> : vector<8x64xf32>
    %46 = tpu.matmul %41, %45, %cst_48 {dimension_numbers = #tpu.dot_dimension_numbers<[1], [0], [0], [1], [0, 0, 1, 1], [], []>} : vector<8x64xbf16>, vector<64x64xbf16>, vector<8x64xf32> -> vector<8x64xf32>
    %47 = arith.addf %43, %46 : vector<8x64xf32>
    %c0_49 = arith.constant 0 : index
    %c0_50 = arith.constant 0 : index
    %c0_51 = arith.constant 0 : index
    %48 = vector.load %arg4[%c0_49, %c0_50, %c0_51] : memref<1x8x64xf32, #tpu.memory_space<vmem>>, vector<1x8x64xf32>
    %49 = vector.shape_cast %48 : vector<1x8x64xf32> to vector<8x64xf32>
    %50 = vector.shape_cast %47 : vector<8x64xf32> to vector<1x8x64xf32>
    tpu.vector_store %arg4[%c0_49, %c0_50, %c0_51], %50 {strides = array<i32>} : memref<1x8x64xf32, #tpu.memory_space<vmem>>, vector<1x8x64xf32>,
    %c0_52 = arith.constant 0 : index
    %c5 = arith.constant 5 : index
    %c0_53 = arith.constant 0 : index
    %51 = vector.load %arg1[%c0_52, %c5, %c0_53] : memref<1x24x64xbf16, #tpu.memory_space<vmem>>, vector<1x8x64xbf16>
    %52 = vector.shape_cast %51 : vector<1x8x64xbf16> to vector<8x64xbf16>
    %c0_54 = arith.constant 0 : index
    %c0_55 = arith.constant 0 : index
    %c0_56 = arith.constant 0 : index
    %53 = vector.load %arg4[%c0_54, %c0_55, %c0_56] : memref<1x8x64xf32, #tpu.memory_space<vmem>>, vector<1x8x64xf32>
    %54 = vector.shape_cast %53 : vector<1x8x64xf32> to vector<8x64xf32>
    %c4_57 = arith.constant 4 : index
    %c0_58 = arith.constant 0 : index
    %c0_59 = arith.constant 0 : index
    %55 = vector.load %arg2[%c4_57, %c0_58, %c0_59] : memref<9x64x64xbf16, #tpu.memory_space<vmem>>, vector<1x64x64xbf16>
    %56 = vector.shape_cast %55 : vector<1x64x64xbf16> to vector<64x64xbf16>
    %cst_60 = arith.constant dense<0.000000e+00> : vector<8x64xf32>
    %57 = tpu.matmul %52, %56, %cst_60 {dimension_numbers = #tpu.dot_dimension_numbers<[1], [0], [0], [1], [0, 0, 1, 1], [], []>} : vector<8x64xbf16>, vector<64x64xbf16>, vector<8x64xf32> -> vector<8x64xf32>
    %58 = arith.addf %54, %57 : vector<8x64xf32>
    %c0_61 = arith.constant 0 : index
    %c0_62 = arith.constant 0 : index
    %c0_63 = arith.constant 0 : index
    %59 = vector.load %arg4[%c0_61, %c0_62, %c0_63] : memref<1x8x64xf32, #tpu.memory_space<vmem>>, vector<1x8x64xf32>
    %60 = vector.shape_cast %59 : vector<1x8x64xf32> to vector<8x64xf32>
    %61 = vector.shape_cast %58 : vector<8x64xf32> to vector<1x8x64xf32>
    tpu.vector_store %arg4[%c0_61, %c0_62, %c0_63], %61 {strides = array<i32>} : memref<1x8x64xf32, #tpu.memory_space<vmem>>, vector<1x8x64xf32>,
    %c0_64 = arith.constant 0 : index
    %c6 = arith.constant 6 : index
    %c0_65 = arith.constant 0 : index
    %62 = vector.load %arg1[%c0_64, %c6, %c0_65] : memref<1x24x64xbf16, #tpu.memory_space<vmem>>, vector<1x8x64xbf16>
    %63 = vector.shape_cast %62 : vector<1x8x64xbf16> to vector<8x64xbf16>
    %c0_66 = arith.constant 0 : index
    %c0_67 = arith.constant 0 : index
    %c0_68 = arith.constant 0 : index
    %64 = vector.load %arg4[%c0_66, %c0_67, %c0_68] : memref<1x8x64xf32, #tpu.memory_space<vmem>>, vector<1x8x64xf32>
    %65 = vector.shape_cast %64 : vector<1x8x64xf32> to vector<8x64xf32>
    %c5_69 = arith.constant 5 : index
    %c0_70 = arith.constant 0 : index
    %c0_71 = arith.constant 0 : index
    %66 = vector.load %arg2[%c5_69, %c0_70, %c0_71] : memref<9x64x64xbf16, #tpu.memory_space<vmem>>, vector<1x64x64xbf16>
    %67 = vector.shape_cast %66 : vector<1x64x64xbf16> to vector<64x64xbf16>
    %cst_72 = arith.constant dense<0.000000e+00> : vector<8x64xf32>
    %68 = tpu.matmul %63, %67, %cst_72 {dimension_numbers = #tpu.dot_dimension_numbers<[1], [0], [0], [1], [0, 0, 1, 1], [], []>} : vector<8x64xbf16>, vector<64x64xbf16>, vector<8x64xf32> -> vector<8x64xf32>
    %69 = arith.addf %65, %68 : vector<8x64xf32>
    %c0_73 = arith.constant 0 : index
    %c0_74 = arith.constant 0 : index
    %c0_75 = arith.constant 0 : index
    %70 = vector.load %arg4[%c0_73, %c0_74, %c0_75] : memref<1x8x64xf32, #tpu.memory_space<vmem>>, vector<1x8x64xf32>
    %71 = vector.shape_cast %70 : vector<1x8x64xf32> to vector<8x64xf32>
    %72 = vector.shape_cast %69 : vector<8x64xf32> to vector<1x8x64xf32>
    tpu.vector_store %arg4[%c0_73, %c0_74, %c0_75], %72 {strides = array<i32>} : memref<1x8x64xf32, #tpu.memory_space<vmem>>, vector<1x8x64xf32>,
    %c0_76 = arith.constant 0 : index
    %c8 = arith.constant 8 : index
    %c0_77 = arith.constant 0 : index
    %73 = vector.load %arg1[%c0_76, %c8, %c0_77] : memref<1x24x64xbf16, #tpu.memory_space<vmem>>, vector<1x8x64xbf16>
    %74 = vector.shape_cast %73 : vector<1x8x64xbf16> to vector<8x64xbf16>
    %c0_78 = arith.constant 0 : index
    %c0_79 = arith.constant 0 : index
    %c0_80 = arith.constant 0 : index
    %75 = vector.load %arg4[%c0_78, %c0_79, %c0_80] : memref<1x8x64xf32, #tpu.memory_space<vmem>>, vector<1x8x64xf32>
    %76 = vector.shape_cast %75 : vector<1x8x64xf32> to vector<8x64xf32>
    %c6_81 = arith.constant 6 : index
    %c0_82 = arith.constant 0 : index
    %c0_83 = arith.constant 0 : index
    %77 = vector.load %arg2[%c6_81, %c0_82, %c0_83] : memref<9x64x64xbf16, #tpu.memory_space<vmem>>, vector<1x64x64xbf16>
    %78 = vector.shape_cast %77 : vector<1x64x64xbf16> to vector<64x64xbf16>
    %cst_84 = arith.constant dense<0.000000e+00> : vector<8x64xf32>
    %79 = tpu.matmul %74, %78, %cst_84 {dimension_numbers = #tpu.dot_dimension_numbers<[1], [0], [0], [1], [0, 0, 1, 1], [], []>} : vector<8x64xbf16>, vector<64x64xbf16>, vector<8x64xf32> -> vector<8x64xf32>
    %80 = arith.addf %76, %79 : vector<8x64xf32>
    %c0_85 = arith.constant 0 : index
    %c0_86 = arith.constant 0 : index
    %c0_87 = arith.constant 0 : index
    %81 = vector.load %arg4[%c0_85, %c0_86, %c0_87] : memref<1x8x64xf32, #tpu.memory_space<vmem>>, vector<1x8x64xf32>
    %82 = vector.shape_cast %81 : vector<1x8x64xf32> to vector<8x64xf32>
    %83 = vector.shape_cast %80 : vector<8x64xf32> to vector<1x8x64xf32>
    tpu.vector_store %arg4[%c0_85, %c0_86, %c0_87], %83 {strides = array<i32>} : memref<1x8x64xf32, #tpu.memory_space<vmem>>, vector<1x8x64xf32>,
    %c0_88 = arith.constant 0 : index
    %c9 = arith.constant 9 : index
    %c0_89 = arith.constant 0 : index
    %84 = vector.load %arg1[%c0_88, %c9, %c0_89] : memref<1x24x64xbf16, #tpu.memory_space<vmem>>, vector<1x8x64xbf16>
    %85 = vector.shape_cast %84 : vector<1x8x64xbf16> to vector<8x64xbf16>
    %c0_90 = arith.constant 0 : index
    %c0_91 = arith.constant 0 : index
    %c0_92 = arith.constant 0 : index
    %86 = vector.load %arg4[%c0_90, %c0_91, %c0_92] : memref<1x8x64xf32, #tpu.memory_space<vmem>>, vector<1x8x64xf32>
    %87 = vector.shape_cast %86 : vector<1x8x64xf32> to vector<8x64xf32>
    %c7 = arith.constant 7 : index
    %c0_93 = arith.constant 0 : index
    %c0_94 = arith.constant 0 : index
    %88 = vector.load %arg2[%c7, %c0_93, %c0_94] : memref<9x64x64xbf16, #tpu.memory_space<vmem>>, vector<1x64x64xbf16>
    %89 = vector.shape_cast %88 : vector<1x64x64xbf16> to vector<64x64xbf16>
    %cst_95 = arith.constant dense<0.000000e+00> : vector<8x64xf32>
    %90 = tpu.matmul %85, %89, %cst_95 {dimension_numbers = #tpu.dot_dimension_numbers<[1], [0], [0], [1], [0, 0, 1, 1], [], []>} : vector<8x64xbf16>, vector<64x64xbf16>, vector<8x64xf32> -> vector<8x64xf32>
    %91 = arith.addf %87, %90 : vector<8x64xf32>
    %c0_96 = arith.constant 0 : index
    %c0_97 = arith.constant 0 : index
    %c0_98 = arith.constant 0 : index
    %92 = vector.load %arg4[%c0_96, %c0_97, %c0_98] : memref<1x8x64xf32, #tpu.memory_space<vmem>>, vector<1x8x64xf32>
    %93 = vector.shape_cast %92 : vector<1x8x64xf32> to vector<8x64xf32>
    %94 = vector.shape_cast %91 : vector<8x64xf32> to vector<1x8x64xf32>
    tpu.vector_store %arg4[%c0_96, %c0_97, %c0_98], %94 {strides = array<i32>} : memref<1x8x64xf32, #tpu.memory_space<vmem>>, vector<1x8x64xf32>,
    %c0_99 = arith.constant 0 : index
    %c10 = arith.constant 10 : index
    %c0_100 = arith.constant 0 : index
    %95 = vector.load %arg1[%c0_99, %c10, %c0_100] : memref<1x24x64xbf16, #tpu.memory_space<vmem>>, vector<1x8x64xbf16>
    %96 = vector.shape_cast %95 : vector<1x8x64xbf16> to vector<8x64xbf16>
    %c0_101 = arith.constant 0 : index
    %c0_102 = arith.constant 0 : index
    %c0_103 = arith.constant 0 : index
    %97 = vector.load %arg4[%c0_101, %c0_102, %c0_103] : memref<1x8x64xf32, #tpu.memory_space<vmem>>, vector<1x8x64xf32>
    %98 = vector.shape_cast %97 : vector<1x8x64xf32> to vector<8x64xf32>
    %c8_104 = arith.constant 8 : index
    %c0_105 = arith.constant 0 : index
    %c0_106 = arith.constant 0 : index
    %99 = vector.load %arg2[%c8_104, %c0_105, %c0_106] : memref<9x64x64xbf16, #tpu.memory_space<vmem>>, vector<1x64x64xbf16>
    %100 = vector.shape_cast %99 : vector<1x64x64xbf16> to vector<64x64xbf16>
    %cst_107 = arith.constant dense<0.000000e+00> : vector<8x64xf32>
    %101 = tpu.matmul %96, %100, %cst_107 {dimension_numbers = #tpu.dot_dimension_numbers<[1], [0], [0], [1], [0, 0, 1, 1], [], []>} : vector<8x64xbf16>, vector<64x64xbf16>, vector<8x64xf32> -> vector<8x64xf32>
    %102 = arith.addf %98, %101 : vector<8x64xf32>
    %c0_108 = arith.constant 0 : index
    %c0_109 = arith.constant 0 : index
    %c0_110 = arith.constant 0 : index
    %103 = vector.load %arg4[%c0_108, %c0_109, %c0_110] : memref<1x8x64xf32, #tpu.memory_space<vmem>>, vector<1x8x64xf32>
    %104 = vector.shape_cast %103 : vector<1x8x64xf32> to vector<8x64xf32>
    %105 = vector.shape_cast %102 : vector<8x64xf32> to vector<1x8x64xf32>
    tpu.vector_store %arg4[%c0_108, %c0_109, %c0_110], %105 {strides = array<i32>} : memref<1x8x64xf32, #tpu.memory_space<vmem>>, vector<1x8x64xf32>,
    return
  }
  func.func @transform_0(%arg0: i32) -> (i32, i32, i32) {
    %c0_i32 = arith.constant 0 : i32
    %c0_i32_0 = arith.constant 0 : i32
    %c0_i32_1 = arith.constant 0 : i32
    return %arg0, %c0_i32, %c0_i32_0 : i32, i32, i32
  }
  func.func @transform_1(%arg0: i32) -> (i32, i32, i32) {
    %c0_i32 = arith.constant 0 : i32
    %c0_i32_0 = arith.constant 0 : i32
    %c0_i32_1 = arith.constant 0 : i32
    %c0_i32_2 = arith.constant 0 : i32
    return %c0_i32, %c0_i32_0, %c0_i32_1 : i32, i32, i32
  }
  func.func @transform_2(%arg0: i32) -> (i32, i32) {
    %c0_i32 = arith.constant 0 : i32
    %c0_i32_0 = arith.constant 0 : i32
    %c0_i32_1 = arith.constant 0 : i32
    return %c0_i32, %c0_i32_0 : i32, i32
  }
  func.func @transform_3(%arg0: i32) -> (i32, i32, i32) {
    %c0_i32 = arith.constant 0 : i32
    %c0_i32_0 = arith.constant 0 : i32
    %c0_i32_1 = arith.constant 0 : i32
    return %arg0, %c0_i32, %c0_i32_0 : i32, i32, i32
  }
}

module attributes {stable_mosaic.version = 11 : i64} {
  func.func @_dense_kernel(%arg0: i32, %arg1: memref<16x69xbf16, #tpu.memory_space<vmem>>, %arg2: memref<69x32xbf16, #tpu.memory_space<vmem>>, %arg3: memref<1x32xf32, #tpu.memory_space<vmem>>, %arg4: memref<16x32xf32, #tpu.memory_space<vmem>>) attributes {dimension_semantics = [#tpu.dimension_semantics<parallel>], iteration_bounds = array<i64: 1>, scalar_prefetch = 0 : i64, scratch_operands = 0 : i64, tpu.core_type = #tpu.core_type<tc>, window_params = [{transform_indices = @transform_0, window_bounds = array<i64: 16, 69>}, {pipeline_mode = #tpu.pipeline_mode<synchronous>, transform_indices = @transform_1, window_bounds = array<i64: 69, 32>}, {pipeline_mode = #tpu.pipeline_mode<synchronous>, transform_indices = @transform_2, window_bounds = array<i64: 1, 32>}, {transform_indices = @transform_3, window_bounds = array<i64: 16, 32>}]} {
    %c0 = arith.constant 0 : index
    %c0_0 = arith.constant 0 : index
    %0 = vector.load %arg1[%c0, %c0_0] : memref<16x69xbf16, #tpu.memory_space<vmem>>, vector<16x69xbf16>
    %c0_1 = arith.constant 0 : index
    %c0_2 = arith.constant 0 : index
    %1 = vector.load %arg2[%c0_1, %c0_2] : memref<69x32xbf16, #tpu.memory_space<vmem>>, vector<69x32xbf16>
    %cst = arith.constant dense<0.000000e+00> : vector<16x32xf32>
    %2 = tpu.matmul %0, %1, %cst {dimension_numbers = #tpu.dot_dimension_numbers<[1], [0], [0], [1], [0, 0, 1, 1], [], []>} : vector<16x69xbf16>, vector<69x32xbf16>, vector<16x32xf32> -> vector<16x32xf32>
    %c0_3 = arith.constant 0 : index
    %c0_4 = arith.constant 0 : index
    %3 = vector.load %arg3[%c0_3, %c0_4] : memref<1x32xf32, #tpu.memory_space<vmem>>, vector<1x32xf32>
    %4 = vector.broadcast %3 : vector<1x32xf32> to vector<16x32xf32>
    %5 = arith.addf %2, %4 : vector<16x32xf32>
    %c0_5 = arith.constant 0 : index
    %c0_6 = arith.constant 0 : index
    %6 = vector.load %arg4[%c0_5, %c0_6] : memref<16x32xf32, #tpu.memory_space<vmem>>, vector<16x32xf32>
    tpu.vector_store %arg4[%c0_5, %c0_6], %5 {strides = array<i32>} : memref<16x32xf32, #tpu.memory_space<vmem>>, vector<16x32xf32>,
    return
  }
  func.func @transform_0(%arg0: i32) -> (i32, i32) {
    %c0_i32 = arith.constant 0 : i32
    %c0_i32_0 = arith.constant 0 : i32
    return %arg0, %c0_i32 : i32, i32
  }
  func.func @transform_1(%arg0: i32) -> (i32, i32) {
    %c0_i32 = arith.constant 0 : i32
    %c0_i32_0 = arith.constant 0 : i32
    %c0_i32_1 = arith.constant 0 : i32
    return %c0_i32, %c0_i32_0 : i32, i32
  }
  func.func @transform_2(%arg0: i32) -> (i32, i32) {
    %c0_i32 = arith.constant 0 : i32
    %c0_i32_0 = arith.constant 0 : i32
    %c0_i32_1 = arith.constant 0 : i32
    return %c0_i32, %c0_i32_0 : i32, i32
  }
  func.func @transform_3(%arg0: i32) -> (i32, i32) {
    %c0_i32 = arith.constant 0 : i32
    %c0_i32_0 = arith.constant 0 : i32
    return %arg0, %c0_i32 : i32, i32
  }
}

module attributes {stable_mosaic.version = 11 : i64} {
  func.func @_tff_kernel(%arg0: i32, %arg1: memref<1x8x32xf32, #tpu.memory_space<vmem>>, %arg2: memref<1x32xf32, #tpu.memory_space<vmem>>, %arg3: memref<1x32xf32, #tpu.memory_space<vmem>>, %arg4: memref<32x64xf32, #tpu.memory_space<vmem>>, %arg5: memref<1x64xf32, #tpu.memory_space<vmem>>, %arg6: memref<64x32xf32, #tpu.memory_space<vmem>>, %arg7: memref<1x32xf32, #tpu.memory_space<vmem>>, %arg8: memref<1x8x32xf32, #tpu.memory_space<vmem>>) attributes {dimension_semantics = [#tpu.dimension_semantics<parallel>], iteration_bounds = array<i64: 2>, scalar_prefetch = 0 : i64, scratch_operands = 0 : i64, tpu.core_type = #tpu.core_type<tc>, window_params = [{transform_indices = @transform_0, window_bounds = array<i64: 1, 8, 32>}, {pipeline_mode = #tpu.pipeline_mode<synchronous>, transform_indices = @transform_1, window_bounds = array<i64: 1, 32>}, {pipeline_mode = #tpu.pipeline_mode<synchronous>, transform_indices = @transform_2, window_bounds = array<i64: 1, 32>}, {pipeline_mode = #tpu.pipeline_mode<synchronous>, transform_indices = @transform_3, window_bounds = array<i64: 32, 64>}, {pipeline_mode = #tpu.pipeline_mode<synchronous>, transform_indices = @transform_4, window_bounds = array<i64: 1, 64>}, {pipeline_mode = #tpu.pipeline_mode<synchronous>, transform_indices = @transform_5, window_bounds = array<i64: 64, 32>}, {pipeline_mode = #tpu.pipeline_mode<synchronous>, transform_indices = @transform_6, window_bounds = array<i64: 1, 32>}, {transform_indices = @transform_7, window_bounds = array<i64: 1, 8, 32>}]} {
    %c0 = arith.constant 0 : index
    %c0_0 = arith.constant 0 : index
    %c0_1 = arith.constant 0 : index
    %0 = vector.load %arg1[%c0, %c0_0, %c0_1] : memref<1x8x32xf32, #tpu.memory_space<vmem>>, vector<1x8x32xf32>
    %1 = vector.shape_cast %0 : vector<1x8x32xf32> to vector<8x32xf32>
    %cst = arith.constant dense<0.000000e+00> : vector<8xf32>
    %2 = vector.multi_reduction <add>, %1, %cst [1] : vector<8x32xf32> to vector<8xf32>
    %3 = vector.shape_cast %2 : vector<8xf32> to vector<8x1xf32>
    %cst_2 = arith.constant 3.200000e+01 : f32
    %4 = vector.broadcast %cst_2 : f32 to vector<8x1xf32>
    %5 = arith.divf %3, %4 : vector<8x1xf32>
    %6 = vector.broadcast %5 : vector<8x1xf32> to vector<8x32xf32>
    %7 = arith.subf %1, %6 : vector<8x32xf32>
    %8 = arith.mulf %7, %7 : vector<8x32xf32>
    %cst_3 = arith.constant dense<0.000000e+00> : vector<8xf32>
    %9 = vector.multi_reduction <add>, %8, %cst_3 [1] : vector<8x32xf32> to vector<8xf32>
    %10 = vector.shape_cast %9 : vector<8xf32> to vector<8x1xf32>
    %cst_4 = arith.constant 3.200000e+01 : f32
    %11 = vector.broadcast %cst_4 : f32 to vector<8x1xf32>
    %12 = arith.divf %10, %11 : vector<8x1xf32>
    %13 = vector.broadcast %5 : vector<8x1xf32> to vector<8x32xf32>
    %14 = arith.subf %1, %13 : vector<8x32xf32>
    %cst_5 = arith.constant 9.99999974E-6 : f32
    %15 = vector.broadcast %cst_5 : f32 to vector<8x1xf32>
    %16 = arith.addf %12, %15 : vector<8x1xf32>
    %17 = math.rsqrt %16 : vector<8x1xf32>
    %18 = vector.broadcast %17 : vector<8x1xf32> to vector<8x32xf32>
    %19 = arith.mulf %14, %18 : vector<8x32xf32>
    %c0_6 = arith.constant 0 : index
    %c0_7 = arith.constant 0 : index
    %20 = vector.load %arg2[%c0_6, %c0_7] : memref<1x32xf32, #tpu.memory_space<vmem>>, vector<1x32xf32>
    %21 = vector.broadcast %20 : vector<1x32xf32> to vector<8x32xf32>
    %22 = arith.mulf %19, %21 : vector<8x32xf32>
    %c0_8 = arith.constant 0 : index
    %c0_9 = arith.constant 0 : index
    %23 = vector.load %arg3[%c0_8, %c0_9] : memref<1x32xf32, #tpu.memory_space<vmem>>, vector<1x32xf32>
    %24 = vector.broadcast %23 : vector<1x32xf32> to vector<8x32xf32>
    %25 = arith.addf %22, %24 : vector<8x32xf32>
    %c0_10 = arith.constant 0 : index
    %c0_11 = arith.constant 0 : index
    %26 = vector.load %arg4[%c0_10, %c0_11] : memref<32x64xf32, #tpu.memory_space<vmem>>, vector<32x64xf32>
    %cst_12 = arith.constant dense<0.000000e+00> : vector<8x64xf32>
    %27 = tpu.matmul %25, %26, %cst_12 {dimension_numbers = #tpu.dot_dimension_numbers<[1], [0], [0], [1], [0, 0, 1, 1], [], []>} : vector<8x32xf32>, vector<32x64xf32>, vector<8x64xf32> -> vector<8x64xf32>
    %c0_13 = arith.constant 0 : index
    %c0_14 = arith.constant 0 : index
    %28 = vector.load %arg5[%c0_13, %c0_14] : memref<1x64xf32, #tpu.memory_space<vmem>>, vector<1x64xf32>
    %29 = vector.broadcast %28 : vector<1x64xf32> to vector<8x64xf32>
    %30 = arith.addf %27, %29 : vector<8x64xf32>
    %cst_15 = arith.constant 0.000000e+00 : f32
    %31 = vector.broadcast %cst_15 : f32 to vector<8x64xf32>
    %32 = arith.maximumf %30, %31 : vector<8x64xf32>
    %c0_16 = arith.constant 0 : index
    %c0_17 = arith.constant 0 : index
    %33 = vector.load %arg6[%c0_16, %c0_17] : memref<64x32xf32, #tpu.memory_space<vmem>>, vector<64x32xf32>
    %cst_18 = arith.constant dense<0.000000e+00> : vector<8x32xf32>
    %34 = tpu.matmul %32, %33, %cst_18 {dimension_numbers = #tpu.dot_dimension_numbers<[1], [0], [0], [1], [0, 0, 1, 1], [], []>} : vector<8x64xf32>, vector<64x32xf32>, vector<8x32xf32> -> vector<8x32xf32>
    %35 = arith.addf %1, %34 : vector<8x32xf32>
    %c0_19 = arith.constant 0 : index
    %c0_20 = arith.constant 0 : index
    %36 = vector.load %arg7[%c0_19, %c0_20] : memref<1x32xf32, #tpu.memory_space<vmem>>, vector<1x32xf32>
    %37 = vector.broadcast %36 : vector<1x32xf32> to vector<8x32xf32>
    %38 = arith.addf %35, %37 : vector<8x32xf32>
    %c0_21 = arith.constant 0 : index
    %c0_22 = arith.constant 0 : index
    %c0_23 = arith.constant 0 : index
    %39 = vector.load %arg8[%c0_21, %c0_22, %c0_23] : memref<1x8x32xf32, #tpu.memory_space<vmem>>, vector<1x8x32xf32>
    %40 = vector.shape_cast %39 : vector<1x8x32xf32> to vector<8x32xf32>
    %41 = vector.shape_cast %38 : vector<8x32xf32> to vector<1x8x32xf32>
    tpu.vector_store %arg8[%c0_21, %c0_22, %c0_23], %41 {strides = array<i32>} : memref<1x8x32xf32, #tpu.memory_space<vmem>>, vector<1x8x32xf32>,
    return
  }
  func.func @transform_0(%arg0: i32) -> (i32, i32, i32) {
    %c0_i32 = arith.constant 0 : i32
    %c0_i32_0 = arith.constant 0 : i32
    %c0_i32_1 = arith.constant 0 : i32
    return %arg0, %c0_i32, %c0_i32_0 : i32, i32, i32
  }
  func.func @transform_1(%arg0: i32) -> (i32, i32) {
    %c0_i32 = arith.constant 0 : i32
    %c0_i32_0 = arith.constant 0 : i32
    %c0_i32_1 = arith.constant 0 : i32
    return %c0_i32, %c0_i32_0 : i32, i32
  }
  func.func @transform_2(%arg0: i32) -> (i32, i32) {
    %c0_i32 = arith.constant 0 : i32
    %c0_i32_0 = arith.constant 0 : i32
    %c0_i32_1 = arith.constant 0 : i32
    return %c0_i32, %c0_i32_0 : i32, i32
  }
  func.func @transform_3(%arg0: i32) -> (i32, i32) {
    %c0_i32 = arith.constant 0 : i32
    %c0_i32_0 = arith.constant 0 : i32
    %c0_i32_1 = arith.constant 0 : i32
    return %c0_i32, %c0_i32_0 : i32, i32
  }
  func.func @transform_4(%arg0: i32) -> (i32, i32) {
    %c0_i32 = arith.constant 0 : i32
    %c0_i32_0 = arith.constant 0 : i32
    %c0_i32_1 = arith.constant 0 : i32
    return %c0_i32, %c0_i32_0 : i32, i32
  }
  func.func @transform_5(%arg0: i32) -> (i32, i32) {
    %c0_i32 = arith.constant 0 : i32
    %c0_i32_0 = arith.constant 0 : i32
    %c0_i32_1 = arith.constant 0 : i32
    return %c0_i32, %c0_i32_0 : i32, i32
  }
  func.func @transform_6(%arg0: i32) -> (i32, i32) {
    %c0_i32 = arith.constant 0 : i32
    %c0_i32_0 = arith.constant 0 : i32
    %c0_i32_1 = arith.constant 0 : i32
    return %c0_i32, %c0_i32_0 : i32, i32
  }
  func.func @transform_7(%arg0: i32) -> (i32, i32, i32) {
    %c0_i32 = arith.constant 0 : i32
    %c0_i32_0 = arith.constant 0 : i32
    %c0_i32_1 = arith.constant 0 : i32
    return %arg0, %c0_i32, %c0_i32_0 : i32, i32, i32
  }
}

module attributes {stable_mosaic.version = 11 : i64} {
  func.func @_fast_ff_kernel(%arg0: i32, %arg1: memref<1x8x32xf32, #tpu.memory_space<vmem>>, %arg2: memref<1x32x8xf32, #tpu.memory_space<vmem>>, %arg3: memref<1x32xf32, #tpu.memory_space<vmem>>, %arg4: memref<1x32xf32, #tpu.memory_space<vmem>>, %arg5: memref<32x1xf32, #tpu.memory_space<vmem>>, %arg6: memref<32x1xf32, #tpu.memory_space<vmem>>, %arg7: memref<32x32xf32, #tpu.memory_space<vmem>>, %arg8: memref<32x32xf32, #tpu.memory_space<vmem>>, %arg9: memref<32x32xf32, #tpu.memory_space<vmem>>, %arg10: memref<32x2xf32, #tpu.memory_space<vmem>>, %arg11: memref<2x32xf32, #tpu.memory_space<vmem>>, %arg12: memref<32x32xf32, #tpu.memory_space<vmem>>, %arg13: memref<32x32xf32, #tpu.memory_space<vmem>>, %arg14: memref<1x8x32xf32, #tpu.memory_space<vmem>>, %arg15: memref<8x32xf32, #tpu.memory_space<vmem>>) attributes {dimension_semantics = [#tpu.dimension_semantics<parallel>], iteration_bounds = array<i64: 2>, scalar_prefetch = 0 : i64, scratch_operands = 1 : i64, tpu.core_type = #tpu.core_type<tc>, window_params = [{transform_indices = @transform_0, window_bounds = array<i64: 1, 8, 32>}, {transform_indices = @transform_1, window_bounds = array<i64: 1, 32, 8>}, {pipeline_mode = #tpu.pipeline_mode<synchronous>, transform_indices = @transform_2, window_bounds = array<i64: 1, 32>}, {pipeline_mode = #tpu.pipeline_mode<synchronous>, transform_indices = @transform_3, window_bounds = array<i64: 1, 32>}, {pipeline_mode = #tpu.pipeline_mode<synchronous>, transform_indices = @transform_4, window_bounds = array<i64: 32, 1>}, {pipeline_mode = #tpu.pipeline_mode<synchronous>, transform_indices = @transform_5, window_bounds = array<i64: 32, 1>}, {pipeline_mode = #tpu.pipeline_mode<synchronous>, transform_indices = @transform_6, window_bounds = array<i64: 32, 32>}, {pipeline_mode = #tpu.pipeline_mode<synchronous>, transform_indices = @transform_7, window_bounds = array<i64: 32, 32>}, {pipeline_mode = #tpu.pipeline_mode<synchronous>, transform_indices = @transform_8, window_bounds = array<i64: 32, 32>}, {pipeline_mode = #tpu.pipeline_mode<synchronous>, transform_indices = @transform_9, window_bounds = array<i64: 32, 2>}, {pipeline_mode = #tpu.pipeline_mode<synchronous>, transform_indices = @transform_10, window_bounds = array<i64: 2, 32>}, {pipeline_mode = #tpu.pipeline_mode<synchronous>, transform_indices = @transform_11, window_bounds = array<i64: 32, 32>}, {pipeline_mode = #tpu.pipeline_mode<synchronous>, transform_indices = @transform_12, window_bounds = array<i64: 32, 32>}, {transform_indices = @transform_13, window_bounds = array<i64: 1, 8, 32>}]} {
    %c0 = arith.constant 0 : index
    %c0_0 = arith.constant 0 : index
    %c0_1 = arith.constant 0 : index
    %0 = vector.load %arg1[%c0, %c0_0, %c0_1] : memref<1x8x32xf32, #tpu.memory_space<vmem>>, vector<1x8x32xf32>
    %1 = vector.shape_cast %0 : vector<1x8x32xf32> to vector<8x32xf32>
    %cst = arith.constant dense<0.000000e+00> : vector<8xf32>
    %2 = vector.multi_reduction <add>, %1, %cst [1] : vector<8x32xf32> to vector<8xf32>
    %3 = vector.shape_cast %2 : vector<8xf32> to vector<8x1xf32>
    %cst_2 = arith.constant 3.200000e+01 : f32
    %4 = vector.broadcast %cst_2 : f32 to vector<8x1xf32>
    %5 = arith.divf %3, %4 : vector<8x1xf32>
    %6 = vector.broadcast %5 : vector<8x1xf32> to vector<8x32xf32>
    %7 = arith.subf %1, %6 : vector<8x32xf32>
    %8 = arith.mulf %7, %7 : vector<8x32xf32>
    %cst_3 = arith.constant dense<0.000000e+00> : vector<8xf32>
    %9 = vector.multi_reduction <add>, %8, %cst_3 [1] : vector<8x32xf32> to vector<8xf32>
    %10 = vector.shape_cast %9 : vector<8xf32> to vector<8x1xf32>
    %cst_4 = arith.constant 3.200000e+01 : f32
    %11 = vector.broadcast %cst_4 : f32 to vector<8x1xf32>
    %12 = arith.divf %10, %11 : vector<8x1xf32>
    %13 = vector.broadcast %5 : vector<8x1xf32> to vector<8x32xf32>
    %14 = arith.subf %1, %13 : vector<8x32xf32>
    %cst_5 = arith.constant 9.99999974E-6 : f32
    %15 = vector.broadcast %cst_5 : f32 to vector<8x1xf32>
    %16 = arith.addf %12, %15 : vector<8x1xf32>
    %17 = math.rsqrt %16 : vector<8x1xf32>
    %18 = vector.broadcast %17 : vector<8x1xf32> to vector<8x32xf32>
    %19 = arith.mulf %14, %18 : vector<8x32xf32>
    %c0_6 = arith.constant 0 : index
    %c0_7 = arith.constant 0 : index
    %20 = vector.load %arg3[%c0_6, %c0_7] : memref<1x32xf32, #tpu.memory_space<vmem>>, vector<1x32xf32>
    %21 = vector.broadcast %20 : vector<1x32xf32> to vector<8x32xf32>
    %22 = arith.mulf %19, %21 : vector<8x32xf32>
    %c0_8 = arith.constant 0 : index
    %c0_9 = arith.constant 0 : index
    %23 = vector.load %arg4[%c0_8, %c0_9] : memref<1x32xf32, #tpu.memory_space<vmem>>, vector<1x32xf32>
    %24 = vector.broadcast %23 : vector<1x32xf32> to vector<8x32xf32>
    %25 = arith.addf %22, %24 : vector<8x32xf32>
    %c0_10 = arith.constant 0 : index
    %c0_11 = arith.constant 0 : index
    %c0_12 = arith.constant 0 : index
    %26 = vector.load %arg2[%c0_10, %c0_11, %c0_12] : memref<1x32x8xf32, #tpu.memory_space<vmem>>, vector<1x32x8xf32>
    %27 = vector.shape_cast %26 : vector<1x32x8xf32> to vector<32x8xf32>
    %cst_13 = arith.constant dense<0.000000e+00> : vector<8xf32>
    %28 = vector.multi_reduction <add>, %27, %cst_13 [0] : vector<32x8xf32> to vector<8xf32>
    %29 = vector.shape_cast %28 : vector<8xf32> to vector<1x8xf32>
    %cst_14 = arith.constant 3.200000e+01 : f32
    %30 = vector.broadcast %cst_14 : f32 to vector<1x8xf32>
    %31 = arith.divf %29, %30 : vector<1x8xf32>
    %32 = vector.broadcast %31 : vector<1x8xf32> to vector<32x8xf32>
    %33 = arith.subf %27, %32 : vector<32x8xf32>
    %34 = arith.mulf %33, %33 : vector<32x8xf32>
    %cst_15 = arith.constant dense<0.000000e+00> : vector<8xf32>
    %35 = vector.multi_reduction <add>, %34, %cst_15 [0] : vector<32x8xf32> to vector<8xf32>
    %36 = vector.shape_cast %35 : vector<8xf32> to vector<1x8xf32>
    %cst_16 = arith.constant 3.200000e+01 : f32
    %37 = vector.broadcast %cst_16 : f32 to vector<1x8xf32>
    %38 = arith.divf %36, %37 : vector<1x8xf32>
    %39 = vector.broadcast %31 : vector<1x8xf32> to vector<32x8xf32>
    %40 = arith.subf %27, %39 : vector<32x8xf32>
    %cst_17 = arith.constant 9.99999974E-6 : f32
    %41 = vector.broadcast %cst_17 : f32 to vector<1x8xf32>
    %42 = arith.addf %38, %41 : vector<1x8xf32>
    %43 = math.rsqrt %42 : vector<1x8xf32>
    %44 = vector.broadcast %43 : vector<1x8xf32> to vector<32x8xf32>
    %45 = arith.mulf %40, %44 : vector<32x8xf32>
    %c0_18 = arith.constant 0 : index
    %c0_19 = arith.constant 0 : index
    %46 = vector.load %arg5[%c0_18, %c0_19] : memref<32x1xf32, #tpu.memory_space<vmem>>, vector<32x1xf32>
    %47 = vector.broadcast %46 : vector<32x1xf32> to vector<32x8xf32>
    %48 = arith.mulf %45, %47 : vector<32x8xf32>
    %c0_20 = arith.constant 0 : index
    %c0_21 = arith.constant 0 : index
    %49 = vector.load %arg6[%c0_20, %c0_21] : memref<32x1xf32, #tpu.memory_space<vmem>>, vector<32x1xf32>
    %50 = vector.broadcast %49 : vector<32x1xf32> to vector<32x8xf32>
    %51 = arith.addf %48, %50 : vector<32x8xf32>
    %c0_22 = arith.constant 0 : index
    %c0_23 = arith.constant 0 : index
    %52 = vector.load %arg12[%c0_22, %c0_23] : memref<32x32xf32, #tpu.memory_space<vmem>>, vector<32x32xf32>
    %c0_24 = arith.constant 0 : index
    %c0_25 = arith.constant 0 : index
    %53 = vector.load %arg7[%c0_24, %c0_25] : memref<32x32xf32, #tpu.memory_space<vmem>>, vector<32x32xf32>
    %cst_26 = arith.constant dense<0.000000e+00> : vector<8x32xf32>
    %54 = tpu.matmul %25, %53, %cst_26 {dimension_numbers = #tpu.dot_dimension_numbers<[1], [0], [0], [1], [0, 0, 1, 1], [], []>} : vector<8x32xf32>, vector<32x32xf32>, vector<8x32xf32> -> vector<8x32xf32>
    %c0_27 = arith.constant 0 : index
    %c0_28 = arith.constant 0 : index
    %55 = vector.load %arg9[%c0_27, %c0_28] : memref<32x32xf32, #tpu.memory_space<vmem>>, vector<32x32xf32>
    %cst_29 = arith.constant dense<0.000000e+00> : vector<8x32xf32>
    %56 = tpu.matmul %25, %55, %cst_29 {dimension_numbers = #tpu.dot_dimension_numbers<[1], [0], [0], [1], [0, 0, 1, 1], [], []>} : vector<8x32xf32>, vector<32x32xf32>, vector<8x32xf32> -> vector<8x32xf32>
    %c0_30 = arith.constant 0 : index
    %c0_31 = arith.constant 0 : index
    %57 = vector.load %arg10[%c0_30, %c0_31] : memref<32x2xf32, #tpu.memory_space<vmem>>, vector<32x2xf32>
    %cst_32 = arith.constant dense<0.000000e+00> : vector<8x2xf32>
    %58 = tpu.matmul %25, %57, %cst_32 {dimension_numbers = #tpu.dot_dimension_numbers<[1], [0], [0], [1], [0, 0, 1, 1], [], []>} : vector<8x32xf32>, vector<32x2xf32>, vector<8x2xf32> -> vector<8x2xf32>
    %cst_33 = arith.constant 0.000000e+00 : f32
    %59 = vector.broadcast %cst_33 : f32 to vector<8x2xf32>
    %60 = arith.subf %59, %58 : vector<8x2xf32>
    %61 = math.exp %60 : vector<8x2xf32>
    %cst_34 = arith.constant 1.000000e+00 : f32
    %62 = vector.broadcast %cst_34 : f32 to vector<8x2xf32>
    %63 = arith.addf %62, %61 : vector<8x2xf32>
    %cst_35 = arith.constant 1.000000e+00 : f32
    %64 = vector.broadcast %cst_35 : f32 to vector<8x2xf32>
    %65 = arith.divf %64, %63 : vector<8x2xf32>
    %c0_36 = arith.constant 0 : index
    %c0_37 = arith.constant 0 : index
    %66 = vector.load %arg11[%c0_36, %c0_37] : memref<2x32xf32, #tpu.memory_space<vmem>>, vector<2x32xf32>
    %cst_38 = arith.constant dense<0.000000e+00> : vector<8x32xf32>
    %67 = tpu.matmul %65, %66, %cst_38 {dimension_numbers = #tpu.dot_dimension_numbers<[1], [0], [0], [1], [0, 0, 1, 1], [], []>} : vector<8x2xf32>, vector<2x32xf32>, vector<8x32xf32> -> vector<8x32xf32>
    %c0_39 = arith.constant 0 : index
    %c0_40 = arith.constant 0 : index
    %68 = vector.load %arg8[%c0_39, %c0_40] : memref<32x32xf32, #tpu.memory_space<vmem>>, vector<32x32xf32>
    %cst_41 = arith.constant dense<0.000000e+00> : vector<32x8xf32>
    %69 = tpu.matmul %68, %51, %cst_41 {dimension_numbers = #tpu.dot_dimension_numbers<[1], [0], [0], [1], [0, 0, 1, 1], [], []>} : vector<32x32xf32>, vector<32x8xf32>, vector<32x8xf32> -> vector<32x8xf32>
    %cst_42 = arith.constant 0.000000e+00 : f32
    %70 = vector.broadcast %cst_42 : f32 to vector<8x32xf32>
    %71 = arith.cmpf ogt, %54, %70 : vector<8x32xf32>
    %cst_43 = arith.constant 1.000000e+00 : f32
    %72 = vector.broadcast %cst_43 : f32 to vector<8x32xf32>
    %73 = arith.addf %54, %72 : vector<8x32xf32>
    %74 = math.exp %54 : vector<8x32xf32>
    %75 = arith.select %71, %73, %74 : vector<8x32xi1>, vector<8x32xf32>
    %cst_44 = arith.constant dense<0.000000e+00> : vector<8x32xf32>
    %76 = tpu.matmul %75, %52, %cst_44 {dimension_numbers = #tpu.dot_dimension_numbers<[1], [0], [0], [1], [0, 0, 1, 1], [], []>} : vector<8x32xf32>, vector<32x32xf32>, vector<8x32xf32> -> vector<8x32xf32>
    %77 = arith.divf %75, %76 : vector<8x32xf32>
    %cst_45 = arith.constant 0.000000e+00 : f32
    %78 = vector.broadcast %cst_45 : f32 to vector<32x8xf32>
    %79 = arith.cmpf ogt, %69, %78 : vector<32x8xf32>
    %cst_46 = arith.constant 1.000000e+00 : f32
    %80 = vector.broadcast %cst_46 : f32 to vector<32x8xf32>
    %81 = arith.addf %69, %80 : vector<32x8xf32>
    %82 = math.exp %69 : vector<32x8xf32>
    %83 = arith.select %79, %81, %82 : vector<32x8xi1>, vector<32x8xf32>
    %cst_47 = arith.constant dense<0.000000e+00> : vector<32x8xf32>
    %84 = tpu.matmul %52, %83, %cst_47 {dimension_numbers = #tpu.dot_dimension_numbers<[1], [0], [0], [1], [0, 0, 1, 1], [], []>} : vector<32x32xf32>, vector<32x8xf32>, vector<32x8xf32> -> vector<32x8xf32>
    %85 = arith.divf %83, %84 : vector<32x8xf32>
    %cst_48 = arith.constant 0.000000e+00 : f32
    %86 = vector.broadcast %cst_48 : f32 to vector<32x32xf32>
    %87 = vector.extract_strided_slice %85 {offsets = [0, 0], sizes = [32, 1], strides = [1, 1]} : vector<32x8xf32> to vector<32x1xf32>
    %88 = vector.extract_strided_slice %56 {offsets = [0, 0], sizes = [1, 32], strides = [1, 1]} : vector<8x32xf32> to vector<1x32xf32>
    %89 = vector.extract_strided_slice %67 {offsets = [0, 0], sizes = [1, 32], strides = [1, 1]} : vector<8x32xf32> to vector<1x32xf32>
    %90 = vector.extract_strided_slice %77 {offsets = [0, 0], sizes = [1, 32], strides = [1, 1]} : vector<8x32xf32> to vector<1x32xf32>
    %91 = vector.broadcast %87 : vector<32x1xf32> to vector<32x32xf32>
    %92 = arith.mulf %91, %86 : vector<32x32xf32>
    %cst_49 = arith.constant dense<0.000000e+00> : vector<32xf32>
    %93 = vector.multi_reduction <add>, %92, %cst_49 [0] : vector<32x32xf32> to vector<32xf32>
    %94 = vector.shape_cast %93 : vector<32xf32> to vector<1x32xf32>
    %95 = arith.subf %88, %94 : vector<1x32xf32>
    %96 = arith.mulf %89, %95 : vector<1x32xf32>
    %97 = vector.broadcast %87 : vector<32x1xf32> to vector<32x32xf32>
    %98 = vector.broadcast %96 : vector<1x32xf32> to vector<32x32xf32>
    %99 = arith.mulf %97, %98 : vector<32x32xf32>
    %100 = arith.mulf %52, %99 : vector<32x32xf32>
    %101 = arith.addf %86, %100 : vector<32x32xf32>
    %cst_50 = arith.constant dense<0.000000e+00> : vector<1x32xf32>
    %102 = tpu.matmul %90, %101, %cst_50 {dimension_numbers = #tpu.dot_dimension_numbers<[1], [0], [0], [1], [0, 0, 1, 1], [], []>} : vector<1x32xf32>, vector<32x32xf32>, vector<1x32xf32> -> vector<1x32xf32>
    %c0_51 = arith.constant 0 : index
    %c0_52 = arith.constant 0 : index
    %103 = vector.load %arg15[%c0_51, %c0_52] : memref<8x32xf32, #tpu.memory_space<vmem>>, vector<1x32xf32>
    tpu.vector_store %arg15[%c0_51, %c0_52], %102 {strides = array<i32>} : memref<8x32xf32, #tpu.memory_space<vmem>>, vector<1x32xf32>,
    %104 = vector.extract_strided_slice %85 {offsets = [0, 1], sizes = [32, 1], strides = [1, 1]} : vector<32x8xf32> to vector<32x1xf32>
    %105 = vector.extract_strided_slice %56 {offsets = [1, 0], sizes = [1, 32], strides = [1, 1]} : vector<8x32xf32> to vector<1x32xf32>
    %106 = vector.extract_strided_slice %67 {offsets = [1, 0], sizes = [1, 32], strides = [1, 1]} : vector<8x32xf32> to vector<1x32xf32>
    %107 = vector.extract_strided_slice %77 {offsets = [1, 0], sizes = [1, 32], strides = [1, 1]} : vector<8x32xf32> to vector<1x32xf32>
    %108 = vector.broadcast %104 : vector<32x1xf32> to vector<32x32xf32>
    %109 = arith.mulf %108, %101 : vector<32x32xf32>
    %cst_53 = arith.constant dense<0.000000e+00> : vector<32xf32>
    %110 = vector.multi_reduction <add>, %109, %cst_53 [0] : vector<32x32xf32> to vector<32xf32>
    %111 = vector.shape_cast %110 : vector<32xf32> to vector<1x32xf32>
    %112 = arith.subf %105, %111 : vector<1x32xf32>
    %113 = arith.mulf %106, %112 : vector<1x32xf32>
    %114 = vector.broadcast %104 : vector<32x1xf32> to vector<32x32xf32>
    %115 = vector.broadcast %113 : vector<1x32xf32> to vector<32x32xf32>
    %116 = arith.mulf %114, %115 : vector<32x32xf32>
    %117 = arith.mulf %52, %116 : vector<32x32xf32>
    %118 = arith.addf %101, %117 : vector<32x32xf32>
    %cst_54 = arith.constant dense<0.000000e+00> : vector<1x32xf32>
    %119 = tpu.matmul %107, %118, %cst_54 {dimension_numbers = #tpu.dot_dimension_numbers<[1], [0], [0], [1], [0, 0, 1, 1], [], []>} : vector<1x32xf32>, vector<32x32xf32>, vector<1x32xf32> -> vector<1x32xf32>
    %c1 = arith.constant 1 : index
    %c0_55 = arith.constant 0 : index
    %120 = vector.load %arg15[%c1, %c0_55] : memref<8x32xf32, #tpu.memory_space<vmem>>, vector<1x32xf32>
    tpu.vector_store %arg15[%c1, %c0_55], %119 {strides = array<i32>} : memref<8x32xf32, #tpu.memory_space<vmem>>, vector<1x32xf32>,
    %121 = vector.extract_strided_slice %85 {offsets = [0, 2], sizes = [32, 1], strides = [1, 1]} : vector<32x8xf32> to vector<32x1xf32>
    %122 = vector.extract_strided_slice %56 {offsets = [2, 0], sizes = [1, 32], strides = [1, 1]} : vector<8x32xf32> to vector<1x32xf32>
    %123 = vector.extract_strided_slice %67 {offsets = [2, 0], sizes = [1, 32], strides = [1, 1]} : vector<8x32xf32> to vector<1x32xf32>
    %124 = vector.extract_strided_slice %77 {offsets = [2, 0], sizes = [1, 32], strides = [1, 1]} : vector<8x32xf32> to vector<1x32xf32>
    %125 = vector.broadcast %121 : vector<32x1xf32> to vector<32x32xf32>
    %126 = arith.mulf %125, %118 : vector<32x32xf32>
    %cst_56 = arith.constant dense<0.000000e+00> : vector<32xf32>
    %127 = vector.multi_reduction <add>, %126, %cst_56 [0] : vector<32x32xf32> to vector<32xf32>
    %128 = vector.shape_cast %127 : vector<32xf32> to vector<1x32xf32>
    %129 = arith.subf %122, %128 : vector<1x32xf32>
    %130 = arith.mulf %123, %129 : vector<1x32xf32>
    %131 = vector.broadcast %121 : vector<32x1xf32> to vector<32x32xf32>
    %132 = vector.broadcast %130 : vector<1x32xf32> to vector<32x32xf32>
    %133 = arith.mulf %131, %132 : vector<32x32xf32>
    %134 = arith.mulf %52, %133 : vector<32x32xf32>
    %135 = arith.addf %118, %134 : vector<32x32xf32>
    %cst_57 = arith.constant dense<0.000000e+00> : vector<1x32xf32>
    %136 = tpu.matmul %124, %135, %cst_57 {dimension_numbers = #tpu.dot_dimension_numbers<[1], [0], [0], [1], [0, 0, 1, 1], [], []>} : vector<1x32xf32>, vector<32x32xf32>, vector<1x32xf32> -> vector<1x32xf32>
    %c2 = arith.constant 2 : index
    %c0_58 = arith.constant 0 : index
    %137 = vector.load %arg15[%c2, %c0_58] : memref<8x32xf32, #tpu.memory_space<vmem>>, vector<1x32xf32>
    tpu.vector_store %arg15[%c2, %c0_58], %136 {strides = array<i32>} : memref<8x32xf32, #tpu.memory_space<vmem>>, vector<1x32xf32>,
    %138 = vector.extract_strided_slice %85 {offsets = [0, 3], sizes = [32, 1], strides = [1, 1]} : vector<32x8xf32> to vector<32x1xf32>
    %139 = vector.extract_strided_slice %56 {offsets = [3, 0], sizes = [1, 32], strides = [1, 1]} : vector<8x32xf32> to vector<1x32xf32>
    %140 = vector.extract_strided_slice %67 {offsets = [3, 0], sizes = [1, 32], strides = [1, 1]} : vector<8x32xf32> to vector<1x32xf32>
    %141 = vector.extract_strided_slice %77 {offsets = [3, 0], sizes = [1, 32], strides = [1, 1]} : vector<8x32xf32> to vector<1x32xf32>
    %142 = vector.broadcast %138 : vector<32x1xf32> to vector<32x32xf32>
    %143 = arith.mulf %142, %135 : vector<32x32xf32>
    %cst_59 = arith.constant dense<0.000000e+00> : vector<32xf32>
    %144 = vector.multi_reduction <add>, %143, %cst_59 [0] : vector<32x32xf32> to vector<32xf32>
    %145 = vector.shape_cast %144 : vector<32xf32> to vector<1x32xf32>
    %146 = arith.subf %139, %145 : vector<1x32xf32>
    %147 = arith.mulf %140, %146 : vector<1x32xf32>
    %148 = vector.broadcast %138 : vector<32x1xf32> to vector<32x32xf32>
    %149 = vector.broadcast %147 : vector<1x32xf32> to vector<32x32xf32>
    %150 = arith.mulf %148, %149 : vector<32x32xf32>
    %151 = arith.mulf %52, %150 : vector<32x32xf32>
    %152 = arith.addf %135, %151 : vector<32x32xf32>
    %cst_60 = arith.constant dense<0.000000e+00> : vector<1x32xf32>
    %153 = tpu.matmul %141, %152, %cst_60 {dimension_numbers = #tpu.dot_dimension_numbers<[1], [0], [0], [1], [0, 0, 1, 1], [], []>} : vector<1x32xf32>, vector<32x32xf32>, vector<1x32xf32> -> vector<1x32xf32>
    %c3 = arith.constant 3 : index
    %c0_61 = arith.constant 0 : index
    %154 = vector.load %arg15[%c3, %c0_61] : memref<8x32xf32, #tpu.memory_space<vmem>>, vector<1x32xf32>
    tpu.vector_store %arg15[%c3, %c0_61], %153 {strides = array<i32>} : memref<8x32xf32, #tpu.memory_space<vmem>>, vector<1x32xf32>,
    %155 = vector.extract_strided_slice %85 {offsets = [0, 4], sizes = [32, 1], strides = [1, 1]} : vector<32x8xf32> to vector<32x1xf32>
    %156 = vector.extract_strided_slice %56 {offsets = [4, 0], sizes = [1, 32], strides = [1, 1]} : vector<8x32xf32> to vector<1x32xf32>
    %157 = vector.extract_strided_slice %67 {offsets = [4, 0], sizes = [1, 32], strides = [1, 1]} : vector<8x32xf32> to vector<1x32xf32>
    %158 = vector.extract_strided_slice %77 {offsets = [4, 0], sizes = [1, 32], strides = [1, 1]} : vector<8x32xf32> to vector<1x32xf32>
    %159 = vector.broadcast %155 : vector<32x1xf32> to vector<32x32xf32>
    %160 = arith.mulf %159, %152 : vector<32x32xf32>
    %cst_62 = arith.constant dense<0.000000e+00> : vector<32xf32>
    %161 = vector.multi_reduction <add>, %160, %cst_62 [0] : vector<32x32xf32> to vector<32xf32>
    %162 = vector.shape_cast %161 : vector<32xf32> to vector<1x32xf32>
    %163 = arith.subf %156, %162 : vector<1x32xf32>
    %164 = arith.mulf %157, %163 : vector<1x32xf32>
    %165 = vector.broadcast %155 : vector<32x1xf32> to vector<32x32xf32>
    %166 = vector.broadcast %164 : vector<1x32xf32> to vector<32x32xf32>
    %167 = arith.mulf %165, %166 : vector<32x32xf32>
    %168 = arith.mulf %52, %167 : vector<32x32xf32>
    %169 = arith.addf %152, %168 : vector<32x32xf32>
    %cst_63 = arith.constant dense<0.000000e+00> : vector<1x32xf32>
    %170 = tpu.matmul %158, %169, %cst_63 {dimension_numbers = #tpu.dot_dimension_numbers<[1], [0], [0], [1], [0, 0, 1, 1], [], []>} : vector<1x32xf32>, vector<32x32xf32>, vector<1x32xf32> -> vector<1x32xf32>
    %c4 = arith.constant 4 : index
    %c0_64 = arith.constant 0 : index
    %171 = vector.load %arg15[%c4, %c0_64] : memref<8x32xf32, #tpu.memory_space<vmem>>, vector<1x32xf32>
    tpu.vector_store %arg15[%c4, %c0_64], %170 {strides = array<i32>} : memref<8x32xf32, #tpu.memory_space<vmem>>, vector<1x32xf32>,
    %172 = vector.extract_strided_slice %85 {offsets = [0, 5], sizes = [32, 1], strides = [1, 1]} : vector<32x8xf32> to vector<32x1xf32>
    %173 = vector.extract_strided_slice %56 {offsets = [5, 0], sizes = [1, 32], strides = [1, 1]} : vector<8x32xf32> to vector<1x32xf32>
    %174 = vector.extract_strided_slice %67 {offsets = [5, 0], sizes = [1, 32], strides = [1, 1]} : vector<8x32xf32> to vector<1x32xf32>
    %175 = vector.extract_strided_slice %77 {offsets = [5, 0], sizes = [1, 32], strides = [1, 1]} : vector<8x32xf32> to vector<1x32xf32>
    %176 = vector.broadcast %172 : vector<32x1xf32> to vector<32x32xf32>
    %177 = arith.mulf %176, %169 : vector<32x32xf32>
    %cst_65 = arith.constant dense<0.000000e+00> : vector<32xf32>
    %178 = vector.multi_reduction <add>, %177, %cst_65 [0] : vector<32x32xf32> to vector<32xf32>
    %179 = vector.shape_cast %178 : vector<32xf32> to vector<1x32xf32>
    %180 = arith.subf %173, %179 : vector<1x32xf32>
    %181 = arith.mulf %174, %180 : vector<1x32xf32>
    %182 = vector.broadcast %172 : vector<32x1xf32> to vector<32x32xf32>
    %183 = vector.broadcast %181 : vector<1x32xf32> to vector<32x32xf32>
    %184 = arith.mulf %182, %183 : vector<32x32xf32>
    %185 = arith.mulf %52, %184 : vector<32x32xf32>
    %186 = arith.addf %169, %185 : vector<32x32xf32>
    %cst_66 = arith.constant dense<0.000000e+00> : vector<1x32xf32>
    %187 = tpu.matmul %175, %186, %cst_66 {dimension_numbers = #tpu.dot_dimension_numbers<[1], [0], [0], [1], [0, 0, 1, 1], [], []>} : vector<1x32xf32>, vector<32x32xf32>, vector<1x32xf32> -> vector<1x32xf32>
    %c5 = arith.constant 5 : index
    %c0_67 = arith.constant 0 : index
    %188 = vector.load %arg15[%c5, %c0_67] : memref<8x32xf32, #tpu.memory_space<vmem>>, vector<1x32xf32>
    tpu.vector_store %arg15[%c5, %c0_67], %187 {strides = array<i32>} : memref<8x32xf32, #tpu.memory_space<vmem>>, vector<1x32xf32>,
    %189 = vector.extract_strided_slice %85 {offsets = [0, 6], sizes = [32, 1], strides = [1, 1]} : vector<32x8xf32> to vector<32x1xf32>
    %190 = vector.extract_strided_slice %56 {offsets = [6, 0], sizes = [1, 32], strides = [1, 1]} : vector<8x32xf32> to vector<1x32xf32>
    %191 = vector.extract_strided_slice %67 {offsets = [6, 0], sizes = [1, 32], strides = [1, 1]} : vector<8x32xf32> to vector<1x32xf32>
    %192 = vector.extract_strided_slice %77 {offsets = [6, 0], sizes = [1, 32], strides = [1, 1]} : vector<8x32xf32> to vector<1x32xf32>
    %193 = vector.broadcast %189 : vector<32x1xf32> to vector<32x32xf32>
    %194 = arith.mulf %193, %186 : vector<32x32xf32>
    %cst_68 = arith.constant dense<0.000000e+00> : vector<32xf32>
    %195 = vector.multi_reduction <add>, %194, %cst_68 [0] : vector<32x32xf32> to vector<32xf32>
    %196 = vector.shape_cast %195 : vector<32xf32> to vector<1x32xf32>
    %197 = arith.subf %190, %196 : vector<1x32xf32>
    %198 = arith.mulf %191, %197 : vector<1x32xf32>
    %199 = vector.broadcast %189 : vector<32x1xf32> to vector<32x32xf32>
    %200 = vector.broadcast %198 : vector<1x32xf32> to vector<32x32xf32>
    %201 = arith.mulf %199, %200 : vector<32x32xf32>
    %202 = arith.mulf %52, %201 : vector<32x32xf32>
    %203 = arith.addf %186, %202 : vector<32x32xf32>
    %cst_69 = arith.constant dense<0.000000e+00> : vector<1x32xf32>
    %204 = tpu.matmul %192, %203, %cst_69 {dimension_numbers = #tpu.dot_dimension_numbers<[1], [0], [0], [1], [0, 0, 1, 1], [], []>} : vector<1x32xf32>, vector<32x32xf32>, vector<1x32xf32> -> vector<1x32xf32>
    %c6 = arith.constant 6 : index
    %c0_70 = arith.constant 0 : index
    %205 = vector.load %arg15[%c6, %c0_70] : memref<8x32xf32, #tpu.memory_space<vmem>>, vector<1x32xf32>
    tpu.vector_store %arg15[%c6, %c0_70], %204 {strides = array<i32>} : memref<8x32xf32, #tpu.memory_space<vmem>>, vector<1x32xf32>,
    %206 = vector.extract_strided_slice %85 {offsets = [0, 7], sizes = [32, 1], strides = [1, 1]} : vector<32x8xf32> to vector<32x1xf32>
    %207 = vector.extract_strided_slice %56 {offsets = [7, 0], sizes = [1, 32], strides = [1, 1]} : vector<8x32xf32> to vector<1x32xf32>
    %208 = vector.extract_strided_slice %67 {offsets = [7, 0], sizes = [1, 32], strides = [1, 1]} : vector<8x32xf32> to vector<1x32xf32>
    %209 = vector.extract_strided_slice %77 {offsets = [7, 0], sizes = [1, 32], strides = [1, 1]} : vector<8x32xf32> to vector<1x32xf32>
    %210 = vector.broadcast %206 : vector<32x1xf32> to vector<32x32xf32>
    %211 = arith.mulf %210, %203 : vector<32x32xf32>
    %cst_71 = arith.constant dense<0.000000e+00> : vector<32xf32>
    %212 = vector.multi_reduction <add>, %211, %cst_71 [0] : vector<32x32xf32> to vector<32xf32>
    %213 = vector.shape_cast %212 : vector<32xf32> to vector<1x32xf32>
    %214 = arith.subf %207, %213 : vector<1x32xf32>
    %215 = arith.mulf %208, %214 : vector<1x32xf32>
    %216 = vector.broadcast %206 : vector<32x1xf32> to vector<32x32xf32>
    %217 = vector.broadcast %215 : vector<1x32xf32> to vector<32x32xf32>
    %218 = arith.mulf %216, %217 : vector<32x32xf32>
    %219 = arith.mulf %52, %218 : vector<32x32xf32>
    %220 = arith.addf %203, %219 : vector<32x32xf32>
    %cst_72 = arith.constant dense<0.000000e+00> : vector<1x32xf32>
    %221 = tpu.matmul %209, %220, %cst_72 {dimension_numbers = #tpu.dot_dimension_numbers<[1], [0], [0], [1], [0, 0, 1, 1], [], []>} : vector<1x32xf32>, vector<32x32xf32>, vector<1x32xf32> -> vector<1x32xf32>
    %c7 = arith.constant 7 : index
    %c0_73 = arith.constant 0 : index
    %222 = vector.load %arg15[%c7, %c0_73] : memref<8x32xf32, #tpu.memory_space<vmem>>, vector<1x32xf32>
    tpu.vector_store %arg15[%c7, %c0_73], %221 {strides = array<i32>} : memref<8x32xf32, #tpu.memory_space<vmem>>, vector<1x32xf32>,
    %c0_74 = arith.constant 0 : index
    %c0_75 = arith.constant 0 : index
    %223 = vector.load %arg15[%c0_74, %c0_75] : memref<8x32xf32, #tpu.memory_space<vmem>>, vector<8x32xf32>
    %c0_76 = arith.constant 0 : index
    %c0_77 = arith.constant 0 : index
    %224 = vector.load %arg13[%c0_76, %c0_77] : memref<32x32xf32, #tpu.memory_space<vmem>>, vector<32x32xf32>
    %cst_78 = arith.constant dense<0.000000e+00> : vector<8x32xf32>
    %225 = tpu.matmul %223, %224, %cst_78 {dimension_numbers = #tpu.dot_dimension_numbers<[1], [0], [0], [1], [0, 0, 1, 1], [], []>} : vector<8x32xf32>, vector<32x32xf32>, vector<8x32xf32> -> vector<8x32xf32>
    %226 = arith.addf %1, %225 : vector<8x32xf32>
    %c0_79 = arith.constant 0 : index
    %c0_80 = arith.constant 0 : index
    %c0_81 = arith.constant 0 : index
    %227 = vector.load %arg14[%c0_79, %c0_80, %c0_81] : memref<1x8x32xf32, #tpu.memory_space<vmem>>, vector<1x8x32xf32>
    %228 = vector.shape_cast %227 : vector<1x8x32xf32> to vector<8x32xf32>
    %229 = vector.shape_cast %226 : vector<8x32xf32> to vector<1x8x32xf32>
    tpu.vector_store %arg14[%c0_79, %c0_80, %c0_81], %229 {strides = array<i32>} : memref<1x8x32xf32, #tpu.memory_space<vmem>>, vector<1x8x32xf32>,
    return
  }
  func.func @transform_0(%arg0: i32) -> (i32, i32, i32) {
    %c0_i32 = arith.constant 0 : i32
    %c0_i32_0 = arith.constant 0 : i32
    %c0_i32_1 = arith.constant 0 : i32
    return %arg0, %c0_i32, %c0_i32_0 : i32, i32, i32
  }
  func.func @transform_1(%arg0: i32) -> (i32, i32, i32) {
    %c0_i32 = arith.constant 0 : i32
    %c0_i32_0 = arith.constant 0 : i32
    %c0_i32_1 = arith.constant 0 : i32
    return %arg0, %c0_i32, %c0_i32_0 : i32, i32, i32
  }
  func.func @transform_2(%arg0: i32) -> (i32, i32) {
    %c0_i32 = arith.constant 0 : i32
    %c0_i32_0 = arith.constant 0 : i32
    %c0_i32_1 = arith.constant 0 : i32
    return %c0_i32, %c0_i32_0 : i32, i32
  }
  func.func @transform_3(%arg0: i32) -> (i32, i32) {
    %c0_i32 = arith.constant 0 : i32
    %c0_i32_0 = arith.constant 0 : i32
    %c0_i32_1 = arith.constant 0 : i32
    return %c0_i32, %c0_i32_0 : i32, i32
  }
  func.func @transform_4(%arg0: i32) -> (i32, i32) {
    %c0_i32 = arith.constant 0 : i32
    %c0_i32_0 = arith.constant 0 : i32
    %c0_i32_1 = arith.constant 0 : i32
    return %c0_i32, %c0_i32_0 : i32, i32
  }
  func.func @transform_5(%arg0: i32) -> (i32, i32) {
    %c0_i32 = arith.constant 0 : i32
    %c0_i32_0 = arith.constant 0 : i32
    %c0_i32_1 = arith.constant 0 : i32
    return %c0_i32, %c0_i32_0 : i32, i32
  }
  func.func @transform_6(%arg0: i32) -> (i32, i32) {
    %c0_i32 = arith.constant 0 : i32
    %c0_i32_0 = arith.constant 0 : i32
    %c0_i32_1 = arith.constant 0 : i32
    return %c0_i32, %c0_i32_0 : i32, i32
  }
  func.func @transform_7(%arg0: i32) -> (i32, i32) {
    %c0_i32 = arith.constant 0 : i32
    %c0_i32_0 = arith.constant 0 : i32
    %c0_i32_1 = arith.constant 0 : i32
    return %c0_i32, %c0_i32_0 : i32, i32
  }
  func.func @transform_8(%arg0: i32) -> (i32, i32) {
    %c0_i32 = arith.constant 0 : i32
    %c0_i32_0 = arith.constant 0 : i32
    %c0_i32_1 = arith.constant 0 : i32
    return %c0_i32, %c0_i32_0 : i32, i32
  }
  func.func @transform_9(%arg0: i32) -> (i32, i32) {
    %c0_i32 = arith.constant 0 : i32
    %c0_i32_0 = arith.constant 0 : i32
    %c0_i32_1 = arith.constant 0 : i32
    return %c0_i32, %c0_i32_0 : i32, i32
  }
  func.func @transform_10(%arg0: i32) -> (i32, i32) {
    %c0_i32 = arith.constant 0 : i32
    %c0_i32_0 = arith.constant 0 : i32
    %c0_i32_1 = arith.constant 0 : i32
    return %c0_i32, %c0_i32_0 : i32, i32
  }
  func.func @transform_11(%arg0: i32) -> (i32, i32) {
    %c0_i32 = arith.constant 0 : i32
    %c0_i32_0 = arith.constant 0 : i32
    %c0_i32_1 = arith.constant 0 : i32
    return %c0_i32, %c0_i32_0 : i32, i32
  }
  func.func @transform_12(%arg0: i32) -> (i32, i32) {
    %c0_i32 = arith.constant 0 : i32
    %c0_i32_0 = arith.constant 0 : i32
    %c0_i32_1 = arith.constant 0 : i32
    return %c0_i32, %c0_i32_0 : i32, i32
  }
  func.func @transform_13(%arg0: i32) -> (i32, i32, i32) {
    %c0_i32 = arith.constant 0 : i32
    %c0_i32_0 = arith.constant 0 : i32
    %c0_i32_1 = arith.constant 0 : i32
    return %arg0, %c0_i32, %c0_i32_0 : i32, i32, i32
  }
}

module attributes {stable_mosaic.version = 11 : i64} {
  func.func @_dense_kernel(%arg0: i32, %arg1: memref<16x32xbf16, #tpu.memory_space<vmem>>, %arg2: memref<32x128xbf16, #tpu.memory_space<vmem>>, %arg3: memref<1x128xf32, #tpu.memory_space<vmem>>, %arg4: memref<16x128xf32, #tpu.memory_space<vmem>>) attributes {dimension_semantics = [#tpu.dimension_semantics<parallel>], iteration_bounds = array<i64: 1>, scalar_prefetch = 0 : i64, scratch_operands = 0 : i64, tpu.core_type = #tpu.core_type<tc>, window_params = [{transform_indices = @transform_0, window_bounds = array<i64: 16, 32>}, {pipeline_mode = #tpu.pipeline_mode<synchronous>, transform_indices = @transform_1, window_bounds = array<i64: 32, 128>}, {pipeline_mode = #tpu.pipeline_mode<synchronous>, transform_indices = @transform_2, window_bounds = array<i64: 1, 128>}, {transform_indices = @transform_3, window_bounds = array<i64: 16, 128>}]} {
    %c0 = arith.constant 0 : index
    %c0_0 = arith.constant 0 : index
    %0 = vector.load %arg1[%c0, %c0_0] : memref<16x32xbf16, #tpu.memory_space<vmem>>, vector<16x32xbf16>
    %c0_1 = arith.constant 0 : index
    %c0_2 = arith.constant 0 : index
    %1 = vector.load %arg2[%c0_1, %c0_2] : memref<32x128xbf16, #tpu.memory_space<vmem>>, vector<32x128xbf16>
    %cst = arith.constant dense<0.000000e+00> : vector<16x128xf32>
    %2 = tpu.matmul %0, %1, %cst {dimension_numbers = #tpu.dot_dimension_numbers<[1], [0], [0], [1], [0, 0, 1, 1], [], []>} : vector<16x32xbf16>, vector<32x128xbf16>, vector<16x128xf32> -> vector<16x128xf32>
    %c0_3 = arith.constant 0 : index
    %c0_4 = arith.constant 0 : index
    %3 = vector.load %arg3[%c0_3, %c0_4] : memref<1x128xf32, #tpu.memory_space<vmem>>, vector<1x128xf32>
    %4 = vector.broadcast %3 : vector<1x128xf32> to vector<16x128xf32>
    %5 = arith.addf %2, %4 : vector<16x128xf32>
    %c0_5 = arith.constant 0 : index
    %c0_6 = arith.constant 0 : index
    %6 = vector.load %arg4[%c0_5, %c0_6] : memref<16x128xf32, #tpu.memory_space<vmem>>, vector<16x128xf32>
    tpu.vector_store %arg4[%c0_5, %c0_6], %5 {strides = array<i32>} : memref<16x128xf32, #tpu.memory_space<vmem>>, vector<16x128xf32>,
    return
  }
  func.func @transform_0(%arg0: i32) -> (i32, i32) {
    %c0_i32 = arith.constant 0 : i32
    %c0_i32_0 = arith.constant 0 : i32
    return %arg0, %c0_i32 : i32, i32
  }
  func.func @transform_1(%arg0: i32) -> (i32, i32) {
    %c0_i32 = arith.constant 0 : i32
    %c0_i32_0 = arith.constant 0 : i32
    %c0_i32_1 = arith.constant 0 : i32
    return %c0_i32, %c0_i32_0 : i32, i32
  }
  func.func @transform_2(%arg0: i32) -> (i32, i32) {
    %c0_i32 = arith.constant 0 : i32
    %c0_i32_0 = arith.constant 0 : i32
    %c0_i32_1 = arith.constant 0 : i32
    return %c0_i32, %c0_i32_0 : i32, i32
  }
  func.func @transform_3(%arg0: i32) -> (i32, i32) {
    %c0_i32 = arith.constant 0 : i32
    %c0_i32_0 = arith.constant 0 : i32
    return %arg0, %c0_i32 : i32, i32
  }
}

</mosaic_0001>

<bundles_post_ra>
// kernel: conv_delta_forward.8
= control target key start
LH: loop header
LB: loop body
LE: loop exit
PB: predicated region body
PF: predicated region fallthrough
CT: control target
= control target key end

     0   :  { %s6297_s12 = smov 0   ;;  %s8108_s0 = inlined_call_operand.vmem [shape: bf16[16,332,8], index: 0, kind: input, shape index: {}]   ;;  %s8109_s1 = inlined_call_operand.vmem [shape: bf16[9,8,64], index: 1, kind: input, shape index: {}]   ;;  %s8110_s2 = inlined_call_operand.vmem [shape: f32[1,64], index: 2, kind: input, shape index: {}]   ;;  %s8111_s3 = inlined_call_operand.vmem [shape: f32[16,288,64], index: 3, kind: output, shape index: {}]  }
   0x1 LB: > { %s5214_s13 = sadd.s32 4294967295, %s6275_s12   ;;  %p5218_p0 = scmp.ge.s32.totalorder %s6275_s12, 1  ;;  %s6275_s12 = sphi %s6297_s12, %s13_s12  }
   0x2   : > { %p137_p1 = scmp.lt.s32.totalorder %s6275_s12, 17 }
   0x4   : > { %p138_p2 = pnand %p5218_p0, %p137_p1 }
   0x5   : > { %v289_v0 = vld [vmem:[%s8109_s1] sm:$0xf] (!%p138_p2)  ;;  %vm435_vm0 = vcmask (!%p138_p2), 1043456   ;;  %p161_p3 = scmp.lt.s32.totalorder (!%p138_p2), %s5214_s13, 15  ;;  %v5258_v2 = vld [vmem:[%s8109_s1 + $0x4] sm:$0xf] (!%p138_p2) }
   0x6   : > { %141 = sbr.rel (%p138_p2) target bundleno = 559 (0x22f), region = 32  ;;  %6080 = vmatprep.subr.msk.bf16.mxu1 (!%p138_p2), %vm435_vm0, %v289_v0  ;;  %6079 = vmatprep.subr.msk.bf16.mxu0 (!%p138_p2), %vm435_vm0, %v289_v0  ;;  %v437_v1 = vsel (!%p138_p2), %vm435_vm0, %v289_v0, 0  ;;  %v5296_v3 = vld [vmem:[%s8109_s1 + $0x8] sm:$0xf] (!%p138_p2)  ;;  %vm380_vm1 = vcmask (!%p138_p2), 64512   ;;  %v1060_v10 = vsel (!%p138_p2), %vm435_vm0, %v5258_v2, 0 }
   0x7   : > { %6078 = vmatpush3.bf16.msra.mxu1 (!%p138_p2), %v437_v1  ;;  %5736 = vmatpush3.bf16.msra.mxu0 (!%p138_p2), %v437_v1  ;;  %v1572_v7 = vsel (!%p138_p2), %vm435_vm0, %v5296_v3, 0  ;;  %v6335_v8 = vld [vmem:[%s8109_s1 + $0xc] sm:$0xf] (!%p138_p2)  ;;  %v6343_v11 = vld [vmem:[%s8109_s1 + $0x10] sm:$0xf] (!%p138_p2)  ;;  %vm1479_vm3 = vcmask (!%p138_p2), 1046528  }
   0x8   : > { %6081 = vmatprep.subr.msk.bf16.mxu1 (!%p138_p2), %vm435_vm0, %v5258_v2  ;;  %6082 = vmatprep.subr.msk.bf16.mxu0 (!%p138_p2), %vm435_vm0, %v5296_v3  ;;  %vm856_vm2 = vsmask.f32 (!%p138_p2), 7424  ;;  %v6395_v57 = vld [vmem:[%s8109_s1 + $0x14] sm:$0xf] (!%p138_p2)  ;;  %v2083_v58 = vsel (!%p138_p2), %vm435_vm0, %v6335_v8, 0  ;;  %vm180_vm5 = vcmask (!%p138_p2), 523264  }
   0x9   : > { %vm2502_vm4 = vsmask.f32 (!%p138_p2), 6400  ;;  %vm3147_vm6 = vcmask (!%p138_p2), 1045504   ;;  %vm4170_vm7 = vsmask.f32 (!%p138_p2), 5376  ;;  %vm4815_vm8 = vcmask (!%p138_p2), 1044480  }
   0xd   : > { %s8113_s13 = smov (!%p161_p3, %s5214_s13), 15 }
   0xe   : > { %s6089_s20 = smul.u32 168, %s8113_s13 }
   0xf   : > { %s6090_s9 = smul.u32 288, %s8113_s13 }
  0x10   : > { %s6325_s23 = scalar_lea.vmem %s8108_s0, %s6089_s20 }
  0x11   : > { %v6099_v4 = vld [vmem:[%s6325_s23] sm:$0xff]   ;;  %v6100_v5 = vld [vmem:[%s6325_s23 + $0x50] sm:$0xff]   ;;  %v6101_v6 = vld [vmem:[%s6325_s23 + $0x8] sm:$0xff]   ;;  %s6586_s13 = scalar_lea.vmem %s8111_s3, %s6090_s9 }
  0x12   : > { %5737 = vmatprep.mubr.msk.bf16.mxu0 %vm380_vm1, %v6099_v4  ;;  %5757 = vmatprep.mubr.msk.bf16.mxu1 %vm380_vm1, %v6100_v5  ;;  %v6102_v9 = vld [vmem:[%s6325_s23 + $0x58] sm:$0xff]   ;;  %v6103_v12 = vld [vmem:[%s6325_s23 + $0x10] sm:$0xff]   ;;  %v6104_v13 = vld [vmem:[%s6325_s23 + $0x60] sm:$0xff]  }
  0x13   : > { %5738 = vmatmul.mubr.msk.bf16.vlgmr.msra.gmra.mrb[0].mxu0 %vm380_vm1, %v6101_v6  ;;  %5758 = vmatmul.mubr.msk.bf16.vlgmr.msra.gmra.mrb[0].mxu1 %vm380_vm1, %v6102_v9  ;;  %v6105_v14 = vld [vmem:[%s6325_s23 + $0x18] sm:$0xff]   ;;  %v6106_v15 = vld [vmem:[%s6325_s23 + $0x68] sm:$0xff]   ;;  %v6107_v16 = vld [vmem:[%s6325_s23 + $0x20] sm:$0xff]  }
  0x14   : > { %5812 = vmatpush3.bf16.msra.mxu0 %v1572_v7  ;;  %5774 = vmatpush3.bf16.msra.mxu1 %v1060_v10  ;;  %v6108_v17 = vld [vmem:[%s6325_s23 + $0x70] sm:$0xff]   ;;  %v6109_v18 = vld [vmem:[%s6325_s23 + $0x28] sm:$0xff]   ;;  %v6110_v19 = vld [vmem:[%s6325_s23 + $0x78] sm:$0xff]  }
  0x15   : > { %5741 = vmatprep.mubr.msk.bf16.mxu0 %vm380_vm1, %v6103_v12  ;;  %5761 = vmatprep.mubr.msk.bf16.mxu1 %vm380_vm1, %v6104_v13  ;;  %v6111_v20 = vld [vmem:[%s6325_s23 + $0x30] sm:$0xff]   ;;  %v6112_v21 = vld [vmem:[%s6325_s23 + $0x80] sm:$0xff]   ;;  %v6117_v23 = vld [vmem:[%s6325_s23 + $0x8] sm:$0xff]  }
  0x16   : > { %6083 = vmatprep.subr.msk.bf16.mxu1 %vm435_vm0, %v6335_v8  ;;  %6084 = vmatprep.subr.msk.bf16.mxu0 %vm435_vm0, %v6343_v11  ;;  %v6116_v22 = vld [vmem:[%s6325_s23] sm:$0xff]   ;;  %v865_v26 = vshll.u32 %v6117_v23, 16  ;;  %v6119_v27 = vld [vmem:[%s6325_s23 + $0x10] sm:$0xff]   ;;  %v6113_v28 = vld [vmem:[%s6325_s23 + $0x38] sm:$0xff]   ;;  %v869_v35 = vshrl.u32 %v6117_v23, 16  ;;  %v2728_v8 = vsel %vm435_vm0, %v6343_v11, 0 }
  0x17   : > { %v858_v24 = vshrl.u32 %v6116_v22, 16  ;;  %v860_v25 = vshll.u32 %v6116_v22, 16  ;;  %v6120_v31 = vld [vmem:[%s6325_s23 + $0x18] sm:$0xff]   ;;  %v6114_v32 = vld [vmem:[%s6325_s23 + $0x88] sm:$0xff]   ;;  %v6115_v34 = vld [vmem:[%s6325_s23 + $0x40] sm:$0xff]   ;;  %v873_v36 = vshll.u32 %v6119_v27, 16 }
  0x18   : > { %v867_v30 = vrot.slane %v865_v26, 1  ;;  %v6122_v37 = vld [vmem:[%s6325_s23 + $0x8] sm:$0xff]   ;;  %v6121_v38 = vld [vmem:[%s6325_s23] sm:$0xfe]   ;;  %v877_v40 = vshrl.u32 %v6119_v27, 16  ;;  %v881_v41 = vshll.u32 %v6120_v31, 16 }
  0x19   : > { %v862_v29 = vrot.slane %v860_v25, 1  ;;  %v6123_v42 = vld [vmem:[%s6325_s23 + $0x20] sm:$0xff]   ;;  %v875_v43 = vrot.slane %v873_v36, 1  ;;  %v1480_v45 = vrot.slane %v6121_v38, 1  ;;  %v1481_v46 = vrot.slane %v6122_v37, 1  ;;  %v6125_v49 = vld [vmem:[%s6325_s23 + $0x28] sm:$0xff]  }
  0x1a   : > { %v871_v44 = vor.u32 %v869_v35, %v867_v30  ;;  %v883_v48 = vrot.slane %v881_v41, 1  ;;  %v6118_v50 = vld [vmem:[%s6325_s23 + $0x48] sm:$0xff]   ;;  %v889_v51 = vshll.u32 %v6123_v42, 16  ;;  %v6124_v52 = vld [vmem:[%s6325_s23 + $0x10] sm:$0xff]   ;;  %v885_v55 = vshrl.u32 %v6120_v31, 16  ;;  %v6126_v56 = vld [vmem:[%s6325_s23 + $0x18] sm:$0xff]  }
  0x1b   : > { %5742 = vmatmul.mubr.msk.bf16.gmra.mrb[4].mxu0 %vm380_vm1, %v6105_v14  ;;  %5762 = vmatmul.mubr.msk.bf16.gmra.mrb[4].mxu1 %vm380_vm1, %v6106_v15  ;;  %v863_v33 = vor.u32 %v862_v29, %v858_v24  ;;  %v879_v47 = vor.u32 %v877_v40, %v875_v43  ;;  %v1482_v54 = vsel %vm1479_vm3, %v1480_v45, %v1481_v46  ;;  %v893_v60 = vshrl.u32 %v6123_v42, 16  ;;  %v6127_v0 = vld [vmem:[%s6325_s23 + $0x30] sm:$0xff]   ;;  %v6129_v5 = vld [vmem:[%s6325_s23 + $0x38] sm:$0xff]   ;;  %v6128_v6 = vld [vmem:[%s6325_s23 + $0x20] sm:$0xff]  }
  0x1c   : > { %5745 = vmatprep.mubr.msk.bf16.mxu0 %vm380_vm1, %v6107_v16  ;;  %5765 = vmatprep.mubr.msk.bf16.mxu1 %vm380_vm1, %v6108_v17  ;;  %v876_v53 = vsel %vm856_vm2, %v871_v44, %v875_v43  ;;  %v897_v61 = vshll.u32 %v6125_v49, 16  ;;  %v891_v62 = vrot.slane %v889_v51, 1  ;;  %v1483_v63 = vrot.slane %v6124_v52, 1  ;;  %v6130_v13 = vld [vmem:[%s6325_s23 + $0x28] sm:$0xff]   ;;  %v6417_v14 = vld [vmem:[%s8109_s1 + $0x18] sm:$0xf] }
  0x1d   : > { %v868_v39 = vsel %vm856_vm2, %v863_v33, %v867_v30  ;;  %v884_v59 = vsel %vm856_vm2, %v879_v47, %v883_v48  ;;  %v887_v1 = vor.u32 %v885_v55, %v883_v48  ;;  %v1485_v2 = vrot.slane %v6126_v56, 1  ;;  %v6133_v25 = vld [vmem:[%s6325_s23 + $0x48] sm:$0xff]   ;;  %v6132_v29 = vld [vmem:[%s6325_s23 + $0x30] sm:$0xff]   ;;  %v6134_v33 = vld [vmem:[%s6325_s23 + $0x38] sm:$0xff]  }
  0x1e   : > { %v895_v3 = vor.u32 %v893_v60, %v891_v62  ;;  %v899_v4 = vrot.slane %v897_v61, 1  ;;  %v1484_v7 = vsel %vm1479_vm3, %v1481_v46, %v1483_v63  ;;  %v905_v9 = vshll.u32 %v6127_v0, 16  ;;  %v6135_v36 = vld [vmem:[%s6325_s23 + $0x50] sm:$0xff]   ;;  %v6137_v44 = vld [vmem:[%s6325_s23 + $0x58] sm:$0xff]   ;;  %v6136_v45 = vld [vmem:[%s6325_s23 + $0x40] sm:$0xff]  }
  0x1f   : > { %v892_v10 = vsel %vm856_vm2, %v887_v1, %v891_v62  ;;  %v901_v12 = vshrl.u32 %v6125_v49, 16  ;;  %v1486_v16 = vsel %vm1479_vm3, %v1483_v63, %v1485_v2  ;;  %v909_v17 = vshrl.u32 %v6127_v0, 16  ;;  %v6138_v48 = vld [vmem:[%s6325_s23 + $0x48] sm:$0xff]   ;;  %v6139_v56 = vld [vmem:[%s6325_s23 + $0x60] sm:$0xff]   ;;  %v6140_v63 = vld [vmem:[%s6325_s23 + $0x50] sm:$0xff]  }
  0x20   : > { %v900_v15 = vsel %vm856_vm2, %v895_v3, %v899_v4  ;;  %v1487_v11 = vrot.slane %v6128_v6, 1  ;;  %v1489_v22 = vrot.slane %v6130_v13, 1  ;;  %v917_v27 = vshrl.u32 %v6129_v5, 16  ;;  %v6141_v60 = vld [vmem:[%s6325_s23 + $0x68] sm:$0xff]  }
  0x21   : > { %v929_v35 = vshll.u32 %v6133_v25, 16  ;;  %v1491_v38 = vrot.slane %v6132_v29, 1  ;;  %v1493_v40 = vrot.slane %v6134_v33, 1  ;;  %v937_v43 = vshll.u32 %v6135_v36, 16 }
  0x22   : > { %v1488_v26 = vsel %vm1479_vm3, %v1485_v2, %v1487_v11  ;;  %v1490_v31 = vsel %vm1479_vm3, %v1487_v11, %v1489_v22  ;;  %v933_v47 = vshrl.u32 %v6133_v25, 16  ;;  %v1495_v55 = vrot.slane %v6136_v45, 1 }
  0x23   : > { %5746 = vmatmul.mubr.msk.bf16.gmra.mrb[8].mxu0 %vm380_vm1, %v6109_v18  ;;  %5766 = vmatmul.mubr.msk.bf16.gmra.mrb[8].mxu1 %vm380_vm1, %v6110_v19  ;;  %v913_v18 = vshll.u32 %v6129_v5, 16  ;;  %v907_v19 = vrot.slane %v905_v9, 1  ;;  %v931_v42 = vrot.slane %v929_v35, 1  ;;  %v1492_v46 = vsel %vm1479_vm3, %v1489_v22, %v1491_v38  ;;  %v6149_v35 = vld [vmem:[%s6325_s23 + $0x88] sm:$0xff]  }
  0x24   : > { %5749 = vmatprep.mubr.msk.bf16.mxu0 %vm380_vm1, %v6111_v20  ;;  %5769 = vmatprep.mubr.msk.bf16.mxu1 %vm380_vm1, %v6112_v21  ;;  %v6131_v20 = vld [vmem:[%s6325_s23 + $0x40] sm:$0xff]   ;;  %v903_v21 = vor.u32 %v901_v12, %v899_v4  ;;  %v939_v52 = vrot.slane %v937_v43, 1  ;;  %v1496_v1 = vsel %vm1479_vm3, %v1493_v40, %v1495_v55  ;;  %v953_v2 = vshll.u32 %v6139_v56, 16  ;;  %v6143_v12 = vld [vmem:[%s6325_s23 + $0x70] sm:$0xff]  }
  0x25   : > { %v911_v23 = vor.u32 %v909_v17, %v907_v19  ;;  %v915_v24 = vrot.slane %v913_v18, 1  ;;  %v949_v4 = vshrl.u32 %v6137_v44, 16  ;;  %v957_v5 = vshrl.u32 %v6139_v56, 16  ;;  %v6145_v18 = vld [vmem:[%s6325_s23 + $0x78] sm:$0xff]  }
  0x26   : > { %v908_v30 = vsel %vm856_vm2, %v903_v21, %v907_v19  ;;  %v961_v6 = vshll.u32 %v6141_v60, 16  ;;  %v1499_v9 = vrot.slane %v6140_v63, 1  ;;  %v969_v19 = vshll.u32 %v6143_v12, 16  ;;  %v6154_v63 = vld [vmem:[%s6325_s23 + $0x8] sm:$0xfe]  }
  0x27   : > { %v993_v45 = vshll.u32 %v6149_v35, 16 }
  0x28   : > { %v963_v17 = vrot.slane %v961_v6, 1 }
  0x2b   : > { %5750 = vmatmul.mubr.msk.bf16.gmra.mrb[12].mxu0 %vm380_vm1, %v6113_v28  ;;  %5770 = vmatmul.mubr.msk.bf16.gmra.mrb[12].mxu1 %vm380_vm1, %v6114_v32  ;;  %v921_v28 = vshll.u32 %v6131_v20, 16  ;;  %v925_v32 = vshrl.u32 %v6131_v20, 16  ;;  %v6144_v20 = vld [vmem:[%s6325_s23 + $0x60] sm:$0xff]  }
  0x2c   : > { %5753 = vmatprep.mubr.msk.bf16.mxu0 %vm380_vm1, %v6115_v34  ;;  %5775 = vmatprep.mubr.msk.bf16.mxu1 %vm380_vm1, %v868_v39  ;;  %v916_v34 = vsel %vm856_vm2, %v911_v23, %v915_v24  ;;  %v919_v39 = vor.u32 %v917_v27, %v915_v24  ;;  %v965_v23 = vshrl.u32 %v6141_v60, 16  ;;  %v6146_v24 = vld [vmem:[%s6325_s23 + $0x68] sm:$0xff]   ;;  %v977_v27 = vshll.u32 %v6145_v18, 16 }
  0x2d   : > { %v923_v37 = vrot.slane %v921_v28, 1  ;;  %v971_v28 = vrot.slane %v969_v19, 1  ;;  %v1503_v29 = vrot.slane %v6144_v20, 1  ;;  %v6159_v60 = vld [vmem:[%s6325_s23 + $0x8] sm:$0xfe]   ;;  %v6162_v19 = vld [vmem:[%s6325_s23 + $0x18] sm:$0xff]  }
  0x2e   : > { %v2504_v6 = vshrl.u32 %v6159_v60, 16 }
  0x2f   : > { %v927_v41 = vor.u32 %v925_v32, %v923_v37  ;;  %v924_v49 = vsel %vm856_vm2, %v919_v39, %v923_v37  ;;  %v1505_v32 = vrot.slane %v6146_v24, 1 }
  0x30   : > { %v2506_v20 = vrot.slane %v2504_v6, 1 }
  0x31   : > { %v932_v51 = vsel %vm856_vm2, %v927_v41, %v931_v42  ;;  %v981_v41 = vshrl.u32 %v6145_v18, 16 }
  0x33   : > { %5754 = vmatmul.mubr.msk.bf16.gmra.mrb[16].mxu0 %vm380_vm1, %v6118_v50  ;;  %5776 = vmatmul.mubr.msk.bf16.vlgmr.msra.gmra.mrb[16].mxu1 %vm380_vm1, %v876_v53  ;;  %v1494_v50 = vsel %vm1479_vm3, %v1491_v38, %v1493_v40  ;;  %v941_v53 = vshrl.u32 %v6135_v36, 16  ;;  %v6148_v38 = vld [vmem:[%s6325_s23 + $0x70] sm:$0xff]   ;;  %v1506_v40 = vsel %vm1479_vm3, %v1503_v29, %v1505_v32 }
  0x34   : > { %5813 = vmatprep.mubr.msk.bf16.mxu0 %vm380_vm1, %v1482_v54  ;;  %5850 = vmatpush3.bf16.msra.mxu1 %v2083_v58  ;;  %v945_v54 = vshll.u32 %v6137_v44, 16  ;;  %v935_v58 = vor.u32 %v933_v47, %v931_v42  ;;  %v6150_v42 = vld [vmem:[%s6325_s23 + $0x78] sm:$0xff]  }
  0x35   : > { %5779 = vmatprep.mubr.msk.bf16.mxu1 %vm380_vm1, %v884_v59  ;;  %6085 = vmatprep.subr.msk.bf16.mxu1 %vm435_vm0, %v6395_v57  ;;  %v1497_v59 = vrot.slane %v6138_v48, 1  ;;  %v943_v61 = vor.u32 %v941_v53, %v939_v52  ;;  %v1507_v48 = vrot.slane %v6148_v38, 1  ;;  %v997_v53 = vshrl.u32 %v6149_v35, 16  ;;  %v6166_v35 = vld [vmem:[%s6325_s23 + $0x28] sm:$0xff]  }
  0x36   : > { %v947_v62 = vrot.slane %v945_v54, 1  ;;  %v940_v0 = vsel %vm856_vm2, %v935_v58, %v939_v52  ;;  %v995_v52 = vrot.slane %v993_v45, 1  ;;  %v6152_v54 = vld [vmem:[%s6325_s23 + $0x80] sm:$0xff]   ;;  %v6160_v58 = vld [vmem:[%s6325_s23 + $0x10] sm:$0xff]  }
  0x37   : > { %v1498_v3 = vsel %vm1479_vm3, %v1495_v55, %v1497_v59  ;;  %v1500_v11 = vsel %vm1479_vm3, %v1497_v59, %v1499_v9  ;;  %v6153_v55 = vld [vmem:[%s6325_s23 + $0x88] sm:$0xff]   ;;  %v1508_v59 = vsel %vm1479_vm3, %v1505_v32, %v1507_v48 }
  0x38   : > { %v951_v13 = vor.u32 %v949_v4, %v947_v62 }
  0x3b   : > { %5814 = vmatmul.mubr.msk.bf16.vlgmr.msra.gmra.mrb[20].mxu0 %vm380_vm1, %v1484_v7  ;;  %5780 = vmatmul.mubr.msk.bf16.gmra.mrb[20].mxu1 %vm380_vm1, %v892_v10  ;;  %v6142_v7 = vld [vmem:[%s6325_s23 + $0x58] sm:$0xff]   ;;  %v955_v10 = vrot.slane %v953_v2, 1  ;;  %v6155_v2 = vld [vmem:[%s6325_s23 + $0x10] sm:$0xff]  }
  0x3c   : > { %5888 = vmatpush3.bf16.msra.mxu0 %v2728_v8  ;;  %5783 = vmatprep.mubr.msk.bf16.mxu1 %vm380_vm1, %v900_v15  ;;  %v948_v8 = vsel %vm856_vm2, %v943_v61, %v947_v62  ;;  %v1501_v15 = vrot.slane %v6142_v7, 1  ;;  %v2507_v7 = vshll.u32 %v6159_v60, 16 }
  0x3d   : > { %5817 = vmatprep.mubr.msk.bf16.mxu0 %vm380_vm1, %v1486_v16  ;;  %6086 = vmatprep.subr.msk.bf16.mxu0 %vm435_vm0, %v6417_v14  ;;  %v959_v16 = vor.u32 %v957_v5, %v955_v10  ;;  %v956_v21 = vsel %vm856_vm2, %v951_v13, %v955_v10  ;;  %v1513_v5 = vrot.slane %v6153_v55, 1  ;;  %v1991_v10 = vrot.slane %v6154_v63, 1  ;;  %v6156_v13 = vld [vmem:[%s6325_s23 + $0x90] ss:$0 sps:$4 sm:$0x11]  }
  0x3e   : > { %v1502_v22 = vsel %vm1479_vm3, %v1499_v9, %v1501_v15  ;;  %v1504_v36 = vsel %vm1479_vm3, %v1501_v15, %v1503_v29  ;;  %v2515_v9 = vshll.u32 %v6160_v58, 16  ;;  %v6157_v15 = vld [vmem:[%s6325_s23 + $0x18] sm:$0xff]  }
  0x3f   : > { %v964_v25 = vsel %vm856_vm2, %v959_v16, %v963_v17  ;;  %v1994_v29 = vrot.slane %v6157_v15, 1  ;;  %v6532_v55 = vld [vmem:[%s8109_s1 + $0x1c] sm:$0xf]  ;;  %v6169_v15 = vld [vmem:[%s6325_s23 + $0x48] sm:$0xff]  }
  0x43   : > { %5818 = vmatmul.mubr.msk.bf16.gmra.mrb[24].mxu0 %vm380_vm1, %v1488_v26  ;;  %5784 = vmatmul.mubr.msk.bf16.gmra.mrb[24].mxu1 %vm380_vm1, %v908_v30  ;;  %v973_v26 = vshrl.u32 %v6143_v12, 16  ;;  %v6147_v30 = vld [vmem:[%s6325_s23 + $0x80] sm:$0xff]   ;;  %v1992_v12 = vrot.slane %v6155_v2, 1 }
  0x44   : > { %5821 = vmatprep.mubr.msk.bf16.mxu0 %vm380_vm1, %v1490_v31  ;;  %5787 = vmatprep.mubr.msk.bf16.mxu1 %vm380_vm1, %v916_v34  ;;  %v967_v31 = vor.u32 %v965_v23, %v963_v17  ;;  %v979_v34 = vrot.slane %v977_v27, 1  ;;  %v985_v37 = vshll.u32 %v6147_v30, 16  ;;  %v989_v44 = vshrl.u32 %v6147_v30, 16 }
  0x45   : > { %v975_v33 = vor.u32 %v973_v26, %v971_v28  ;;  %v2517_v23 = vrot.slane %v2515_v9, 2  ;;  %v1993_v24 = vsel %vm1479_vm3, %v1991_v10, %v1992_v12  ;;  %v1515_v26 = vrot.slane %v6156_v13, 1 }
  0x46   : > { %v972_v39 = vsel %vm856_vm2, %v967_v31, %v971_v28  ;;  %v987_v47 = vrot.slane %v985_v37, 1  ;;  %v2521_v27 = vshrl.u32 %v6162_v19, 16  ;;  %v2524_v28 = vshll.u32 %v6162_v19, 16  ;;  %v6161_v37 = vld [vmem:[%s6325_s23 + $0x28] sm:$0xff]  }
  0x47   : > { %v980_v43 = vsel %vm856_vm2, %v975_v33, %v979_v34 }
  0x48   : > { %v2523_v38 = vrot.slane %v2521_v27, 1 }
  0x4b   : > { %5822 = vmatmul.mubr.msk.bf16.gmra.mrb[28].mxu0 %vm380_vm1, %v1492_v46  ;;  %5788 = vmatmul.mubr.msk.bf16.gmra.mrb[28].mxu1 %vm380_vm1, %v924_v49  ;;  %v6151_v46 = vld [vmem:[%s6325_s23 + $0x90] ss:$0 sps:$4 sm:$0x11]   ;;  %v983_v49 = vor.u32 %v981_v41, %v979_v34  ;;  %v1995_v41 = vsel %vm1479_vm3, %v1992_v12, %v1994_v29 }
  0x4c   : > { %5825 = vmatprep.mubr.msk.bf16.mxu0 %vm380_vm1, %v1494_v50  ;;  %5791 = vmatprep.mubr.msk.bf16.mxu1 %vm380_vm1, %v932_v51  ;;  %v1509_v50 = vrot.slane %v6150_v42, 1  ;;  %v991_v51 = vor.u32 %v989_v44, %v987_v47  ;;  %v1001_v56 = vshll.u32 %v6151_v46, 16  ;;  %v3240_v42 = vsel %vm435_vm0, %v6395_v57, 0  ;;  %v6168_v44 = vld [vmem:[%s6325_s23 + $0x30] sm:$0xff]  }
  0x4d   : > { %v988_v61 = vsel %vm856_vm2, %v983_v49, %v987_v47  ;;  %v1998_v57 = vrot.slane %v6161_v37, 1  ;;  %v6178_v37 = vld [vmem:[%s6325_s23 + $0x58] sm:$0xff]  }
  0x4e   : > { %v1510_v62 = vsel %vm1479_vm3, %v1507_v48, %v1509_v50  ;;  %v1003_v4 = vrot.slane %v1001_v56, 1  ;;  %v2539_v48 = vshrl.u32 %v6166_v35, 16  ;;  %v3751_v56 = vsel %vm435_vm0, %v6417_v14, 0 }
  0x53   : > { %5826 = vmatmul.mubr.msk.bf16.gmra.mrb[32].mxu0 %vm380_vm1, %v1496_v1  ;;  %5792 = vmatmul.mubr.msk.bf16.gmra.mrb[32].mxu1 %vm380_vm1, %v940_v0  ;;  %v996_v0 = vsel %vm856_vm2, %v991_v51, %v995_v52  ;;  %v1511_v1 = vrot.slane %v6152_v54, 1  ;;  %v2548_v51 = vshrl.u32 %v6168_v44, 16 }
  0x54   : > { %5829 = vmatprep.mubr.msk.bf16.mxu0 %vm380_vm1, %v1498_v3  ;;  %5795 = vmatprep.mubr.msk.bf16.mxu1 %vm380_vm1, %v948_v8  ;;  %v999_v3 = vor.u32 %v997_v53, %v995_v52  ;;  %v2512_v8 = vshrl.u32 %v6160_v58, 16  ;;  %v2551_v52 = vshll.u32 %v6168_v44, 16  ;;  %v2541_v58 = vrot.slane %v2539_v48, 1 }
  0x55   : > { %v1512_v17 = vsel %vm1479_vm3, %v1509_v50, %v1511_v1  ;;  %v1514_v18 = vsel %vm1479_vm3, %v1511_v1, %v1513_v5  ;;  %v2542_v50 = vshll.u32 %v6166_v35, 16  ;;  %v6167_v1 = vld [vmem:[%s6325_s23 + $0x40] sm:$0xff]   ;;  %v2550_v2 = vrot.slane %v2548_v51, 1  ;;  %v6576_v35 = vld [vmem:[%s6325_s23 + $0x58] sm:$0xff]  }
  0x56   : > { %v1004_v16 = vsel %vm856_vm2, %v999_v3, %v1003_v4  ;;  %v2553_v3 = vrot.slane %v2551_v52, 2  ;;  %v2004_v13 = vrot.slane %v6167_v1, 1  ;;  %v2596_v48 = vshll.u32 %v6178_v37, 16 }
  0x57   : > { %v2010_v51 = vrot.slane %v6576_v35, 1 }
  0x58   : > { %v2554_v10 = vor.u32 %v2553_v3, %v2550_v2  ;;  %v6184_v2 = vld [vmem:[%s6325_s23 + $0x70] sm:$0xff]  }
  0x5b   : > { %5830 = vmatmul.mubr.msk.bf16.gmra.mrb[36].mxu0 %vm380_vm1, %v1500_v11  ;;  %5796 = vmatmul.mubr.msk.bf16.gmra.mrb[36].mxu1 %vm380_vm1, %v956_v21  ;;  %v6158_v11 = vld [vmem:[%s6325_s23 + $0x20] sm:$0xff]   ;;  %v2509_v21 = vrot.slane %v2507_v7, 2 }
  0x5c   : > { %5833 = vmatprep.mubr.msk.bf16.mxu0 %vm380_vm1, %v1502_v22  ;;  %5799 = vmatprep.mubr.msk.bf16.mxu1 %vm380_vm1, %v964_v25  ;;  %v2514_v22 = vrot.slane %v2512_v8, 1  ;;  %v6164_v25 = vld [vmem:[%s6325_s23 + $0x20] sm:$0xff]   ;;  %v1996_v32 = vrot.slane %v6158_v11, 1 }
  0x5d   : > { %v2510_v30 = vor.u32 %v2509_v21, %v2506_v20  ;;  %v2530_v33 = vshrl.u32 %v6164_v25, 16  ;;  %v2533_v34 = vshll.u32 %v6164_v25, 16 }
  0x5e   : > { %v2518_v31 = vor.u32 %v2517_v23, %v2514_v22  ;;  %v1997_v45 = vsel %vm1479_vm3, %v1994_v29, %v1996_v32  ;;  %v1999_v63 = vsel %vm1479_vm3, %v1996_v32, %v1998_v57 }
  0x5f   : > { %v2532_v46 = vrot.slane %v2530_v33, 1  ;;  %v2535_v47 = vrot.slane %v2533_v34, 2 }
  0x61   : > { %v2536_v54 = vor.u32 %v2535_v47, %v2532_v46  ;;  %v6595_v46 = vld [vmem:[%s6325_s23 + $0x60] sm:$0xff]   ;;  %v2593_v47 = vshrl.u32 %v6178_v37, 16 }
  0x63   : > { %5834 = vmatmul.mubr.msk.bf16.gmra.mrb[40].mxu0 %vm380_vm1, %v1504_v36  ;;  %5800 = vmatmul.mubr.msk.bf16.gmra.mrb[40].mxu1 %vm380_vm1, %v972_v39  ;;  %v1516_v36 = vsel %vm1479_vm3, %v1513_v5, %v1515_v26  ;;  %v2526_v39 = vrot.slane %v2524_v28, 2  ;;  %v6565_v26 = vld [vmem:[%s6325_s23 + $0x50] sm:$0xff]   ;;  %v2006_v28 = vrot.slane %v6169_v15, 1 }
  0x64   : > { %5837 = vmatprep.mubr.msk.bf16.mxu0 %vm380_vm1, %v1506_v40  ;;  %5803 = vmatprep.mubr.msk.bf16.mxu1 %vm380_vm1, %v980_v43  ;;  %v6163_v40 = vld [vmem:[%s6325_s23 + $0x30] sm:$0xff]   ;;  %v2519_v43 = vsel %vm2502_vm4, %v2510_v30, %v2518_v31  ;;  %v2008_v34 = vrot.slane %v6565_v26, 1 }
  0x65   : > { %v2527_v49 = vor.u32 %v2526_v39, %v2523_v38  ;;  %v2000_v53 = vrot.slane %v6163_v40, 1  ;;  %v6581_v40 = vld [vmem:[%s6325_s23 + $0x60] sm:$0xff]  }
  0x67   : > { %v2528_v60 = vsel %vm2502_vm4, %v2518_v31, %v2527_v49  ;;  %v2001_v4 = vsel %vm1479_vm3, %v1998_v57, %v2000_v53  ;;  %v2537_v14 = vsel %vm2502_vm4, %v2527_v49, %v2536_v54  ;;  %v5221_v49 = vld [vmem:[%s8110_s2] ss:$0 sm:$0xff]  ;;  %v2602_v57 = vshrl.u32 %v6581_v40, 16 }
  0x68   : > { %183 = vst.msk [vmem:[%s6586_s13 + $0x10] sm:$0xff] %vm180_vm5, %v5221_v49  ;;  %181 = vst.msk [vmem:[%s6586_s13] sm:$0xff] %vm180_vm5, %v5221_v49 }
  0x69   : > { %182 = vst.msk [vmem:[%s6586_s13 + $0x8] sm:$0xff] %vm180_vm5, %v5221_v49  ;;  %184 = vst.msk [vmem:[%s6586_s13 + $0x18] sm:$0xff] %vm180_vm5, %v5221_v49 }
  0x6a   : > { %185 = vst.msk [vmem:[%s6586_s13 + $0x20] sm:$0xff] %vm180_vm5, %v5221_v49  ;;  %186 = vst.msk [vmem:[%s6586_s13 + $0x28] sm:$0xff] %vm180_vm5, %v5221_v49 }
  0x6b   : > { %5838 = vmatmul.mubr.msk.bf16.gmra.mrb[44].mxu0 %vm380_vm1, %v1508_v59  ;;  %5804 = vmatmul.mubr.msk.bf16.gmra.mrb[44].mxu1 %vm380_vm1, %v988_v61  ;;  %v6170_v59 = vld [vmem:[%s6325_s23 + $0x38] sm:$0xff]   ;;  %v2544_v61 = vrot.slane %v2542_v50, 2  ;;  %187 = vst.msk [vmem:[%s6586_s13 + $0x30] sm:$0xff] %vm180_vm5, %v5221_v49  ;;  %188 = vst.msk [vmem:[%s6586_s13 + $0x38] sm:$0xff] %vm180_vm5, %v5221_v49 }
  0x6c   : > { %5841 = vmatprep.mubr.msk.bf16.mxu0 %vm380_vm1, %v1510_v62  ;;  %5807 = vmatprep.mubr.msk.bf16.mxu1 %vm380_vm1, %v996_v0  ;;  %v6172_v62 = vld [vmem:[%s6325_s23 + $0x40] sm:$0xff]   ;;  %v6165_v0 = vld [vmem:[%s6325_s23 + $0x38] sm:$0xff]   ;;  %v2557_v5 = vshrl.u32 %v6170_v59, 16  ;;  %v2560_v7 = vshll.u32 %v6170_v59, 16  ;;  %189 = vst.msk [vmem:[%s6586_s13 + $0x40] sm:$0xff] %vm180_vm5, %v5221_v49  ;;  %190 = vst.msk [vmem:[%s6586_s13 + $0x48] sm:$0xff] %vm180_vm5, %v5221_v49 }
  0x6d   : > { %v2545_v6 = vor.u32 %v2544_v61, %v2541_v58  ;;  %v2566_v8 = vshrl.u32 %v6172_v62, 16  ;;  %v2002_v9 = vrot.slane %v6165_v0, 1  ;;  %v2569_v12 = vshll.u32 %v6172_v62, 16  ;;  %191 = vst.msk [vmem:[%s6586_s13 + $0x50] sm:$0xff] %vm180_vm5, %v5221_v49  ;;  %192 = vst.msk [vmem:[%s6586_s13 + $0x58] sm:$0xff] %vm180_vm5, %v5221_v49  ;;  %v6182_v62 = vld [vmem:[%s6325_s23 + $0x68] sm:$0xff]  }
  0x6e   : > { %v2562_v19 = vrot.slane %v2560_v7, 2  ;;  %193 = vst.msk [vmem:[%s6586_s13 + $0x60] sm:$0xff] %vm180_vm5, %v5221_v49  ;;  %194 = vst.msk [vmem:[%s6586_s13 + $0x68] sm:$0xff] %vm180_vm5, %v5221_v49  ;;  %v2595_v58 = vrot.slane %v2593_v47, 1  ;;  %v2598_v59 = vrot.slane %v2596_v48, 2  ;;  %v2604_v61 = vrot.slane %v2602_v57, 1 }
  0x6f   : > { %v2546_v11 = vsel %vm2502_vm4, %v2536_v54, %v2545_v6  ;;  %v2568_v20 = vrot.slane %v2566_v8, 1  ;;  %v2003_v21 = vsel %vm1479_vm3, %v2000_v53, %v2002_v9  ;;  %v2555_v22 = vsel %vm2502_vm4, %v2545_v6, %v2554_v10  ;;  %195 = vst.msk [vmem:[%s6586_s13 + $0x70] sm:$0xff] %vm180_vm5, %v5221_v49  ;;  %196 = vst.msk [vmem:[%s6586_s13 + $0x78] sm:$0xff] %vm180_vm5, %v5221_v49 }
  0x70   : > { %v2571_v23 = vrot.slane %v2569_v12, 2  ;;  %v2005_v25 = vsel %vm1479_vm3, %v2002_v9, %v2004_v13  ;;  %197 = vst.msk [vmem:[%s6586_s13 + $0x80] sm:$0xff] %vm180_vm5, %v5221_v49  ;;  %198 = vst.msk [vmem:[%s6586_s13 + $0x88] sm:$0xff] %vm180_vm5, %v5221_v49  ;;  %v2605_v53 = vshll.u32 %v6581_v40, 16  ;;  %v2012_v54 = vrot.slane %v6595_v46, 1 }
  0x71   : > { %199 = vst.msk [vmem:[%s6586_s13 + $0x90] sm:$0xff] %vm180_vm5, %v5221_v49  ;;  %200 = vst.msk [vmem:[%s6586_s13 + $0x98] sm:$0xff] %vm180_vm5, %v5221_v49  ;;  %v2614_v6 = vshll.u32 %v6182_v62, 16  ;;  %v2620_v9 = vshrl.u32 %v6184_v2, 16 }
  0x72   : > { %v6572_v31 = vor.u32 %v2571_v23, %v2568_v20  ;;  %201 = vst.msk [vmem:[%s6586_s13 + $0xa0] sm:$0xff] %vm180_vm5, %v5221_v49  ;;  %202 = vst.msk [vmem:[%s6586_s13 + $0xa8] sm:$0xff] %vm180_vm5, %v5221_v49  ;;  %v2607_v1 = vrot.slane %v2605_v53, 2  ;;  %v2013_v3 = vsel %vm1479_vm3, %v2010_v51, %v2012_v54  ;;  %v6188_v23 = vld [vmem:[%s6325_s23 + $0x80] sm:$0xff]  }
  0x73   : > { %5842 = vmatmul.mubr.msk.bf16.gmra.mrb[48].mxu0 %vm380_vm1, %v1512_v17  ;;  %5808 = vmatmul.mubr.msk.bf16.gmra.mrb[48].mxu1 %vm380_vm1, %v1004_v16  ;;  %v6554_v16 = vld [vmem:[%s8109_s1 + $0x20] sm:$0xf]  ;;  %v2559_v17 = vrot.slane %v2557_v5, 1  ;;  %203 = vst.msk [vmem:[%s6586_s13 + $0xb0] sm:$0xff] %vm180_vm5, %v5221_v49  ;;  %204 = vst.msk [vmem:[%s6586_s13 + $0xb8] sm:$0xff] %vm180_vm5, %v5221_v49  ;;  %v2611_v5 = vshrl.u32 %v6182_v62, 16 }
  0x74   : > { %5845 = vmatprep.mubr.msk.bf16.mxu0 %vm380_vm1, %v1514_v18  ;;  %5851 = vmatprep.mubr.msk.bf16.mxu1 %vm380_vm1, %v1993_v24  ;;  %v6174_v18 = vld [vmem:[%s6325_s23 + $0x48] sm:$0xff]   ;;  %v6176_v24 = vld [vmem:[%s6325_s23 + $0x50] sm:$0xff]   ;;  %205 = vst.msk [vmem:[%s6586_s13 + $0xc0] sm:$0xff] %vm180_vm5, %v5221_v49  ;;  %206 = vst.msk [vmem:[%s6586_s13 + $0xc8] sm:$0xff] %vm180_vm5, %v5221_v49  ;;  %v2608_v8 = vor.u32 %v2607_v1, %v2604_v61 }
  0x75   : > { %v2575_v27 = vshrl.u32 %v6174_v18, 16  ;;  %v2563_v29 = vor.u32 %v2562_v19, %v2559_v17  ;;  %v2578_v30 = vshll.u32 %v6174_v18, 16  ;;  %v2584_v32 = vshrl.u32 %v6176_v24, 16  ;;  %207 = vst.msk [vmem:[%s6586_s13 + $0xd0] sm:$0xff] %vm180_vm5, %v5221_v49  ;;  %208 = vst.msk [vmem:[%s6586_s13 + $0xd8] sm:$0xff] %vm180_vm5, %v5221_v49 }
  0x76   : > { %v2587_v33 = vshll.u32 %v6176_v24, 16  ;;  %209 = vst.msk [vmem:[%s6586_s13 + $0xe0] sm:$0xff] %vm180_vm5, %v5221_v49  ;;  %210 = vst.msk [vmem:[%s6586_s13 + $0xe8] sm:$0xff] %vm180_vm5, %v5221_v49  ;;  %v2613_v17 = vrot.slane %v2611_v5, 1  ;;  %v2616_v18 = vrot.slane %v2614_v6, 2 }
  0x77   : > { %v2564_v38 = vsel %vm2502_vm4, %v2554_v10, %v2563_v29  ;;  %v2580_v39 = vrot.slane %v2578_v30, 2  ;;  %211 = vst.msk [vmem:[%s6586_s13 + $0xf0] sm:$0xff] %vm180_vm5, %v5221_v49  ;;  %212 = vst.msk [vmem:[%s6586_s13 + $0xf8] sm:$0xff] %vm180_vm5, %v5221_v49  ;;  %v2623_v10 = vshll.u32 %v6184_v2, 16  ;;  %v6193_v2 = vld [vmem:[%s6325_s23 + $0x10] sm:$0xff]  }
  0x78   : > { %v2589_v44 = vrot.slane %v2587_v33, 2  ;;  %213 = vst.msk [vmem:[%s6586_s13 + $0x100] sm:$0xff] %vm180_vm5, %v5221_v49  ;;  %214 = vst.msk [vmem:[%s6586_s13 + $0x108] sm:$0xff] %vm180_vm5, %v5221_v49  ;;  %v6194_v53 = vld [vmem:[%s6325_s23 + $0x98] ss:$0 sps:$4 sm:$0x33]  }
  0x79   : > { %215 = vst.msk [vmem:[%s6586_s13 + $0x110] sm:$0xff] %vm180_vm5, %v5221_v49  ;;  %216 = vst.msk [vmem:[%s6586_s13 + $0x118] sm:$0xff] %vm180_vm5, %v5221_v49 }
  0x7b   : > { %5846 = vmatmul.mubr.msk.bf16.gmra.mrb[52].mxu0 %vm380_vm1, %v1516_v36  ;;  %5852 = vmatmul.mubr.msk.bf16.vlgmr.msra.gmra.mrb[52].mxu1 %vm380_vm1, %v1995_v41  ;;  %v2577_v36 = vrot.slane %v2575_v27, 1  ;;  %v2007_v41 = vsel %vm1479_vm3, %v2004_v13, %v2006_v28  ;;  %v6181_v13 = vld [vmem:[%s6325_s23 + $0x78] sm:$0xff]   ;;  %v2617_v27 = vor.u32 %v2616_v18, %v2613_v17  ;;  %v6197_v18 = vld [vmem:[%s6325_s23 + $0x10] sm:$0xfc]  }
  0x7c   : > { %5889 = vmatprep.mubr.msk.bf16.mxu0 %vm380_vm1, %v2519_v43  ;;  %5926 = vmatpush3.bf16.msra.mxu1 %v3240_v42  ;;  %v2573_v42 = vsel %vm2502_vm4, %v2563_v29, %v6572_v31  ;;  %v2586_v43 = vrot.slane %v2584_v32, 1  ;;  %v2018_v26 = vrot.slane %v6181_v13, 1  ;;  %v2641_v32 = vshll.u32 %v6188_v23, 16  ;;  %v6195_v13 = vld [vmem:[%s6325_s23 + $0x18] sm:$0xff]  }
  0x7d   : > { %5855 = vmatprep.mubr.msk.bf16.mxu1 %vm380_vm1, %v1997_v45  ;;  %6087 = vmatprep.subr.msk.bf16.mxu1 %vm435_vm0, %v6532_v55  ;;  %v2009_v45 = vsel %vm1479_vm3, %v2006_v28, %v2008_v34  ;;  %v2581_v50 = vor.u32 %v2580_v39, %v2577_v36  ;;  %v2618_v35 = vsel %vm2502_vm4, %v2608_v8, %v2617_v27  ;;  %v6185_v36 = vld [vmem:[%s6325_s23 + $0x88] sm:$0xff]  }
  0x7e   : > { %v2590_v52 = vor.u32 %v2589_v44, %v2586_v43  ;;  %v6191_v43 = vld [vmem:[%s6325_s23 + $0x90] sm:$0xff]   ;;  %v2022_v48 = vrot.slane %v6185_v36, 1 }
  0x7f   : > { %v2656_v57 = vshrl.u32 %v6191_v43, 16 }
  0x80   : > { %v2591_v0 = vsel %vm2502_vm4, %v2581_v50, %v2590_v52 }
  0x83   : > { %5890 = vmatmul.mubr.msk.bf16.vlgmr.msra.gmra.mrb[56].mxu0 %vm380_vm1, %v2528_v60  ;;  %5856 = vmatmul.mubr.msk.bf16.gmra.mrb[56].mxu1 %vm380_vm1, %v1999_v63  ;;  %v2582_v60 = vsel %vm2502_vm4, %v6572_v31, %v2581_v50  ;;  %v2011_v63 = vsel %vm1479_vm3, %v2008_v34, %v2010_v51  ;;  %v2638_v31 = vshrl.u32 %v6188_v23, 16  ;;  %v6190_v34 = vld [vmem:[%s6325_s23 + $0x88] sm:$0xff]   ;;  %v2659_v51 = vshll.u32 %v6191_v43, 16  ;;  %v6206_v43 = vld [vmem:[%s6325_s23 + $0x38] sm:$0xff]  }
  0x84   : > { %5964 = vmatpush3.bf16.msra.mxu0 %v3751_v56  ;;  %5859 = vmatprep.mubr.msk.bf16.mxu1 %vm380_vm1, %v2001_v4  ;;  %v6177_v56 = vld [vmem:[%s6325_s23 + $0x68] sm:$0xff]   ;;  %v6179_v4 = vld [vmem:[%s6325_s23 + $0x70] sm:$0xff]   ;;  %v2647_v46 = vshrl.u32 %v6190_v34, 16  ;;  %v2650_v47 = vshll.u32 %v6190_v34, 16  ;;  %v3659_v23 = vrot.slane %v6197_v18, 2 }
  0x85   : > { %5893 = vmatprep.mubr.msk.bf16.mxu0 %vm380_vm1, %v2537_v14  ;;  %6088 = vmatprep.subr.msk.bf16.mxu0 %vm435_vm0, %v6554_v16  ;;  %v2599_v14 = vor.u32 %v2598_v59, %v2595_v58  ;;  %v2014_v7 = vrot.slane %v6177_v56, 1  ;;  %v2016_v12 = vrot.slane %v6179_v4, 1  ;;  %v2665_v4 = vshrl.u32 %v6194_v53, 16  ;;  %v6202_v34 = vld [vmem:[%s6325_s23 + $0x28] sm:$0xff]  }
  0x86   : > { %v2649_v56 = vrot.slane %v2647_v46, 1  ;;  %v2652_v58 = vrot.slane %v2650_v47, 2  ;;  %v6205_v46 = vld [vmem:[%s6325_s23 + $0x40] sm:$0xff]   ;;  %v6801_v18 = vld [vmem:[%s6325_s23 + $0x68] sm:$0xff]  }
  0x87   : > { %v2600_v15 = vsel %vm2502_vm4, %v2590_v52, %v2599_v14  ;;  %v2015_v19 = vsel %vm1479_vm3, %v2012_v54, %v2014_v7  ;;  %v2609_v20 = vsel %vm2502_vm4, %v2599_v14, %v2608_v8  ;;  %v2017_v24 = vsel %vm1479_vm3, %v2014_v7, %v2016_v12  ;;  %v6189_v54 = vld [vmem:[%s6325_s23 + $0x98] ss:$0 sps:$4 sm:$0x11]  }
  0x88   : > { %v2019_v39 = vsel %vm1479_vm3, %v2016_v12, %v2018_v26  ;;  %v2668_v14 = vshll.u32 %v6194_v53, 16  ;;  %v2026_v5 = vrot.slane %v6189_v54, 1  ;;  %v3149_v8 = vrot.slane %v6193_v2, 2  ;;  %v6210_v54 = vld [vmem:[%s6325_s23 + $0x48] sm:$0xff]  }
  0x8a   : > { %v2670_v12 = vrot.slane %v2668_v14, 2 }
  0x8b   : > { %5894 = vmatmul.mubr.msk.bf16.gmra.mrb[60].mxu0 %vm380_vm1, %v2546_v11  ;;  %5860 = vmatmul.mubr.msk.bf16.gmra.mrb[60].mxu1 %vm380_vm1, %v2003_v21  ;;  %v6186_v11 = vld [vmem:[%s6325_s23 + $0x78] sm:$0xff]   ;;  %v2622_v21 = vrot.slane %v2620_v9, 1 }
  0x8c   : > { %5897 = vmatprep.mubr.msk.bf16.mxu0 %vm380_vm1, %v2555_v22  ;;  %5863 = vmatprep.mubr.msk.bf16.mxu1 %vm380_vm1, %v2005_v25  ;;  %v2625_v22 = vrot.slane %v2623_v10, 2  ;;  %v6183_v25 = vld [vmem:[%s6325_s23 + $0x80] sm:$0xff]   ;;  %v2629_v28 = vshrl.u32 %v6186_v11, 16  ;;  %v2632_v29 = vshll.u32 %v6186_v11, 16  ;;  %v2667_v10 = vrot.slane %v2665_v4, 1  ;;  %v6198_v11 = vld [vmem:[%s6325_s23 + $0x18] sm:$0xff]  }
  0x8d   : > { %v2020_v33 = vrot.slane %v6183_v25, 1  ;;  %v6214_v4 = vld [vmem:[%s6325_s23 + $0x58] sm:$0xff]  }
  0x8e   : > { %v2626_v30 = vor.u32 %v2625_v22, %v2622_v21  ;;  %v2631_v37 = vrot.slane %v2629_v28, 1  ;;  %v2671_v21 = vor.u32 %v2670_v12, %v2667_v10  ;;  %v3151_v22 = vrot.slane %v6195_v13, 2  ;;  %v6200_v28 = vld [vmem:[%s6325_s23 + $0x20] sm:$0xff]  }
  0x8f   : > { %v2021_v44 = vsel %vm1479_vm3, %v2018_v26, %v2020_v33  ;;  %v2023_v61 = vsel %vm1479_vm3, %v2020_v33, %v2022_v48  ;;  %v6216_v12 = vld [vmem:[%s6325_s23 + $0x60] sm:$0xff]  }
  0x90   : > { %v2627_v40 = vsel %vm2502_vm4, %v2617_v27, %v2626_v30  ;;  %v6199_v27 = vld [vmem:[%s6325_s23 + $0x28] sm:$0xff]  }
  0x91   : > { %v3155_v36 = vrot.slane %v6199_v27, 2  ;;  %v273_v27 = vld [vmem:[%s6586_s13 + $0xa0] sm:$0xff] }
  0x93   : > { %5898 = vmatmul.mubr.msk.bf16.gmra.mrb[64].mxu0 %vm380_vm1, %v2564_v38  ;;  %5864 = vmatmul.mubr.msk.bf16.gmra.mrb[64].mxu1 %vm380_vm1, %v2007_v41  ;;  %v2634_v38 = vrot.slane %v2632_v29, 2  ;;  %v2640_v41 = vrot.slane %v2638_v31, 1  ;;  %v3152_v29 = vsel %vm3147_vm6, %v3149_v8, %v3151_v22  ;;  %v6201_v31 = vld [vmem:[%s6325_s23 + $0x30] sm:$0xff]  }
  0x94   : > { %5901 = vmatprep.mubr.msk.bf16.mxu0 %vm380_vm1, %v2573_v42  ;;  %5867 = vmatprep.mubr.msk.bf16.mxu1 %vm380_vm1, %v2009_v45  ;;  %v2643_v42 = vrot.slane %v2641_v32, 2  ;;  %v6187_v45 = vld [vmem:[%s6325_s23 + $0x90] sm:$0xff]   ;;  %v4396_v32 = vsel %vm435_vm0, %v6532_v55, 0 }
  0x95   : > { %v2635_v49 = vor.u32 %v2634_v38, %v2631_v37  ;;  %v2024_v52 = vrot.slane %v6187_v45, 1  ;;  %v3157_v37 = vrot.slane %v6201_v31, 2  ;;  %v3664_v38 = vrot.slane %v6202_v34, 2  ;;  %v254_v34 = vld [vmem:[%s6586_s13 + $0x8] sm:$0xff] }
  0x96   : > { %v2644_v50 = vor.u32 %v2643_v42, %v2640_v41  ;;  %v4908_v42 = vsel %vm435_vm0, %v6554_v16, 0 }
  0x97   : > { %v2636_v59 = vsel %vm2502_vm4, %v2626_v30, %v2635_v49  ;;  %v2025_v1 = vsel %vm1479_vm3, %v2022_v48, %v2024_v52  ;;  %v3668_v48 = vrot.slane %v6206_v43, 2 }
  0x98   : > { %v2645_v62 = vsel %vm2502_vm4, %v2635_v49, %v2644_v50  ;;  %v3161_v49 = vrot.slane %v6205_v46, 2 }
  0x9b   : > { %5902 = vmatmul.mubr.msk.bf16.gmra.mrb[68].mxu0 %vm380_vm1, %v2582_v60  ;;  %5868 = vmatmul.mubr.msk.bf16.gmra.mrb[68].mxu1 %vm380_vm1, %v2011_v63  ;;  %v6192_v60 = vld [vmem:[%s6325_s23 + $0x8] sm:$0xfc]   ;;  %v2658_v63 = vrot.slane %v2656_v57, 1 }
  0x9c   : > { %5905 = vmatprep.mubr.msk.bf16.mxu0 %vm380_vm1, %v2591_v0  ;;  %5871 = vmatprep.mubr.msk.bf16.mxu1 %vm380_vm1, %v2013_v3  ;;  %v2661_v0 = vrot.slane %v2659_v51, 2  ;;  %v2653_v3 = vor.u32 %v2652_v58, %v2649_v56  ;;  %v3148_v7 = vrot.slane %v6192_v60, 2  ;;  %v6208_v51 = vld [vmem:[%s6325_s23 + $0x40] sm:$0xff]   ;;  %v6209_v58 = vld [vmem:[%s6325_s23 + $0x50] sm:$0xff]  }
  0x9e   : > { %v2662_v6 = vor.u32 %v2661_v0, %v2658_v63  ;;  %v2654_v9 = vsel %vm2502_vm4, %v2644_v50, %v2653_v3  ;;  %v6207_v50 = vld [vmem:[%s6325_s23 + $0x48] sm:$0xff]   ;;  %v6212_v0 = vld [vmem:[%s6325_s23 + $0x50] sm:$0xff]  }
  0x9f   : > { %v3163_v60 = vrot.slane %v6207_v50, 2 }
  0xa0   : > { %v2663_v17 = vsel %vm2502_vm4, %v2653_v3, %v2662_v6  ;;  %v2672_v26 = vsel %vm2502_vm4, %v2662_v6, %v2671_v21  ;;  %v6211_v3 = vld [vmem:[%s6325_s23 + $0x58] sm:$0xff]   ;;  %v3674_v6 = vrot.slane %v6212_v0, 2  ;;  %v3678_v21 = vrot.slane %v6216_v12, 2  ;;  %v278_v12 = vld [vmem:[%s6586_s13 + $0xc8] sm:$0xff] }
  0xa1   : > { %v280_v0 = vld [vmem:[%s6586_s13 + $0xd8] sm:$0xff] }
  0xa3   : > { %5906 = vmatmul.mubr.msk.bf16.gmra.mrb[72].mxu0 %vm380_vm1, %v2600_v15  ;;  %5872 = vmatmul.mubr.msk.bf16.gmra.mrb[72].mxu1 %vm380_vm1, %v2015_v19  ;;  %v2027_v15 = vsel %vm1479_vm3, %v2024_v52, %v2026_v5  ;;  %v3150_v19 = vsel %vm3147_vm6, %v3148_v7, %v3149_v8  ;;  %v6213_v5 = vld [vmem:[%s6325_s23 + $0x60] sm:$0xff]   ;;  %v3167_v7 = vrot.slane %v6211_v3, 2  ;;  %v3676_v8 = vrot.slane %v6214_v4, 2 }
  0xa4   : > { %5909 = vmatprep.mubr.msk.bf16.mxu0 %vm380_vm1, %v2609_v20  ;;  %5875 = vmatprep.mubr.msk.bf16.mxu1 %vm380_vm1, %v2017_v24  ;;  %v6196_v20 = vld [vmem:[%s6325_s23 + $0x20] sm:$0xff]   ;;  %v3660_v24 = vrot.slane %v6198_v11, 2 }
  0xa5   : > { %v3153_v25 = vrot.slane %v6196_v20, 2  ;;  %v255_v20 = vld [vmem:[%s6586_s13 + $0x10] sm:$0xff] }
  0xa6   : > { %v3661_v30 = vsel %vm3147_vm6, %v3659_v23, %v3660_v24  ;;  %v253_v23 = vld [vmem:[%s6586_s13] sm:$0xff] }
  0xa7   : > { %v3154_v33 = vsel %vm3147_vm6, %v3151_v22, %v3153_v25  ;;  %v3156_v41 = vsel %vm3147_vm6, %v3153_v25, %v3155_v36  ;;  %v275_v22 = vld [vmem:[%s6586_s13 + $0xb0] sm:$0xff]  ;;  %v3680_v25 = vrot.slane %v6801_v18, 2 }
  0xa9   : > { %v3681_v46 = vsel %vm3147_vm6, %v3678_v21, %v3680_v25 }
  0xab   : > { %5910 = vmatmul.mubr.msk.bf16.gmra.mrb[76].mxu0 %vm380_vm1, %v2618_v35  ;;  %5876 = vmatmul.mubr.msk.bf16.gmra.mrb[76].mxu1 %vm380_vm1, %v2019_v39  ;;  %v3662_v35 = vrot.slane %v6200_v28, 2  ;;  %v6203_v39 = vld [vmem:[%s6325_s23 + $0x38] sm:$0xff]  }
  0xac   : > { %5913 = vmatprep.mubr.msk.bf16.mxu0 %vm380_vm1, %v2627_v40  ;;  %5879 = vmatprep.mubr.msk.bf16.mxu1 %vm380_vm1, %v2021_v44  ;;  %v6204_v40 = vld [vmem:[%s6325_s23 + $0x30] sm:$0xff]   ;;  %v3158_v44 = vsel %vm3147_vm6, %v3155_v36, %v3157_v37  ;;  %v3159_v16 = vrot.slane %v6203_v39, 2  ;;  %v256_v28 = vld [vmem:[%s6586_s13 + $0x18] sm:$0xff]  ;;  %v3679_v39 = vsel %vm3147_vm6, %v3676_v8, %v3678_v21 }
  0xad   : > { %v3663_v55 = vsel %vm3147_vm6, %v3660_v24, %v3662_v35  ;;  %v3665_v45 = vsel %vm3147_vm6, %v3662_v35, %v3664_v38  ;;  %v3666_v47 = vrot.slane %v6204_v40, 2  ;;  %v6220_v40 = vld [vmem:[%s6325_s23 + $0x70] sm:$0xff]  }
  0xae   : > { %v3160_v52 = vsel %vm3147_vm6, %v3157_v37, %v3159_v16  ;;  %v3162_v56 = vsel %vm3147_vm6, %v3159_v16, %v3161_v49  ;;  %v6831_v16 = vld [vmem:[%s6325_s23 + $0x78] sm:$0xff]  }
  0xaf   : > { %v3667_v57 = vsel %vm3147_vm6, %v3664_v38, %v3666_v47  ;;  %v3669_v53 = vsel %vm3147_vm6, %v3666_v47, %v3668_v48  ;;  %v6219_v47 = vld [vmem:[%s6325_s23 + $0x78] sm:$0xff]  }
  0xb3   : > { %5914 = vmatmul.mubr.msk.bf16.gmra.mrb[80].mxu0 %vm380_vm1, %v2636_v59  ;;  %5880 = vmatmul.mubr.msk.bf16.gmra.mrb[80].mxu1 %vm380_vm1, %v2023_v61  ;;  %v3670_v59 = vrot.slane %v6208_v51, 2  ;;  %v3672_v61 = vrot.slane %v6210_v54, 2  ;;  %v6841_v51 = vld [vmem:[%s6325_s23 + $0x80] sm:$0xff]   ;;  %v3682_v54 = vrot.slane %v6220_v40, 2  ;;  %v264_v40 = vld [vmem:[%s6586_s13 + $0x58] sm:$0xff] }
  0xb4   : > { %5917 = vmatprep.mubr.msk.bf16.mxu0 %vm380_vm1, %v2645_v62  ;;  %5883 = vmatprep.mubr.msk.bf16.mxu1 %vm380_vm1, %v2025_v1  ;;  %v3165_v62 = vrot.slane %v6209_v58, 2  ;;  %v3164_v1 = vsel %vm3147_vm6, %v3161_v49, %v3163_v60  ;;  %v257_v58 = vld [vmem:[%s6586_s13 + $0x20] sm:$0xff] }
  0xb5   : > { %v3671_v63 = vsel %vm3147_vm6, %v3668_v48, %v3670_v59  ;;  %v3673_v2 = vsel %vm3147_vm6, %v3670_v59, %v3672_v61  ;;  %v3675_v10 = vsel %vm3147_vm6, %v3672_v61, %v3674_v6  ;;  %v3175_v59 = vrot.slane %v6219_v47, 2 }
  0xb6   : > { %v3166_v14 = vsel %vm3147_vm6, %v3163_v60, %v3165_v62  ;;  %v3168_v13 = vsel %vm3147_vm6, %v3165_v62, %v3167_v7  ;;  %v3684_v60 = vrot.slane %v6831_v16, 2  ;;  %v277_v62 = vld [vmem:[%s6586_s13 + $0xc0] sm:$0xff] }
  0xb8   : > { %v3685_v18 = vsel %vm3147_vm6, %v3682_v54, %v3684_v60 }
  0xbb   : > { %5918 = vmatmul.mubr.msk.bf16.gmra.mrb[84].mxu0 %vm380_vm1, %v2654_v9  ;;  %5884 = vmatmul.mubr.msk.bf16.gmra.mrb[84].mxu1 %vm380_vm1, %v2027_v15  ;;  %v3169_v9 = vrot.slane %v6213_v5, 2  ;;  %v3677_v15 = vsel %vm3147_vm6, %v3674_v6, %v3676_v8  ;;  %v6867_v5 = vld [vmem:[%s6325_s23 + $0x88] sm:$0xff]   ;;  %v6870_v6 = vld [vmem:[%s6325_s23 + $0x80] sm:$0xff]  }
  0xbc   : > { %5921 = vmatprep.mubr.msk.bf16.mxu0 %vm380_vm1, %v2663_v17  ;;  %5927 = vmatprep.mubr.msk.bf16.mxu1 %vm380_vm1, %v3150_v19  ;;  %v6215_v17 = vld [vmem:[%s6325_s23 + $0x68] sm:$0xff]   ;;  %v6805_v19 = vld [vmem:[%s6325_s23 + $0x70] sm:$0xff]  }
  0xbd   : > { %v3170_v11 = vsel %vm3147_vm6, %v3167_v7, %v3169_v9  ;;  %v3171_v24 = vrot.slane %v6215_v17, 2  ;;  %v6880_v17 = vld [vmem:[%s6325_s23 + $0x88] sm:$0xff]  }
  0xc3   : > { %5922 = vmatmul.mubr.msk.bf16.gmra.mrb[88].mxu0 %vm380_vm1, %v2672_v26  ;;  %5928 = vmatmul.mubr.msk.bf16.vlgmr.msra.gmra.mrb[88].mxu1 %vm380_vm1, %v3152_v29  ;;  %v3173_v29 = vrot.slane %v6805_v19, 2 }
  0xc4   : > { %5965 = vmatprep.mubr.msk.bf16.mxu0 %vm380_vm1, %v3661_v30  ;;  %6002 = vmatpush3.bf16.msra.mxu1 %v4396_v32 }
  0xc5   : > { %5931 = vmatprep.mubr.msk.bf16.mxu1 %vm380_vm1, %v3154_v33  ;;  %v276_v33 = vld [vmem:[%s6586_s13 + $0xb8] sm:$0xff] }
  0xcb   : > { %5966 = vmatmul.mubr.msk.bf16.vlgmr.msra.gmra.mrb[92].mxu0 %vm380_vm1, %v3663_v55  ;;  %5932 = vmatmul.mubr.msk.bf16.gmra.mrb[92].mxu1 %vm380_vm1, %v3156_v41  ;;  %v274_v55 = vld [vmem:[%s6586_s13 + $0xa8] sm:$0xff] }
  0xcc   : > { %6040 = vmatpush3.bf16.msra.mxu0 %v4908_v42  ;;  %5935 = vmatprep.mubr.msk.bf16.mxu1 %vm380_vm1, %v3158_v44 }
  0xcd   : > { %5969 = vmatprep.mubr.msk.bf16.mxu0 %vm380_vm1, %v3665_v45  ;;  %v3172_v45 = vsel %vm3147_vm6, %v3169_v9, %v3171_v24 }
  0xd3   : > { %5970 = vmatmul.mubr.msk.bf16.gmra.mrb[96].mxu0 %vm380_vm1, %v3667_v57  ;;  %5936 = vmatmul.mubr.msk.bf16.gmra.mrb[96].mxu1 %vm380_vm1, %v3160_v52  ;;  %v3174_v57 = vsel %vm3147_vm6, %v3171_v24, %v3173_v29  ;;  %v6230_v24 = vld [vmem:[%s6325_s23 + $0x10] sm:$0xfc]  }
  0xd4   : > { %5973 = vmatprep.mubr.msk.bf16.mxu0 %vm380_vm1, %v3669_v53  ;;  %5939 = vmatprep.mubr.msk.bf16.mxu1 %vm380_vm1, %v3162_v56  ;;  %v259_v53 = vld [vmem:[%s6586_s13 + $0x30] sm:$0xff] }
  0xd5   : > { %v279_v56 = vld [vmem:[%s6586_s13 + $0xd0] sm:$0xff] }
  0xdb   : > { %5974 = vmatmul.mubr.msk.bf16.gmra.mrb[100].mxu0 %vm380_vm1, %v3671_v63  ;;  %5940 = vmatmul.mubr.msk.bf16.gmra.mrb[100].mxu1 %vm380_vm1, %v3164_v1  ;;  %v260_v63 = vld [vmem:[%s6586_s13 + $0x38] sm:$0xff]  ;;  %v3177_v1 = vrot.slane %v6841_v51, 2 }
  0xdc   : > { %5977 = vmatprep.mubr.msk.bf16.mxu0 %vm380_vm1, %v3673_v2  ;;  %5943 = vmatprep.mubr.msk.bf16.mxu1 %vm380_vm1, %v3166_v14  ;;  %v258_v14 = vld [vmem:[%s6586_s13 + $0x28] sm:$0xff] }
  0xdd   : > { %v3178_v19 = vsel %vm3147_vm6, %v3175_v59, %v3177_v1 }
  0xe3   : > { %5978 = vmatmul.mubr.msk.bf16.gmra.mrb[104].mxu0 %vm380_vm1, %v3675_v10  ;;  %5944 = vmatmul.mubr.msk.bf16.gmra.mrb[104].mxu1 %vm380_vm1, %v3168_v13  ;;  %v3683_v13 = vsel %vm3147_vm6, %v3680_v25, %v3682_v54 }
  0xe4   : > { %5981 = vmatprep.mubr.msk.bf16.mxu0 %vm380_vm1, %v3677_v15  ;;  %5947 = vmatprep.mubr.msk.bf16.mxu1 %vm380_vm1, %v3170_v11  ;;  %v6877_v15 = vld [vmem:[%s6325_s23 + $0x90] sm:$0xff]  }
  0xe6   : > { %v5739_v26 = vpop.f32.mrb[0].mxu0  ;;  %v5759_v31 = vpop.f32.mrb[0].mxu1 }
  0xe7   : > { %v618_v30 = vadd.f32 %v5739_v26, %v255_v20  ;;  %v473_v32 = vpop.f32.mrb[1].mxu0  ;;  %v638_v35 = vadd.f32 %v5759_v31, %v275_v22  ;;  %v553_v37 = vpop.f32.mrb[1].mxu1  ;;  %v3686_v31 = vrot.slane %v6870_v6, 2 }
  0xe8   : > { %v616_v36 = vadd.f32 %v473_v32, %v253_v23  ;;  %v5740_v38 = vpop.f32.mrb[2].mxu0  ;;  %v636_v41 = vadd.f32 %v553_v37, %v273_v27  ;;  %v5760_v43 = vpop.f32.mrb[2].mxu1  ;;  %v3176_v23 = vsel %vm3147_vm6, %v3173_v29, %v3175_v59  ;;  %v263_v32 = vld [vmem:[%s6586_s13 + $0x50] sm:$0xff]  ;;  %v281_v37 = vld [vmem:[%s6586_s13 + $0xe0] sm:$0xff] }
  0xe9   : > { %654 = vst.msk [vmem:[%s6586_s13 + $0x10] sm:$0xff] %vm180_vm5, %v618_v30  ;;  %v619_v42 = vadd.f32 %v5740_v38, %v256_v28  ;;  %v476_v44 = vpop.f32.mrb[3].mxu0  ;;  %674 = vst.msk [vmem:[%s6586_s13 + $0xb0] sm:$0xff] %vm180_vm5, %v638_v35  ;;  %v639_v48 = vadd.f32 %v5760_v43, %v276_v33  ;;  %v556_v50 = vpop.f32.mrb[3].mxu1  ;;  %v6231_v28 = vld [vmem:[%s6325_s23 + $0x18] sm:$0xff]   ;;  %v3179_v30 = vrot.slane %v6867_v5, 2 }
  0xea   : > { %652 = vst.msk [vmem:[%s6586_s13] sm:$0xff] %vm180_vm5, %v616_v36  ;;  %v617_v49 = vadd.f32 %v476_v44, %v254_v34  ;;  %672 = vst.msk [vmem:[%s6586_s13 + $0xa0] sm:$0xff] %vm180_vm5, %v636_v41  ;;  %v637_v52 = vadd.f32 %v556_v50, %v274_v55  ;;  %v3181_v33 = vrot.slane %v6877_v15, 2  ;;  %v3688_v34 = vrot.slane %v6880_v17, 2  ;;  %v283_v35 = vld [vmem:[%s6586_s13 + $0xf0] sm:$0xff]  ;;  %v261_v36 = vld [vmem:[%s6586_s13 + $0x40] sm:$0xff] }
  0xeb   : > { %655 = vst.msk [vmem:[%s6586_s13 + $0x18] sm:$0xff] %vm180_vm5, %v619_v42  ;;  %5982 = vmatmul.mubr.msk.bf16.gmra.mrb[108].mxu0 %vm380_vm1, %v3679_v39  ;;  %675 = vst.msk [vmem:[%s6586_s13 + $0xb8] sm:$0xff] %vm180_vm5, %v639_v48  ;;  %5948 = vmatmul.mubr.msk.bf16.gmra.mrb[108].mxu1 %vm380_vm1, %v3172_v45  ;;  %v4172_v38 = vshrl.u32 %v6230_v24, 16  ;;  %v4175_v55 = vshll.u32 %v6230_v24, 16  ;;  %v284_v41 = vld [vmem:[%s6586_s13 + $0xf8] sm:$0xff]  ;;  %v262_v42 = vld [vmem:[%s6586_s13 + $0x48] sm:$0xff]  ;;  %v3180_v48 = vsel %vm3147_vm6, %v3177_v1, %v3179_v30 }
  0xec   : > { %653 = vst.msk [vmem:[%s6586_s13 + $0x8] sm:$0xff] %vm180_vm5, %v617_v49  ;;  %5985 = vmatprep.mubr.msk.bf16.mxu0 %vm380_vm1, %v3681_v46  ;;  %673 = vst.msk [vmem:[%s6586_s13 + $0xa8] sm:$0xff] %vm180_vm5, %v637_v52  ;;  %5951 = vmatprep.mubr.msk.bf16.mxu1 %vm380_vm1, %v3174_v57  ;;  %v4180_v43 = vshrl.u32 %v6231_v28, 16  ;;  %v4183_v44 = vshll.u32 %v6231_v28, 16  ;;  %v3687_v49 = vsel %vm3147_vm6, %v3684_v60, %v3686_v31  ;;  %v6233_v57 = vld [vmem:[%s6325_s23 + $0x20] sm:$0xff]   ;;  %v6228_v59 = vld [vmem:[%s6325_s23 + $0x90] sm:$0xff]  }
  0xed   : > { %v6227_v50 = vld [vmem:[%s6325_s23 + $0x98] ss:$0 sps:$4 sm:$0x33]   ;;  %v3689_v16 = vsel %vm3147_vm6, %v3686_v31, %v3688_v34  ;;  %v6941_v1 = vrot.slane %v4172_v38, 2 }
  0xee   : > { %v5743_v61 = vpop.f32.mrb[4].mxu0  ;;  %v5763_v3 = vpop.f32.mrb[4].mxu1  ;;  %v6937_v60 = vld [vmem:[%s6325_s23 + $0x98] sm:$0xff]   ;;  %v4182_v6 = vrot.slane %v4180_v43, 2 }
  0xef   : > { %v622_v2 = vadd.f32 %v5743_v61, %v259_v53  ;;  %v489_v4 = vpop.f32.mrb[5].mxu0  ;;  %v642_v7 = vadd.f32 %v5763_v3, %v279_v56  ;;  %v569_v9 = vpop.f32.mrb[5].mxu1  ;;  %v282_v56 = vld [vmem:[%s6586_s13 + $0xe8] sm:$0xff]  ;;  %v6975_v28 = vld [vmem:[%s6325_s23 + $0xa0] ss:$0 sps:$4 sm:$0x33]  }
  0xf0   : > { %v620_v8 = vadd.f32 %v489_v4, %v257_v58  ;;  %v5744_v10 = vpop.f32.mrb[6].mxu0  ;;  %v640_v11 = vadd.f32 %v569_v9, %v277_v62  ;;  %v5764_v21 = vpop.f32.mrb[6].mxu1  ;;  %v3182_v58 = vsel %vm3147_vm6, %v3179_v30, %v3181_v33  ;;  %v6234_v3 = vld [vmem:[%s6325_s23 + $0x28] sm:$0xff]   ;;  %v3183_v9 = vrot.slane %v6227_v50, 2 }
  0xf1   : > { %658 = vst.msk [vmem:[%s6586_s13 + $0x30] sm:$0xff] %vm180_vm5, %v622_v2  ;;  %v623_v20 = vadd.f32 %v5744_v10, %v260_v63  ;;  %v492_v22 = vpop.f32.mrb[7].mxu0  ;;  %678 = vst.msk [vmem:[%s6586_s13 + $0xd0] sm:$0xff] %vm180_vm5, %v642_v7  ;;  %v643_v25 = vadd.f32 %v5764_v21, %v280_v0  ;;  %v572_v27 = vpop.f32.mrb[7].mxu1  ;;  %v6943_v2 = vrot.slane %v4175_v55, 3  ;;  %v4185_v7 = vrot.slane %v4183_v44, 3 }
  0xf2   : > { %656 = vst.msk [vmem:[%s6586_s13 + $0x20] sm:$0xff] %vm180_vm5, %v620_v8  ;;  %v621_v26 = vadd.f32 %v492_v22, %v258_v14  ;;  %676 = vst.msk [vmem:[%s6586_s13 + $0xc0] sm:$0xff] %vm180_vm5, %v640_v11  ;;  %v641_v29 = vadd.f32 %v572_v27, %v278_v12  ;;  %v4189_v10 = vshrl.u32 %v6233_v57, 16  ;;  %v4192_v12 = vshll.u32 %v6233_v57, 16  ;;  %v287_v21 = vld [vmem:[%s6586_s13 + $0x110] sm:$0xff]  ;;  %v265_v22 = vld [vmem:[%s6586_s13 + $0x60] sm:$0xff] }
  0xf3   : > { %659 = vst.msk [vmem:[%s6586_s13 + $0x38] sm:$0xff] %vm180_vm5, %v623_v20  ;;  %5986 = vmatmul.mubr.msk.bf16.gmra.mrb[112].mxu0 %vm380_vm1, %v3683_v13  ;;  %679 = vst.msk [vmem:[%s6586_s13 + $0xd8] sm:$0xff] %vm180_vm5, %v643_v25  ;;  %5952 = vmatmul.mubr.msk.bf16.gmra.mrb[112].mxu1 %vm380_vm1, %v3176_v23  ;;  %v267_v13 = vld [vmem:[%s6586_s13 + $0x70] sm:$0xff]  ;;  %v3690_v11 = vrot.slane %v6228_v59, 2  ;;  %v3692_v20 = vrot.slane %v6937_v60, 2  ;;  %v4198_v23 = vshrl.u32 %v6234_v3, 16  ;;  %v4178_v27 = vor.u32 %v6943_v2, %v6941_v1 }
  0xf4   : > { %657 = vst.msk [vmem:[%s6586_s13 + $0x28] sm:$0xff] %vm180_vm5, %v621_v26  ;;  %5989 = vmatprep.mubr.msk.bf16.mxu0 %vm380_vm1, %v3685_v18  ;;  %677 = vst.msk [vmem:[%s6586_s13 + $0xc8] sm:$0xff] %vm180_vm5, %v641_v29  ;;  %5955 = vmatprep.mubr.msk.bf16.mxu1 %vm380_vm1, %v3178_v19  ;;  %v4201_v18 = vshll.u32 %v6234_v3, 16  ;;  %v285_v25 = vld [vmem:[%s6586_s13 + $0x100] sm:$0xff]  ;;  %v268_v26 = vld [vmem:[%s6586_s13 + $0x78] sm:$0xff]  ;;  %v6972_v19 = vor.u32 %v4185_v7, %v4182_v6  ;;  %v4194_v38 = vrot.slane %v4192_v12, 3 }
  0xf5   : > { %v3691_v43 = vsel %vm3147_vm6, %v3688_v34, %v3690_v11  ;;  %v3693_v15 = vsel %vm3147_vm6, %v3690_v11, %v3692_v20  ;;  %v6990_v44 = vld [vmem:[%s6325_s23 + $0x18] sm:$0xff]   ;;  %v6235_v34 = vld [vmem:[%s6325_s23 + $0x10] sm:$0xf8]   ;;  %v6241_v60 = vld [vmem:[%s6325_s23 + $0x40] sm:$0xff]  }
  0xf6   : > { %v5747_v39 = vpop.f32.mrb[8].mxu0  ;;  %v5767_v46 = vpop.f32.mrb[8].mxu1  ;;  %v4203_v17 = vrot.slane %v4201_v18, 3  ;;  %v4817_v1 = vrot.slane %v6990_v44, 3  ;;  %v272_v3 = vld [vmem:[%s6586_s13 + $0x98] sm:$0xff]  ;;  %v727_v6 = vld [vmem:[%s6586_s13 + $0x10] sm:$0xff] }
  0xf7   : > { %v626_v45 = vadd.f32 %v5747_v39, %v263_v32  ;;  %v505_v47 = vpop.f32.mrb[9].mxu0  ;;  %v646_v51 = vadd.f32 %v5767_v46, %v283_v35  ;;  %v585_v53 = vpop.f32.mrb[9].mxu1  ;;  %v288_v32 = vld [vmem:[%s6586_s13 + $0x118] sm:$0xff]  ;;  %v266_v35 = vld [vmem:[%s6586_s13 + $0x68] sm:$0xff] }
  0xf8   : > { %v624_v52 = vadd.f32 %v505_v47, %v261_v36  ;;  %v5748_v54 = vpop.f32.mrb[10].mxu0  ;;  %v644_v61 = vadd.f32 %v585_v53, %v281_v37  ;;  %v5768_v63 = vpop.f32.mrb[10].mxu1  ;;  %v3184_v36 = vsel %vm3147_vm6, %v3181_v33, %v3183_v9  ;;  %v4191_v37 = vrot.slane %v4189_v10, 2  ;;  %v6237_v33 = vld [vmem:[%s6325_s23 + $0x30] sm:$0xff]   ;;  %v6239_v53 = vld [vmem:[%s6325_s23 + $0x38] sm:$0xff]   ;;  %v270_v9 = vld [vmem:[%s6586_s13 + $0x88] sm:$0xff] }
  0xf9   : > { %662 = vst.msk [vmem:[%s6586_s13 + $0x50] sm:$0xff] %vm180_vm5, %v626_v45  ;;  %v627_v62 = vadd.f32 %v5748_v54, %v264_v40  ;;  %v508_v0 = vpop.f32.mrb[11].mxu0  ;;  %682 = vst.msk [vmem:[%s6586_s13 + $0xf0] sm:$0xff] %vm180_vm5, %v646_v51  ;;  %v647_v4 = vadd.f32 %v5768_v63, %v284_v41  ;;  %v588_v5 = vpop.f32.mrb[11].mxu1  ;;  %v4207_v59 = vshrl.u32 %v6237_v33, 16 }
  0xfa   : > { %660 = vst.msk [vmem:[%s6586_s13 + $0x40] sm:$0xff] %vm180_vm5, %v624_v52  ;;  %v625_v14 = vadd.f32 %v508_v0, %v262_v42  ;;  %680 = vst.msk [vmem:[%s6586_s13 + $0xe0] sm:$0xff] %vm180_vm5, %v644_v61  ;;  %v645_v8 = vadd.f32 %v588_v5, %v282_v56  ;;  %v286_v42 = vld [vmem:[%s6586_s13 + $0x108] sm:$0xff]  ;;  %v4187_v52 = vsel %vm4170_vm7, %v4178_v27, %v6972_v19  ;;  %v3694_v56 = vrot.slane %v6975_v28, 2  ;;  %v728_v27 = vld [vmem:[%s6586_s13 + $0x18] sm:$0xff] }
  0xfb   : > { %663 = vst.msk [vmem:[%s6586_s13 + $0x58] sm:$0xff] %vm180_vm5, %v627_v62  ;;  %5990 = vmatmul.mubr.msk.bf16.gmra.mrb[116].mxu0 %vm380_vm1, %v3687_v49  ;;  %683 = vst.msk [vmem:[%s6586_s13 + $0xf8] sm:$0xff] %vm180_vm5, %v647_v4  ;;  %5956 = vmatmul.mubr.msk.bf16.gmra.mrb[116].mxu1 %vm380_vm1, %v3180_v48  ;;  %v4200_v49 = vrot.slane %v4198_v23, 2  ;;  %v4210_v61 = vshll.u32 %v6237_v33, 16  ;;  %v269_v62 = vld [vmem:[%s6586_s13 + $0x80] sm:$0xff]  ;;  %v4816_v0 = vrot.slane %v6235_v34, 3 }
  0xfc   : > { %661 = vst.msk [vmem:[%s6586_s13 + $0x48] sm:$0xff] %vm180_vm5, %v625_v14  ;;  %5993 = vmatprep.mubr.msk.bf16.mxu0 %vm380_vm1, %v3689_v16  ;;  %681 = vst.msk [vmem:[%s6586_s13 + $0xe8] sm:$0xff] %vm180_vm5, %v645_v8  ;;  %5959 = vmatprep.mubr.msk.bf16.mxu1 %vm380_vm1, %v3182_v58  ;;  %v4195_v58 = vor.u32 %v4194_v38, %v4191_v37  ;;  %v271_v16 = vld [vmem:[%s6586_s13 + $0x90] sm:$0xff]  ;;  %v4216_v4 = vshrl.u32 %v6239_v53, 16  ;;  %v4219_v14 = vshll.u32 %v6239_v53, 16  ;;  %v726_v37 = vld [vmem:[%s6586_s13 + $0x8] sm:$0xff] }
  0xfd   : > { %v7020_v63 = vor.u32 %v4203_v17, %v4200_v49  ;;  %v3695_v10 = vsel %vm3147_vm6, %v3692_v20, %v3694_v56  ;;  %v731_v49 = vld [vmem:[%s6586_s13 + $0x30] sm:$0xff]  ;;  %v729_v53 = vld [vmem:[%s6586_s13 + $0x20] sm:$0xff] }
  0xfe   : > { %v5751_v24 = vpop.f32.mrb[12].mxu0  ;;  %v5771_v30 = vpop.f32.mrb[12].mxu1  ;;  %v4196_v12 = vsel %vm4170_vm7, %v6972_v19, %v4195_v58 }
  0xff   : > { %v630_v29 = vadd.f32 %v5751_v24, %v267_v13  ;;  %v521_v31 = vpop.f32.mrb[13].mxu0  ;;  %v650_v55 = vadd.f32 %v5771_v30, %v287_v21  ;;  %v601_v40 = vpop.f32.mrb[13].mxu1  ;;  %v7032_v13 = vld [vmem:[%s6325_s23 + $0x20] sm:$0xff]   ;;  %v4209_v24 = vrot.slane %v4207_v59, 2  ;;  %v4818_v30 = vsel %vm4815_vm8, %v4816_v0, %v4817_v1  ;;  %v732_v0 = vld [vmem:[%s6586_s13 + $0x38] sm:$0xff] }
 0x100   : > { %v628_v39 = vadd.f32 %v521_v31, %v265_v22  ;;  %v5752_v41 = vpop.f32.mrb[14].mxu0  ;;  %v648_v45 = vadd.f32 %v601_v40, %v285_v25  ;;  %v5772_v47 = vpop.f32.mrb[14].mxu1  ;;  %v725_v22 = vld [vmem:[%s6586_s13] sm:$0xff]  ;;  %v4212_v25 = vrot.slane %v4210_v61, 3  ;;  %v7045_v31 = vld [vmem:[%s6325_s23 + $0x28] sm:$0xff]   ;;  %v7083_v61 = vld [vmem:[%s6325_s23 + $0x38] sm:$0xff]  }
 0x101   : > { %666 = vst.msk [vmem:[%s6586_s13 + $0x70] sm:$0xff] %vm180_vm5, %v630_v29  ;;  %v631_v46 = vadd.f32 %v5752_v41, %v268_v26  ;;  %v524_v48 = vpop.f32.mrb[15].mxu0  ;;  %686 = vst.msk [vmem:[%s6586_s13 + $0x110] sm:$0xff] %vm180_vm5, %v650_v55  ;;  %v651_v50 = vadd.f32 %v5772_v47, %v288_v32  ;;  %v604_v51 = vpop.f32.mrb[15].mxu1  ;;  %v4205_v29 = vsel %vm4170_vm7, %v4195_v58, %v7020_v63  ;;  %v6243_v32 = vld [vmem:[%s6325_s23 + $0x48] sm:$0xff]   ;;  %v4218_v55 = vrot.slane %v4216_v4, 2 }
 0x102   : > { %664 = vst.msk [vmem:[%s6586_s13 + $0x60] sm:$0xff] %vm180_vm5, %v628_v39  ;;  %v629_v57 = vadd.f32 %v524_v48, %v266_v35  ;;  %684 = vst.msk [vmem:[%s6586_s13 + $0x100] sm:$0xff] %vm180_vm5, %v648_v45  ;;  %v649_v54 = vadd.f32 %v604_v51, %v286_v42  ;;  %v4221_v39 = vrot.slane %v4219_v14, 3  ;;  %v4819_v41 = vrot.slane %v7032_v13, 3  ;;  %v6245_v51 = vld [vmem:[%s6325_s23 + $0x50] sm:$0xff]  }
 0x103   : > { %667 = vst.msk [vmem:[%s6586_s13 + $0x78] sm:$0xff] %vm180_vm5, %v631_v46  ;;  %5994 = vmatmul.mubr.msk.bf16.gmra.mrb[120].mxu0 %vm380_vm1, %v3691_v43  ;;  %687 = vst.msk [vmem:[%s6586_s13 + $0x118] sm:$0xff] %vm180_vm5, %v651_v50  ;;  %5960 = vmatmul.mubr.msk.bf16.gmra.mrb[120].mxu1 %vm380_vm1, %v3184_v36  ;;  %v4213_v42 = vor.u32 %v4212_v25, %v4209_v24  ;;  %v4225_v43 = vshrl.u32 %v6241_v60, 16  ;;  %v4821_v33 = vrot.slane %v7045_v31, 3  ;;  %v4234_v45 = vshrl.u32 %v6243_v32, 16 }
 0x104   : > { %665 = vst.msk [vmem:[%s6586_s13 + $0x68] sm:$0xff] %vm180_vm5, %v629_v57  ;;  %5997 = vmatprep.mubr.msk.bf16.mxu0 %vm380_vm1, %v3693_v15  ;;  %685 = vst.msk [vmem:[%s6586_s13 + $0x108] sm:$0xff] %vm180_vm5, %v649_v54  ;;  %6003 = vmatprep.mubr.msk.bf16.mxu1 %vm380_vm1, %v4187_v52  ;;  %v4228_v15 = vshll.u32 %v6241_v60, 16  ;;  %v4237_v46 = vshll.u32 %v6243_v32, 16  ;;  %v7069_v48 = vor.u32 %v4221_v39, %v4218_v55  ;;  %v7076_v57 = vld [vmem:[%s6325_s23 + $0x30] sm:$0xff]   ;;  %v4246_v24 = vshll.u32 %v6245_v51, 16 }
 0x105   : > { %v4820_v50 = vsel %vm4815_vm8, %v4817_v1, %v4819_v41  ;;  %v4214_v58 = vsel %vm4170_vm7, %v7020_v63, %v4213_v42  ;;  %v4236_v4 = vrot.slane %v4234_v45, 2 }
 0x106   : > { %v5755_v2 = vpop.f32.mrb[16].mxu0  ;;  %v5777_v7 = vpop.f32.mrb[16].mxu1  ;;  %v4230_v59 = vrot.slane %v4228_v15, 3  ;;  %v4239_v63 = vrot.slane %v4237_v46, 3  ;;  %v736_v46 = vld [vmem:[%s6586_s13 + $0x58] sm:$0xff] }
 0x107   : > { %v634_v5 = vadd.f32 %v5755_v2, %v271_v16  ;;  %v537_v8 = vpop.f32.mrb[17].mxu0  ;;  %v1241_v11 = vadd.f32 %v5777_v7, %v727_v6  ;;  %v1096_v23 = vpop.f32.mrb[17].mxu1  ;;  %v4227_v16 = vrot.slane %v4225_v43, 2  ;;  %v730_v7 = vld [vmem:[%s6586_s13 + $0x28] sm:$0xff]  ;;  %v6249_v43 = vld [vmem:[%s6325_s23 + $0x60] sm:$0xff]  }
 0x108   : > { %v632_v21 = vadd.f32 %v537_v8, %v269_v62  ;;  %v5756_v18 = vpop.f32.mrb[18].mxu0  ;;  %v1239_v20 = vadd.f32 %v1096_v23, %v725_v22  ;;  %v5778_v19 = vpop.f32.mrb[18].mxu1 }
 0x109   : > { %670 = vst.msk [vmem:[%s6586_s13 + $0x90] sm:$0xff] %vm180_vm5, %v634_v5  ;;  %v635_v26 = vadd.f32 %v5756_v18, %v272_v3  ;;  %v540_v28 = vpop.f32.mrb[19].mxu0  ;;  %1277 = vst.msk [vmem:[%s6586_s13 + $0x10] sm:$0xff] %vm180_vm5, %v1241_v11  ;;  %v1242_v35 = vadd.f32 %v5778_v19, %v728_v27  ;;  %v1099_v38 = vpop.f32.mrb[19].mxu1  ;;  %v4822_v3 = vsel %vm4815_vm8, %v4819_v41, %v4821_v33  ;;  %v4823_v18 = vrot.slane %v7076_v57, 3 }
 0x10a   : > { %668 = vst.msk [vmem:[%s6586_s13 + $0x80] sm:$0xff] %vm180_vm5, %v632_v21  ;;  %v633_v36 = vadd.f32 %v540_v28, %v270_v9  ;;  %1275 = vst.msk [vmem:[%s6586_s13] sm:$0xff] %vm180_vm5, %v1239_v20  ;;  %v1240_v40 = vadd.f32 %v1099_v38, %v726_v37  ;;  %v4223_v9 = vsel %vm4170_vm7, %v4213_v42, %v7069_v48  ;;  %v4243_v21 = vshrl.u32 %v6245_v51, 16  ;;  %v733_v38 = vld [vmem:[%s6586_s13 + $0x40] sm:$0xff]  ;;  %v7130_v42 = vld [vmem:[%s6325_s23 + $0x48] sm:$0xff]  }
 0x10b   : > { %671 = vst.msk [vmem:[%s6586_s13 + $0x98] sm:$0xff] %vm180_vm5, %v635_v26  ;;  %5998 = vmatmul.mubr.msk.bf16.gmra.mrb[124].mxu0 %vm380_vm1, %v3695_v10  ;;  %1278 = vst.msk [vmem:[%s6586_s13 + $0x18] sm:$0xff] %vm180_vm5, %v1242_v35  ;;  %6004 = vmatmul.mubr.msk.bf16.vlgmr.msra.gmra.mrb[124].mxu1 %vm380_vm1, %v4196_v12  ;;  %v6247_v10 = vld [vmem:[%s6325_s23 + $0x58] sm:$0xff]   ;;  %v4231_v60 = vor.u32 %v4230_v59, %v4227_v16  ;;  %v7114_v20 = vor.u32 %v4239_v63, %v4236_v4  ;;  %v4825_v26 = vrot.slane %v7083_v61, 3 }
 0x10c   : > { %669 = vst.msk [vmem:[%s6586_s13 + $0x88] sm:$0xff] %vm180_vm5, %v633_v36  ;;  %6041 = vmatprep.mubr.msk.bf16.mxu0 %vm380_vm1, %v4818_v30  ;;  %1276 = vst.msk [vmem:[%s6586_s13 + $0x8] sm:$0xff] %vm180_vm5, %v1240_v40  ;;  %6007 = vmatprep.mubr.msk.bf16.mxu1 %vm380_vm1, %v4205_v29  ;;  %v4252_v19 = vshrl.u32 %v6247_v10, 16  ;;  %v4255_v28 = vshll.u32 %v6247_v10, 16  ;;  %v735_v29 = vld [vmem:[%s6586_s13 + $0x50] sm:$0xff]  ;;  %v4245_v35 = vrot.slane %v4243_v21, 2  ;;  %v4824_v40 = vsel %vm4815_vm8, %v4821_v33, %v4823_v18 }
 0x10d   : > { %v7123_v36 = vld [vmem:[%s6325_s23 + $0x40] sm:$0xff]   ;;  %v4248_v41 = vrot.slane %v4246_v24, 3  ;;  %v4241_v31 = vsel %vm4170_vm7, %v4231_v60, %v7114_v20  ;;  %v4826_v33 = vsel %vm4815_vm8, %v4823_v18, %v4825_v26  ;;  %v4829_v4 = vrot.slane %v7130_v42, 3 }
 0x10e   : > { %v5815_v47 = vpop.f32.mrb[20].mxu0  ;;  %v5781_v17 = vpop.f32.mrb[20].mxu1  ;;  %v4827_v59 = vrot.slane %v7123_v36, 3  ;;  %v737_v21 = vld [vmem:[%s6586_s13 + $0x60] sm:$0xff] }
 0x10f   : > { %v1608_v34 = vpop.f32.mrb[21].mxu0  ;;  %v1245_v52 = vadd.f32 %v5781_v17, %v731_v49  ;;  %v1112_v54 = vpop.f32.mrb[21].mxu1  ;;  %v4232_v17 = vsel %vm4170_vm7, %v7069_v48, %v4231_v60  ;;  %v4257_v48 = vrot.slane %v4255_v28, 3  ;;  %v7183_v60 = vld [vmem:[%s6325_s23 + $0x58] sm:$0xff]  }
 0x110   : > { %v5816_v56 = vpop.f32.mrb[22].mxu0  ;;  %v1350_v44 = vld [vmem:[%s6586_s13 + $0x10] sm:$0xff]  ;;  %v1243_v62 = vadd.f32 %v1112_v54, %v729_v53  ;;  %v5782_v1 = vpop.f32.mrb[22].mxu1  ;;  %v4254_v54 = vrot.slane %v4252_v19, 2  ;;  %v4828_v10 = vsel %vm4815_vm8, %v4825_v26, %v4827_v59 }
 0x111   : > { %v1611_v2 = vpop.f32.mrb[23].mxu0  ;;  %1281 = vst.msk [vmem:[%s6586_s13 + $0x30] sm:$0xff] %vm180_vm5, %v1245_v52  ;;  %v1753_v14 = vadd.f32 %v5815_v47, %v1350_v44  ;;  %v1348_v5 = vld [vmem:[%s6586_s13] sm:$0xff]  ;;  %v1246_v6 = vadd.f32 %v5782_v1, %v732_v0  ;;  %v1115_v8 = vpop.f32.mrb[23].mxu1  ;;  %v734_v52 = vld [vmem:[%s6586_s13 + $0x48] sm:$0xff]  ;;  %v4249_v0 = vor.u32 %v4248_v41, %v4245_v35  ;;  %v4261_v1 = vshrl.u32 %v6249_v43, 16 }
 0x112   : > { %1279 = vst.msk [vmem:[%s6586_s13 + $0x20] sm:$0xff] %vm180_vm5, %v1243_v62  ;;  %v1751_v12 = vadd.f32 %v1608_v34, %v1348_v5  ;;  %v1351_v13 = vld [vmem:[%s6586_s13 + $0x18] sm:$0xff]  ;;  %v1244_v11 = vadd.f32 %v1115_v8, %v730_v7  ;;  %v6251_v34 = vld [vmem:[%s6325_s23 + $0x68] sm:$0xff]   ;;  %v739_v7 = vld [vmem:[%s6586_s13 + $0x70] sm:$0xff] }
 0x113   : > { %6042 = vmatmul.mubr.msk.bf16.vlgmr.msra.gmra.mrb[128].mxu0 %vm380_vm1, %v4820_v50  ;;  %1789 = vst.msk [vmem:[%s6586_s13 + $0x10] sm:$0xff] %vm180_vm5, %v1753_v14  ;;  %1282 = vst.msk [vmem:[%s6586_s13 + $0x38] sm:$0xff] %vm180_vm5, %v1246_v6  ;;  %v1754_v22 = vadd.f32 %v5816_v56, %v1351_v13  ;;  %v1349_v23 = vld [vmem:[%s6586_s13 + $0x8] sm:$0xff]  ;;  %6008 = vmatmul.mubr.msk.bf16.gmra.mrb[128].mxu1 %vm380_vm1, %v4214_v58  ;;  %v4270_v63 = vshrl.u32 %v6251_v34, 16  ;;  %v4273_v14 = vshll.u32 %v6251_v34, 16  ;;  %v6253_v13 = vld [vmem:[%s6325_s23 + $0x70] sm:$0xff]  }
 0x114   : > { %6045 = vmatprep.mubr.msk.bf16.mxu0 %vm380_vm1, %v4822_v3  ;;  %1787 = vst.msk [vmem:[%s6586_s13] sm:$0xff] %vm180_vm5, %v1751_v12  ;;  %1280 = vst.msk [vmem:[%s6586_s13 + $0x28] sm:$0xff] %vm180_vm5, %v1244_v11  ;;  %v1752_v25 = vadd.f32 %v1611_v2, %v1349_v23  ;;  %6011 = vmatprep.mubr.msk.bf16.mxu1 %vm380_vm1, %v4223_v9  ;;  %v4264_v2 = vshll.u32 %v6249_v43, 16  ;;  %v7167_v6 = vor.u32 %v4257_v48, %v4254_v54  ;;  %v7176_v12 = vld [vmem:[%s6325_s23 + $0x50] sm:$0xff]  }
 0x115   : > { %1790 = vst.msk [vmem:[%s6586_s13 + $0x18] sm:$0xff] %vm180_vm5, %v1754_v22  ;;  %v4250_v18 = vsel %vm4170_vm7, %v7114_v20, %v4249_v0  ;;  %v4263_v24 = vrot.slane %v4261_v1, 2  ;;  %v4275_v20 = vrot.slane %v4273_v14, 3  ;;  %v4833_v34 = vrot.slane %v7183_v60, 3  ;;  %v7230_v1 = vld [vmem:[%s6325_s23 + $0x68] sm:$0xff]   ;;  %v744_v14 = vld [vmem:[%s6586_s13 + $0x98] sm:$0xff] }
 0x116   : > { %v5819_v27 = vpop.f32.mrb[24].mxu0  ;;  %1788 = vst.msk [vmem:[%s6586_s13 + $0x8] sm:$0xff] %vm180_vm5, %v1752_v25  ;;  %v5785_v30 = vpop.f32.mrb[24].mxu1  ;;  %v4266_v25 = vrot.slane %v4264_v2, 3  ;;  %v6257_v2 = vld [vmem:[%s6325_s23 + $0x80] sm:$0xff]  }
 0x117   : > { %v1624_v32 = vpop.f32.mrb[25].mxu0  ;;  %v1249_v37 = vadd.f32 %v5785_v30, %v735_v29  ;;  %v1128_v55 = vpop.f32.mrb[25].mxu1  ;;  %v4830_v29 = vsel %vm4815_vm8, %v4827_v59, %v4829_v4  ;;  %v4272_v30 = vrot.slane %v4270_v63, 2 }
 0x118   : > { %v5820_v39 = vpop.f32.mrb[26].mxu0  ;;  %v1354_v15 = vld [vmem:[%s6586_s13 + $0x30] sm:$0xff]  ;;  %v1247_v45 = vadd.f32 %v1128_v55, %v733_v38  ;;  %v5786_v47 = vpop.f32.mrb[26].mxu1  ;;  %v4259_v55 = vsel %vm4170_vm7, %v4249_v0, %v7167_v6 }
 0x119   : > { %v1627_v49 = vpop.f32.mrb[27].mxu0  ;;  %1285 = vst.msk [vmem:[%s6586_s13 + $0x50] sm:$0xff] %vm180_vm5, %v1249_v37  ;;  %v1757_v50 = vadd.f32 %v5819_v27, %v1354_v15  ;;  %v1352_v57 = vld [vmem:[%s6586_s13 + $0x20] sm:$0xff]  ;;  %v1250_v51 = vadd.f32 %v5786_v47, %v736_v46  ;;  %v1131_v53 = vpop.f32.mrb[27].mxu1  ;;  %v740_v27 = vld [vmem:[%s6586_s13 + $0x78] sm:$0xff]  ;;  %v738_v37 = vld [vmem:[%s6586_s13 + $0x68] sm:$0xff] }
 0x11a   : > { %1283 = vst.msk [vmem:[%s6586_s13 + $0x40] sm:$0xff] %vm180_vm5, %v1247_v45  ;;  %v1755_v56 = vadd.f32 %v1624_v32, %v1352_v57  ;;  %v1355_v58 = vld [vmem:[%s6586_s13 + $0x38] sm:$0xff]  ;;  %v1248_v16 = vadd.f32 %v1131_v53, %v734_v52  ;;  %v4279_v15 = vshrl.u32 %v6253_v13, 16  ;;  %v4831_v47 = vrot.slane %v7176_v12, 3  ;;  %v743_v52 = vld [vmem:[%s6586_s13 + $0x90] sm:$0xff] }
 0x11b   : > { %6046 = vmatmul.mubr.msk.bf16.gmra.mrb[132].mxu0 %vm380_vm1, %v4824_v40  ;;  %1793 = vst.msk [vmem:[%s6586_s13 + $0x30] sm:$0xff] %vm180_vm5, %v1757_v50  ;;  %1286 = vst.msk [vmem:[%s6586_s13 + $0x58] sm:$0xff] %vm180_vm5, %v1250_v51  ;;  %v1758_v44 = vadd.f32 %v5820_v39, %v1355_v58  ;;  %v1353_v62 = vld [vmem:[%s6586_s13 + $0x28] sm:$0xff]  ;;  %6012 = vmatmul.mubr.msk.bf16.gmra.mrb[132].mxu1 %vm380_vm1, %v4232_v17  ;;  %v6255_v39 = vld [vmem:[%s6325_s23 + $0x78] sm:$0xff]  }
 0x11c   : > { %6049 = vmatprep.mubr.msk.bf16.mxu0 %vm380_vm1, %v4826_v33  ;;  %1791 = vst.msk [vmem:[%s6586_s13 + $0x20] sm:$0xff] %vm180_vm5, %v1755_v56  ;;  %1284 = vst.msk [vmem:[%s6586_s13 + $0x48] sm:$0xff] %vm180_vm5, %v1248_v16  ;;  %v1756_v3 = vadd.f32 %v1627_v49, %v1353_v62  ;;  %6015 = vmatprep.mubr.msk.bf16.mxu1 %vm380_vm1, %v4241_v31  ;;  %v4282_v49 = vshll.u32 %v6253_v13, 16  ;;  %v4267_v31 = vor.u32 %v4266_v25, %v4263_v24  ;;  %v7223_v56 = vld [vmem:[%s6325_s23 + $0x60] sm:$0xff]  }
 0x11d   : > { %1794 = vst.msk [vmem:[%s6586_s13 + $0x38] sm:$0xff] %vm180_vm5, %v1758_v44  ;;  %v7214_v33 = vor.u32 %v4275_v20, %v4272_v30  ;;  %v4288_v57 = vshrl.u32 %v6255_v39, 16  ;;  %v4291_v51 = vshll.u32 %v6255_v39, 16  ;;  %v4281_v48 = vrot.slane %v4279_v15, 2  ;;  %v741_v16 = vld [vmem:[%s6586_s13 + $0x80] sm:$0xff] }
 0x11e   : > { %v5823_v5 = vpop.f32.mrb[28].mxu0  ;;  %1792 = vst.msk [vmem:[%s6586_s13 + $0x28] sm:$0xff] %vm180_vm5, %v1756_v3  ;;  %v5789_v8 = vpop.f32.mrb[28].mxu1  ;;  %v4832_v62 = vsel %vm4815_vm8, %v4829_v4, %v4831_v47  ;;  %v4284_v0 = vrot.slane %v4282_v49, 3  ;;  %v4834_v4 = vsel %vm4815_vm8, %v4831_v47, %v4833_v34  ;;  %v4835_v25 = vrot.slane %v7223_v56, 3  ;;  %v745_v15 = vld [vmem:[%s6586_s13 + $0xa0] sm:$0xff] }
 0x11f   : > { %v1640_v9 = vpop.f32.mrb[29].mxu0  ;;  %v1253_v11 = vadd.f32 %v5789_v8, %v739_v7  ;;  %v1144_v22 = vpop.f32.mrb[29].mxu1  ;;  %v4268_v8 = vsel %vm4170_vm7, %v7167_v6, %v4267_v31  ;;  %v4277_v42 = vsel %vm4170_vm7, %v4267_v31, %v7214_v33  ;;  %v4293_v6 = vrot.slane %v4291_v51, 3  ;;  %v7283_v31 = vld [vmem:[%s6325_s23 + $0x78] sm:$0xff]  }
 0x120   : > { %v5824_v23 = vpop.f32.mrb[30].mxu0  ;;  %v1358_v61 = vld [vmem:[%s6586_s13 + $0x50] sm:$0xff]  ;;  %v1251_v26 = vadd.f32 %v1144_v22, %v737_v21  ;;  %v5790_v19 = vpop.f32.mrb[30].mxu1  ;;  %v4290_v22 = vrot.slane %v4288_v57, 2  ;;  %v4837_v30 = vrot.slane %v7230_v1, 3  ;;  %v4836_v39 = vsel %vm4815_vm8, %v4833_v34, %v4835_v25 }
 0x121   : > { %v1643_v28 = vpop.f32.mrb[31].mxu0  ;;  %1289 = vst.msk [vmem:[%s6586_s13 + $0x70] sm:$0xff] %vm180_vm5, %v1253_v11  ;;  %v1761_v32 = vadd.f32 %v5823_v5, %v1358_v61  ;;  %v1356_v35 = vld [vmem:[%s6586_s13 + $0x40] sm:$0xff]  ;;  %v1254_v36 = vadd.f32 %v5790_v19, %v740_v27  ;;  %v1147_v38 = vpop.f32.mrb[31].mxu1  ;;  %v742_v11 = vld [vmem:[%s6586_s13 + $0x88] sm:$0xff]  ;;  %v4285_v27 = vor.u32 %v4284_v0, %v4281_v48  ;;  %v4297_v19 = vshrl.u32 %v6257_v2, 16 }
 0x122   : > { %1287 = vst.msk [vmem:[%s6586_s13 + $0x60] sm:$0xff] %vm180_vm5, %v1251_v26  ;;  %v1759_v40 = vadd.f32 %v1640_v9, %v1356_v35  ;;  %v1359_v41 = vld [vmem:[%s6586_s13 + $0x58] sm:$0xff]  ;;  %v1252_v43 = vadd.f32 %v1147_v38, %v738_v37  ;;  %v6259_v9 = vld [vmem:[%s6325_s23 + $0x88] sm:$0xff]   ;;  %v747_v37 = vld [vmem:[%s6586_s13 + $0xb0] sm:$0xff] }
 0x123   : > { %6050 = vmatmul.mubr.msk.bf16.gmra.mrb[136].mxu0 %vm380_vm1, %v4828_v10  ;;  %1797 = vst.msk [vmem:[%s6586_s13 + $0x50] sm:$0xff] %vm180_vm5, %v1761_v32  ;;  %1290 = vst.msk [vmem:[%s6586_s13 + $0x78] sm:$0xff] %vm180_vm5, %v1254_v36  ;;  %v1762_v45 = vadd.f32 %v5824_v23, %v1359_v41  ;;  %v1357_v46 = vld [vmem:[%s6586_s13 + $0x48] sm:$0xff]  ;;  %6016 = vmatmul.mubr.msk.bf16.gmra.mrb[136].mxu1 %vm380_vm1, %v4250_v18  ;;  %v4306_v20 = vshrl.u32 %v6259_v9, 16  ;;  %v4309_v32 = vshll.u32 %v6259_v9, 16  ;;  %v6261_v41 = vld [vmem:[%s6325_s23 + $0x90] sm:$0xff]  }
 0x124   : > { %6053 = vmatprep.mubr.msk.bf16.mxu0 %vm380_vm1, %v4830_v29  ;;  %1795 = vst.msk [vmem:[%s6586_s13 + $0x40] sm:$0xff] %vm180_vm5, %v1759_v40  ;;  %1288 = vst.msk [vmem:[%s6586_s13 + $0x68] sm:$0xff] %vm180_vm5, %v1252_v43  ;;  %v1760_v17 = vadd.f32 %v1643_v28, %v1357_v46  ;;  %6019 = vmatprep.mubr.msk.bf16.mxu1 %vm380_vm1, %v4259_v55  ;;  %v4300_v28 = vshll.u32 %v6257_v2, 16  ;;  %v7267_v36 = vor.u32 %v4293_v6, %v4290_v22  ;;  %v7276_v40 = vld [vmem:[%s6325_s23 + $0x70] sm:$0xff]  }
 0x125   : > { %1798 = vst.msk [vmem:[%s6586_s13 + $0x58] sm:$0xff] %vm180_vm5, %v1762_v45  ;;  %v4286_v47 = vsel %vm4170_vm7, %v7214_v33, %v4285_v27  ;;  %v4299_v49 = vrot.slane %v4297_v19, 2  ;;  %v4841_v9 = vrot.slane %v7283_v31, 3  ;;  %v6265_v19 = vld [vmem:[%s6325_s23 + $0xa0] ss:$0 sps:$4 sm:$0x77]  }
 0x126   : > { %v5827_v50 = vpop.f32.mrb[32].mxu0  ;;  %1796 = vst.msk [vmem:[%s6586_s13 + $0x48] sm:$0xff] %vm180_vm5, %v1760_v17  ;;  %v5793_v53 = vpop.f32.mrb[32].mxu1  ;;  %v4302_v17 = vrot.slane %v4300_v28, 3 }
 0x127   : > { %v1656_v54 = vpop.f32.mrb[33].mxu0  ;;  %v1257_v58 = vadd.f32 %v5793_v53, %v743_v52  ;;  %v1160_v59 = vpop.f32.mrb[33].mxu1  ;;  %v4838_v52 = vsel %vm4815_vm8, %v4835_v25, %v4837_v30  ;;  %v4308_v53 = vrot.slane %v4306_v20, 2  ;;  %v749_v25 = vld [vmem:[%s6586_s13 + $0xc0] sm:$0xff]  ;;  %v752_v20 = vld [vmem:[%s6586_s13 + $0xd8] sm:$0xff] }
 0x128   : > { %v5828_v44 = vpop.f32.mrb[34].mxu0  ;;  %v1362_v3 = vld [vmem:[%s6586_s13 + $0x70] sm:$0xff]  ;;  %v1255_v63 = vadd.f32 %v1160_v59, %v741_v16  ;;  %v5794_v5 = vpop.f32.mrb[34].mxu1  ;;  %v4295_v59 = vsel %vm4170_vm7, %v4285_v27, %v7267_v36 }
 0x129   : > { %v1659_v7 = vpop.f32.mrb[35].mxu0  ;;  %1293 = vst.msk [vmem:[%s6586_s13 + $0x90] sm:$0xff] %vm180_vm5, %v1257_v58  ;;  %v1765_v10 = vadd.f32 %v5827_v50, %v1362_v3  ;;  %v1360_v12 = vld [vmem:[%s6586_s13 + $0x60] sm:$0xff]  ;;  %v1258_v13 = vadd.f32 %v5794_v5, %v744_v14  ;;  %v1163_v21 = vpop.f32.mrb[35].mxu1  ;;  %v748_v50 = vld [vmem:[%s6586_s13 + $0xb8] sm:$0xff]  ;;  %v746_v58 = vld [vmem:[%s6586_s13 + $0xa8] sm:$0xff] }
 0x12a   : > { %1291 = vst.msk [vmem:[%s6586_s13 + $0x80] sm:$0xff] %vm180_vm5, %v1255_v63  ;;  %v1763_v23 = vadd.f32 %v1656_v54, %v1360_v12  ;;  %v1363_v18 = vld [vmem:[%s6586_s13 + $0x78] sm:$0xff]  ;;  %v1256_v24 = vadd.f32 %v1163_v21, %v742_v11  ;;  %v4311_v54 = vrot.slane %v4309_v32, 3  ;;  %v4315_v3 = vshrl.u32 %v6261_v41, 16  ;;  %v751_v11 = vld [vmem:[%s6586_s13 + $0xd0] sm:$0xff] }
 0x12b   : > { %6054 = vmatmul.mubr.msk.bf16.gmra.mrb[140].mxu0 %vm380_vm1, %v4832_v62  ;;  %1801 = vst.msk [vmem:[%s6586_s13 + $0x70] sm:$0xff] %vm180_vm5, %v1765_v10  ;;  %1294 = vst.msk [vmem:[%s6586_s13 + $0x98] sm:$0xff] %vm180_vm5, %v1258_v13  ;;  %v1766_v61 = vadd.f32 %v5828_v44, %v1363_v18  ;;  %v1361_v26 = vld [vmem:[%s6586_s13 + $0x68] sm:$0xff]  ;;  %6020 = vmatmul.mubr.msk.bf16.gmra.mrb[140].mxu1 %vm380_vm1, %v4268_v8  ;;  %v6263_v44 = vld [vmem:[%s6325_s23 + $0x98] sm:$0xff]   ;;  %v4318_v63 = vshll.u32 %v6261_v41, 16 }
 0x12c   : > { %6057 = vmatprep.mubr.msk.bf16.mxu0 %vm380_vm1, %v4834_v4  ;;  %1799 = vst.msk [vmem:[%s6586_s13 + $0x60] sm:$0xff] %vm180_vm5, %v1763_v23  ;;  %1292 = vst.msk [vmem:[%s6586_s13 + $0x88] sm:$0xff] %vm180_vm5, %v1256_v24  ;;  %v1764_v29 = vadd.f32 %v1659_v7, %v1361_v26  ;;  %6023 = vmatprep.mubr.msk.bf16.mxu1 %vm380_vm1, %v4277_v42  ;;  %v4839_v7 = vrot.slane %v7276_v40, 3  ;;  %v4303_v42 = vor.u32 %v4302_v17, %v4299_v49  ;;  %v7323_v18 = vld [vmem:[%s6325_s23 + $0x80] sm:$0xff]   ;;  %v750_v41 = vld [vmem:[%s6586_s13 + $0xc8] sm:$0xff] }
 0x12d   : > { %1802 = vst.msk [vmem:[%s6586_s13 + $0x78] sm:$0xff] %vm180_vm5, %v1766_v61  ;;  %v7314_v4 = vor.u32 %v4311_v54, %v4308_v53  ;;  %v4324_v12 = vshrl.u32 %v6263_v44, 16  ;;  %v4327_v13 = vshll.u32 %v6263_v44, 16  ;;  %v4317_v6 = vrot.slane %v4315_v3, 2  ;;  %v7379_v3 = vld [vmem:[%s6325_s23 + $0x98] sm:$0xff]  }
 0x12e   : > { %v5831_v35 = vpop.f32.mrb[36].mxu0  ;;  %1800 = vst.msk [vmem:[%s6586_s13 + $0x68] sm:$0xff] %vm180_vm5, %v1764_v29  ;;  %v5797_v38 = vpop.f32.mrb[36].mxu1  ;;  %v4320_v23 = vrot.slane %v4318_v63, 3  ;;  %v4840_v27 = vsel %vm4815_vm8, %v4837_v30, %v4839_v7  ;;  %v4842_v1 = vsel %vm4815_vm8, %v4839_v7, %v4841_v9  ;;  %v7340_v30 = vld [vmem:[%s6325_s23 + $0x88] sm:$0xff]  }
 0x12f   : > { %v1672_v55 = vpop.f32.mrb[37].mxu0  ;;  %v1261_v43 = vadd.f32 %v5797_v38, %v747_v37  ;;  %v1176_v45 = vpop.f32.mrb[37].mxu1  ;;  %v4304_v37 = vsel %vm4170_vm7, %v7267_v36, %v4303_v42  ;;  %v4313_v38 = vsel %vm4170_vm7, %v4303_v42, %v7314_v4  ;;  %v4326_v36 = vrot.slane %v4324_v12, 2 }
 0x130   : > { %v5832_v46 = vpop.f32.mrb[38].mxu0  ;;  %v1366_v60 = vld [vmem:[%s6586_s13 + $0x90] sm:$0xff]  ;;  %v1259_v34 = vadd.f32 %v1176_v45, %v745_v15  ;;  %v5798_v57 = vpop.f32.mrb[38].mxu1  ;;  %v4329_v15 = vrot.slane %v4327_v13, 3  ;;  %v754_v13 = vld [vmem:[%s6586_s13 + $0xe8] sm:$0xff] }
 0x131   : > { %v1675_v51 = vpop.f32.mrb[39].mxu0  ;;  %1297 = vst.msk [vmem:[%s6586_s13 + $0xb0] sm:$0xff] %vm180_vm5, %v1261_v43  ;;  %v1769_v33 = vadd.f32 %v5831_v35, %v1366_v60  ;;  %v1364_v48 = vld [vmem:[%s6586_s13 + $0x80] sm:$0xff]  ;;  %v1262_v56 = vadd.f32 %v5798_v57, %v748_v50  ;;  %v1179_v16 = vpop.f32.mrb[39].mxu1  ;;  %v4321_v60 = vor.u32 %v4320_v23, %v4317_v6  ;;  %v4845_v57 = vrot.slane %v7340_v30, 3 }
 0x132   : > { %1295 = vst.msk [vmem:[%s6586_s13 + $0xa0] sm:$0xff] %vm180_vm5, %v1259_v34  ;;  %v1767_v62 = vadd.f32 %v1672_v55, %v1364_v48  ;;  %v1367_v0 = vld [vmem:[%s6586_s13 + $0x98] sm:$0xff]  ;;  %v1260_v2 = vadd.f32 %v1179_v16, %v746_v58  ;;  %v4843_v34 = vrot.slane %v7323_v18, 3  ;;  %v7366_v54 = vor.u32 %v4329_v15, %v4326_v36  ;;  %v753_v16 = vld [vmem:[%s6586_s13 + $0xe0] sm:$0xff] }
 0x133   : > { %6058 = vmatmul.mubr.msk.bf16.gmra.mrb[144].mxu0 %vm380_vm1, %v4836_v39  ;;  %1805 = vst.msk [vmem:[%s6586_s13 + $0x90] sm:$0xff] %vm180_vm5, %v1769_v33  ;;  %1298 = vst.msk [vmem:[%s6586_s13 + $0xb8] sm:$0xff] %vm180_vm5, %v1262_v56  ;;  %v1770_v14 = vadd.f32 %v5832_v46, %v1367_v0  ;;  %v1365_v5 = vld [vmem:[%s6586_s13 + $0x88] sm:$0xff]  ;;  %6024 = vmatmul.mubr.msk.bf16.gmra.mrb[144].mxu1 %vm380_vm1, %v4286_v47  ;;  %v755_v33 = vld [vmem:[%s6586_s13 + $0xf0] sm:$0xff] }
 0x134   : > { %6061 = vmatprep.mubr.msk.bf16.mxu0 %vm380_vm1, %v4838_v52  ;;  %1803 = vst.msk [vmem:[%s6586_s13 + $0x80] sm:$0xff] %vm180_vm5, %v1767_v62  ;;  %1296 = vst.msk [vmem:[%s6586_s13 + $0xa8] sm:$0xff] %vm180_vm5, %v1260_v2  ;;  %v1768_v8 = vadd.f32 %v1675_v51, %v1365_v5  ;;  %6027 = vmatprep.mubr.msk.bf16.mxu1 %vm380_vm1, %v4295_v59  ;;  %v4333_v51 = vshrl.u32 %v6265_v19, 16  ;;  %v4336_v52 = vshll.u32 %v6265_v19, 16  ;;  %v6266_v2 = vld [vmem:[%s6325_s23 + $0x90] sm:$0xff]   ;;  %v756_v5 = vld [vmem:[%s6586_s13 + $0xf8] sm:$0xff] }
 0x135   : > { %1806 = vst.msk [vmem:[%s6586_s13 + $0x98] sm:$0xff] %vm180_vm5, %v1770_v14  ;;  %v4322_v62 = vsel %vm4170_vm7, %v7314_v4, %v4321_v60  ;;  %v4844_v0 = vsel %vm4815_vm8, %v4841_v9, %v4843_v34  ;;  %v4846_v42 = vsel %vm4815_vm8, %v4843_v34, %v4845_v57  ;;  %v6268_v30 = vld [vmem:[%s6325_s23 + $0xa0] ss:$0 sps:$4 sm:$0x77]  }
 0x136   : > { %v5835_v10 = vpop.f32.mrb[40].mxu0  ;;  %1804 = vst.msk [vmem:[%s6586_s13 + $0x88] sm:$0xff] %vm180_vm5, %v1768_v8  ;;  %v5801_v21 = vpop.f32.mrb[40].mxu1  ;;  %v4335_v4 = vrot.slane %v4333_v51, 2 }
 0x137   : > { %v1688_v22 = vpop.f32.mrb[41].mxu0  ;;  %v1265_v24 = vadd.f32 %v5801_v21, %v751_v11  ;;  %v1192_v61 = vpop.f32.mrb[41].mxu1  ;;  %v4331_v21 = vsel %vm4170_vm7, %v4321_v60, %v7366_v54 }
 0x138   : > { %v5836_v26 = vpop.f32.mrb[42].mxu0  ;;  %v1370_v28 = vld [vmem:[%s6586_s13 + $0xb0] sm:$0xff]  ;;  %v1263_v29 = vadd.f32 %v1192_v61, %v749_v25  ;;  %v5802_v32 = vpop.f32.mrb[42].mxu1  ;;  %v4847_v25 = vrot.slane %v6266_v2, 3 }
 0x139   : > { %v1691_v35 = vpop.f32.mrb[43].mxu0  ;;  %1301 = vst.msk [vmem:[%s6586_s13 + $0xd0] sm:$0xff] %vm180_vm5, %v1265_v24  ;;  %v1773_v55 = vadd.f32 %v5835_v10, %v1370_v28  ;;  %v1368_v39 = vld [vmem:[%s6586_s13 + $0xa0] sm:$0xff]  ;;  %v1266_v40 = vadd.f32 %v5802_v32, %v752_v20  ;;  %v1195_v43 = vpop.f32.mrb[43].mxu1  ;;  %v4338_v10 = vrot.slane %v4336_v52, 3  ;;  %v759_v28 = vld [vmem:[%s6586_s13 + $0x110] sm:$0xff] }
 0x13a   : > { %1299 = vst.msk [vmem:[%s6586_s13 + $0xc0] sm:$0xff] %vm180_vm5, %v1263_v29  ;;  %v1771_v45 = vadd.f32 %v1688_v22, %v1368_v39  ;;  %v1371_v46 = vld [vmem:[%s6586_s13 + $0xb8] sm:$0xff]  ;;  %v1264_v47 = vadd.f32 %v1195_v43, %v750_v41  ;;  %v4851_v52 = vrot.slane %v6268_v30, 3 }
 0x13b   : > { %6062 = vmatmul.mubr.msk.bf16.gmra.mrb[148].mxu0 %vm380_vm1, %v4840_v27  ;;  %1809 = vst.msk [vmem:[%s6586_s13 + $0xb0] sm:$0xff] %vm180_vm5, %v1773_v55  ;;  %1302 = vst.msk [vmem:[%s6586_s13 + $0xd8] sm:$0xff] %vm180_vm5, %v1266_v40  ;;  %v1774_v49 = vadd.f32 %v5836_v26, %v1371_v46  ;;  %v1369_v17 = vld [vmem:[%s6586_s13 + $0xa8] sm:$0xff]  ;;  %6028 = vmatmul.mubr.msk.bf16.gmra.mrb[148].mxu1 %vm380_vm1, %v4304_v37  ;;  %v4339_v26 = vor.u32 %v4338_v10, %v4335_v4  ;;  %v4849_v27 = vrot.slane %v7379_v3, 3  ;;  %v760_v40 = vld [vmem:[%s6586_s13 + $0x118] sm:$0xff] }
 0x13c   : > { %6065 = vmatprep.mubr.msk.bf16.mxu0 %vm380_vm1, %v4842_v1  ;;  %1807 = vst.msk [vmem:[%s6586_s13 + $0xa0] sm:$0xff] %vm180_vm5, %v1771_v45  ;;  %1300 = vst.msk [vmem:[%s6586_s13 + $0xc8] sm:$0xff] %vm180_vm5, %v1264_v47  ;;  %v1772_v50 = vadd.f32 %v1691_v35, %v1369_v17  ;;  %6031 = vmatprep.mubr.msk.bf16.mxu1 %vm380_vm1, %v4313_v38  ;;  %v757_v35 = vld [vmem:[%s6586_s13 + $0x100] sm:$0xff]  ;;  %v4848_v1 = vsel %vm4815_vm8, %v4845_v57, %v4847_v25  ;;  %v1863_v3 = vld [vmem:[%s6586_s13 + $0x18] sm:$0xff] }
 0x13d   : > { %1810 = vst.msk [vmem:[%s6586_s13 + $0xb8] sm:$0xff] %vm180_vm5, %v1774_v49  ;;  %v4340_v36 = vsel %vm4170_vm7, %v7366_v54, %v4339_v26  ;;  %v4850_v15 = vsel %vm4815_vm8, %v4847_v25, %v4849_v27  ;;  %v758_v49 = vld [vmem:[%s6586_s13 + $0x108] sm:$0xff] }
 0x13e   : > { %v5839_v53 = vpop.f32.mrb[44].mxu0  ;;  %1808 = vst.msk [vmem:[%s6586_s13 + $0xa8] sm:$0xff] %vm180_vm5, %v1772_v50  ;;  %v5805_v48 = vpop.f32.mrb[44].mxu1 }
 0x13f   : > { %v1704_v56 = vpop.f32.mrb[45].mxu0  ;;  %v1269_v58 = vadd.f32 %v5805_v48, %v755_v33  ;;  %v1208_v59 = vpop.f32.mrb[45].mxu1  ;;  %v1862_v33 = vld [vmem:[%s6586_s13 + $0x10] sm:$0xff] }
 0x140   : > { %v5840_v44 = vpop.f32.mrb[46].mxu0  ;;  %v1374_v63 = vld [vmem:[%s6586_s13 + $0xd0] sm:$0xff]  ;;  %v1267_v14 = vadd.f32 %v1208_v59, %v753_v16  ;;  %v5806_v7 = vpop.f32.mrb[46].mxu1  ;;  %v1860_v16 = vld [vmem:[%s6586_s13] sm:$0xff] }
 0x141   : > { %v1707_v8 = vpop.f32.mrb[47].mxu0  ;;  %1305 = vst.msk [vmem:[%s6586_s13 + $0xf0] sm:$0xff] %vm180_vm5, %v1269_v58  ;;  %v1777_v31 = vadd.f32 %v5839_v53, %v1374_v63  ;;  %v1372_v9 = vld [vmem:[%s6586_s13 + $0xc0] sm:$0xff]  ;;  %v1270_v12 = vadd.f32 %v5806_v7, %v756_v5  ;;  %v1211_v11 = vpop.f32.mrb[47].mxu1 }
 0x142   : > { %1303 = vst.msk [vmem:[%s6586_s13 + $0xe0] sm:$0xff] %vm180_vm5, %v1267_v14  ;;  %v1775_v22 = vadd.f32 %v1704_v56, %v1372_v9  ;;  %v1375_v6 = vld [vmem:[%s6586_s13 + $0xd8] sm:$0xff]  ;;  %v1268_v23 = vadd.f32 %v1211_v11, %v754_v13 }
 0x143   : > { %6066 = vmatmul.mubr.msk.bf16.gmra.mrb[152].mxu0 %vm380_vm1, %v4844_v0  ;;  %1813 = vst.msk [vmem:[%s6586_s13 + $0xd0] sm:$0xff] %vm180_vm5, %v1777_v31  ;;  %1306 = vst.msk [vmem:[%s6586_s13 + $0xf8] sm:$0xff] %vm180_vm5, %v1270_v12  ;;  %v1778_v18 = vadd.f32 %v5840_v44, %v1375_v6  ;;  %v1373_v24 = vld [vmem:[%s6586_s13 + $0xc8] sm:$0xff]  ;;  %6032 = vmatmul.mubr.msk.bf16.gmra.mrb[152].mxu1 %vm380_vm1, %v4322_v62  ;;  %v4852_v62 = vsel %vm4815_vm8, %v4849_v27, %v4851_v52 }
 0x144   : > { %6069 = vmatprep.mubr.msk.bf16.mxu0 %vm380_vm1, %v4846_v42  ;;  %1811 = vst.msk [vmem:[%s6586_s13 + $0xc0] sm:$0xff] %vm180_vm5, %v1775_v22  ;;  %1304 = vst.msk [vmem:[%s6586_s13 + $0xe8] sm:$0xff] %vm180_vm5, %v1268_v23  ;;  %v1776_v61 = vadd.f32 %v1707_v8, %v1373_v24  ;;  %6035 = vmatprep.mubr.msk.bf16.mxu1 %vm380_vm1, %v4331_v21  ;;  %v1861_v42 = vld [vmem:[%s6586_s13 + $0x8] sm:$0xff]  ;;  %v1866_v22 = vld [vmem:[%s6586_s13 + $0x30] sm:$0xff] }
 0x145   : > { %1814 = vst.msk [vmem:[%s6586_s13 + $0xd8] sm:$0xff] %vm180_vm5, %v1778_v18  ;;  %v1864_v24 = vld [vmem:[%s6586_s13 + $0x20] sm:$0xff] }
 0x146   : > { %v5843_v19 = vpop.f32.mrb[48].mxu0  ;;  %1812 = vst.msk [vmem:[%s6586_s13 + $0xc8] sm:$0xff] %vm180_vm5, %v1776_v61  ;;  %v5809_v29 = vpop.f32.mrb[48].mxu1 }
 0x147   : > { %v1720_v20 = vpop.f32.mrb[49].mxu0  ;;  %v1273_v32 = vadd.f32 %v5809_v29, %v759_v28  ;;  %v1224_v37 = vpop.f32.mrb[49].mxu1 }
 0x148   : > { %v5844_v38 = vpop.f32.mrb[50].mxu0  ;;  %v1378_v55 = vld [vmem:[%s6586_s13 + $0xf0] sm:$0xff]  ;;  %v1271_v39 = vadd.f32 %v1224_v37, %v757_v35  ;;  %v5810_v41 = vpop.f32.mrb[50].mxu1  ;;  %v1865_v37 = vld [vmem:[%s6586_s13 + $0x28] sm:$0xff] }
 0x149   : > { %v1723_v43 = vpop.f32.mrb[51].mxu0  ;;  %1309 = vst.msk [vmem:[%s6586_s13 + $0x110] sm:$0xff] %vm180_vm5, %v1273_v32  ;;  %v1781_v45 = vadd.f32 %v5843_v19, %v1378_v55  ;;  %v1376_v46 = vld [vmem:[%s6586_s13 + $0xe0] sm:$0xff]  ;;  %v1274_v47 = vadd.f32 %v5810_v41, %v760_v40  ;;  %v1227_v17 = vpop.f32.mrb[51].mxu1  ;;  %v1867_v19 = vld [vmem:[%s6586_s13 + $0x38] sm:$0xff] }
 0x14a   : > { %1307 = vst.msk [vmem:[%s6586_s13 + $0x100] sm:$0xff] %vm180_vm5, %v1271_v39  ;;  %v1779_v60 = vadd.f32 %v1720_v20, %v1376_v46  ;;  %v1379_v34 = vld [vmem:[%s6586_s13 + $0xf8] sm:$0xff]  ;;  %v1272_v50 = vadd.f32 %v1227_v17, %v758_v49 }
 0x14b   : > { %6070 = vmatmul.mubr.msk.bf16.gmra.mrb[156].mxu0 %vm380_vm1, %v4848_v1  ;;  %1817 = vst.msk [vmem:[%s6586_s13 + $0xf0] sm:$0xff] %vm180_vm5, %v1781_v45  ;;  %1310 = vst.msk [vmem:[%s6586_s13 + $0x118] sm:$0xff] %vm180_vm5, %v1274_v47  ;;  %v1782_v57 = vadd.f32 %v5844_v38, %v1379_v34  ;;  %v1377_v51 = vld [vmem:[%s6586_s13 + $0xe8] sm:$0xff]  ;;  %6036 = vmatmul.mubr.msk.bf16.gmra.mrb[156].mxu1 %vm380_vm1, %v4340_v36  ;;  %v1870_v36 = vld [vmem:[%s6586_s13 + $0x50] sm:$0xff] }
 0x14c   : > { %6073 = vmatprep.mubr.msk.bf16.mxu0 %vm380_vm1, %v4850_v15  ;;  %1815 = vst.msk [vmem:[%s6586_s13 + $0xe0] sm:$0xff] %vm180_vm5, %v1779_v60  ;;  %1308 = vst.msk [vmem:[%s6586_s13 + $0x108] sm:$0xff] %vm180_vm5, %v1272_v50  ;;  %v1780_v53 = vadd.f32 %v1723_v43, %v1377_v51  ;;  %v1868_v47 = vld [vmem:[%s6586_s13 + $0x40] sm:$0xff]  ;;  %v1871_v50 = vld [vmem:[%s6586_s13 + $0x58] sm:$0xff] }
 0x14d   : > { %1818 = vst.msk [vmem:[%s6586_s13 + $0xf8] sm:$0xff] %vm180_vm5, %v1782_v57 }
 0x14e   : > { %v5847_v54 = vpop.f32.mrb[52].mxu0  ;;  %1816 = vst.msk [vmem:[%s6586_s13 + $0xe8] sm:$0xff] %vm180_vm5, %v1780_v53  ;;  %v5853_v48 = vpop.f32.mrb[52].mxu1 }
 0x14f   : > { %v1736_v56 = vpop.f32.mrb[53].mxu0  ;;  %v2264_v58 = vadd.f32 %v5853_v48, %v1862_v33  ;;  %v2119_v59 = vpop.f32.mrb[53].mxu1  ;;  %v1869_v33 = vld [vmem:[%s6586_s13 + $0x48] sm:$0xff] }
 0x150   : > { %v5848_v44 = vpop.f32.mrb[54].mxu0  ;;  %v1382_v0 = vld [vmem:[%s6586_s13 + $0x110] sm:$0xff]  ;;  %v2262_v2 = vadd.f32 %v2119_v59, %v1860_v16  ;;  %v5854_v63 = vpop.f32.mrb[54].mxu1 }
 0x151   : > { %v1739_v14 = vpop.f32.mrb[55].mxu0  ;;  %v1785_v5 = vadd.f32 %v5847_v54, %v1382_v0  ;;  %2300 = vst.msk [vmem:[%s6586_s13 + $0x10] sm:$0xff] %vm180_vm5, %v2264_v58  ;;  %v1380_v7 = vld [vmem:[%s6586_s13 + $0x100] sm:$0xff]  ;;  %v2265_v8 = vadd.f32 %v5854_v63, %v1863_v3  ;;  %v2122_v4 = vpop.f32.mrb[55].mxu1 }
 0x152   : > { %v1783_v10 = vadd.f32 %v1736_v56, %v1380_v7  ;;  %2298 = vst.msk [vmem:[%s6586_s13] sm:$0xff] %vm180_vm5, %v2262_v2  ;;  %v1383_v31 = vld [vmem:[%s6586_s13 + $0x118] sm:$0xff]  ;;  %v2263_v9 = vadd.f32 %v2122_v4, %v1861_v42  ;;  %v1874_v2 = vld [vmem:[%s6586_s13 + $0x70] sm:$0xff] }
 0x153   : > { %6074 = vmatmul.mubr.msk.bf16.gmra.mrb[160].mxu0 %vm380_vm1, %v4852_v62  ;;  %1821 = vst.msk [vmem:[%s6586_s13 + $0x110] sm:$0xff] %vm180_vm5, %v1785_v5  ;;  %v1786_v12 = vadd.f32 %v5848_v44, %v1383_v31  ;;  %2301 = vst.msk [vmem:[%s6586_s13 + $0x18] sm:$0xff] %vm180_vm5, %v2265_v8  ;;  %v1381_v13 = vld [vmem:[%s6586_s13 + $0x108] sm:$0xff]  ;;  %v1872_v5 = vld [vmem:[%s6586_s13 + $0x60] sm:$0xff] }
 0x154   : > { %1819 = vst.msk [vmem:[%s6586_s13 + $0x100] sm:$0xff] %vm180_vm5, %v1783_v10  ;;  %v1784_v11 = vadd.f32 %v1739_v14, %v1381_v13  ;;  %2299 = vst.msk [vmem:[%s6586_s13 + $0x8] sm:$0xff] %vm180_vm5, %v2263_v9  ;;  %v1875_v10 = vld [vmem:[%s6586_s13 + $0x78] sm:$0xff] }
 0x155   : > { %1822 = vst.msk [vmem:[%s6586_s13 + $0x118] sm:$0xff] %vm180_vm5, %v1786_v12 }
 0x156   : > { %v5891_v21 = vpop.f32.mrb[56].mxu0  ;;  %1820 = vst.msk [vmem:[%s6586_s13 + $0x108] sm:$0xff] %vm180_vm5, %v1784_v11  ;;  %v5857_v6 = vpop.f32.mrb[56].mxu1 }
 0x157   : > { %v2764_v23 = vpop.f32.mrb[57].mxu0  ;;  %v2268_v18 = vadd.f32 %v5857_v6, %v1866_v22  ;;  %v2135_v25 = vpop.f32.mrb[57].mxu1 }
 0x158   : > { %v5892_v61 = vpop.f32.mrb[58].mxu0  ;;  %v2373_v26 = vld [vmem:[%s6586_s13 + $0x10] sm:$0xff]  ;;  %v2266_v27 = vadd.f32 %v2135_v25, %v1864_v24  ;;  %v5858_v28 = vpop.f32.mrb[58].mxu1 }
 0x159   : > { %v2767_v29 = vpop.f32.mrb[59].mxu0  ;;  %2304 = vst.msk [vmem:[%s6586_s13 + $0x30] sm:$0xff] %vm180_vm5, %v2268_v18  ;;  %v2909_v20 = vadd.f32 %v5891_v21, %v2373_v26  ;;  %v2371_v32 = vld [vmem:[%s6586_s13] sm:$0xff]  ;;  %v2269_v35 = vadd.f32 %v5858_v28, %v1867_v19  ;;  %v2138_v38 = vpop.f32.mrb[59].mxu1  ;;  %v1873_v21 = vld [vmem:[%s6586_s13 + $0x68] sm:$0xff] }
 0x15a   : > { %2302 = vst.msk [vmem:[%s6586_s13 + $0x20] sm:$0xff] %vm180_vm5, %v2266_v27  ;;  %v2907_v1 = vadd.f32 %v2764_v23, %v2371_v32  ;;  %v2374_v30 = vld [vmem:[%s6586_s13 + $0x18] sm:$0xff]  ;;  %v2267_v55 = vadd.f32 %v2138_v38, %v1865_v37  ;;  %v1878_v27 = vld [vmem:[%s6586_s13 + $0x90] sm:$0xff] }
 0x15b   : > { %2945 = vst.msk [vmem:[%s6586_s13 + $0x10] sm:$0xff] %vm180_vm5, %v2909_v20  ;;  %2305 = vst.msk [vmem:[%s6586_s13 + $0x38] sm:$0xff] %vm180_vm5, %v2269_v35  ;;  %v2910_v39 = vadd.f32 %v5892_v61, %v2374_v30  ;;  %v2372_v40 = vld [vmem:[%s6586_s13 + $0x8] sm:$0xff]  ;;  %v1876_v20 = vld [vmem:[%s6586_s13 + $0x80] sm:$0xff] }
 0x15c   : > { %2943 = vst.msk [vmem:[%s6586_s13] sm:$0xff] %vm180_vm5, %v2907_v1  ;;  %2303 = vst.msk [vmem:[%s6586_s13 + $0x28] sm:$0xff] %vm180_vm5, %v2267_v55  ;;  %v2908_v41 = vadd.f32 %v2767_v29, %v2372_v40  ;;  %v1879_v1 = vld [vmem:[%s6586_s13 + $0x98] sm:$0xff] }
 0x15d   : > { %2946 = vst.msk [vmem:[%s6586_s13 + $0x18] sm:$0xff] %vm180_vm5, %v2910_v39 }
 0x15e   : > { %v5895_v43 = vpop.f32.mrb[60].mxu0  ;;  %2944 = vst.msk [vmem:[%s6586_s13 + $0x8] sm:$0xff] %vm180_vm5, %v2908_v41  ;;  %v5861_v15 = vpop.f32.mrb[60].mxu1 }
 0x15f   : > { %v2780_v45 = vpop.f32.mrb[61].mxu0  ;;  %v2272_v46 = vadd.f32 %v5861_v15, %v1870_v36  ;;  %v2151_v49 = vpop.f32.mrb[61].mxu1 }
 0x160   : > { %v5896_v17 = vpop.f32.mrb[62].mxu0  ;;  %v2377_v60 = vld [vmem:[%s6586_s13 + $0x30] sm:$0xff]  ;;  %v2270_v34 = vadd.f32 %v2151_v49, %v1868_v47  ;;  %v5862_v57 = vpop.f32.mrb[62].mxu1 }
 0x161   : > { %v2783_v51 = vpop.f32.mrb[63].mxu0  ;;  %2308 = vst.msk [vmem:[%s6586_s13 + $0x50] sm:$0xff] %vm180_vm5, %v2272_v46  ;;  %v2913_v52 = vadd.f32 %v5895_v43, %v2377_v60  ;;  %v2375_v53 = vld [vmem:[%s6586_s13 + $0x20] sm:$0xff]  ;;  %v2273_v54 = vadd.f32 %v5862_v57, %v1871_v50  ;;  %v2154_v48 = vpop.f32.mrb[63].mxu1  ;;  %v1877_v43 = vld [vmem:[%s6586_s13 + $0x88] sm:$0xff] }
 0x162   : > { %2306 = vst.msk [vmem:[%s6586_s13 + $0x40] sm:$0xff] %vm180_vm5, %v2270_v34  ;;  %v2911_v56 = vadd.f32 %v2780_v45, %v2375_v53  ;;  %v2378_v58 = vld [vmem:[%s6586_s13 + $0x38] sm:$0xff]  ;;  %v2271_v16 = vadd.f32 %v2154_v48, %v1869_v33  ;;  %v1882_v34 = vld [vmem:[%s6586_s13 + $0xb0] sm:$0xff] }
 0x163   : > { %2949 = vst.msk [vmem:[%s6586_s13 + $0x30] sm:$0xff] %vm180_vm5, %v2913_v52  ;;  %2309 = vst.msk [vmem:[%s6586_s13 + $0x58] sm:$0xff] %vm180_vm5, %v2273_v54  ;;  %v2914_v59 = vadd.f32 %v5896_v17, %v2378_v58  ;;  %v2376_v44 = vld [vmem:[%s6586_s13 + $0x28] sm:$0xff]  ;;  %v1880_v52 = vld [vmem:[%s6586_s13 + $0xa0] sm:$0xff] }
 0x164   : > { %2947 = vst.msk [vmem:[%s6586_s13 + $0x20] sm:$0xff] %vm180_vm5, %v2911_v56  ;;  %2307 = vst.msk [vmem:[%s6586_s13 + $0x48] sm:$0xff] %vm180_vm5, %v2271_v16  ;;  %v2912_v62 = vadd.f32 %v2783_v51, %v2376_v44  ;;  %v1883_v56 = vld [vmem:[%s6586_s13 + $0xb8] sm:$0xff] }
 0x165   : > { %2950 = vst.msk [vmem:[%s6586_s13 + $0x38] sm:$0xff] %vm180_vm5, %v2914_v59 }
 0x166   : > { %v5899_v0 = vpop.f32.mrb[64].mxu0  ;;  %2948 = vst.msk [vmem:[%s6586_s13 + $0x28] sm:$0xff] %vm180_vm5, %v2912_v62  ;;  %v5865_v3 = vpop.f32.mrb[64].mxu1 }
 0x167   : > { %v2796_v63 = vpop.f32.mrb[65].mxu0  ;;  %v2276_v14 = vadd.f32 %v5865_v3, %v1874_v2  ;;  %v2167_v7 = vpop.f32.mrb[65].mxu1 }
 0x168   : > { %v5900_v8 = vpop.f32.mrb[66].mxu0  ;;  %v2381_v42 = vld [vmem:[%s6586_s13 + $0x50] sm:$0xff]  ;;  %v2274_v4 = vadd.f32 %v2167_v7, %v1872_v5  ;;  %v5866_v31 = vpop.f32.mrb[66].mxu1 }
 0x169   : > { %v2799_v9 = vpop.f32.mrb[67].mxu0  ;;  %2312 = vst.msk [vmem:[%s6586_s13 + $0x70] sm:$0xff] %vm180_vm5, %v2276_v14  ;;  %v2917_v12 = vadd.f32 %v5899_v0, %v2381_v42  ;;  %v2379_v13 = vld [vmem:[%s6586_s13 + $0x40] sm:$0xff]  ;;  %v2277_v11 = vadd.f32 %v5866_v31, %v1875_v10  ;;  %v2170_v22 = vpop.f32.mrb[67].mxu1  ;;  %v1881_v0 = vld [vmem:[%s6586_s13 + $0xa8] sm:$0xff] }
 0x16a   : > { %2310 = vst.msk [vmem:[%s6586_s13 + $0x60] sm:$0xff] %vm180_vm5, %v2274_v4  ;;  %v2915_v6 = vadd.f32 %v2796_v63, %v2379_v13  ;;  %v2382_v23 = vld [vmem:[%s6586_s13 + $0x58] sm:$0xff]  ;;  %v2275_v18 = vadd.f32 %v2170_v22, %v1873_v21  ;;  %v1886_v4 = vld [vmem:[%s6586_s13 + $0xd0] sm:$0xff] }
 0x16b   : > { %2953 = vst.msk [vmem:[%s6586_s13 + $0x50] sm:$0xff] %vm180_vm5, %v2917_v12  ;;  %2313 = vst.msk [vmem:[%s6586_s13 + $0x78] sm:$0xff] %vm180_vm5, %v2277_v11  ;;  %v2918_v24 = vadd.f32 %v5900_v8, %v2382_v23  ;;  %v2380_v25 = vld [vmem:[%s6586_s13 + $0x48] sm:$0xff]  ;;  %v1884_v12 = vld [vmem:[%s6586_s13 + $0xc0] sm:$0xff] }
 0x16c   : > { %2951 = vst.msk [vmem:[%s6586_s13 + $0x40] sm:$0xff] %vm180_vm5, %v2915_v6  ;;  %2311 = vst.msk [vmem:[%s6586_s13 + $0x68] sm:$0xff] %vm180_vm5, %v2275_v18  ;;  %v2916_v61 = vadd.f32 %v2799_v9, %v2380_v25  ;;  %v1887_v6 = vld [vmem:[%s6586_s13 + $0xd8] sm:$0xff] }
 0x16d   : > { %2954 = vst.msk [vmem:[%s6586_s13 + $0x58] sm:$0xff] %vm180_vm5, %v2918_v24 }
 0x16e   : > { %v5903_v26 = vpop.f32.mrb[68].mxu0  ;;  %2952 = vst.msk [vmem:[%s6586_s13 + $0x48] sm:$0xff] %vm180_vm5, %v2916_v61  ;;  %v5869_v19 = vpop.f32.mrb[68].mxu1 }
 0x16f   : > { %v2812_v28 = vpop.f32.mrb[69].mxu0  ;;  %v2280_v29 = vadd.f32 %v5869_v19, %v1878_v27  ;;  %v2183_v32 = vpop.f32.mrb[69].mxu1 }
 0x170   : > { %v5904_v35 = vpop.f32.mrb[70].mxu0  ;;  %v2385_v37 = vld [vmem:[%s6586_s13 + $0x70] sm:$0xff]  ;;  %v2278_v38 = vadd.f32 %v2183_v32, %v1876_v20  ;;  %v5870_v30 = vpop.f32.mrb[70].mxu1 }
 0x171   : > { %v2815_v55 = vpop.f32.mrb[71].mxu0  ;;  %2316 = vst.msk [vmem:[%s6586_s13 + $0x90] sm:$0xff] %vm180_vm5, %v2280_v29  ;;  %v2921_v39 = vadd.f32 %v5903_v26, %v2385_v37  ;;  %v2383_v40 = vld [vmem:[%s6586_s13 + $0x60] sm:$0xff]  ;;  %v2281_v41 = vadd.f32 %v5870_v30, %v1879_v1  ;;  %v2186_v36 = vpop.f32.mrb[71].mxu1  ;;  %v1885_v26 = vld [vmem:[%s6586_s13 + $0xc8] sm:$0xff] }
 0x172   : > { %2314 = vst.msk [vmem:[%s6586_s13 + $0x80] sm:$0xff] %vm180_vm5, %v2278_v38  ;;  %v2919_v15 = vadd.f32 %v2812_v28, %v2383_v40  ;;  %v2386_v45 = vld [vmem:[%s6586_s13 + $0x78] sm:$0xff]  ;;  %v2279_v46 = vadd.f32 %v2186_v36, %v1877_v43  ;;  %v1890_v38 = vld [vmem:[%s6586_s13 + $0xf0] sm:$0xff] }
 0x173   : > { %2957 = vst.msk [vmem:[%s6586_s13 + $0x70] sm:$0xff] %vm180_vm5, %v2921_v39  ;;  %2317 = vst.msk [vmem:[%s6586_s13 + $0x98] sm:$0xff] %vm180_vm5, %v2281_v41  ;;  %v2922_v47 = vadd.f32 %v5904_v35, %v2386_v45  ;;  %v2384_v49 = vld [vmem:[%s6586_s13 + $0x68] sm:$0xff]  ;;  %v1888_v39 = vld [vmem:[%s6586_s13 + $0xe0] sm:$0xff] }
 0x174   : > { %2955 = vst.msk [vmem:[%s6586_s13 + $0x60] sm:$0xff] %vm180_vm5, %v2919_v15  ;;  %2315 = vst.msk [vmem:[%s6586_s13 + $0x88] sm:$0xff] %vm180_vm5, %v2279_v46  ;;  %v2920_v17 = vadd.f32 %v2815_v55, %v2384_v49  ;;  %v1891_v15 = vld [vmem:[%s6586_s13 + $0xf8] sm:$0xff] }
 0x175   : > { %2958 = vst.msk [vmem:[%s6586_s13 + $0x78] sm:$0xff] %vm180_vm5, %v2922_v47 }
 0x176   : > { %v5907_v60 = vpop.f32.mrb[72].mxu0  ;;  %2956 = vst.msk [vmem:[%s6586_s13 + $0x68] sm:$0xff] %vm180_vm5, %v2920_v17  ;;  %v5873_v50 = vpop.f32.mrb[72].mxu1 }
 0x177   : > { %v2828_v57 = vpop.f32.mrb[73].mxu0  ;;  %v2284_v51 = vadd.f32 %v5873_v50, %v1882_v34  ;;  %v2199_v53 = vpop.f32.mrb[73].mxu1 }
 0x178   : > { %v5908_v54 = vpop.f32.mrb[74].mxu0  ;;  %v2389_v33 = vld [vmem:[%s6586_s13 + $0x90] sm:$0xff]  ;;  %v2282_v48 = vadd.f32 %v2199_v53, %v1880_v52  ;;  %v5874_v58 = vpop.f32.mrb[74].mxu1 }
 0x179   : > { %v2831_v16 = vpop.f32.mrb[75].mxu0  ;;  %2320 = vst.msk [vmem:[%s6586_s13 + $0xb0] sm:$0xff] %vm180_vm5, %v2284_v51  ;;  %v2925_v59 = vadd.f32 %v5907_v60, %v2389_v33  ;;  %v2387_v44 = vld [vmem:[%s6586_s13 + $0x80] sm:$0xff]  ;;  %v2285_v62 = vadd.f32 %v5874_v58, %v1883_v56  ;;  %v2202_v2 = vpop.f32.mrb[75].mxu1  ;;  %v1889_v60 = vld [vmem:[%s6586_s13 + $0xe8] sm:$0xff] }
 0x17a   : > { %2318 = vst.msk [vmem:[%s6586_s13 + $0xa0] sm:$0xff] %vm180_vm5, %v2282_v48  ;;  %v2923_v3 = vadd.f32 %v2828_v57, %v2387_v44  ;;  %v2390_v63 = vld [vmem:[%s6586_s13 + $0x98] sm:$0xff]  ;;  %v2283_v14 = vadd.f32 %v2202_v2, %v1881_v0  ;;  %v1894_v48 = vld [vmem:[%s6586_s13 + $0x110] sm:$0xff] }
 0x17b   : > { %2961 = vst.msk [vmem:[%s6586_s13 + $0x90] sm:$0xff] %vm180_vm5, %v2925_v59  ;;  %2321 = vst.msk [vmem:[%s6586_s13 + $0xb8] sm:$0xff] %vm180_vm5, %v2285_v62  ;;  %v2926_v5 = vadd.f32 %v5908_v54, %v2390_v63  ;;  %v2388_v7 = vld [vmem:[%s6586_s13 + $0x88] sm:$0xff]  ;;  %v1892_v59 = vld [vmem:[%s6586_s13 + $0x100] sm:$0xff] }
 0x17c   : > { %2959 = vst.msk [vmem:[%s6586_s13 + $0x80] sm:$0xff] %vm180_vm5, %v2923_v3  ;;  %2319 = vst.msk [vmem:[%s6586_s13 + $0xa8] sm:$0xff] %vm180_vm5, %v2283_v14  ;;  %v2924_v8 = vadd.f32 %v2831_v16, %v2388_v7  ;;  %v1895_v3 = vld [vmem:[%s6586_s13 + $0x118] sm:$0xff] }
 0x17d   : > { %2962 = vst.msk [vmem:[%s6586_s13 + $0x98] sm:$0xff] %vm180_vm5, %v2926_v5 }
 0x17e   : > { %v5911_v42 = vpop.f32.mrb[76].mxu0  ;;  %2960 = vst.msk [vmem:[%s6586_s13 + $0x88] sm:$0xff] %vm180_vm5, %v2924_v8  ;;  %v5877_v10 = vpop.f32.mrb[76].mxu1 }
 0x17f   : > { %v2844_v31 = vpop.f32.mrb[77].mxu0  ;;  %v2288_v9 = vadd.f32 %v5877_v10, %v1886_v4  ;;  %v2215_v13 = vpop.f32.mrb[77].mxu1 }
 0x180   : > { %v5912_v11 = vpop.f32.mrb[78].mxu0  ;;  %v2393_v21 = vld [vmem:[%s6586_s13 + $0xb0] sm:$0xff]  ;;  %v2286_v22 = vadd.f32 %v2215_v13, %v1884_v12  ;;  %v5878_v23 = vpop.f32.mrb[78].mxu1 }
 0x181   : > { %v2847_v18 = vpop.f32.mrb[79].mxu0  ;;  %2324 = vst.msk [vmem:[%s6586_s13 + $0xd0] sm:$0xff] %vm180_vm5, %v2288_v9  ;;  %v2929_v24 = vadd.f32 %v5911_v42, %v2393_v21  ;;  %v2391_v25 = vld [vmem:[%s6586_s13 + $0xa0] sm:$0xff]  ;;  %v2289_v61 = vadd.f32 %v5878_v23, %v1887_v6  ;;  %v2218_v27 = vpop.f32.mrb[79].mxu1  ;;  %v1893_v42 = vld [vmem:[%s6586_s13 + $0x108] sm:$0xff] }
 0x182   : > { %2322 = vst.msk [vmem:[%s6586_s13 + $0xc0] sm:$0xff] %vm180_vm5, %v2286_v22  ;;  %v2927_v19 = vadd.f32 %v2844_v31, %v2391_v25  ;;  %v2394_v28 = vld [vmem:[%s6586_s13 + $0xb8] sm:$0xff]  ;;  %v2287_v29 = vadd.f32 %v2218_v27, %v1885_v26  ;;  %v3018_v22 = vld [vmem:[%s6586_s13 + $0x10] sm:$0xff] }
 0x183   : > { %2965 = vst.msk [vmem:[%s6586_s13 + $0xb0] sm:$0xff] %vm180_vm5, %v2929_v24  ;;  %2325 = vst.msk [vmem:[%s6586_s13 + $0xd8] sm:$0xff] %vm180_vm5, %v2289_v61  ;;  %v2930_v20 = vadd.f32 %v5912_v11, %v2394_v28  ;;  %v2392_v32 = vld [vmem:[%s6586_s13 + $0xa8] sm:$0xff]  ;;  %v3016_v24 = vld [vmem:[%s6586_s13] sm:$0xff] }
 0x184   : > { %2963 = vst.msk [vmem:[%s6586_s13 + $0xa0] sm:$0xff] %vm180_vm5, %v2927_v19  ;;  %2323 = vst.msk [vmem:[%s6586_s13 + $0xc8] sm:$0xff] %vm180_vm5, %v2287_v29  ;;  %v2928_v35 = vadd.f32 %v2847_v18, %v2392_v32  ;;  %v3019_v19 = vld [vmem:[%s6586_s13 + $0x18] sm:$0xff] }
 0x185   : > { %2966 = vst.msk [vmem:[%s6586_s13 + $0xb8] sm:$0xff] %vm180_vm5, %v2930_v20 }
 0x186   : > { %v5915_v37 = vpop.f32.mrb[80].mxu0  ;;  %2964 = vst.msk [vmem:[%s6586_s13 + $0xa8] sm:$0xff] %vm180_vm5, %v2928_v35  ;;  %v5881_v1 = vpop.f32.mrb[80].mxu1 }
 0x187   : > { %v2860_v30 = vpop.f32.mrb[81].mxu0  ;;  %v2292_v55 = vadd.f32 %v5881_v1, %v1890_v38  ;;  %v2231_v40 = vpop.f32.mrb[81].mxu1 }
 0x188   : > { %v5916_v41 = vpop.f32.mrb[82].mxu0  ;;  %v2397_v43 = vld [vmem:[%s6586_s13 + $0xd0] sm:$0xff]  ;;  %v2290_v36 = vadd.f32 %v2231_v40, %v1888_v39  ;;  %v5882_v45 = vpop.f32.mrb[82].mxu1 }
 0x189   : > { %v2863_v46 = vpop.f32.mrb[83].mxu0  ;;  %2328 = vst.msk [vmem:[%s6586_s13 + $0xf0] sm:$0xff] %vm180_vm5, %v2292_v55  ;;  %v2933_v47 = vadd.f32 %v5915_v37, %v2397_v43  ;;  %v2395_v49 = vld [vmem:[%s6586_s13 + $0xc0] sm:$0xff]  ;;  %v2293_v17 = vadd.f32 %v5882_v45, %v1891_v15  ;;  %v2234_v34 = vpop.f32.mrb[83].mxu1  ;;  %v3017_v37 = vld [vmem:[%s6586_s13 + $0x8] sm:$0xff] }
 0x18a   : > { %2326 = vst.msk [vmem:[%s6586_s13 + $0xe0] sm:$0xff] %vm180_vm5, %v2290_v36  ;;  %v2931_v50 = vadd.f32 %v2860_v30, %v2395_v49  ;;  %v2398_v57 = vld [vmem:[%s6586_s13 + $0xd8] sm:$0xff]  ;;  %v2291_v51 = vadd.f32 %v2234_v34, %v1889_v60  ;;  %v3022_v36 = vld [vmem:[%s6586_s13 + $0x30] sm:$0xff] }
 0x18b   : > { %2969 = vst.msk [vmem:[%s6586_s13 + $0xd0] sm:$0xff] %vm180_vm5, %v2933_v47  ;;  %2329 = vst.msk [vmem:[%s6586_s13 + $0xf8] sm:$0xff] %vm180_vm5, %v2293_v17  ;;  %v2934_v52 = vadd.f32 %v5916_v41, %v2398_v57  ;;  %v2396_v53 = vld [vmem:[%s6586_s13 + $0xc8] sm:$0xff]  ;;  %v3020_v47 = vld [vmem:[%s6586_s13 + $0x20] sm:$0xff] }
 0x18c   : > { %2967 = vst.msk [vmem:[%s6586_s13 + $0xc0] sm:$0xff] %vm180_vm5, %v2931_v50  ;;  %2327 = vst.msk [vmem:[%s6586_s13 + $0xe8] sm:$0xff] %vm180_vm5, %v2291_v51  ;;  %v2932_v54 = vadd.f32 %v2863_v46, %v2396_v53  ;;  %v3023_v50 = vld [vmem:[%s6586_s13 + $0x38] sm:$0xff] }
 0x18d   : > { %2970 = vst.msk [vmem:[%s6586_s13 + $0xd8] sm:$0xff] %vm180_vm5, %v2934_v52 }
 0x18e   : > { %v5919_v33 = vpop.f32.mrb[84].mxu0  ;;  %2968 = vst.msk [vmem:[%s6586_s13 + $0xc8] sm:$0xff] %vm180_vm5, %v2932_v54  ;;  %v5885_v56 = vpop.f32.mrb[84].mxu1 }
 0x18f   : > { %v2876_v58 = vpop.f32.mrb[85].mxu0  ;;  %v2296_v16 = vadd.f32 %v5885_v56, %v1894_v48  ;;  %v2247_v44 = vpop.f32.mrb[85].mxu1 }
 0x190   : > { %v5920_v62 = vpop.f32.mrb[86].mxu0  ;;  %v2401_v0 = vld [vmem:[%s6586_s13 + $0xf0] sm:$0xff]  ;;  %v2294_v2 = vadd.f32 %v2247_v44, %v1892_v59  ;;  %v5886_v63 = vpop.f32.mrb[86].mxu1 }
 0x191   : > { %v2879_v14 = vpop.f32.mrb[87].mxu0  ;;  %2332 = vst.msk [vmem:[%s6586_s13 + $0x110] sm:$0xff] %vm180_vm5, %v2296_v16  ;;  %v2937_v5 = vadd.f32 %v5919_v33, %v2401_v0  ;;  %v2399_v7 = vld [vmem:[%s6586_s13 + $0xe0] sm:$0xff]  ;;  %v2297_v8 = vadd.f32 %v5886_v63, %v1895_v3  ;;  %v2250_v4 = vpop.f32.mrb[87].mxu1  ;;  %v3021_v33 = vld [vmem:[%s6586_s13 + $0x28] sm:$0xff] }
 0x192   : > { %2330 = vst.msk [vmem:[%s6586_s13 + $0x100] sm:$0xff] %vm180_vm5, %v2294_v2  ;;  %v2935_v10 = vadd.f32 %v2876_v58, %v2399_v7  ;;  %v2402_v31 = vld [vmem:[%s6586_s13 + $0xf8] sm:$0xff]  ;;  %v2295_v9 = vadd.f32 %v2250_v4, %v1893_v42  ;;  %v3026_v2 = vld [vmem:[%s6586_s13 + $0x50] sm:$0xff] }
 0x193   : > { %2973 = vst.msk [vmem:[%s6586_s13 + $0xf0] sm:$0xff] %vm180_vm5, %v2937_v5  ;;  %2333 = vst.msk [vmem:[%s6586_s13 + $0x118] sm:$0xff] %vm180_vm5, %v2297_v8  ;;  %v2938_v12 = vadd.f32 %v5920_v62, %v2402_v31  ;;  %v2400_v13 = vld [vmem:[%s6586_s13 + $0xe8] sm:$0xff]  ;;  %v3024_v5 = vld [vmem:[%s6586_s13 + $0x40] sm:$0xff] }
 0x194   : > { %2971 = vst.msk [vmem:[%s6586_s13 + $0xe0] sm:$0xff] %vm180_vm5, %v2935_v10  ;;  %2331 = vst.msk [vmem:[%s6586_s13 + $0x108] sm:$0xff] %vm180_vm5, %v2295_v9  ;;  %v2936_v11 = vadd.f32 %v2879_v14, %v2400_v13  ;;  %v3027_v10 = vld [vmem:[%s6586_s13 + $0x58] sm:$0xff] }
 0x195   : > { %2974 = vst.msk [vmem:[%s6586_s13 + $0xf8] sm:$0xff] %vm180_vm5, %v2938_v12 }
 0x196   : > { %v5923_v21 = vpop.f32.mrb[88].mxu0  ;;  %2972 = vst.msk [vmem:[%s6586_s13 + $0xe8] sm:$0xff] %vm180_vm5, %v2936_v11  ;;  %v5929_v6 = vpop.f32.mrb[88].mxu1 }
 0x197   : > { %v2892_v23 = vpop.f32.mrb[89].mxu0  ;;  %v3421_v18 = vadd.f32 %v5929_v6, %v3018_v22  ;;  %v3276_v25 = vpop.f32.mrb[89].mxu1 }
 0x198   : > { %v5924_v61 = vpop.f32.mrb[90].mxu0  ;;  %v2405_v26 = vld [vmem:[%s6586_s13 + $0x110] sm:$0xff]  ;;  %v3419_v27 = vadd.f32 %v3276_v25, %v3016_v24  ;;  %v5930_v28 = vpop.f32.mrb[90].mxu1 }
 0x199   : > { %v2895_v29 = vpop.f32.mrb[91].mxu0  ;;  %v2941_v20 = vadd.f32 %v5923_v21, %v2405_v26  ;;  %3457 = vst.msk [vmem:[%s6586_s13 + $0x10] sm:$0xff] %vm180_vm5, %v3421_v18  ;;  %v2403_v32 = vld [vmem:[%s6586_s13 + $0x100] sm:$0xff]  ;;  %v3422_v35 = vadd.f32 %v5930_v28, %v3019_v19  ;;  %v3279_v38 = vpop.f32.mrb[91].mxu1  ;;  %v3025_v21 = vld [vmem:[%s6586_s13 + $0x48] sm:$0xff] }
 0x19a   : > { %v2939_v1 = vadd.f32 %v2892_v23, %v2403_v32  ;;  %3455 = vst.msk [vmem:[%s6586_s13] sm:$0xff] %vm180_vm5, %v3419_v27  ;;  %v2406_v30 = vld [vmem:[%s6586_s13 + $0x118] sm:$0xff]  ;;  %v3420_v55 = vadd.f32 %v3279_v38, %v3017_v37  ;;  %v3030_v27 = vld [vmem:[%s6586_s13 + $0x70] sm:$0xff] }
 0x19b   : > { %2977 = vst.msk [vmem:[%s6586_s13 + $0x110] sm:$0xff] %vm180_vm5, %v2941_v20  ;;  %v2942_v39 = vadd.f32 %v5924_v61, %v2406_v30  ;;  %3458 = vst.msk [vmem:[%s6586_s13 + $0x18] sm:$0xff] %vm180_vm5, %v3422_v35  ;;  %v2404_v40 = vld [vmem:[%s6586_s13 + $0x108] sm:$0xff]  ;;  %v3028_v20 = vld [vmem:[%s6586_s13 + $0x60] sm:$0xff] }
 0x19c   : > { %2975 = vst.msk [vmem:[%s6586_s13 + $0x100] sm:$0xff] %vm180_vm5, %v2939_v1  ;;  %v2940_v41 = vadd.f32 %v2895_v29, %v2404_v40  ;;  %3456 = vst.msk [vmem:[%s6586_s13 + $0x8] sm:$0xff] %vm180_vm5, %v3420_v55  ;;  %v3031_v1 = vld [vmem:[%s6586_s13 + $0x78] sm:$0xff] }
 0x19d   : > { %2978 = vst.msk [vmem:[%s6586_s13 + $0x118] sm:$0xff] %vm180_vm5, %v2942_v39 }
 0x19e   : > { %v5967_v43 = vpop.f32.mrb[92].mxu0  ;;  %2976 = vst.msk [vmem:[%s6586_s13 + $0x108] sm:$0xff] %vm180_vm5, %v2940_v41  ;;  %v5933_v15 = vpop.f32.mrb[92].mxu1 }
 0x19f   : > { %v3787_v45 = vpop.f32.mrb[93].mxu0  ;;  %v3425_v46 = vadd.f32 %v5933_v15, %v3022_v36  ;;  %v3292_v49 = vpop.f32.mrb[93].mxu1 }
 0x1a0   : > { %v5968_v17 = vpop.f32.mrb[94].mxu0  ;;  %v3530_v60 = vld [vmem:[%s6586_s13 + $0x10] sm:$0xff]  ;;  %v3423_v34 = vadd.f32 %v3292_v49, %v3020_v47  ;;  %v5934_v57 = vpop.f32.mrb[94].mxu1 }
 0x1a1   : > { %v3790_v51 = vpop.f32.mrb[95].mxu0  ;;  %3461 = vst.msk [vmem:[%s6586_s13 + $0x30] sm:$0xff] %vm180_vm5, %v3425_v46  ;;  %v3932_v52 = vadd.f32 %v5967_v43, %v3530_v60  ;;  %v3528_v53 = vld [vmem:[%s6586_s13] sm:$0xff]  ;;  %v3426_v54 = vadd.f32 %v5934_v57, %v3023_v50  ;;  %v3295_v48 = vpop.f32.mrb[95].mxu1  ;;  %v3029_v43 = vld [vmem:[%s6586_s13 + $0x68] sm:$0xff] }
 0x1a2   : > { %3459 = vst.msk [vmem:[%s6586_s13 + $0x20] sm:$0xff] %vm180_vm5, %v3423_v34  ;;  %v3930_v56 = vadd.f32 %v3787_v45, %v3528_v53  ;;  %v3531_v58 = vld [vmem:[%s6586_s13 + $0x18] sm:$0xff]  ;;  %v3424_v16 = vadd.f32 %v3295_v48, %v3021_v33  ;;  %v3034_v34 = vld [vmem:[%s6586_s13 + $0x90] sm:$0xff] }
 0x1a3   : > { %3968 = vst.msk [vmem:[%s6586_s13 + $0x10] sm:$0xff] %vm180_vm5, %v3932_v52  ;;  %3462 = vst.msk [vmem:[%s6586_s13 + $0x38] sm:$0xff] %vm180_vm5, %v3426_v54  ;;  %v3933_v59 = vadd.f32 %v5968_v17, %v3531_v58  ;;  %v3529_v44 = vld [vmem:[%s6586_s13 + $0x8] sm:$0xff]  ;;  %v3032_v52 = vld [vmem:[%s6586_s13 + $0x80] sm:$0xff] }
 0x1a4   : > { %3966 = vst.msk [vmem:[%s6586_s13] sm:$0xff] %vm180_vm5, %v3930_v56  ;;  %3460 = vst.msk [vmem:[%s6586_s13 + $0x28] sm:$0xff] %vm180_vm5, %v3424_v16  ;;  %v3931_v62 = vadd.f32 %v3790_v51, %v3529_v44  ;;  %v3035_v56 = vld [vmem:[%s6586_s13 + $0x98] sm:$0xff] }
 0x1a5   : > { %3969 = vst.msk [vmem:[%s6586_s13 + $0x18] sm:$0xff] %vm180_vm5, %v3933_v59 }
 0x1a6   : > { %v5971_v0 = vpop.f32.mrb[96].mxu0  ;;  %3967 = vst.msk [vmem:[%s6586_s13 + $0x8] sm:$0xff] %vm180_vm5, %v3931_v62  ;;  %v5937_v3 = vpop.f32.mrb[96].mxu1 }
 0x1a7   : > { %v3803_v63 = vpop.f32.mrb[97].mxu0  ;;  %v3429_v14 = vadd.f32 %v5937_v3, %v3026_v2  ;;  %v3308_v7 = vpop.f32.mrb[97].mxu1 }
 0x1a8   : > { %v5972_v8 = vpop.f32.mrb[98].mxu0  ;;  %v3534_v42 = vld [vmem:[%s6586_s13 + $0x30] sm:$0xff]  ;;  %v3427_v4 = vadd.f32 %v3308_v7, %v3024_v5  ;;  %v5938_v31 = vpop.f32.mrb[98].mxu1 }
 0x1a9   : > { %v3806_v9 = vpop.f32.mrb[99].mxu0  ;;  %3465 = vst.msk [vmem:[%s6586_s13 + $0x50] sm:$0xff] %vm180_vm5, %v3429_v14  ;;  %v3936_v12 = vadd.f32 %v5971_v0, %v3534_v42  ;;  %v3532_v13 = vld [vmem:[%s6586_s13 + $0x20] sm:$0xff]  ;;  %v3430_v11 = vadd.f32 %v5938_v31, %v3027_v10  ;;  %v3311_v22 = vpop.f32.mrb[99].mxu1  ;;  %v3033_v0 = vld [vmem:[%s6586_s13 + $0x88] sm:$0xff] }
 0x1aa   : > { %3463 = vst.msk [vmem:[%s6586_s13 + $0x40] sm:$0xff] %vm180_vm5, %v3427_v4  ;;  %v3934_v6 = vadd.f32 %v3803_v63, %v3532_v13  ;;  %v3535_v23 = vld [vmem:[%s6586_s13 + $0x38] sm:$0xff]  ;;  %v3428_v18 = vadd.f32 %v3311_v22, %v3025_v21  ;;  %v3038_v4 = vld [vmem:[%s6586_s13 + $0xb0] sm:$0xff] }
 0x1ab   : > { %3972 = vst.msk [vmem:[%s6586_s13 + $0x30] sm:$0xff] %vm180_vm5, %v3936_v12  ;;  %3466 = vst.msk [vmem:[%s6586_s13 + $0x58] sm:$0xff] %vm180_vm5, %v3430_v11  ;;  %v3937_v24 = vadd.f32 %v5972_v8, %v3535_v23  ;;  %v3533_v25 = vld [vmem:[%s6586_s13 + $0x28] sm:$0xff]  ;;  %v3036_v12 = vld [vmem:[%s6586_s13 + $0xa0] sm:$0xff] }
 0x1ac   : > { %3970 = vst.msk [vmem:[%s6586_s13 + $0x20] sm:$0xff] %vm180_vm5, %v3934_v6  ;;  %3464 = vst.msk [vmem:[%s6586_s13 + $0x48] sm:$0xff] %vm180_vm5, %v3428_v18  ;;  %v3935_v61 = vadd.f32 %v3806_v9, %v3533_v25  ;;  %v3039_v6 = vld [vmem:[%s6586_s13 + $0xb8] sm:$0xff] }
 0x1ad   : > { %3973 = vst.msk [vmem:[%s6586_s13 + $0x38] sm:$0xff] %vm180_vm5, %v3937_v24 }
 0x1ae   : > { %v5975_v26 = vpop.f32.mrb[100].mxu0  ;;  %3971 = vst.msk [vmem:[%s6586_s13 + $0x28] sm:$0xff] %vm180_vm5, %v3935_v61  ;;  %v5941_v19 = vpop.f32.mrb[100].mxu1 }
 0x1af   : > { %v3819_v28 = vpop.f32.mrb[101].mxu0  ;;  %v3433_v29 = vadd.f32 %v5941_v19, %v3030_v27  ;;  %v3324_v32 = vpop.f32.mrb[101].mxu1 }
 0x1b0   : > { %v5976_v35 = vpop.f32.mrb[102].mxu0  ;;  %v3538_v37 = vld [vmem:[%s6586_s13 + $0x50] sm:$0xff]  ;;  %v3431_v38 = vadd.f32 %v3324_v32, %v3028_v20  ;;  %v5942_v30 = vpop.f32.mrb[102].mxu1 }
 0x1b1   : > { %v3822_v55 = vpop.f32.mrb[103].mxu0  ;;  %3469 = vst.msk [vmem:[%s6586_s13 + $0x70] sm:$0xff] %vm180_vm5, %v3433_v29  ;;  %v3940_v39 = vadd.f32 %v5975_v26, %v3538_v37  ;;  %v3536_v40 = vld [vmem:[%s6586_s13 + $0x40] sm:$0xff]  ;;  %v3434_v41 = vadd.f32 %v5942_v30, %v3031_v1  ;;  %v3327_v36 = vpop.f32.mrb[103].mxu1  ;;  %v3037_v26 = vld [vmem:[%s6586_s13 + $0xa8] sm:$0xff] }
 0x1b2   : > { %3467 = vst.msk [vmem:[%s6586_s13 + $0x60] sm:$0xff] %vm180_vm5, %v3431_v38  ;;  %v3938_v15 = vadd.f32 %v3819_v28, %v3536_v40  ;;  %v3539_v45 = vld [vmem:[%s6586_s13 + $0x58] sm:$0xff]  ;;  %v3432_v46 = vadd.f32 %v3327_v36, %v3029_v43  ;;  %v3042_v38 = vld [vmem:[%s6586_s13 + $0xd0] sm:$0xff] }
 0x1b3   : > { %3976 = vst.msk [vmem:[%s6586_s13 + $0x50] sm:$0xff] %vm180_vm5, %v3940_v39  ;;  %3470 = vst.msk [vmem:[%s6586_s13 + $0x78] sm:$0xff] %vm180_vm5, %v3434_v41  ;;  %v3941_v47 = vadd.f32 %v5976_v35, %v3539_v45  ;;  %v3537_v49 = vld [vmem:[%s6586_s13 + $0x48] sm:$0xff]  ;;  %v3040_v39 = vld [vmem:[%s6586_s13 + $0xc0] sm:$0xff] }
 0x1b4   : > { %3974 = vst.msk [vmem:[%s6586_s13 + $0x40] sm:$0xff] %vm180_vm5, %v3938_v15  ;;  %3468 = vst.msk [vmem:[%s6586_s13 + $0x68] sm:$0xff] %vm180_vm5, %v3432_v46  ;;  %v3939_v17 = vadd.f32 %v3822_v55, %v3537_v49  ;;  %v3043_v15 = vld [vmem:[%s6586_s13 + $0xd8] sm:$0xff] }
 0x1b5   : > { %3977 = vst.msk [vmem:[%s6586_s13 + $0x58] sm:$0xff] %vm180_vm5, %v3941_v47 }
 0x1b6   : > { %v5979_v60 = vpop.f32.mrb[104].mxu0  ;;  %3975 = vst.msk [vmem:[%s6586_s13 + $0x48] sm:$0xff] %vm180_vm5, %v3939_v17  ;;  %v5945_v50 = vpop.f32.mrb[104].mxu1 }
 0x1b7   : > { %v3835_v57 = vpop.f32.mrb[105].mxu0  ;;  %v3437_v51 = vadd.f32 %v5945_v50, %v3034_v34  ;;  %v3340_v53 = vpop.f32.mrb[105].mxu1 }
 0x1b8   : > { %v5980_v54 = vpop.f32.mrb[106].mxu0  ;;  %v3542_v33 = vld [vmem:[%s6586_s13 + $0x70] sm:$0xff]  ;;  %v3435_v48 = vadd.f32 %v3340_v53, %v3032_v52  ;;  %v5946_v58 = vpop.f32.mrb[106].mxu1 }
 0x1b9   : > { %v3838_v16 = vpop.f32.mrb[107].mxu0  ;;  %3473 = vst.msk [vmem:[%s6586_s13 + $0x90] sm:$0xff] %vm180_vm5, %v3437_v51  ;;  %v3944_v59 = vadd.f32 %v5979_v60, %v3542_v33  ;;  %v3540_v44 = vld [vmem:[%s6586_s13 + $0x60] sm:$0xff]  ;;  %v3438_v62 = vadd.f32 %v5946_v58, %v3035_v56  ;;  %v3343_v2 = vpop.f32.mrb[107].mxu1  ;;  %v3041_v60 = vld [vmem:[%s6586_s13 + $0xc8] sm:$0xff] }
 0x1ba   : > { %3471 = vst.msk [vmem:[%s6586_s13 + $0x80] sm:$0xff] %vm180_vm5, %v3435_v48  ;;  %v3942_v3 = vadd.f32 %v3835_v57, %v3540_v44  ;;  %v3543_v63 = vld [vmem:[%s6586_s13 + $0x78] sm:$0xff]  ;;  %v3436_v14 = vadd.f32 %v3343_v2, %v3033_v0  ;;  %v3046_v48 = vld [vmem:[%s6586_s13 + $0xf0] sm:$0xff] }
 0x1bb   : > { %3980 = vst.msk [vmem:[%s6586_s13 + $0x70] sm:$0xff] %vm180_vm5, %v3944_v59  ;;  %3474 = vst.msk [vmem:[%s6586_s13 + $0x98] sm:$0xff] %vm180_vm5, %v3438_v62  ;;  %v3945_v5 = vadd.f32 %v5980_v54, %v3543_v63  ;;  %v3541_v7 = vld [vmem:[%s6586_s13 + $0x68] sm:$0xff]  ;;  %v3044_v59 = vld [vmem:[%s6586_s13 + $0xe0] sm:$0xff] }
 0x1bc   : > { %3978 = vst.msk [vmem:[%s6586_s13 + $0x60] sm:$0xff] %vm180_vm5, %v3942_v3  ;;  %3472 = vst.msk [vmem:[%s6586_s13 + $0x88] sm:$0xff] %vm180_vm5, %v3436_v14  ;;  %v3943_v8 = vadd.f32 %v3838_v16, %v3541_v7  ;;  %v3047_v3 = vld [vmem:[%s6586_s13 + $0xf8] sm:$0xff] }
 0x1bd   : > { %3981 = vst.msk [vmem:[%s6586_s13 + $0x78] sm:$0xff] %vm180_vm5, %v3945_v5 }
 0x1be   : > { %v5983_v42 = vpop.f32.mrb[108].mxu0  ;;  %3979 = vst.msk [vmem:[%s6586_s13 + $0x68] sm:$0xff] %vm180_vm5, %v3943_v8  ;;  %v5949_v10 = vpop.f32.mrb[108].mxu1 }
 0x1bf   : > { %v3851_v31 = vpop.f32.mrb[109].mxu0  ;;  %v3441_v9 = vadd.f32 %v5949_v10, %v3038_v4  ;;  %v3356_v13 = vpop.f32.mrb[109].mxu1 }
 0x1c0   : > { %v5984_v11 = vpop.f32.mrb[110].mxu0  ;;  %v3546_v21 = vld [vmem:[%s6586_s13 + $0x90] sm:$0xff]  ;;  %v3439_v22 = vadd.f32 %v3356_v13, %v3036_v12  ;;  %v5950_v23 = vpop.f32.mrb[110].mxu1 }
 0x1c1   : > { %v3854_v18 = vpop.f32.mrb[111].mxu0  ;;  %3477 = vst.msk [vmem:[%s6586_s13 + $0xb0] sm:$0xff] %vm180_vm5, %v3441_v9  ;;  %v3948_v24 = vadd.f32 %v5983_v42, %v3546_v21  ;;  %v3544_v25 = vld [vmem:[%s6586_s13 + $0x80] sm:$0xff]  ;;  %v3442_v61 = vadd.f32 %v5950_v23, %v3039_v6  ;;  %v3359_v27 = vpop.f32.mrb[111].mxu1  ;;  %v3045_v42 = vld [vmem:[%s6586_s13 + $0xe8] sm:$0xff] }
 0x1c2   : > { %3475 = vst.msk [vmem:[%s6586_s13 + $0xa0] sm:$0xff] %vm180_vm5, %v3439_v22  ;;  %v3946_v19 = vadd.f32 %v3851_v31, %v3544_v25  ;;  %v3547_v28 = vld [vmem:[%s6586_s13 + $0x98] sm:$0xff]  ;;  %v3440_v29 = vadd.f32 %v3359_v27, %v3037_v26  ;;  %v3050_v22 = vld [vmem:[%s6586_s13 + $0x110] sm:$0xff] }
 0x1c3   : > { %3984 = vst.msk [vmem:[%s6586_s13 + $0x90] sm:$0xff] %vm180_vm5, %v3948_v24  ;;  %3478 = vst.msk [vmem:[%s6586_s13 + $0xb8] sm:$0xff] %vm180_vm5, %v3442_v61  ;;  %v3949_v20 = vadd.f32 %v5984_v11, %v3547_v28  ;;  %v3545_v32 = vld [vmem:[%s6586_s13 + $0x88] sm:$0xff]  ;;  %v3048_v24 = vld [vmem:[%s6586_s13 + $0x100] sm:$0xff] }
 0x1c4   : > { %3982 = vst.msk [vmem:[%s6586_s13 + $0x80] sm:$0xff] %vm180_vm5, %v3946_v19  ;;  %3476 = vst.msk [vmem:[%s6586_s13 + $0xa8] sm:$0xff] %vm180_vm5, %v3440_v29  ;;  %v3947_v35 = vadd.f32 %v3854_v18, %v3545_v32  ;;  %v3051_v19 = vld [vmem:[%s6586_s13 + $0x118] sm:$0xff] }
 0x1c5   : > { %3985 = vst.msk [vmem:[%s6586_s13 + $0x98] sm:$0xff] %vm180_vm5, %v3949_v20 }
 0x1c6   : > { %v5987_v37 = vpop.f32.mrb[112].mxu0  ;;  %3983 = vst.msk [vmem:[%s6586_s13 + $0x88] sm:$0xff] %vm180_vm5, %v3947_v35  ;;  %v5953_v1 = vpop.f32.mrb[112].mxu1 }
 0x1c7   : > { %v3867_v30 = vpop.f32.mrb[113].mxu0  ;;  %v3445_v55 = vadd.f32 %v5953_v1, %v3042_v38  ;;  %v3372_v40 = vpop.f32.mrb[113].mxu1 }
 0x1c8   : > { %v5988_v41 = vpop.f32.mrb[114].mxu0  ;;  %v3550_v43 = vld [vmem:[%s6586_s13 + $0xb0] sm:$0xff]  ;;  %v3443_v36 = vadd.f32 %v3372_v40, %v3040_v39  ;;  %v5954_v45 = vpop.f32.mrb[114].mxu1 }
 0x1c9   : > { %v3870_v46 = vpop.f32.mrb[115].mxu0  ;;  %3481 = vst.msk [vmem:[%s6586_s13 + $0xd0] sm:$0xff] %vm180_vm5, %v3445_v55  ;;  %v3952_v47 = vadd.f32 %v5987_v37, %v3550_v43  ;;  %v3548_v49 = vld [vmem:[%s6586_s13 + $0xa0] sm:$0xff]  ;;  %v3446_v17 = vadd.f32 %v5954_v45, %v3043_v15  ;;  %v3375_v34 = vpop.f32.mrb[115].mxu1  ;;  %v3049_v37 = vld [vmem:[%s6586_s13 + $0x108] sm:$0xff] }
 0x1ca   : > { %3479 = vst.msk [vmem:[%s6586_s13 + $0xc0] sm:$0xff] %vm180_vm5, %v3443_v36  ;;  %v3950_v50 = vadd.f32 %v3867_v30, %v3548_v49  ;;  %v3551_v57 = vld [vmem:[%s6586_s13 + $0xb8] sm:$0xff]  ;;  %v3444_v51 = vadd.f32 %v3375_v34, %v3041_v60  ;;  %v4041_v36 = vld [vmem:[%s6586_s13 + $0x10] sm:$0xff] }
 0x1cb   : > { %3988 = vst.msk [vmem:[%s6586_s13 + $0xb0] sm:$0xff] %vm180_vm5, %v3952_v47  ;;  %3482 = vst.msk [vmem:[%s6586_s13 + $0xd8] sm:$0xff] %vm180_vm5, %v3446_v17  ;;  %v3953_v52 = vadd.f32 %v5988_v41, %v3551_v57  ;;  %v3549_v53 = vld [vmem:[%s6586_s13 + $0xa8] sm:$0xff]  ;;  %v4039_v47 = vld [vmem:[%s6586_s13] sm:$0xff] }
 0x1cc   : > { %3986 = vst.msk [vmem:[%s6586_s13 + $0xa0] sm:$0xff] %vm180_vm5, %v3950_v50  ;;  %3480 = vst.msk [vmem:[%s6586_s13 + $0xc8] sm:$0xff] %vm180_vm5, %v3444_v51  ;;  %v3951_v54 = vadd.f32 %v3870_v46, %v3549_v53  ;;  %v4042_v50 = vld [vmem:[%s6586_s13 + $0x18] sm:$0xff] }
 0x1cd   : > { %3989 = vst.msk [vmem:[%s6586_s13 + $0xb8] sm:$0xff] %vm180_vm5, %v3953_v52 }
 0x1ce   : > { %v5991_v33 = vpop.f32.mrb[116].mxu0  ;;  %3987 = vst.msk [vmem:[%s6586_s13 + $0xa8] sm:$0xff] %vm180_vm5, %v3951_v54  ;;  %v5957_v56 = vpop.f32.mrb[116].mxu1 }
 0x1cf   : > { %v3883_v58 = vpop.f32.mrb[117].mxu0  ;;  %v3449_v16 = vadd.f32 %v5957_v56, %v3046_v48  ;;  %v3388_v44 = vpop.f32.mrb[117].mxu1 }
 0x1d0   : > { %v5992_v62 = vpop.f32.mrb[118].mxu0  ;;  %v3554_v0 = vld [vmem:[%s6586_s13 + $0xd0] sm:$0xff]  ;;  %v3447_v2 = vadd.f32 %v3388_v44, %v3044_v59  ;;  %v5958_v63 = vpop.f32.mrb[118].mxu1 }
 0x1d1   : > { %v3886_v14 = vpop.f32.mrb[119].mxu0  ;;  %3485 = vst.msk [vmem:[%s6586_s13 + $0xf0] sm:$0xff] %vm180_vm5, %v3449_v16  ;;  %v3956_v5 = vadd.f32 %v5991_v33, %v3554_v0  ;;  %v3552_v7 = vld [vmem:[%s6586_s13 + $0xc0] sm:$0xff]  ;;  %v3450_v8 = vadd.f32 %v5958_v63, %v3047_v3  ;;  %v3391_v4 = vpop.f32.mrb[119].mxu1  ;;  %v4040_v33 = vld [vmem:[%s6586_s13 + $0x8] sm:$0xff] }
 0x1d2   : > { %3483 = vst.msk [vmem:[%s6586_s13 + $0xe0] sm:$0xff] %vm180_vm5, %v3447_v2  ;;  %v3954_v10 = vadd.f32 %v3883_v58, %v3552_v7  ;;  %v3555_v31 = vld [vmem:[%s6586_s13 + $0xd8] sm:$0xff]  ;;  %v3448_v9 = vadd.f32 %v3391_v4, %v3045_v42  ;;  %v4045_v2 = vld [vmem:[%s6586_s13 + $0x30] sm:$0xff] }
 0x1d3   : > { %3992 = vst.msk [vmem:[%s6586_s13 + $0xd0] sm:$0xff] %vm180_vm5, %v3956_v5  ;;  %3486 = vst.msk [vmem:[%s6586_s13 + $0xf8] sm:$0xff] %vm180_vm5, %v3450_v8  ;;  %v3957_v12 = vadd.f32 %v5992_v62, %v3555_v31  ;;  %v3553_v13 = vld [vmem:[%s6586_s13 + $0xc8] sm:$0xff]  ;;  %v4043_v5 = vld [vmem:[%s6586_s13 + $0x20] sm:$0xff] }
 0x1d4   : > { %3990 = vst.msk [vmem:[%s6586_s13 + $0xc0] sm:$0xff] %vm180_vm5, %v3954_v10  ;;  %3484 = vst.msk [vmem:[%s6586_s13 + $0xe8] sm:$0xff] %vm180_vm5, %v3448_v9  ;;  %v3955_v11 = vadd.f32 %v3886_v14, %v3553_v13  ;;  %v4046_v10 = vld [vmem:[%s6586_s13 + $0x38] sm:$0xff] }
 0x1d5   : > { %3993 = vst.msk [vmem:[%s6586_s13 + $0xd8] sm:$0xff] %vm180_vm5, %v3957_v12 }
 0x1d6   : > { %v5995_v21 = vpop.f32.mrb[120].mxu0  ;;  %3991 = vst.msk [vmem:[%s6586_s13 + $0xc8] sm:$0xff] %vm180_vm5, %v3955_v11  ;;  %v5961_v6 = vpop.f32.mrb[120].mxu1 }
 0x1d7   : > { %v3899_v23 = vpop.f32.mrb[121].mxu0  ;;  %v3453_v18 = vadd.f32 %v5961_v6, %v3050_v22  ;;  %v3404_v25 = vpop.f32.mrb[121].mxu1 }
 0x1d8   : > { %v5996_v61 = vpop.f32.mrb[122].mxu0  ;;  %v3558_v26 = vld [vmem:[%s6586_s13 + $0xf0] sm:$0xff]  ;;  %v3451_v27 = vadd.f32 %v3404_v25, %v3048_v24  ;;  %v5962_v28 = vpop.f32.mrb[122].mxu1 }
 0x1d9   : > { %v3902_v29 = vpop.f32.mrb[123].mxu0  ;;  %3489 = vst.msk [vmem:[%s6586_s13 + $0x110] sm:$0xff] %vm180_vm5, %v3453_v18  ;;  %v3960_v20 = vadd.f32 %v5995_v21, %v3558_v26  ;;  %v3556_v32 = vld [vmem:[%s6586_s13 + $0xe0] sm:$0xff]  ;;  %v3454_v35 = vadd.f32 %v5962_v28, %v3051_v19  ;;  %v3407_v38 = vpop.f32.mrb[123].mxu1  ;;  %v4044_v21 = vld [vmem:[%s6586_s13 + $0x28] sm:$0xff] }
 0x1da   : > { %3487 = vst.msk [vmem:[%s6586_s13 + $0x100] sm:$0xff] %vm180_vm5, %v3451_v27  ;;  %v3958_v1 = vadd.f32 %v3899_v23, %v3556_v32  ;;  %v3559_v30 = vld [vmem:[%s6586_s13 + $0xf8] sm:$0xff]  ;;  %v3452_v55 = vadd.f32 %v3407_v38, %v3049_v37  ;;  %v4049_v27 = vld [vmem:[%s6586_s13 + $0x50] sm:$0xff] }
 0x1db   : > { %3996 = vst.msk [vmem:[%s6586_s13 + $0xf0] sm:$0xff] %vm180_vm5, %v3960_v20  ;;  %3490 = vst.msk [vmem:[%s6586_s13 + $0x118] sm:$0xff] %vm180_vm5, %v3454_v35  ;;  %v3961_v39 = vadd.f32 %v5996_v61, %v3559_v30  ;;  %v3557_v40 = vld [vmem:[%s6586_s13 + $0xe8] sm:$0xff]  ;;  %v4047_v20 = vld [vmem:[%s6586_s13 + $0x40] sm:$0xff] }
 0x1dc   : > { %3994 = vst.msk [vmem:[%s6586_s13 + $0xe0] sm:$0xff] %vm180_vm5, %v3958_v1  ;;  %3488 = vst.msk [vmem:[%s6586_s13 + $0x108] sm:$0xff] %vm180_vm5, %v3452_v55  ;;  %v3959_v41 = vadd.f32 %v3902_v29, %v3557_v40  ;;  %v4050_v1 = vld [vmem:[%s6586_s13 + $0x58] sm:$0xff] }
 0x1dd   : > { %3997 = vst.msk [vmem:[%s6586_s13 + $0xf8] sm:$0xff] %vm180_vm5, %v3961_v39 }
 0x1de   : > { %v5999_v43 = vpop.f32.mrb[124].mxu0  ;;  %3995 = vst.msk [vmem:[%s6586_s13 + $0xe8] sm:$0xff] %vm180_vm5, %v3959_v41  ;;  %v6005_v15 = vpop.f32.mrb[124].mxu1 }
 0x1df   : > { %v3915_v45 = vpop.f32.mrb[125].mxu0  ;;  %v4577_v46 = vadd.f32 %v6005_v15, %v4041_v36  ;;  %v4432_v49 = vpop.f32.mrb[125].mxu1 }
 0x1e0   : > { %v6000_v17 = vpop.f32.mrb[126].mxu0  ;;  %v3562_v60 = vld [vmem:[%s6586_s13 + $0x110] sm:$0xff]  ;;  %v4575_v34 = vadd.f32 %v4432_v49, %v4039_v47  ;;  %v6006_v57 = vpop.f32.mrb[126].mxu1 }
 0x1e1   : > { %v3918_v51 = vpop.f32.mrb[127].mxu0  ;;  %v3964_v52 = vadd.f32 %v5999_v43, %v3562_v60  ;;  %4613 = vst.msk [vmem:[%s6586_s13 + $0x10] sm:$0xff] %vm180_vm5, %v4577_v46  ;;  %v3560_v53 = vld [vmem:[%s6586_s13 + $0x100] sm:$0xff]  ;;  %v4578_v54 = vadd.f32 %v6006_v57, %v4042_v50  ;;  %v4435_v48 = vpop.f32.mrb[127].mxu1  ;;  %v4048_v43 = vld [vmem:[%s6586_s13 + $0x48] sm:$0xff] }
 0x1e2   : > { %v3962_v56 = vadd.f32 %v3915_v45, %v3560_v53  ;;  %4611 = vst.msk [vmem:[%s6586_s13] sm:$0xff] %vm180_vm5, %v4575_v34  ;;  %v3563_v58 = vld [vmem:[%s6586_s13 + $0x118] sm:$0xff]  ;;  %v4576_v16 = vadd.f32 %v4435_v48, %v4040_v33  ;;  %v4053_v34 = vld [vmem:[%s6586_s13 + $0x70] sm:$0xff] }
 0x1e3   : > { %4000 = vst.msk [vmem:[%s6586_s13 + $0x110] sm:$0xff] %vm180_vm5, %v3964_v52  ;;  %v3965_v59 = vadd.f32 %v6000_v17, %v3563_v58  ;;  %4614 = vst.msk [vmem:[%s6586_s13 + $0x18] sm:$0xff] %vm180_vm5, %v4578_v54  ;;  %v3561_v44 = vld [vmem:[%s6586_s13 + $0x108] sm:$0xff]  ;;  %v4051_v52 = vld [vmem:[%s6586_s13 + $0x60] sm:$0xff] }
 0x1e4   : > { %3998 = vst.msk [vmem:[%s6586_s13 + $0x100] sm:$0xff] %vm180_vm5, %v3962_v56  ;;  %v3963_v62 = vadd.f32 %v3918_v51, %v3561_v44  ;;  %4612 = vst.msk [vmem:[%s6586_s13 + $0x8] sm:$0xff] %vm180_vm5, %v4576_v16  ;;  %v4054_v56 = vld [vmem:[%s6586_s13 + $0x78] sm:$0xff] }
 0x1e5   : > { %4001 = vst.msk [vmem:[%s6586_s13 + $0x118] sm:$0xff] %vm180_vm5, %v3965_v59 }
 0x1e6   : > { %v6043_v0 = vpop.f32.mrb[128].mxu0  ;;  %3999 = vst.msk [vmem:[%s6586_s13 + $0x108] sm:$0xff] %vm180_vm5, %v3963_v62  ;;  %v6009_v3 = vpop.f32.mrb[128].mxu1 }
 0x1e7   : > { %v4944_v63 = vpop.f32.mrb[129].mxu0  ;;  %v4581_v14 = vadd.f32 %v6009_v3, %v4045_v2  ;;  %v4448_v7 = vpop.f32.mrb[129].mxu1 }
 0x1e8   : > { %v6044_v8 = vpop.f32.mrb[130].mxu0  ;;  %v4686_v42 = vld [vmem:[%s6586_s13 + $0x10] sm:$0xff]  ;;  %v4579_v4 = vadd.f32 %v4448_v7, %v4043_v5  ;;  %v6010_v31 = vpop.f32.mrb[130].mxu1 }
 0x1e9   : > { %v4947_v9 = vpop.f32.mrb[131].mxu0  ;;  %4617 = vst.msk [vmem:[%s6586_s13 + $0x30] sm:$0xff] %vm180_vm5, %v4581_v14  ;;  %v5089_v12 = vadd.f32 %v6043_v0, %v4686_v42  ;;  %v4684_v13 = vld [vmem:[%s6586_s13] sm:$0xff]  ;;  %v4582_v11 = vadd.f32 %v6010_v31, %v4046_v10  ;;  %v4451_v22 = vpop.f32.mrb[131].mxu1  ;;  %v4052_v0 = vld [vmem:[%s6586_s13 + $0x68] sm:$0xff] }
 0x1ea   : > { %4615 = vst.msk [vmem:[%s6586_s13 + $0x20] sm:$0xff] %vm180_vm5, %v4579_v4  ;;  %v5087_v6 = vadd.f32 %v4944_v63, %v4684_v13  ;;  %v4687_v23 = vld [vmem:[%s6586_s13 + $0x18] sm:$0xff]  ;;  %v4580_v18 = vadd.f32 %v4451_v22, %v4044_v21  ;;  %v4057_v4 = vld [vmem:[%s6586_s13 + $0x90] sm:$0xff] }
 0x1eb   : > { %5125 = vst.msk [vmem:[%s6586_s13 + $0x10] sm:$0xff] %vm180_vm5, %v5089_v12  ;;  %4618 = vst.msk [vmem:[%s6586_s13 + $0x38] sm:$0xff] %vm180_vm5, %v4582_v11  ;;  %v5090_v24 = vadd.f32 %v6044_v8, %v4687_v23  ;;  %v4685_v25 = vld [vmem:[%s6586_s13 + $0x8] sm:$0xff]  ;;  %v4055_v12 = vld [vmem:[%s6586_s13 + $0x80] sm:$0xff] }
 0x1ec   : > { %5123 = vst.msk [vmem:[%s6586_s13] sm:$0xff] %vm180_vm5, %v5087_v6  ;;  %4616 = vst.msk [vmem:[%s6586_s13 + $0x28] sm:$0xff] %vm180_vm5, %v4580_v18  ;;  %v5088_v61 = vadd.f32 %v4947_v9, %v4685_v25  ;;  %v4058_v6 = vld [vmem:[%s6586_s13 + $0x98] sm:$0xff] }
 0x1ed   : > { %5126 = vst.msk [vmem:[%s6586_s13 + $0x18] sm:$0xff] %vm180_vm5, %v5090_v24 }
 0x1ee   : > { %v6047_v26 = vpop.f32.mrb[132].mxu0  ;;  %5124 = vst.msk [vmem:[%s6586_s13 + $0x8] sm:$0xff] %vm180_vm5, %v5088_v61  ;;  %v6013_v19 = vpop.f32.mrb[132].mxu1 }
 0x1ef   : > { %v4960_v28 = vpop.f32.mrb[133].mxu0  ;;  %v4585_v29 = vadd.f32 %v6013_v19, %v4049_v27  ;;  %v4464_v32 = vpop.f32.mrb[133].mxu1 }
 0x1f0   : > { %v6048_v35 = vpop.f32.mrb[134].mxu0  ;;  %v4690_v37 = vld [vmem:[%s6586_s13 + $0x30] sm:$0xff]  ;;  %v4583_v38 = vadd.f32 %v4464_v32, %v4047_v20  ;;  %v6014_v30 = vpop.f32.mrb[134].mxu1 }
 0x1f1   : > { %v4963_v55 = vpop.f32.mrb[135].mxu0  ;;  %4621 = vst.msk [vmem:[%s6586_s13 + $0x50] sm:$0xff] %vm180_vm5, %v4585_v29  ;;  %v5093_v39 = vadd.f32 %v6047_v26, %v4690_v37  ;;  %v4688_v40 = vld [vmem:[%s6586_s13 + $0x20] sm:$0xff]  ;;  %v4586_v41 = vadd.f32 %v6014_v30, %v4050_v1  ;;  %v4467_v36 = vpop.f32.mrb[135].mxu1  ;;  %v4056_v26 = vld [vmem:[%s6586_s13 + $0x88] sm:$0xff] }
 0x1f2   : > { %4619 = vst.msk [vmem:[%s6586_s13 + $0x40] sm:$0xff] %vm180_vm5, %v4583_v38  ;;  %v5091_v15 = vadd.f32 %v4960_v28, %v4688_v40  ;;  %v4691_v45 = vld [vmem:[%s6586_s13 + $0x38] sm:$0xff]  ;;  %v4584_v46 = vadd.f32 %v4467_v36, %v4048_v43  ;;  %v4061_v38 = vld [vmem:[%s6586_s13 + $0xb0] sm:$0xff] }
 0x1f3   : > { %5129 = vst.msk [vmem:[%s6586_s13 + $0x30] sm:$0xff] %vm180_vm5, %v5093_v39  ;;  %4622 = vst.msk [vmem:[%s6586_s13 + $0x58] sm:$0xff] %vm180_vm5, %v4586_v41  ;;  %v5094_v47 = vadd.f32 %v6048_v35, %v4691_v45  ;;  %v4689_v49 = vld [vmem:[%s6586_s13 + $0x28] sm:$0xff]  ;;  %v4059_v39 = vld [vmem:[%s6586_s13 + $0xa0] sm:$0xff] }
 0x1f4   : > { %5127 = vst.msk [vmem:[%s6586_s13 + $0x20] sm:$0xff] %vm180_vm5, %v5091_v15  ;;  %4620 = vst.msk [vmem:[%s6586_s13 + $0x48] sm:$0xff] %vm180_vm5, %v4584_v46  ;;  %v5092_v17 = vadd.f32 %v4963_v55, %v4689_v49  ;;  %v4062_v15 = vld [vmem:[%s6586_s13 + $0xb8] sm:$0xff] }
 0x1f5   : > { %5130 = vst.msk [vmem:[%s6586_s13 + $0x38] sm:$0xff] %vm180_vm5, %v5094_v47 }
 0x1f6   : > { %v6051_v60 = vpop.f32.mrb[136].mxu0  ;;  %5128 = vst.msk [vmem:[%s6586_s13 + $0x28] sm:$0xff] %vm180_vm5, %v5092_v17  ;;  %v6017_v50 = vpop.f32.mrb[136].mxu1 }
 0x1f7   : > { %v4976_v57 = vpop.f32.mrb[137].mxu0  ;;  %v4589_v51 = vadd.f32 %v6017_v50, %v4053_v34  ;;  %v4480_v53 = vpop.f32.mrb[137].mxu1 }
 0x1f8   : > { %v6052_v54 = vpop.f32.mrb[138].mxu0  ;;  %v4694_v33 = vld [vmem:[%s6586_s13 + $0x50] sm:$0xff]  ;;  %v4587_v48 = vadd.f32 %v4480_v53, %v4051_v52  ;;  %v6018_v58 = vpop.f32.mrb[138].mxu1 }
 0x1f9   : > { %v4979_v16 = vpop.f32.mrb[139].mxu0  ;;  %4625 = vst.msk [vmem:[%s6586_s13 + $0x70] sm:$0xff] %vm180_vm5, %v4589_v51  ;;  %v5097_v59 = vadd.f32 %v6051_v60, %v4694_v33  ;;  %v4692_v44 = vld [vmem:[%s6586_s13 + $0x40] sm:$0xff]  ;;  %v4590_v62 = vadd.f32 %v6018_v58, %v4054_v56  ;;  %v4483_v2 = vpop.f32.mrb[139].mxu1  ;;  %v4060_v60 = vld [vmem:[%s6586_s13 + $0xa8] sm:$0xff] }
 0x1fa   : > { %4623 = vst.msk [vmem:[%s6586_s13 + $0x60] sm:$0xff] %vm180_vm5, %v4587_v48  ;;  %v5095_v3 = vadd.f32 %v4976_v57, %v4692_v44  ;;  %v4695_v63 = vld [vmem:[%s6586_s13 + $0x58] sm:$0xff]  ;;  %v4588_v14 = vadd.f32 %v4483_v2, %v4052_v0  ;;  %v4065_v48 = vld [vmem:[%s6586_s13 + $0xd0] sm:$0xff] }
 0x1fb   : > { %5133 = vst.msk [vmem:[%s6586_s13 + $0x50] sm:$0xff] %vm180_vm5, %v5097_v59  ;;  %4626 = vst.msk [vmem:[%s6586_s13 + $0x78] sm:$0xff] %vm180_vm5, %v4590_v62  ;;  %v5098_v5 = vadd.f32 %v6052_v54, %v4695_v63  ;;  %v4693_v7 = vld [vmem:[%s6586_s13 + $0x48] sm:$0xff]  ;;  %v4063_v59 = vld [vmem:[%s6586_s13 + $0xc0] sm:$0xff] }
 0x1fc   : > { %5131 = vst.msk [vmem:[%s6586_s13 + $0x40] sm:$0xff] %vm180_vm5, %v5095_v3  ;;  %4624 = vst.msk [vmem:[%s6586_s13 + $0x68] sm:$0xff] %vm180_vm5, %v4588_v14  ;;  %v5096_v8 = vadd.f32 %v4979_v16, %v4693_v7  ;;  %v4066_v3 = vld [vmem:[%s6586_s13 + $0xd8] sm:$0xff] }
 0x1fd   : > { %5134 = vst.msk [vmem:[%s6586_s13 + $0x58] sm:$0xff] %vm180_vm5, %v5098_v5 }
 0x1fe   : > { %v6055_v42 = vpop.f32.mrb[140].mxu0  ;;  %5132 = vst.msk [vmem:[%s6586_s13 + $0x48] sm:$0xff] %vm180_vm5, %v5096_v8  ;;  %v6021_v10 = vpop.f32.mrb[140].mxu1 }
 0x1ff   : > { %v4992_v31 = vpop.f32.mrb[141].mxu0  ;;  %v4593_v9 = vadd.f32 %v6021_v10, %v4057_v4  ;;  %v4496_v13 = vpop.f32.mrb[141].mxu1 }
 0x200   : > { %v6056_v11 = vpop.f32.mrb[142].mxu0  ;;  %v4698_v21 = vld [vmem:[%s6586_s13 + $0x70] sm:$0xff]  ;;  %v4591_v22 = vadd.f32 %v4496_v13, %v4055_v12  ;;  %v6022_v23 = vpop.f32.mrb[142].mxu1 }
 0x201   : > { %v4995_v18 = vpop.f32.mrb[143].mxu0  ;;  %4629 = vst.msk [vmem:[%s6586_s13 + $0x90] sm:$0xff] %vm180_vm5, %v4593_v9  ;;  %v5101_v24 = vadd.f32 %v6055_v42, %v4698_v21  ;;  %v4696_v25 = vld [vmem:[%s6586_s13 + $0x60] sm:$0xff]  ;;  %v4594_v61 = vadd.f32 %v6022_v23, %v4058_v6  ;;  %v4499_v27 = vpop.f32.mrb[143].mxu1  ;;  %v4064_v42 = vld [vmem:[%s6586_s13 + $0xc8] sm:$0xff] }
 0x202   : > { %4627 = vst.msk [vmem:[%s6586_s13 + $0x80] sm:$0xff] %vm180_vm5, %v4591_v22  ;;  %v5099_v19 = vadd.f32 %v4992_v31, %v4696_v25  ;;  %v4699_v28 = vld [vmem:[%s6586_s13 + $0x78] sm:$0xff]  ;;  %v4592_v29 = vadd.f32 %v4499_v27, %v4056_v26  ;;  %v4069_v22 = vld [vmem:[%s6586_s13 + $0xf0] sm:$0xff] }
 0x203   : > { %5137 = vst.msk [vmem:[%s6586_s13 + $0x70] sm:$0xff] %vm180_vm5, %v5101_v24  ;;  %4630 = vst.msk [vmem:[%s6586_s13 + $0x98] sm:$0xff] %vm180_vm5, %v4594_v61  ;;  %v5102_v20 = vadd.f32 %v6056_v11, %v4699_v28  ;;  %v4697_v32 = vld [vmem:[%s6586_s13 + $0x68] sm:$0xff]  ;;  %v4067_v24 = vld [vmem:[%s6586_s13 + $0xe0] sm:$0xff] }
 0x204   : > { %5135 = vst.msk [vmem:[%s6586_s13 + $0x60] sm:$0xff] %vm180_vm5, %v5099_v19  ;;  %4628 = vst.msk [vmem:[%s6586_s13 + $0x88] sm:$0xff] %vm180_vm5, %v4592_v29  ;;  %v5100_v35 = vadd.f32 %v4995_v18, %v4697_v32  ;;  %v4070_v19 = vld [vmem:[%s6586_s13 + $0xf8] sm:$0xff] }
 0x205   : > { %5138 = vst.msk [vmem:[%s6586_s13 + $0x78] sm:$0xff] %vm180_vm5, %v5102_v20 }
 0x206   : > { %v6059_v37 = vpop.f32.mrb[144].mxu0  ;;  %5136 = vst.msk [vmem:[%s6586_s13 + $0x68] sm:$0xff] %vm180_vm5, %v5100_v35  ;;  %v6025_v1 = vpop.f32.mrb[144].mxu1 }
 0x207   : > { %v5008_v30 = vpop.f32.mrb[145].mxu0  ;;  %v4597_v55 = vadd.f32 %v6025_v1, %v4061_v38  ;;  %v4512_v40 = vpop.f32.mrb[145].mxu1 }
 0x208   : > { %v6060_v41 = vpop.f32.mrb[146].mxu0  ;;  %v4702_v43 = vld [vmem:[%s6586_s13 + $0x90] sm:$0xff]  ;;  %v4595_v36 = vadd.f32 %v4512_v40, %v4059_v39  ;;  %v6026_v45 = vpop.f32.mrb[146].mxu1 }
 0x209   : > { %v5011_v46 = vpop.f32.mrb[147].mxu0  ;;  %4633 = vst.msk [vmem:[%s6586_s13 + $0xb0] sm:$0xff] %vm180_vm5, %v4597_v55  ;;  %v5105_v47 = vadd.f32 %v6059_v37, %v4702_v43  ;;  %v4700_v49 = vld [vmem:[%s6586_s13 + $0x80] sm:$0xff]  ;;  %v4598_v17 = vadd.f32 %v6026_v45, %v4062_v15  ;;  %v4515_v34 = vpop.f32.mrb[147].mxu1  ;;  %v4068_v37 = vld [vmem:[%s6586_s13 + $0xe8] sm:$0xff] }
 0x20a   : > { %4631 = vst.msk [vmem:[%s6586_s13 + $0xa0] sm:$0xff] %vm180_vm5, %v4595_v36  ;;  %v5103_v50 = vadd.f32 %v5008_v30, %v4700_v49  ;;  %v4703_v57 = vld [vmem:[%s6586_s13 + $0x98] sm:$0xff]  ;;  %v4596_v51 = vadd.f32 %v4515_v34, %v4060_v60  ;;  %v4073_v36 = vld [vmem:[%s6586_s13 + $0x110] sm:$0xff] }
 0x20b   : > { %5141 = vst.msk [vmem:[%s6586_s13 + $0x90] sm:$0xff] %vm180_vm5, %v5105_v47  ;;  %4634 = vst.msk [vmem:[%s6586_s13 + $0xb8] sm:$0xff] %vm180_vm5, %v4598_v17  ;;  %v5106_v52 = vadd.f32 %v6060_v41, %v4703_v57  ;;  %v4701_v53 = vld [vmem:[%s6586_s13 + $0x88] sm:$0xff]  ;;  %v4071_v47 = vld [vmem:[%s6586_s13 + $0x100] sm:$0xff] }
 0x20c   : > { %5139 = vst.msk [vmem:[%s6586_s13 + $0x80] sm:$0xff] %vm180_vm5, %v5103_v50  ;;  %4632 = vst.msk [vmem:[%s6586_s13 + $0xa8] sm:$0xff] %vm180_vm5, %v4596_v51  ;;  %v5104_v54 = vadd.f32 %v5011_v46, %v4701_v53  ;;  %v4074_v50 = vld [vmem:[%s6586_s13 + $0x118] sm:$0xff] }
 0x20d   : > { %5142 = vst.msk [vmem:[%s6586_s13 + $0x98] sm:$0xff] %vm180_vm5, %v5106_v52 }
 0x20e   : > { %v6063_v33 = vpop.f32.mrb[148].mxu0  ;;  %5140 = vst.msk [vmem:[%s6586_s13 + $0x88] sm:$0xff] %vm180_vm5, %v5104_v54  ;;  %v6029_v56 = vpop.f32.mrb[148].mxu1 }
 0x20f   : > { %v5024_v58 = vpop.f32.mrb[149].mxu0  ;;  %v4601_v16 = vadd.f32 %v6029_v56, %v4065_v48  ;;  %v4528_v44 = vpop.f32.mrb[149].mxu1 }
 0x210   : > { %v6064_v62 = vpop.f32.mrb[150].mxu0  ;;  %v4706_v0 = vld [vmem:[%s6586_s13 + $0xb0] sm:$0xff]  ;;  %v4599_v2 = vadd.f32 %v4528_v44, %v4063_v59  ;;  %v6030_v63 = vpop.f32.mrb[150].mxu1 }
 0x211   : > { %v5027_v14 = vpop.f32.mrb[151].mxu0  ;;  %4637 = vst.msk [vmem:[%s6586_s13 + $0xd0] sm:$0xff] %vm180_vm5, %v4601_v16  ;;  %v5109_v5 = vadd.f32 %v6063_v33, %v4706_v0  ;;  %v4704_v7 = vld [vmem:[%s6586_s13 + $0xa0] sm:$0xff]  ;;  %v4602_v8 = vadd.f32 %v6030_v63, %v4066_v3  ;;  %v4531_v4 = vpop.f32.mrb[151].mxu1  ;;  %v4072_v33 = vld [vmem:[%s6586_s13 + $0x108] sm:$0xff] }
 0x212   : > { %4635 = vst.msk [vmem:[%s6586_s13 + $0xc0] sm:$0xff] %vm180_vm5, %v4599_v2  ;;  %v5107_v10 = vadd.f32 %v5024_v58, %v4704_v7  ;;  %v4707_v31 = vld [vmem:[%s6586_s13 + $0xb8] sm:$0xff]  ;;  %v4600_v9 = vadd.f32 %v4531_v4, %v4064_v42 }
 0x213   : > { %5145 = vst.msk [vmem:[%s6586_s13 + $0xb0] sm:$0xff] %vm180_vm5, %v5109_v5  ;;  %4638 = vst.msk [vmem:[%s6586_s13 + $0xd8] sm:$0xff] %vm180_vm5, %v4602_v8  ;;  %v5110_v12 = vadd.f32 %v6064_v62, %v4707_v31  ;;  %v4705_v13 = vld [vmem:[%s6586_s13 + $0xa8] sm:$0xff] }
 0x214   : > { %5143 = vst.msk [vmem:[%s6586_s13 + $0xa0] sm:$0xff] %vm180_vm5, %v5107_v10  ;;  %4636 = vst.msk [vmem:[%s6586_s13 + $0xc8] sm:$0xff] %vm180_vm5, %v4600_v9  ;;  %v5108_v11 = vadd.f32 %v5027_v14, %v4705_v13 }
 0x215   : > { %5146 = vst.msk [vmem:[%s6586_s13 + $0xb8] sm:$0xff] %vm180_vm5, %v5110_v12 }
 0x216   : > { %v6067_v21 = vpop.f32.mrb[152].mxu0  ;;  %5144 = vst.msk [vmem:[%s6586_s13 + $0xa8] sm:$0xff] %vm180_vm5, %v5108_v11  ;;  %v6033_v6 = vpop.f32.mrb[152].mxu1 }
 0x217   : > { %v5040_v23 = vpop.f32.mrb[153].mxu0  ;;  %v4605_v18 = vadd.f32 %v6033_v6, %v4069_v22  ;;  %v4544_v25 = vpop.f32.mrb[153].mxu1 }
 0x218   : > { %v6068_v61 = vpop.f32.mrb[154].mxu0  ;;  %v4710_v26 = vld [vmem:[%s6586_s13 + $0xd0] sm:$0xff]  ;;  %v4603_v27 = vadd.f32 %v4544_v25, %v4067_v24  ;;  %v6034_v28 = vpop.f32.mrb[154].mxu1 }
 0x219   : > { %v5043_v29 = vpop.f32.mrb[155].mxu0  ;;  %4641 = vst.msk [vmem:[%s6586_s13 + $0xf0] sm:$0xff] %vm180_vm5, %v4605_v18  ;;  %v5113_v20 = vadd.f32 %v6067_v21, %v4710_v26  ;;  %v4708_v32 = vld [vmem:[%s6586_s13 + $0xc0] sm:$0xff]  ;;  %v4606_v35 = vadd.f32 %v6034_v28, %v4070_v19  ;;  %v4547_v38 = vpop.f32.mrb[155].mxu1 }
 0x21a   : > { %4639 = vst.msk [vmem:[%s6586_s13 + $0xe0] sm:$0xff] %vm180_vm5, %v4603_v27  ;;  %v5111_v1 = vadd.f32 %v5040_v23, %v4708_v32  ;;  %v4711_v30 = vld [vmem:[%s6586_s13 + $0xd8] sm:$0xff]  ;;  %v4604_v55 = vadd.f32 %v4547_v38, %v4068_v37 }
 0x21b   : > { %5149 = vst.msk [vmem:[%s6586_s13 + $0xd0] sm:$0xff] %vm180_vm5, %v5113_v20  ;;  %4642 = vst.msk [vmem:[%s6586_s13 + $0xf8] sm:$0xff] %vm180_vm5, %v4606_v35  ;;  %v5114_v39 = vadd.f32 %v6068_v61, %v4711_v30  ;;  %v4709_v40 = vld [vmem:[%s6586_s13 + $0xc8] sm:$0xff] }
 0x21c   : > { %5147 = vst.msk [vmem:[%s6586_s13 + $0xc0] sm:$0xff] %vm180_vm5, %v5111_v1  ;;  %4640 = vst.msk [vmem:[%s6586_s13 + $0xe8] sm:$0xff] %vm180_vm5, %v4604_v55  ;;  %v5112_v41 = vadd.f32 %v5043_v29, %v4709_v40 }
 0x21d   : > { %5150 = vst.msk [vmem:[%s6586_s13 + $0xd8] sm:$0xff] %vm180_vm5, %v5114_v39 }
 0x21e   : > { %v6071_v43 = vpop.f32.mrb[156].mxu0  ;;  %5148 = vst.msk [vmem:[%s6586_s13 + $0xc8] sm:$0xff] %vm180_vm5, %v5112_v41  ;;  %v6037_v15 = vpop.f32.mrb[156].mxu1 }
 0x21f   : > { %v5056_v45 = vpop.f32.mrb[157].mxu0  ;;  %v4609_v46 = vadd.f32 %v6037_v15, %v4073_v36  ;;  %v4560_v49 = vpop.f32.mrb[157].mxu1 }
 0x220   : > { %v6072_v17 = vpop.f32.mrb[158].mxu0  ;;  %v4714_v60 = vld [vmem:[%s6586_s13 + $0xf0] sm:$0xff]  ;;  %v4607_v34 = vadd.f32 %v4560_v49, %v4071_v47  ;;  %v6038_v57 = vpop.f32.mrb[158].mxu1 }
 0x221   : > { %v5059_v51 = vpop.f32.mrb[159].mxu0  ;;  %4645 = vst.msk [vmem:[%s6586_s13 + $0x110] sm:$0xff] %vm180_vm5, %v4609_v46  ;;  %v5117_v52 = vadd.f32 %v6071_v43, %v4714_v60  ;;  %v4712_v53 = vld [vmem:[%s6586_s13 + $0xe0] sm:$0xff]  ;;  %v4610_v54 = vadd.f32 %v6038_v57, %v4074_v50  ;;  %v4563_v48 = vpop.f32.mrb[159].mxu1 }
 0x222   : > { %4643 = vst.msk [vmem:[%s6586_s13 + $0x100] sm:$0xff] %vm180_vm5, %v4607_v34  ;;  %v5115_v56 = vadd.f32 %v5056_v45, %v4712_v53  ;;  %v4715_v58 = vld [vmem:[%s6586_s13 + $0xf8] sm:$0xff]  ;;  %v4608_v16 = vadd.f32 %v4563_v48, %v4072_v33 }
 0x223   : > { %5153 = vst.msk [vmem:[%s6586_s13 + $0xf0] sm:$0xff] %vm180_vm5, %v5117_v52  ;;  %4646 = vst.msk [vmem:[%s6586_s13 + $0x118] sm:$0xff] %vm180_vm5, %v4610_v54  ;;  %v5118_v59 = vadd.f32 %v6072_v17, %v4715_v58  ;;  %v4713_v44 = vld [vmem:[%s6586_s13 + $0xe8] sm:$0xff] }
 0x224   : > { %5151 = vst.msk [vmem:[%s6586_s13 + $0xe0] sm:$0xff] %vm180_vm5, %v5115_v56  ;;  %4644 = vst.msk [vmem:[%s6586_s13 + $0x108] sm:$0xff] %vm180_vm5, %v4608_v16  ;;  %v5116_v62 = vadd.f32 %v5059_v51, %v4713_v44 }
 0x225   : > { %5154 = vst.msk [vmem:[%s6586_s13 + $0xf8] sm:$0xff] %vm180_vm5, %v5118_v59 }
 0x226   : > { %v6075_v0 = vpop.f32.mrb[160].mxu0  ;;  %5152 = vst.msk [vmem:[%s6586_s13 + $0xe8] sm:$0xff] %vm180_vm5, %v5116_v62 }
 0x227   : > { %v5072_v2 = vpop.f32.mrb[161].mxu0 }
 0x228   : > { %v6076_v3 = vpop.f32.mrb[162].mxu0  ;;  %v4718_v63 = vld [vmem:[%s6586_s13 + $0x110] sm:$0xff] }
 0x229   : > { %v5075_v14 = vpop.f32.mrb[163].mxu0  ;;  %v5121_v5 = vadd.f32 %v6075_v0, %v4718_v63  ;;  %v4716_v7 = vld [vmem:[%s6586_s13 + $0x100] sm:$0xff] }
 0x22a   : > { %v5119_v8 = vadd.f32 %v5072_v2, %v4716_v7  ;;  %v4719_v42 = vld [vmem:[%s6586_s13 + $0x118] sm:$0xff] }
 0x22b   : > { %5157 = vst.msk [vmem:[%s6586_s13 + $0x110] sm:$0xff] %vm180_vm5, %v5121_v5  ;;  %v5122_v4 = vadd.f32 %v6076_v3, %v4719_v42  ;;  %v4717_v10 = vld [vmem:[%s6586_s13 + $0x108] sm:$0xff] }
 0x22c   : > { %5155 = vst.msk [vmem:[%s6586_s13 + $0x100] sm:$0xff] %vm180_vm5, %v5119_v8  ;;  %v5120_v31 = vadd.f32 %v5075_v14, %v4717_v10 }
 0x22d   : > { %5158 = vst.msk [vmem:[%s6586_s13 + $0x118] sm:$0xff] %vm180_vm5, %v5122_v4 }
 0x22e   : > { %5156 = vst.msk [vmem:[%s6586_s13 + $0x108] sm:$0xff] %vm180_vm5, %v5120_v31 }
 0x22f PF: > { %s13_s12 = sadd.s32 1, %s6275_s12  }
 0x230   : > { %p10_p4 = scmp.ge.s32.totalorder %s13_s12, 18  }
 0x232   :  { %12 = sbr.rel (!%p10_p4) target bundleno = 1 (0x1), region = 70 }

// kernel: conv_delta_forward.9
= control target key start
LH: loop header
LB: loop body
LE: loop exit
PB: predicated region body
PF: predicated region fallthrough
CT: control target
= control target key end

     0   :  { %s2842_s12 = smov 0   ;;  %s3536_s0 = inlined_call_operand.vmem [shape: bf16[16,108,64], index: 0, kind: input, shape index: {}]   ;;  %s3537_s1 = inlined_call_operand.vmem [shape: bf16[9,64,64], index: 1, kind: input, shape index: {}]   ;;  %s3538_s2 = inlined_call_operand.vmem [shape: f32[1,64], index: 2, kind: input, shape index: {}]   ;;  %s3539_s3 = inlined_call_operand.vmem [shape: f32[16,80,64], index: 3, kind: output, shape index: {}]  }
   0x1 LB: > { %s2162_s13 = sadd.s32 4294967295, %s2818_s12   ;;  %p2166_p0 = scmp.ge.s32.totalorder %s2818_s12, 1  ;;  %s2818_s12 = sphi %s2842_s12, %s13_s12  }
   0x2   : > { %p137_p1 = scmp.lt.s32.totalorder %s2818_s12, 17 }
   0x4   : > { %p138_p2 = pnand %p2166_p0, %p137_p1 }
   0x5   : > { %v2723_v0 = vld [vmem:[%s3537_s1] sm:$0xff] (!%p138_p2)   ;;  %v2820_v1 = vmov (!%p138_p2), 0.0   ;;  %v2724_v2 = vld [vmem:[%s3537_s1 + $0x8] sm:$0xff] (!%p138_p2)   ;;  %p161_p3 = scmp.lt.s32.totalorder (!%p138_p2), %s2162_s13, 15  ;;  %vm2821_vm0 = vmmov (!%p138_p2), 0   ;;  %v2725_v3 = vld [vmem:[%s3537_s1 + $0x10] sm:$0xff] (!%p138_p2)  }
   0x6   : > { %141 = sbr.rel (%p138_p2) target bundleno = 425 (0x1a9), region = 32  ;;  %2703 = vmatprep.subr.bf16.mxu1 (!%p138_p2), %v2820_v1  ;;  %2451 = vmatprep.subr.bf16.mxu0 (!%p138_p2), %v2820_v1  ;;  %v2726_v4 = vld [vmem:[%s3537_s1 + $0x18] sm:$0xff] (!%p138_p2)   ;;  %v2728_v6 = vld [vmem:[%s3537_s1 + $0x20] sm:$0xff] (!%p138_p2)   ;;  %vm180_vm1 = vcmask (!%p138_p2), 523264   ;;  %v2729_v9 = vld [vmem:[%s3537_s1 + $0x28] sm:$0xff] (!%p138_p2)   ;;  %vm669_vm2 = vcmask (!%p138_p2), 1046528  }
   0x7   : > { %2707 = vmatpush3.bf16.msra.mxu1 (!%p138_p2), %v2723_v0  ;;  %2452 = vmatpush3.bf16.msra.mxu0 (!%p138_p2), %v2723_v0  ;;  %v2734_v8 = vld [vmem:[%s3537_s1 + $0x40] sm:$0xff] (!%p138_p2)   ;;  %v2736_v10 = vld [vmem:[%s3537_s1 + $0x48] sm:$0xff] (!%p138_p2)   ;;  %v2731_v12 = vld [vmem:[%s3537_s1 + $0x30] sm:$0xff] (!%p138_p2)   ;;  %vm434_vm3 = vsmask.f32 (!%p138_p2), 7424  ;;  %vm1316_vm5 = vcmask (!%p138_p2), 1045504  }
   0x8   : > { %2704 = vmatprep.subr.bf16.mxu1 (!%p138_p2), %v2820_v1  ;;  %2467 = vmatprep.mubr.msk.bf16.mxu1 (!%p138_p2), %vm2821_vm0, %v2820_v1  ;;  %v2740_v16 = vld [vmem:[%s3537_s1 + $0x50] sm:$0xff] (!%p138_p2)   ;;  %v2735_v18 = vld [vmem:[%s3537_s1 + $0x38] sm:$0xff] (!%p138_p2)   ;;  %v2747_v30 = vld [vmem:[%s3537_s1 + $0x80] sm:$0xff] (!%p138_p2)   ;;  %vm1072_vm4 = vsmask.f32 (!%p138_p2), 6400  ;;  %vm1963_vm6 = vcmask (!%p138_p2), 1044480  }
   0x9   : > { %2453 = vmatprep.subr.bf16.mxu0 (!%p138_p2), %v2820_v1  ;;  %2459 = vmatprep.mubr.msk.bf16.mxu0 (!%p138_p2), %vm2821_vm0, %v2820_v1  ;;  %v2742_v21 = vld [vmem:[%s3537_s1 + $0x58] sm:$0xff] (!%p138_p2)   ;;  %v2751_v34 = vld [vmem:[%s3537_s1 + $0x88] sm:$0xff] (!%p138_p2)   ;;  %v2741_v38 = vld [vmem:[%s3537_s1 + $0x60] sm:$0xff] (!%p138_p2)   ;;  %vm1719_vm7 = vsmask.f32 (!%p138_p2), 5376 }
   0xa   : > { %v2746_v41 = vld [vmem:[%s3537_s1 + $0x68] sm:$0xff] (!%p138_p2)   ;;  %v2755_v43 = vld [vmem:[%s3537_s1 + $0x90] sm:$0xff] (!%p138_p2)   ;;  %v2761_v48 = vld [vmem:[%s3537_s1 + $0x98] sm:$0xff] (!%p138_p2)  }
   0xb   : > { %2708 = vmatpush3.bf16.msra.mxu1 (!%p138_p2), %v2724_v2  ;;  %2454 = vmatpush3.bf16.msra.mxu0 (!%p138_p2), %v2724_v2  ;;  %v2750_v52 = vld [vmem:[%s3537_s1 + $0x70] sm:$0xff] (!%p138_p2)   ;;  %v2754_v58 = vld [vmem:[%s3537_s1 + $0x78] sm:$0xff] (!%p138_p2)  }
   0xc   : > { %2705 = vmatprep.subr.bf16.mxu1 (!%p138_p2), %v2820_v1  ;;  %2455 = vmatprep.subr.bf16.mxu0 (!%p138_p2), %v2820_v1 }
   0xd   : > { %s3541_s13 = smov (!%p161_p3, %s2162_s13), 15 }
   0xe   : > { %s2711_s20 = smul.u32 56, %s3541_s13 }
   0xf   : > { %2709 = vmatpush3.bf16.msra.mxu1 %v2725_v3  ;;  %2456 = vmatpush3.bf16.msra.mxu0 %v2725_v3  ;;  %s2712_s24 = smul.u32 80, %s3541_s13 }
  0x10   : > { %s2875_s23 = scalar_lea.vmem %s3536_s0, %s2711_s20  ;;  %2706 = vmatprep.subr.bf16.mxu1 %v2820_v1  ;;  %2457 = vmatprep.subr.bf16.mxu0 %v2820_v1 }
  0x11   : > { %v2727_v5 = vld [vmem:[%s2875_s23 + $0x10] sm:$0xff]   ;;  %v2732_v7 = vld [vmem:[%s2875_s23] sm:$0xff]   ;;  %v2730_v11 = vld [vmem:[%s2875_s23 + $0x18] sm:$0xff]   ;;  %s3085_s28 = scalar_lea.vmem %s3539_s3, %s2712_s24 }
  0x12   : > { %v2737_v13 = vld [vmem:[%s2875_s23 + $0x8] sm:$0xff]   ;;  %v2738_v14 = vld [vmem:[%s2875_s23] sm:$0xff]   ;;  %v2743_v28 = vld [vmem:[%s2875_s23 + $0x10] sm:$0xff]  }
  0x13   : > { %2710 = vmatpush3.bf16.msra.mxu1 %v2726_v4  ;;  %2458 = vmatpush3.bf16.msra.mxu0 %v2726_v4  ;;  %v2745_v15 = vld [vmem:[%s2875_s23 + $0x8] sm:$0xff]   ;;  %v2744_v17 = vld [vmem:[%s2875_s23] sm:$0xfe]   ;;  %v438_v20 = vshll.u32 %v2738_v14, 16  ;;  %v436_v25 = vshrl.u32 %v2738_v14, 16  ;;  %v2749_v31 = vld [vmem:[%s2875_s23 + $0x10] sm:$0xff]  }
  0x14   : > { %2479 = vmatprep.subr.bf16.mxu1 %v2820_v1  ;;  %2507 = vmatprep.subr.bf16.mxu0 %v2820_v1  ;;  %v2739_v19 = vld [vmem:[%s2875_s23 + $0x8] sm:$0xff]   ;;  %v670_v22 = vrot.slane %v2744_v17, 1  ;;  %v671_v23 = vrot.slane %v2745_v15, 1  ;;  %v2733_v24 = vld [vmem:[%s2875_s23 + $0x20] sm:$0xff]   ;;  %v451_v35 = vshll.u32 %v2743_v28, 16  ;;  %v673_v36 = vrot.slane %v2749_v31, 1 }
  0x15   : > { %v443_v26 = vshll.u32 %v2739_v19, 16  ;;  %v440_v27 = vrot.slane %v438_v20, 1  ;;  %v447_v39 = vshrl.u32 %v2739_v19, 16  ;;  %v2753_v40 = vld [vmem:[%s2875_s23 + $0x18] sm:$0xff]   ;;  %v455_v49 = vshrl.u32 %v2743_v28, 16  ;;  %v2752_v53 = vld [vmem:[%s2875_s23 + $0x20] sm:$0xff]  }
  0x16   : > { %2468 = vmatmul.mubr.msk.bf16.vlgmr.msra.gmra.mrb[0].mxu1 %vm180_vm1, %v2727_v5  ;;  %2460 = vmatmul.mubr.msk.bf16.vlgmr.msra.gmra.mrb[0].mxu0 %vm180_vm1, %v2732_v7  ;;  %v672_v29 = vsel %vm669_vm2, %v670_v22, %v671_v23  ;;  %v674_v42 = vsel %vm669_vm2, %v671_v23, %v673_v36  ;;  %v453_v44 = vrot.slane %v451_v35, 1  ;;  %v2748_v45 = vld [vmem:[%s2875_s23 + $0x18] sm:$0xff]   ;;  %v675_v47 = vrot.slane %v2753_v40, 1  ;;  %v2757_v55 = vld [vmem:[%s2875_s23 + $0x20] sm:$0xff]   ;;  %v2765_v0 = vld [vmem:[%s2875_s23 + $0xc] sm:$0xff]  }
  0x17   : > { %2480 = vmatpush3.bf16.msra.mxu1 %v2728_v6  ;;  %2471 = vmatprep.mubr.msk.bf16.mxu1 %vm2821_vm0, %v2820_v1  ;;  %v441_v32 = vor.u32 %v440_v27, %v436_v25  ;;  %v445_v33 = vrot.slane %v443_v26, 1  ;;  %v459_v51 = vshll.u32 %v2748_v45, 16  ;;  %v467_v59 = vshll.u32 %v2752_v53, 16  ;;  %v2764_v63 = vld [vmem:[%s2875_s23 + $0x4] sm:$0xfe]   ;;  %v2769_v19 = vld [vmem:[%s2875_s23 + $0x14] sm:$0xff]  }
  0x18   : > { %2481 = vmatprep.subr.bf16.mxu1 %v2820_v1  ;;  %2508 = vmatpush3.bf16.msra.mxu0 %v2734_v8  ;;  %v676_v54 = vsel %vm669_vm2, %v673_v36, %v675_v47  ;;  %v457_v56 = vor.u32 %v455_v49, %v453_v44  ;;  %v463_v60 = vshrl.u32 %v2748_v45, 16  ;;  %v677_v61 = vrot.slane %v2757_v55, 1  ;;  %v2756_v3 = vld [vmem:[%s2875_s23 + $0x28] ss:$0 sps:$4 sm:$0x11]   ;;  %v2773_v31 = vld [vmem:[%s2875_s23 + $0x1c] sm:$0xff]  }
  0x19   : > { %2509 = vmatprep.subr.bf16.mxu0 %v2820_v1  ;;  %2463 = vmatprep.mubr.msk.bf16.mxu0 %vm2821_vm0, %v2820_v1  ;;  %v446_v37 = vsel %vm434_vm3, %v441_v32, %v445_v33  ;;  %v449_v46 = vor.u32 %v447_v39, %v445_v33  ;;  %v461_v57 = vrot.slane %v459_v51, 1  ;;  %v469_v2 = vrot.slane %v467_v59, 1  ;;  %v2758_v5 = vld [vmem:[%s2875_s23 + $0x28] ss:$0 sps:$4 sm:$0x11]   ;;  %v2768_v55 = vld [vmem:[%s2875_s23 + $0x1c] sm:$0xff]  }
  0x1a   : > { %v678_v4 = vsel %vm669_vm2, %v675_v47, %v677_v61  ;;  %v1074_v7 = vshrl.u32 %v2764_v63, 16  ;;  %v1077_v8 = vshll.u32 %v2764_v63, 16  ;;  %v475_v14 = vshll.u32 %v2756_v3, 16  ;;  %v2759_v23 = vld [vmem:[%s2875_s23 + $0x4] sm:$0xfe]   ;;  %v2774_v63 = vld [vmem:[%s3537_s1 + $0xb8] sm:$0xff]  }
  0x1b   : > { %2482 = vmatpush3.bf16.msra.mxu1 %v2729_v9  ;;  %v454_v50 = vsel %vm434_vm3, %v449_v46, %v453_v44  ;;  %v462_v62 = vsel %vm434_vm3, %v457_v56, %v461_v57  ;;  %v465_v6 = vor.u32 %v463_v60, %v461_v57  ;;  %v1082_v9 = vshrl.u32 %v2765_v0, 16  ;;  %v2771_v40 = vld [vmem:[%s3537_s1 + $0xc8] sm:$0xff]   ;;  %v2775_v46 = vld [vmem:[%s3537_s1 + $0xd0] sm:$0xff]  }
  0x1c   : > { %2483 = vmatprep.subr.bf16.mxu1 %v2820_v1  ;;  %2510 = vmatpush3.bf16.msra.mxu0 %v2736_v10  ;;  %v1085_v10 = vshll.u32 %v2765_v0, 16  ;;  %v1076_v15 = vrot.slane %v1074_v7, 1  ;;  %v477_v22 = vrot.slane %v475_v14, 1  ;;  %v1091_v27 = vshrl.u32 %v2769_v19, 16  ;;  %v2777_v47 = vld [vmem:[%s2875_s23 + $0x24] sm:$0xff]   ;;  %v2770_v57 = vld [vmem:[%s3537_s1 + $0xb0] sm:$0xff]  }
  0x1d   : > { %2511 = vmatprep.subr.bf16.mxu0 %v2820_v1  ;;  %v1084_v17 = vrot.slane %v1082_v9, 1  ;;  %v1094_v28 = vshll.u32 %v2769_v19, 16  ;;  %v871_v35 = vrot.slane %v2759_v23, 1  ;;  %v2169_v9 = vld [vmem:[%s3538_s2] ss:$0 sm:$0xff] }
  0x1e   : > { %2472 = vmatmul.mubr.msk.bf16.gmra.mrb[4].mxu1 %vm180_vm1, %v2730_v11  ;;  %2464 = vmatmul.mubr.msk.bf16.gmra.mrb[4].mxu0 %vm180_vm1, %v2737_v13  ;;  %v679_v11 = vrot.slane %v2758_v5, 1  ;;  %v470_v13 = vsel %vm434_vm3, %v465_v6, %v469_v2  ;;  %v1093_v33 = vrot.slane %v1091_v27, 1  ;;  %v2772_v5 = vld [vmem:[%s2875_s23 + $0x24] sm:$0xff]   ;;  %185 = vst.msk [vmem:[%s3085_s28 + $0x20] sm:$0xff] %vm180_vm1, %v2169_v9  ;;  %181 = vst.msk [vmem:[%s3085_s28] sm:$0xff] %vm180_vm1, %v2169_v9 }
  0x1f   : > { %2484 = vmatpush3.bf16.msra.mxu1 %v2731_v12  ;;  %2475 = vmatprep.mubr.msk.bf16.mxu1 %vm2821_vm0, %v2820_v1  ;;  %v471_v12 = vshrl.u32 %v2752_v53, 16  ;;  %v1112_v53 = vshll.u32 %v2777_v47, 16  ;;  %182 = vst.msk [vmem:[%s3085_s28 + $0x8] sm:$0xff] %vm180_vm1, %v2169_v9  ;;  %183 = vst.msk [vmem:[%s3085_s28 + $0x10] sm:$0xff] %vm180_vm1, %v2169_v9 }
  0x20   : > { %2485 = vmatprep.subr.bf16.mxu1 %v2820_v1  ;;  %2512 = vmatpush3.bf16.msra.mxu0 %v2740_v16  ;;  %v1079_v16 = vrot.slane %v1077_v8, 2  ;;  %v680_v20 = vsel %vm669_vm2, %v677_v61, %v679_v11  ;;  %184 = vst.msk [vmem:[%s3085_s28 + $0x18] sm:$0xff] %vm180_vm1, %v2169_v9  ;;  %186 = vst.msk [vmem:[%s3085_s28 + $0x28] sm:$0xff] %vm180_vm1, %v2169_v9 }
  0x21   : > { %2513 = vmatprep.subr.bf16.mxu0 %v2820_v1  ;;  %2515 = vmatprep.mubr.msk.bf16.mxu0 %vm2821_vm0, %v2820_v1  ;;  %v1114_v61 = vrot.slane %v1112_v53, 2  ;;  %187 = vst.msk [vmem:[%s3085_s28 + $0x30] sm:$0xff] %vm180_vm1, %v2169_v9  ;;  %188 = vst.msk [vmem:[%s3085_s28 + $0x38] sm:$0xff] %vm180_vm1, %v2169_v9 }
  0x22   : > { %v1080_v25 = vor.u32 %v1079_v16, %v1076_v15  ;;  %189 = vst.msk [vmem:[%s3085_s28 + $0x40] sm:$0xff] %vm180_vm1, %v2169_v9  ;;  %190 = vst.msk [vmem:[%s3085_s28 + $0x48] sm:$0xff] %vm180_vm1, %v2169_v9  ;;  %v2784_v15 = vld [vmem:[%s2875_s23 + $0x8] sm:$0xfc]   ;;  %v2785_v16 = vld [vmem:[%s2875_s23 + $0x10] sm:$0xff]  }
  0x23   : > { %2486 = vmatpush3.bf16.msra.mxu1 %v2735_v18  ;;  %v1087_v18 = vrot.slane %v1085_v10, 2  ;;  %v878_v10 = vrot.slane %v2772_v5, 1  ;;  %v1519_v19 = vrot.slane %v2785_v16, 2 }
  0x24   : > { %2535 = vmatprep.subr.bf16.mxu1 %v2820_v1  ;;  %2514 = vmatpush3.bf16.msra.mxu0 %v2742_v21  ;;  %v473_v21 = vor.u32 %v471_v12, %v469_v2 }
  0x25   : > { %2563 = vmatprep.subr.bf16.mxu0 %v2820_v1  ;;  %v1088_v26 = vor.u32 %v1087_v18, %v1084_v17  ;;  %v1518_v18 = vrot.slane %v2784_v15, 2 }
  0x26   : > { %2476 = vmatmul.mubr.msk.bf16.gmra.mrb[8].mxu1 %vm180_vm1, %v2733_v24  ;;  %v2760_v24 = vld [vmem:[%s2875_s23 + $0xc] sm:$0xff]  }
  0x27   : > { %2487 = vmatprep.mubr.msk.bf16.mxu1 %vm2821_vm0, %v2820_v1  ;;  %2516 = vmatmul.mubr.msk.bf16.vlgmr.msra.gmra.mrb[8].mxu0 %vm180_vm1, %v672_v29  ;;  %v478_v29 = vsel %vm434_vm3, %v473_v21, %v477_v22  ;;  %v1089_v32 = vsel %vm1072_vm4, %v1080_v25, %v1088_v26  ;;  %v872_v36 = vrot.slane %v2760_v24, 1  ;;  %v2779_v21 = vld [vmem:[%s2875_s23 + $0x4] sm:$0xfc]   ;;  %v2780_v22 = vld [vmem:[%s2875_s23 + $0xc] sm:$0xff]   ;;  %v1520_v23 = vsel %vm1316_vm5, %v1518_v18, %v1519_v19  ;;  %v2789_v25 = vld [vmem:[%s2875_s23 + $0x18] sm:$0xff]  }
  0x28   : > { %2564 = vmatpush3.bf16.msra.mxu0 %v2747_v30  ;;  %2519 = vmatprep.mubr.msk.bf16.mxu0 %vm2821_vm0, %v2820_v1  ;;  %v2767_v30 = vld [vmem:[%s3537_s1 + $0xc0] sm:$0xff]   ;;  %v1318_v27 = vrot.slane %v2780_v22, 2 }
  0x29   : > { %2565 = vmatprep.subr.bf16.mxu0 %v2820_v1  ;;  %v2787_v24 = vld [vmem:[%s3537_s1 + $0x100] sm:$0xff]  }
  0x2c   : > { %2566 = vmatpush3.bf16.msra.mxu0 %v2751_v34  ;;  %v1096_v34 = vrot.slane %v1094_v28, 2  ;;  %v1521_v28 = vrot.slane %v2789_v25, 2 }
  0x2d   : > { %2567 = vmatprep.subr.bf16.mxu0 %v2820_v1 }
  0x2e   : > { %2488 = vmatmul.mubr.msk.bf16.vlgmr.msra.gmra.mrb[12].mxu1 %vm180_vm1, %v446_v37  ;;  %v1100_v37 = vshrl.u32 %v2773_v31, 16  ;;  %v1097_v39 = vor.u32 %v1096_v34, %v1093_v33  ;;  %v1522_v33 = vsel %vm1316_vm5, %v1519_v19, %v1521_v28  ;;  %v2793_v34 = vld [vmem:[%s2875_s23 + $0x20] sm:$0xff]  }
  0x2f   : > { %2536 = vmatpush3.bf16.msra.mxu1 %v2741_v38  ;;  %2491 = vmatprep.mubr.msk.bf16.mxu1 %vm2821_vm0, %v2820_v1  ;;  %v1103_v38 = vshll.u32 %v2773_v31, 16  ;;  %v2782_v31 = vld [vmem:[%s3537_s1 + $0xe0] sm:$0xff]  }
  0x30   : > { %2537 = vmatprep.subr.bf16.mxu1 %v2820_v1  ;;  %2520 = vmatmul.mubr.msk.bf16.gmra.mrb[12].mxu0 %vm180_vm1, %v674_v42  ;;  %v2763_v42 = vld [vmem:[%s2875_s23 + $0x14] sm:$0xff]   ;;  %v1102_v44 = vrot.slane %v1100_v37, 1  ;;  %v2786_v37 = vld [vmem:[%s3537_s1 + $0xe8] sm:$0xff]  }
  0x31   : > { %2523 = vmatprep.mubr.msk.bf16.mxu0 %vm2821_vm0, %v2820_v1  ;;  %2568 = vmatpush3.bf16.msra.mxu0 %v2755_v43  ;;  %v873_v43 = vsel %vm669_vm2, %v871_v35, %v872_v36  ;;  %v1105_v45 = vrot.slane %v1103_v38, 2  ;;  %v874_v49 = vrot.slane %v2763_v42, 1  ;;  %v2795_v35 = vld [vmem:[%s3537_s1 + $0x110] sm:$0xff]   ;;  %v1523_v38 = vrot.slane %v2793_v34, 2 }
  0x32   : > { %2569 = vmatprep.subr.bf16.mxu0 %v2820_v1  ;;  %v2790_v42 = vld [vmem:[%s3537_s1 + $0xf0] sm:$0xff]  }
  0x33   : > { %2538 = vmatpush3.bf16.msra.mxu1 %v2746_v41  ;;  %v2762_v41 = vld [vmem:[%s3537_s1 + $0xa0] sm:$0xff]   ;;  %v1106_v51 = vor.u32 %v1105_v45, %v1102_v44  ;;  %v875_v56 = vsel %vm669_vm2, %v872_v36, %v874_v49  ;;  %v2797_v44 = vld [vmem:[%s2875_s23 + $0x28] sm:$0xff]  }
  0x34   : > { %2539 = vmatprep.subr.bf16.mxu1 %v2820_v1 }
  0x35   : > { %2570 = vmatpush3.bf16.msra.mxu0 %v2761_v48  ;;  %v1098_v48 = vsel %vm1072_vm4, %v1088_v26, %v1097_v39  ;;  %v1107_v59 = vsel %vm1072_vm4, %v1097_v39, %v1106_v51  ;;  %v1317_v26 = vrot.slane %v2779_v21, 2  ;;  %v2801_v39 = vld [vmem:[%s3537_s1 + $0x118] sm:$0xff]   ;;  %v2805_v21 = vld [vmem:[%s2875_s23 + $0x20] sm:$0xff]  }
  0x36   : > { %2492 = vmatmul.mubr.msk.bf16.gmra.mrb[16].mxu1 %vm180_vm1, %v454_v50  ;;  %2619 = vmatprep.subr.bf16.mxu0 %v2820_v1  ;;  %v2766_v50 = vld [vmem:[%s3537_s1 + $0xa8] sm:$0xff]   ;;  %v1747_v25 = vshrl.u32 %v2805_v21, 16 }
  0x37   : > { %2495 = vmatprep.mubr.msk.bf16.mxu1 %vm2821_vm0, %v2820_v1  ;;  %2540 = vmatpush3.bf16.msra.mxu1 %v2750_v52  ;;  %v1109_v52 = vshrl.u32 %v2777_v47, 16  ;;  %v1525_v47 = vrot.slane %v2797_v44, 2 }
  0x38   : > { %2524 = vmatmul.mubr.msk.bf16.gmra.mrb[16].mxu0 %vm180_vm1, %v676_v54  ;;  %2541 = vmatprep.subr.bf16.mxu1 %v2820_v1  ;;  %v2781_v54 = vld [vmem:[%s3537_s1 + $0xd8] sm:$0xff]  }
  0x39   : > { %2527 = vmatprep.mubr.msk.bf16.mxu0 %vm2821_vm0, %v2820_v1  ;;  %v1111_v60 = vrot.slane %v1109_v52, 1 }
  0x3b   : > { %2542 = vmatpush3.bf16.msra.mxu1 %v2754_v58  ;;  %v2778_v58 = vld [vmem:[%s2875_s23 + $0x2c] ss:$0 sps:$4 sm:$0x33]   ;;  %v1115_v0 = vor.u32 %v1114_v61, %v1111_v60  ;;  %v2804_v60 = vld [vmem:[%s2875_s23 + $0x10] sm:$0xff]  }
  0x3c   : > { %2591 = vmatprep.subr.bf16.mxu1 %v2820_v1  ;;  %v1118_v2 = vshrl.u32 %v2778_v58, 16  ;;  %v1121_v3 = vshll.u32 %v2778_v58, 16 }
  0x3d   : > { %v1116_v6 = vsel %vm1072_vm4, %v1106_v51, %v1115_v0  ;;  %v2798_v51 = vld [vmem:[%s2875_s23 + $0x30] ss:$0 sps:$4 sm:$0x33]  }
  0x3e   : > { %2496 = vmatmul.mubr.msk.bf16.gmra.mrb[20].mxu1 %vm180_vm1, %v462_v62  ;;  %v876_v62 = vrot.slane %v2768_v55, 1  ;;  %v1120_v7 = vrot.slane %v1118_v2, 1  ;;  %v1123_v8 = vrot.slane %v1121_v3, 2  ;;  %v1527_v53 = vrot.slane %v2798_v51, 2 }
  0x3f   : > { %2499 = vmatprep.mubr.msk.bf16.mxu1 %vm2821_vm0, %v2820_v1 }
  0x40   : > { %2528 = vmatmul.mubr.msk.bf16.gmra.mrb[20].mxu0 %vm180_vm1, %v678_v4  ;;  %v877_v4 = vsel %vm669_vm2, %v874_v49, %v876_v62  ;;  %v1124_v11 = vor.u32 %v1123_v8, %v1120_v7  ;;  %v879_v12 = vsel %vm669_vm2, %v876_v62, %v878_v10  ;;  %v2792_v49 = vld [vmem:[%s2875_s23 + $0x24] sm:$0xff]   ;;  %v1528_v58 = vsel %vm1316_vm5, %v1525_v47, %v1527_v53 }
  0x41   : > { %2531 = vmatprep.mubr.msk.bf16.mxu0 %vm2821_vm0, %v2820_v1  ;;  %v1324_v52 = vrot.slane %v2792_v49, 2 }
  0x42   : > { %v1125_v14 = vsel %vm1072_vm4, %v1115_v0, %v1124_v11 }
  0x46   : > { %2500 = vmatmul.mubr.msk.bf16.gmra.mrb[24].mxu1 %vm180_vm1, %v470_v13  ;;  %v2776_v13 = vld [vmem:[%s2875_s23 + $0x2c] ss:$0 sps:$4 sm:$0x11]  }
  0x47   : > { %2503 = vmatprep.mubr.msk.bf16.mxu1 %vm2821_vm0, %v2820_v1  ;;  %v880_v17 = vrot.slane %v2776_v13, 1 }
  0x48   : > { %2532 = vmatmul.mubr.msk.bf16.gmra.mrb[24].mxu0 %vm180_vm1, %v680_v20 }
  0x49   : > { %2571 = vmatprep.mubr.msk.bf16.mxu0 %vm2821_vm0, %v2820_v1  ;;  %v881_v20 = vsel %vm669_vm2, %v878_v10, %v880_v17  ;;  %v2802_v10 = vld [vmem:[%s2875_s23 + $0x18] sm:$0xff]  }
  0x4a   : > { %v1738_v15 = vshrl.u32 %v2802_v10, 16  ;;  %v1741_v16 = vshll.u32 %v2802_v10, 16 }
  0x4c   : > { %v1740_v19 = vrot.slane %v1738_v15, 2 }
  0x4e   : > { %2504 = vmatmul.mubr.msk.bf16.gmra.mrb[28].mxu1 %vm180_vm1, %v478_v29  ;;  %v2791_v29 = vld [vmem:[%s3537_s1 + $0x108] sm:$0xff]  }
  0x4f   : > { %2543 = vmatprep.mubr.msk.bf16.mxu1 %vm2821_vm0, %v2820_v1 }
  0x50   : > { %2572 = vmatmul.mubr.msk.bf16.vlgmr.msra.gmra.mrb[28].mxu0 %vm180_vm1, %v1089_v32  ;;  %v2783_v32 = vld [vmem:[%s2875_s23 + $0x14] sm:$0xff]  }
  0x51   : > { %2620 = vmatpush3.bf16.msra.mxu0 %v2767_v30  ;;  %2575 = vmatprep.mubr.msk.bf16.mxu0 %vm2821_vm0, %v2820_v1  ;;  %v1319_v30 = vsel %vm1316_vm5, %v1317_v26, %v1318_v27  ;;  %v1320_v36 = vrot.slane %v2783_v32, 2  ;;  %v1750_v26 = vshll.u32 %v2805_v21, 16 }
  0x52   : > { %2621 = vmatprep.subr.bf16.mxu0 %v2820_v1 }
  0x55   : > { %2622 = vmatpush3.bf16.msra.mxu0 %v2771_v40  ;;  %v1321_v40 = vsel %vm1316_vm5, %v1318_v27, %v1320_v36 }
  0x56   : > { %2544 = vmatmul.mubr.msk.bf16.vlgmr.msra.gmra.mrb[32].mxu1 %vm180_vm1, %v873_v43  ;;  %2623 = vmatprep.subr.bf16.mxu0 %v2820_v1  ;;  %v1524_v43 = vsel %vm1316_vm5, %v1521_v28, %v1523_v38 }
  0x57   : > { %2592 = vmatpush3.bf16.msra.mxu1 %v2762_v41  ;;  %2547 = vmatprep.mubr.msk.bf16.mxu1 %vm2821_vm0, %v2820_v1  ;;  %v2788_v41 = vld [vmem:[%s2875_s23 + $0x1c] sm:$0xff]  }
  0x58   : > { %2593 = vmatprep.subr.bf16.mxu1 %v2820_v1  ;;  %2576 = vmatmul.mubr.msk.bf16.gmra.mrb[32].mxu0 %vm180_vm1, %v1098_v48  ;;  %v1322_v45 = vrot.slane %v2788_v41, 2  ;;  %v2809_v41 = vld [vmem:[%s2875_s23 + $0x30] ss:$0 sps:$4 sm:$0x77]  }
  0x59   : > { %2579 = vmatprep.mubr.msk.bf16.mxu0 %vm2821_vm0, %v2820_v1  ;;  %2624 = vmatpush3.bf16.msra.mxu0 %v2775_v46  ;;  %v2794_v46 = vld [vmem:[%s3537_s1 + $0xf8] sm:$0xff]  }
  0x5a   : > { %2625 = vmatprep.subr.bf16.mxu0 %v2820_v1  ;;  %v1323_v48 = vsel %vm1316_vm5, %v1320_v36, %v1322_v45  ;;  %v1325_v55 = vsel %vm1316_vm5, %v1322_v45, %v1324_v52  ;;  %v1765_v45 = vshrl.u32 %v2809_v41, 16 }
  0x5b   : > { %2594 = vmatpush3.bf16.msra.mxu1 %v2766_v50  ;;  %v1526_v50 = vsel %vm1316_vm5, %v1523_v38, %v1525_v47 }
  0x5c   : > { %2595 = vmatprep.subr.bf16.mxu1 %v2820_v1  ;;  %v1767_v49 = vrot.slane %v1765_v45, 2 }
  0x5d   : > { %2626 = vmatpush3.bf16.msra.mxu0 %v2781_v54  ;;  %v2796_v54 = vld [vmem:[%s2875_s23 + $0x2c] ss:$0 sps:$4 sm:$0x33]  }
  0x5e   : > { %2548 = vmatmul.mubr.msk.bf16.gmra.mrb[36].mxu1 %vm180_vm1, %v875_v56  ;;  %2675 = vmatprep.subr.bf16.mxu0 %v2820_v1  ;;  %v2799_v56 = vld [vmem:[%s2875_s23 + $0x8] sm:$0xfc]   ;;  %v1326_v61 = vrot.slane %v2796_v54, 2  ;;  %v205_v54 = vld [vmem:[%s3085_s28 + $0x20] sm:$0xff] }
  0x5f   : > { %2551 = vmatprep.mubr.msk.bf16.mxu1 %vm2821_vm0, %v2820_v1  ;;  %2596 = vmatpush3.bf16.msra.mxu1 %v2770_v57  ;;  %v2800_v57 = vld [vmem:[%s2875_s23 + $0x10] sm:$0xff]   ;;  %v1721_v62 = vshrl.u32 %v2799_v56, 16 }
  0x60   : > { %2580 = vmatmul.mubr.msk.bf16.gmra.mrb[36].mxu0 %vm180_vm1, %v1107_v59  ;;  %2597 = vmatprep.subr.bf16.mxu1 %v2820_v1  ;;  %v2803_v59 = vld [vmem:[%s2875_s23 + $0x8] sm:$0xf8]   ;;  %v1729_v0 = vshrl.u32 %v2800_v57, 16  ;;  %v1732_v2 = vshll.u32 %v2800_v57, 16  ;;  %v1327_v5 = vsel %vm1316_vm5, %v1324_v52, %v1326_v61 }
  0x61   : > { %2583 = vmatprep.mubr.msk.bf16.mxu0 %vm2821_vm0, %v2820_v1  ;;  %v1964_v3 = vrot.slane %v2803_v59, 3  ;;  %v206_v57 = vld [vmem:[%s3085_s28 + $0x28] sm:$0xff] }
  0x62   : > { %v1731_v8 = vrot.slane %v1729_v0, 2  ;;  %v1734_v9 = vrot.slane %v1732_v2, 3  ;;  %v202_v59 = vld [vmem:[%s3085_s28 + $0x8] sm:$0xff] }
  0x63   : > { %2598 = vmatpush3.bf16.msra.mxu1 %v2774_v63  ;;  %v1724_v63 = vshll.u32 %v2799_v56, 16 }
  0x64   : > { %2647 = vmatprep.subr.bf16.mxu1 %v2820_v1 }
  0x65   : > { %v1726_v7 = vrot.slane %v1724_v63, 3 }
  0x66   : > { %2552 = vmatmul.mubr.msk.bf16.gmra.mrb[40].mxu1 %vm180_vm1, %v877_v4  ;;  %v1965_v4 = vrot.slane %v2804_v60, 3 }
  0x67   : > { %2555 = vmatprep.mubr.msk.bf16.mxu1 %vm2821_vm0, %v2820_v1 }
  0x68   : > { %2584 = vmatmul.mubr.msk.bf16.gmra.mrb[40].mxu0 %vm180_vm1, %v1116_v6  ;;  %v1723_v6 = vrot.slane %v1721_v62, 2  ;;  %v1966_v11 = vsel %vm1963_vm6, %v1964_v3, %v1965_v4 }
  0x69   : > { %2587 = vmatprep.mubr.msk.bf16.mxu0 %vm2821_vm0, %v2820_v1 }
  0x6a   : > { %v1727_v13 = vor.u32 %v1726_v7, %v1723_v6  ;;  %v207_v6 = vld [vmem:[%s3085_s28 + $0x30] sm:$0xff] }
  0x6b   : > { %v203_v7 = vld [vmem:[%s3085_s28 + $0x10] sm:$0xff] }
  0x6e   : > { %2556 = vmatmul.mubr.msk.bf16.gmra.mrb[44].mxu1 %vm180_vm1, %v879_v12  ;;  %v2806_v12 = vld [vmem:[%s2875_s23 + $0x18] sm:$0xff]  }
  0x6f   : > { %2559 = vmatprep.mubr.msk.bf16.mxu1 %vm2821_vm0, %v2820_v1  ;;  %v1967_v17 = vrot.slane %v2806_v12, 3 }
  0x70   : > { %2588 = vmatmul.mubr.msk.bf16.gmra.mrb[44].mxu0 %vm180_vm1, %v1125_v14  ;;  %v1735_v14 = vor.u32 %v1734_v9, %v1731_v8  ;;  %v208_v9 = vld [vmem:[%s3085_s28 + $0x38] sm:$0xff] }
  0x71   : > { %2627 = vmatprep.mubr.msk.bf16.mxu0 %vm2821_vm0, %v2820_v1  ;;  %v1968_v22 = vsel %vm1963_vm6, %v1965_v4, %v1967_v17 }
  0x72   : > { %v1736_v18 = vsel %vm1719_vm7, %v1727_v13, %v1735_v14 }
  0x76   : > { %2560 = vmatmul.mubr.msk.bf16.gmra.mrb[48].mxu1 %vm180_vm1, %v881_v20  ;;  %v1743_v20 = vrot.slane %v1741_v16, 3 }
  0x77   : > { %2599 = vmatprep.mubr.msk.bf16.mxu1 %vm2821_vm0, %v2820_v1 }
  0x78   : > { %2628 = vmatmul.mubr.msk.bf16.vlgmr.msra.gmra.mrb[48].mxu0 %vm180_vm1, %v1520_v23  ;;  %v2808_v23 = vld [vmem:[%s2875_s23 + $0x20] sm:$0xff]  }
  0x79   : > { %2676 = vmatpush3.bf16.msra.mxu0 %v2787_v24  ;;  %2631 = vmatprep.mubr.msk.bf16.mxu0 %vm2821_vm0, %v2820_v1  ;;  %v1744_v24 = vor.u32 %v1743_v20, %v1740_v19  ;;  %v1969_v27 = vrot.slane %v2808_v23, 3 }
  0x7a   : > { %2677 = vmatprep.subr.bf16.mxu0 %v2820_v1 }
  0x7b   : > { %v1745_v28 = vsel %vm1719_vm7, %v1735_v14, %v1744_v24  ;;  %v1970_v32 = vsel %vm1963_vm6, %v1967_v17, %v1969_v27 }
  0x7d   : > { %2678 = vmatpush3.bf16.msra.mxu0 %v2791_v29  ;;  %v1749_v29 = vrot.slane %v1747_v25, 2 }
  0x7e   : > { %2600 = vmatmul.mubr.msk.bf16.vlgmr.msra.gmra.mrb[52].mxu1 %vm180_vm1, %v1319_v30  ;;  %2679 = vmatprep.subr.bf16.mxu0 %v2820_v1  ;;  %v1752_v30 = vrot.slane %v1750_v26, 3 }
  0x7f   : > { %2648 = vmatpush3.bf16.msra.mxu1 %v2782_v31  ;;  %2603 = vmatprep.mubr.msk.bf16.mxu1 %vm2821_vm0, %v2820_v1  ;;  %v2807_v31 = vld [vmem:[%s2875_s23 + $0x28] sm:$0xff]  }
  0x80   : > { %2649 = vmatprep.subr.bf16.mxu1 %v2820_v1  ;;  %2632 = vmatmul.mubr.msk.bf16.gmra.mrb[52].mxu0 %vm180_vm1, %v1522_v33  ;;  %v2810_v33 = vld [vmem:[%s2875_s23 + $0x28] sm:$0xff]   ;;  %v1753_v34 = vor.u32 %v1752_v30, %v1749_v29  ;;  %v1759_v36 = vshll.u32 %v2807_v31, 16 }
  0x81   : > { %2635 = vmatprep.mubr.msk.bf16.mxu0 %vm2821_vm0, %v2820_v1  ;;  %2680 = vmatpush3.bf16.msra.mxu0 %v2795_v35  ;;  %v1756_v35 = vshrl.u32 %v2807_v31, 16 }
  0x82   : > { %2681 = vmatprep.subr.bf16.mxu0 %v2820_v1  ;;  %v1754_v38 = vsel %vm1719_vm7, %v1744_v24, %v1753_v34  ;;  %v210_v24 = vld [vmem:[%s3085_s28 + $0x48] sm:$0xff] }
  0x83   : > { %2650 = vmatpush3.bf16.msra.mxu1 %v2786_v37  ;;  %v1971_v37 = vrot.slane %v2810_v33, 3 }
  0x84   : > { %2651 = vmatprep.subr.bf16.mxu1 %v2820_v1 }
  0x85   : > { %2682 = vmatpush3.bf16.msra.mxu0 %v2801_v39  ;;  %v1758_v39 = vrot.slane %v1756_v35, 2 }
  0x86   : > { %2604 = vmatmul.mubr.msk.bf16.gmra.mrb[56].mxu1 %vm180_vm1, %v1321_v40  ;;  %v1761_v40 = vrot.slane %v1759_v36, 3 }
  0x87   : > { %2607 = vmatprep.mubr.msk.bf16.mxu1 %vm2821_vm0, %v2820_v1  ;;  %2652 = vmatpush3.bf16.msra.mxu1 %v2790_v42  ;;  %v1972_v42 = vsel %vm1963_vm6, %v1969_v27, %v1971_v37 }
  0x88   : > { %2636 = vmatmul.mubr.msk.bf16.gmra.mrb[56].mxu0 %vm180_vm1, %v1524_v43  ;;  %2653 = vmatprep.subr.bf16.mxu1 %v2820_v1  ;;  %v2811_v43 = vld [vmem:[%s2875_s23 + $0x30] ss:$0 sps:$4 sm:$0x77]   ;;  %v1762_v44 = vor.u32 %v1761_v40, %v1758_v39 }
  0x89   : > { %2639 = vmatprep.mubr.msk.bf16.mxu0 %vm2821_vm0, %v2820_v1  ;;  %v1973_v47 = vrot.slane %v2811_v43, 3 }
  0x8b   : > { %2654 = vmatpush3.bf16.msra.mxu1 %v2794_v46  ;;  %v1768_v46 = vshll.u32 %v2809_v41, 16  ;;  %v1974_v51 = vsel %vm1963_vm6, %v1971_v37, %v1973_v47 }
  0x8e   : > { %2608 = vmatmul.mubr.msk.bf16.gmra.mrb[60].mxu1 %vm180_vm1, %v1323_v48  ;;  %v1763_v48 = vsel %vm1719_vm7, %v1753_v34, %v1762_v44 }
  0x8f   : > { %2611 = vmatprep.mubr.msk.bf16.mxu1 %vm2821_vm0, %v2820_v1 }
  0x90   : > { %2640 = vmatmul.mubr.msk.bf16.gmra.mrb[60].mxu0 %vm180_vm1, %v1526_v50  ;;  %v1770_v50 = vrot.slane %v1768_v46, 3 }
  0x91   : > { %2643 = vmatprep.mubr.msk.bf16.mxu0 %vm2821_vm0, %v2820_v1 }
  0x92   : > { %v1771_v52 = vor.u32 %v1770_v50, %v1767_v49 }
  0x94   : > { %v1772_v53 = vsel %vm1719_vm7, %v1762_v44, %v1771_v52 }
  0x96   : > { %2612 = vmatmul.mubr.msk.bf16.gmra.mrb[64].mxu1 %vm180_vm1, %v1325_v55  ;;  %v201_v55 = vld [vmem:[%s3085_s28] sm:$0xff] }
  0x97   : > { %2615 = vmatprep.mubr.msk.bf16.mxu1 %vm2821_vm0, %v2820_v1 }
  0x98   : > { %2644 = vmatmul.mubr.msk.bf16.gmra.mrb[64].mxu0 %vm180_vm1, %v1528_v58 }
  0x99   : > { %2683 = vmatprep.mubr.msk.bf16.mxu0 %vm2821_vm0, %v2820_v1 }
  0x9e   : > { %2616 = vmatmul.mubr.msk.bf16.gmra.mrb[68].mxu1 %vm180_vm1, %v1327_v5 }
  0x9f   : > { %2655 = vmatprep.mubr.msk.bf16.mxu1 %vm2821_vm0, %v2820_v1 }
  0xa0   : > { %2684 = vmatmul.mubr.msk.bf16.vlgmr.msra.gmra.mrb[68].mxu0 %vm180_vm1, %v1966_v11  ;;  %v204_v11 = vld [vmem:[%s3085_s28 + $0x18] sm:$0xff] }
  0xa1   : > { %2687 = vmatprep.mubr.msk.bf16.mxu0 %vm2821_vm0, %v2820_v1 }
  0xa6   : > { %2656 = vmatmul.mubr.msk.bf16.vlgmr.msra.gmra.mrb[72].mxu1 %vm180_vm1, %v1736_v18 }
  0xa7   : > { %2659 = vmatprep.mubr.msk.bf16.mxu1 %vm2821_vm0, %v2820_v1 }
  0xa8   : > { %2688 = vmatmul.mubr.msk.bf16.gmra.mrb[72].mxu0 %vm180_vm1, %v1968_v22  ;;  %v209_v22 = vld [vmem:[%s3085_s28 + $0x40] sm:$0xff] }
  0xa9   : > { %2691 = vmatprep.mubr.msk.bf16.mxu0 %vm2821_vm0, %v2820_v1 }
  0xae   : > { %2660 = vmatmul.mubr.msk.bf16.gmra.mrb[76].mxu1 %vm180_vm1, %v1745_v28 }
  0xaf   : > { %2663 = vmatprep.mubr.msk.bf16.mxu1 %vm2821_vm0, %v2820_v1 }
  0xb0   : > { %2692 = vmatmul.mubr.msk.bf16.gmra.mrb[76].mxu0 %vm180_vm1, %v1970_v32 }
  0xb1   : > { %2695 = vmatprep.mubr.msk.bf16.mxu0 %vm2821_vm0, %v2820_v1 }
  0xb6   : > { %2664 = vmatmul.mubr.msk.bf16.gmra.mrb[80].mxu1 %vm180_vm1, %v1754_v38 }
  0xb7   : > { %2667 = vmatprep.mubr.msk.bf16.mxu1 %vm2821_vm0, %v2820_v1 }
  0xb8   : > { %2696 = vmatmul.mubr.msk.bf16.gmra.mrb[80].mxu0 %vm180_vm1, %v1972_v42 }
  0xb9   : > { %2699 = vmatprep.mubr.msk.bf16.mxu0 %vm2821_vm0, %v2820_v1 }
  0xbe   : > { %2668 = vmatmul.mubr.msk.bf16.gmra.mrb[84].mxu1 %vm180_vm1, %v1763_v48 }
  0xbf   : > { %2671 = vmatprep.mubr.msk.bf16.mxu1 %vm2821_vm0, %v2820_v1 }
  0xc0   : > { %2700 = vmatmul.mubr.msk.bf16.gmra.mrb[84].mxu0 %vm180_vm1, %v1974_v51 }
  0xc6   : > { %2672 = vmatmul.mubr.msk.bf16.gmra.mrb[88].mxu1 %vm180_vm1, %v1772_v53 }
  0xe9   : > { %v333_v56 = vpop.f32.mrb[0].mxu1  ;;  %v317_v58 = vpop.f32.mrb[0].mxu0 }
  0xea   : > { %v360_v1 = vadd.f32 %v333_v56, %v205_v54  ;;  %v2469_v60 = vpop.f32.mrb[1].mxu1  ;;  %v356_v61 = vadd.f32 %v317_v58, %v201_v55  ;;  %v2461_v62 = vpop.f32.mrb[1].mxu0 }
  0xeb   : > { %v336_v63 = vpop.f32.mrb[2].mxu1  ;;  %v320_v0 = vpop.f32.mrb[2].mxu0 }
  0xec   : > { %370 = vst.msk [vmem:[%s3085_s28 + $0x20] sm:$0xff] %vm180_vm1, %v360_v1  ;;  %v361_v2 = vadd.f32 %v336_v63, %v206_v57  ;;  %v2470_v3 = vpop.f32.mrb[3].mxu1  ;;  %366 = vst.msk [vmem:[%s3085_s28] sm:$0xff] %vm180_vm1, %v356_v61  ;;  %v357_v4 = vadd.f32 %v320_v0, %v202_v59  ;;  %v2462_v5 = vpop.f32.mrb[3].mxu0 }
  0xee   : > { %371 = vst.msk [vmem:[%s3085_s28 + $0x28] sm:$0xff] %vm180_vm1, %v361_v2  ;;  %367 = vst.msk [vmem:[%s3085_s28 + $0x8] sm:$0xff] %vm180_vm1, %v357_v4 }
  0xf1   : > { %v341_v8 = vpop.f32.mrb[4].mxu1  ;;  %v325_v10 = vpop.f32.mrb[4].mxu0 }
  0xf2   : > { %v362_v12 = vadd.f32 %v341_v8, %v207_v6  ;;  %v2473_v13 = vpop.f32.mrb[5].mxu1  ;;  %v358_v14 = vadd.f32 %v325_v10, %v203_v7  ;;  %v2465_v15 = vpop.f32.mrb[5].mxu0 }
  0xf3   : > { %v344_v16 = vpop.f32.mrb[6].mxu1  ;;  %v328_v17 = vpop.f32.mrb[6].mxu0  ;;  %v387_v34 = vld [vmem:[%s3085_s28] sm:$0xff] }
  0xf4   : > { %372 = vst.msk [vmem:[%s3085_s28 + $0x30] sm:$0xff] %vm180_vm1, %v362_v12  ;;  %v363_v18 = vadd.f32 %v344_v16, %v208_v9  ;;  %v2474_v19 = vpop.f32.mrb[7].mxu1  ;;  %368 = vst.msk [vmem:[%s3085_s28 + $0x10] sm:$0xff] %vm180_vm1, %v358_v14  ;;  %v359_v20 = vadd.f32 %v328_v17, %v204_v11  ;;  %v2466_v21 = vpop.f32.mrb[7].mxu0  ;;  %v391_v61 = vld [vmem:[%s3085_s28 + $0x20] sm:$0xff] }
  0xf5   : > { %v388_v36 = vld [vmem:[%s3085_s28 + $0x8] sm:$0xff] }
  0xf6   : > { %373 = vst.msk [vmem:[%s3085_s28 + $0x38] sm:$0xff] %vm180_vm1, %v363_v18  ;;  %369 = vst.msk [vmem:[%s3085_s28 + $0x18] sm:$0xff] %vm180_vm1, %v359_v20  ;;  %v392_v3 = vld [vmem:[%s3085_s28 + $0x28] sm:$0xff] }
  0xf9   : > { %v349_v23 = vpop.f32.mrb[8].mxu1 }
  0xfa   : > { %v364_v25 = vadd.f32 %v349_v23, %v209_v22  ;;  %v2477_v26 = vpop.f32.mrb[9].mxu1  ;;  %v754_v27 = vpop.f32.mrb[8].mxu0 }
  0xfb   : > { %v352_v28 = vpop.f32.mrb[10].mxu1  ;;  %v2517_v29 = vpop.f32.mrb[9].mxu0  ;;  %v389_v46 = vld [vmem:[%s3085_s28 + $0x10] sm:$0xff] }
  0xfc   : > { %374 = vst.msk [vmem:[%s3085_s28 + $0x40] sm:$0xff] %vm180_vm1, %v364_v25  ;;  %v365_v30 = vadd.f32 %v352_v28, %v210_v24  ;;  %v2478_v31 = vpop.f32.mrb[11].mxu1  ;;  %v757_v32 = vpop.f32.mrb[10].mxu0  ;;  %v393_v14 = vld [vmem:[%s3085_s28 + $0x30] sm:$0xff] }
  0xfd   : > { %v2518_v33 = vpop.f32.mrb[11].mxu0  ;;  %v390_v48 = vld [vmem:[%s3085_s28 + $0x18] sm:$0xff] }
  0xfe   : > { %375 = vst.msk [vmem:[%s3085_s28 + $0x48] sm:$0xff] %vm180_vm1, %v365_v30  ;;  %v394_v19 = vld [vmem:[%s3085_s28 + $0x38] sm:$0xff] }
 0x101   : > { %v552_v35 = vpop.f32.mrb[12].mxu1 }
 0x102   : > { %v591_v37 = vadd.f32 %v552_v35, %v387_v34  ;;  %v2489_v38 = vpop.f32.mrb[13].mxu1 }
 0x103   : > { %v555_v39 = vpop.f32.mrb[14].mxu1  ;;  %v762_v40 = vpop.f32.mrb[12].mxu0  ;;  %v395_v30 = vld [vmem:[%s3085_s28 + $0x40] sm:$0xff] }
 0x104   : > { %601 = vst.msk [vmem:[%s3085_s28] sm:$0xff] %vm180_vm1, %v591_v37  ;;  %v592_v41 = vadd.f32 %v555_v39, %v388_v36  ;;  %v2490_v42 = vpop.f32.mrb[15].mxu1  ;;  %v2521_v43 = vpop.f32.mrb[13].mxu0 }
 0x105   : > { %v765_v44 = vpop.f32.mrb[14].mxu0  ;;  %v396_v35 = vld [vmem:[%s3085_s28 + $0x48] sm:$0xff] }
 0x106   : > { %602 = vst.msk [vmem:[%s3085_s28 + $0x8] sm:$0xff] %vm180_vm1, %v592_v41  ;;  %v2522_v45 = vpop.f32.mrb[15].mxu0 }
 0x109   : > { %v560_v47 = vpop.f32.mrb[16].mxu1 }
 0x10a   : > { %v593_v49 = vadd.f32 %v560_v47, %v389_v46  ;;  %v2493_v50 = vpop.f32.mrb[17].mxu1 }
 0x10b   : > { %v622_v51 = vld [vmem:[%s3085_s28] sm:$0xff]  ;;  %v563_v52 = vpop.f32.mrb[18].mxu1  ;;  %v770_v53 = vpop.f32.mrb[16].mxu0 }
 0x10c   : > { %603 = vst.msk [vmem:[%s3085_s28 + $0x10] sm:$0xff] %vm180_vm1, %v593_v49  ;;  %v793_v54 = vadd.f32 %v754_v27, %v622_v51  ;;  %v594_v55 = vadd.f32 %v563_v52, %v390_v48  ;;  %v2494_v56 = vpop.f32.mrb[19].mxu1  ;;  %v2525_v57 = vpop.f32.mrb[17].mxu0 }
 0x10d   : > { %v623_v58 = vld [vmem:[%s3085_s28 + $0x8] sm:$0xff]  ;;  %v773_v59 = vpop.f32.mrb[18].mxu0 }
 0x10e   : > { %803 = vst.msk [vmem:[%s3085_s28] sm:$0xff] %vm180_vm1, %v793_v54  ;;  %604 = vst.msk [vmem:[%s3085_s28 + $0x18] sm:$0xff] %vm180_vm1, %v594_v55  ;;  %v794_v1 = vadd.f32 %v757_v32, %v623_v58  ;;  %v2526_v60 = vpop.f32.mrb[19].mxu0 }
 0x110   : > { %804 = vst.msk [vmem:[%s3085_s28 + $0x8] sm:$0xff] %vm180_vm1, %v794_v1 }
 0x111   : > { %v568_v62 = vpop.f32.mrb[20].mxu1 }
 0x112   : > { %v595_v63 = vadd.f32 %v568_v62, %v391_v61  ;;  %v2497_v0 = vpop.f32.mrb[21].mxu1 }
 0x113   : > { %v624_v2 = vld [vmem:[%s3085_s28 + $0x10] sm:$0xff]  ;;  %v571_v4 = vpop.f32.mrb[22].mxu1  ;;  %v778_v5 = vpop.f32.mrb[20].mxu0 }
 0x114   : > { %605 = vst.msk [vmem:[%s3085_s28 + $0x20] sm:$0xff] %vm180_vm1, %v595_v63  ;;  %v795_v6 = vadd.f32 %v762_v40, %v624_v2  ;;  %v596_v7 = vadd.f32 %v571_v4, %v392_v3  ;;  %v2498_v8 = vpop.f32.mrb[23].mxu1  ;;  %v2529_v9 = vpop.f32.mrb[21].mxu0 }
 0x115   : > { %v625_v10 = vld [vmem:[%s3085_s28 + $0x18] sm:$0xff]  ;;  %v781_v11 = vpop.f32.mrb[22].mxu0  ;;  %v824_v46 = vld [vmem:[%s3085_s28] sm:$0xff] }
 0x116   : > { %805 = vst.msk [vmem:[%s3085_s28 + $0x10] sm:$0xff] %vm180_vm1, %v795_v6  ;;  %606 = vst.msk [vmem:[%s3085_s28 + $0x28] sm:$0xff] %vm180_vm1, %v596_v7  ;;  %v796_v12 = vadd.f32 %v765_v44, %v625_v10  ;;  %v2530_v13 = vpop.f32.mrb[23].mxu0 }
 0x117   : > { %v825_v51 = vld [vmem:[%s3085_s28 + $0x8] sm:$0xff] }
 0x118   : > { %806 = vst.msk [vmem:[%s3085_s28 + $0x18] sm:$0xff] %vm180_vm1, %v796_v12 }
 0x119   : > { %v576_v15 = vpop.f32.mrb[24].mxu1 }
 0x11a   : > { %v597_v16 = vadd.f32 %v576_v15, %v393_v14  ;;  %v2501_v17 = vpop.f32.mrb[25].mxu1 }
 0x11b   : > { %v626_v18 = vld [vmem:[%s3085_s28 + $0x20] sm:$0xff]  ;;  %v579_v20 = vpop.f32.mrb[26].mxu1  ;;  %v786_v21 = vpop.f32.mrb[24].mxu0 }
 0x11c   : > { %607 = vst.msk [vmem:[%s3085_s28 + $0x30] sm:$0xff] %vm180_vm1, %v597_v16  ;;  %v797_v22 = vadd.f32 %v770_v53, %v626_v18  ;;  %v598_v23 = vadd.f32 %v579_v20, %v394_v19  ;;  %v2502_v24 = vpop.f32.mrb[27].mxu1  ;;  %v2533_v25 = vpop.f32.mrb[25].mxu0 }
 0x11d   : > { %v627_v26 = vld [vmem:[%s3085_s28 + $0x28] sm:$0xff]  ;;  %v789_v27 = vpop.f32.mrb[26].mxu0  ;;  %v826_v61 = vld [vmem:[%s3085_s28 + $0x10] sm:$0xff] }
 0x11e   : > { %807 = vst.msk [vmem:[%s3085_s28 + $0x20] sm:$0xff] %vm180_vm1, %v797_v22  ;;  %608 = vst.msk [vmem:[%s3085_s28 + $0x38] sm:$0xff] %vm180_vm1, %v598_v23  ;;  %v798_v28 = vadd.f32 %v773_v59, %v627_v26  ;;  %v2534_v29 = vpop.f32.mrb[27].mxu0 }
 0x11f   : > { %v827_v3 = vld [vmem:[%s3085_s28 + $0x18] sm:$0xff] }
 0x120   : > { %808 = vst.msk [vmem:[%s3085_s28 + $0x28] sm:$0xff] %vm180_vm1, %v798_v28 }
 0x121   : > { %v584_v31 = vpop.f32.mrb[28].mxu1 }
 0x122   : > { %v599_v32 = vadd.f32 %v584_v31, %v395_v30  ;;  %v2505_v33 = vpop.f32.mrb[29].mxu1 }
 0x123   : > { %v628_v34 = vld [vmem:[%s3085_s28 + $0x30] sm:$0xff]  ;;  %v587_v36 = vpop.f32.mrb[30].mxu1  ;;  %v1199_v37 = vpop.f32.mrb[28].mxu0 }
 0x124   : > { %609 = vst.msk [vmem:[%s3085_s28 + $0x40] sm:$0xff] %vm180_vm1, %v599_v32  ;;  %v799_v38 = vadd.f32 %v778_v5, %v628_v34  ;;  %v600_v39 = vadd.f32 %v587_v36, %v396_v35  ;;  %v2506_v40 = vpop.f32.mrb[31].mxu1  ;;  %v2573_v41 = vpop.f32.mrb[29].mxu0 }
 0x125   : > { %v629_v42 = vld [vmem:[%s3085_s28 + $0x38] sm:$0xff]  ;;  %v1202_v43 = vpop.f32.mrb[30].mxu0  ;;  %v828_v14 = vld [vmem:[%s3085_s28 + $0x20] sm:$0xff] }
 0x126   : > { %809 = vst.msk [vmem:[%s3085_s28 + $0x30] sm:$0xff] %vm180_vm1, %v799_v38  ;;  %610 = vst.msk [vmem:[%s3085_s28 + $0x48] sm:$0xff] %vm180_vm1, %v600_v39  ;;  %v800_v44 = vadd.f32 %v781_v11, %v629_v42  ;;  %v2574_v45 = vpop.f32.mrb[31].mxu0 }
 0x127   : > { %v829_v19 = vld [vmem:[%s3085_s28 + $0x28] sm:$0xff] }
 0x128   : > { %810 = vst.msk [vmem:[%s3085_s28 + $0x38] sm:$0xff] %vm180_vm1, %v800_v44 }
 0x129   : > { %v955_v47 = vpop.f32.mrb[32].mxu1 }
 0x12a   : > { %v994_v48 = vadd.f32 %v955_v47, %v824_v46  ;;  %v2545_v49 = vpop.f32.mrb[33].mxu1 }
 0x12b   : > { %v630_v50 = vld [vmem:[%s3085_s28 + $0x40] sm:$0xff]  ;;  %v958_v52 = vpop.f32.mrb[34].mxu1  ;;  %v1207_v53 = vpop.f32.mrb[32].mxu0 }
 0x12c   : > { %v801_v54 = vadd.f32 %v786_v21, %v630_v50  ;;  %1004 = vst.msk [vmem:[%s3085_s28] sm:$0xff] %vm180_vm1, %v994_v48  ;;  %v995_v55 = vadd.f32 %v958_v52, %v825_v51  ;;  %v2546_v56 = vpop.f32.mrb[35].mxu1  ;;  %v2577_v57 = vpop.f32.mrb[33].mxu0 }
 0x12d   : > { %v631_v58 = vld [vmem:[%s3085_s28 + $0x48] sm:$0xff]  ;;  %v1210_v59 = vpop.f32.mrb[34].mxu0  ;;  %v830_v30 = vld [vmem:[%s3085_s28 + $0x30] sm:$0xff] }
 0x12e   : > { %811 = vst.msk [vmem:[%s3085_s28 + $0x40] sm:$0xff] %vm180_vm1, %v801_v54  ;;  %v802_v1 = vadd.f32 %v789_v27, %v631_v58  ;;  %1005 = vst.msk [vmem:[%s3085_s28 + $0x8] sm:$0xff] %vm180_vm1, %v995_v55  ;;  %v2578_v60 = vpop.f32.mrb[35].mxu0 }
 0x12f   : > { %v831_v35 = vld [vmem:[%s3085_s28 + $0x38] sm:$0xff] }
 0x130   : > { %812 = vst.msk [vmem:[%s3085_s28 + $0x48] sm:$0xff] %vm180_vm1, %v802_v1 }
 0x131   : > { %v963_v62 = vpop.f32.mrb[36].mxu1 }
 0x132   : > { %v996_v63 = vadd.f32 %v963_v62, %v826_v61  ;;  %v2549_v0 = vpop.f32.mrb[37].mxu1 }
 0x133   : > { %v1025_v2 = vld [vmem:[%s3085_s28] sm:$0xff]  ;;  %v966_v4 = vpop.f32.mrb[38].mxu1  ;;  %v1215_v5 = vpop.f32.mrb[36].mxu0 }
 0x134   : > { %1006 = vst.msk [vmem:[%s3085_s28 + $0x10] sm:$0xff] %vm180_vm1, %v996_v63  ;;  %v1238_v6 = vadd.f32 %v1199_v37, %v1025_v2  ;;  %v997_v7 = vadd.f32 %v966_v4, %v827_v3  ;;  %v2550_v8 = vpop.f32.mrb[39].mxu1  ;;  %v2581_v9 = vpop.f32.mrb[37].mxu0 }
 0x135   : > { %v1026_v10 = vld [vmem:[%s3085_s28 + $0x8] sm:$0xff]  ;;  %v1218_v11 = vpop.f32.mrb[38].mxu0  ;;  %v832_v46 = vld [vmem:[%s3085_s28 + $0x40] sm:$0xff] }
 0x136   : > { %1248 = vst.msk [vmem:[%s3085_s28] sm:$0xff] %vm180_vm1, %v1238_v6  ;;  %1007 = vst.msk [vmem:[%s3085_s28 + $0x18] sm:$0xff] %vm180_vm1, %v997_v7  ;;  %v1239_v12 = vadd.f32 %v1202_v43, %v1026_v10  ;;  %v2582_v13 = vpop.f32.mrb[39].mxu0 }
 0x137   : > { %v833_v51 = vld [vmem:[%s3085_s28 + $0x48] sm:$0xff] }
 0x138   : > { %1249 = vst.msk [vmem:[%s3085_s28 + $0x8] sm:$0xff] %vm180_vm1, %v1239_v12 }
 0x139   : > { %v971_v15 = vpop.f32.mrb[40].mxu1 }
 0x13a   : > { %v998_v16 = vadd.f32 %v971_v15, %v828_v14  ;;  %v2553_v17 = vpop.f32.mrb[41].mxu1 }
 0x13b   : > { %v1027_v18 = vld [vmem:[%s3085_s28 + $0x10] sm:$0xff]  ;;  %v974_v20 = vpop.f32.mrb[42].mxu1  ;;  %v1223_v21 = vpop.f32.mrb[40].mxu0 }
 0x13c   : > { %1008 = vst.msk [vmem:[%s3085_s28 + $0x20] sm:$0xff] %vm180_vm1, %v998_v16  ;;  %v1240_v22 = vadd.f32 %v1207_v53, %v1027_v18  ;;  %v999_v23 = vadd.f32 %v974_v20, %v829_v19  ;;  %v2554_v24 = vpop.f32.mrb[43].mxu1  ;;  %v2585_v25 = vpop.f32.mrb[41].mxu0 }
 0x13d   : > { %v1028_v26 = vld [vmem:[%s3085_s28 + $0x18] sm:$0xff]  ;;  %v1226_v27 = vpop.f32.mrb[42].mxu0  ;;  %v1269_v61 = vld [vmem:[%s3085_s28] sm:$0xff] }
 0x13e   : > { %1250 = vst.msk [vmem:[%s3085_s28 + $0x10] sm:$0xff] %vm180_vm1, %v1240_v22  ;;  %1009 = vst.msk [vmem:[%s3085_s28 + $0x28] sm:$0xff] %vm180_vm1, %v999_v23  ;;  %v1241_v28 = vadd.f32 %v1210_v59, %v1028_v26  ;;  %v2586_v29 = vpop.f32.mrb[43].mxu0 }
 0x13f   : > { %v1270_v3 = vld [vmem:[%s3085_s28 + $0x8] sm:$0xff] }
 0x140   : > { %1251 = vst.msk [vmem:[%s3085_s28 + $0x18] sm:$0xff] %vm180_vm1, %v1241_v28 }
 0x141   : > { %v979_v31 = vpop.f32.mrb[44].mxu1 }
 0x142   : > { %v1000_v32 = vadd.f32 %v979_v31, %v830_v30  ;;  %v2557_v33 = vpop.f32.mrb[45].mxu1 }
 0x143   : > { %v1029_v34 = vld [vmem:[%s3085_s28 + $0x20] sm:$0xff]  ;;  %v982_v36 = vpop.f32.mrb[46].mxu1  ;;  %v1231_v37 = vpop.f32.mrb[44].mxu0 }
 0x144   : > { %1010 = vst.msk [vmem:[%s3085_s28 + $0x30] sm:$0xff] %vm180_vm1, %v1000_v32  ;;  %v1242_v38 = vadd.f32 %v1215_v5, %v1029_v34  ;;  %v1001_v39 = vadd.f32 %v982_v36, %v831_v35  ;;  %v2558_v40 = vpop.f32.mrb[47].mxu1  ;;  %v2589_v41 = vpop.f32.mrb[45].mxu0 }
 0x145   : > { %v1030_v42 = vld [vmem:[%s3085_s28 + $0x28] sm:$0xff]  ;;  %v1234_v43 = vpop.f32.mrb[46].mxu0  ;;  %v1271_v14 = vld [vmem:[%s3085_s28 + $0x10] sm:$0xff] }
 0x146   : > { %1252 = vst.msk [vmem:[%s3085_s28 + $0x20] sm:$0xff] %vm180_vm1, %v1242_v38  ;;  %1011 = vst.msk [vmem:[%s3085_s28 + $0x38] sm:$0xff] %vm180_vm1, %v1001_v39  ;;  %v1243_v44 = vadd.f32 %v1218_v11, %v1030_v42  ;;  %v2590_v45 = vpop.f32.mrb[47].mxu0 }
 0x147   : > { %v1272_v19 = vld [vmem:[%s3085_s28 + $0x18] sm:$0xff] }
 0x148   : > { %1253 = vst.msk [vmem:[%s3085_s28 + $0x28] sm:$0xff] %vm180_vm1, %v1243_v44 }
 0x149   : > { %v987_v47 = vpop.f32.mrb[48].mxu1 }
 0x14a   : > { %v1002_v48 = vadd.f32 %v987_v47, %v832_v46  ;;  %v2561_v49 = vpop.f32.mrb[49].mxu1 }
 0x14b   : > { %v1031_v50 = vld [vmem:[%s3085_s28 + $0x30] sm:$0xff]  ;;  %v990_v52 = vpop.f32.mrb[50].mxu1  ;;  %v1602_v53 = vpop.f32.mrb[48].mxu0 }
 0x14c   : > { %1012 = vst.msk [vmem:[%s3085_s28 + $0x40] sm:$0xff] %vm180_vm1, %v1002_v48  ;;  %v1244_v54 = vadd.f32 %v1223_v21, %v1031_v50  ;;  %v1003_v55 = vadd.f32 %v990_v52, %v833_v51  ;;  %v2562_v56 = vpop.f32.mrb[51].mxu1  ;;  %v2629_v57 = vpop.f32.mrb[49].mxu0 }
 0x14d   : > { %v1032_v58 = vld [vmem:[%s3085_s28 + $0x38] sm:$0xff]  ;;  %v1605_v59 = vpop.f32.mrb[50].mxu0  ;;  %v1273_v30 = vld [vmem:[%s3085_s28 + $0x20] sm:$0xff] }
 0x14e   : > { %1254 = vst.msk [vmem:[%s3085_s28 + $0x30] sm:$0xff] %vm180_vm1, %v1244_v54  ;;  %1013 = vst.msk [vmem:[%s3085_s28 + $0x48] sm:$0xff] %vm180_vm1, %v1003_v55  ;;  %v1245_v1 = vadd.f32 %v1226_v27, %v1032_v58  ;;  %v2630_v60 = vpop.f32.mrb[51].mxu0 }
 0x14f   : > { %v1274_v35 = vld [vmem:[%s3085_s28 + $0x28] sm:$0xff] }
 0x150   : > { %1255 = vst.msk [vmem:[%s3085_s28 + $0x38] sm:$0xff] %vm180_vm1, %v1245_v1 }
 0x151   : > { %v1401_v62 = vpop.f32.mrb[52].mxu1 }
 0x152   : > { %v1440_v63 = vadd.f32 %v1401_v62, %v1269_v61  ;;  %v2601_v0 = vpop.f32.mrb[53].mxu1 }
 0x153   : > { %v1033_v2 = vld [vmem:[%s3085_s28 + $0x40] sm:$0xff]  ;;  %v1404_v4 = vpop.f32.mrb[54].mxu1  ;;  %v1610_v5 = vpop.f32.mrb[52].mxu0 }
 0x154   : > { %v1246_v6 = vadd.f32 %v1231_v37, %v1033_v2  ;;  %1450 = vst.msk [vmem:[%s3085_s28] sm:$0xff] %vm180_vm1, %v1440_v63  ;;  %v1441_v7 = vadd.f32 %v1404_v4, %v1270_v3  ;;  %v2602_v8 = vpop.f32.mrb[55].mxu1  ;;  %v2633_v9 = vpop.f32.mrb[53].mxu0 }
 0x155   : > { %v1034_v10 = vld [vmem:[%s3085_s28 + $0x48] sm:$0xff]  ;;  %v1613_v11 = vpop.f32.mrb[54].mxu0  ;;  %v1275_v46 = vld [vmem:[%s3085_s28 + $0x30] sm:$0xff] }
 0x156   : > { %1256 = vst.msk [vmem:[%s3085_s28 + $0x40] sm:$0xff] %vm180_vm1, %v1246_v6  ;;  %v1247_v12 = vadd.f32 %v1234_v43, %v1034_v10  ;;  %1451 = vst.msk [vmem:[%s3085_s28 + $0x8] sm:$0xff] %vm180_vm1, %v1441_v7  ;;  %v2634_v13 = vpop.f32.mrb[55].mxu0 }
 0x157   : > { %v1276_v51 = vld [vmem:[%s3085_s28 + $0x38] sm:$0xff] }
 0x158   : > { %1257 = vst.msk [vmem:[%s3085_s28 + $0x48] sm:$0xff] %vm180_vm1, %v1247_v12 }
 0x159   : > { %v1409_v15 = vpop.f32.mrb[56].mxu1 }
 0x15a   : > { %v1442_v16 = vadd.f32 %v1409_v15, %v1271_v14  ;;  %v2605_v17 = vpop.f32.mrb[57].mxu1 }
 0x15b   : > { %v1471_v18 = vld [vmem:[%s3085_s28] sm:$0xff]  ;;  %v1412_v20 = vpop.f32.mrb[58].mxu1  ;;  %v1618_v21 = vpop.f32.mrb[56].mxu0 }
 0x15c   : > { %1452 = vst.msk [vmem:[%s3085_s28 + $0x10] sm:$0xff] %vm180_vm1, %v1442_v16  ;;  %v1641_v22 = vadd.f32 %v1602_v53, %v1471_v18  ;;  %v1443_v23 = vadd.f32 %v1412_v20, %v1272_v19  ;;  %v2606_v24 = vpop.f32.mrb[59].mxu1  ;;  %v2637_v25 = vpop.f32.mrb[57].mxu0 }
 0x15d   : > { %v1472_v26 = vld [vmem:[%s3085_s28 + $0x8] sm:$0xff]  ;;  %v1621_v27 = vpop.f32.mrb[58].mxu0  ;;  %v1277_v61 = vld [vmem:[%s3085_s28 + $0x40] sm:$0xff] }
 0x15e   : > { %1651 = vst.msk [vmem:[%s3085_s28] sm:$0xff] %vm180_vm1, %v1641_v22  ;;  %1453 = vst.msk [vmem:[%s3085_s28 + $0x18] sm:$0xff] %vm180_vm1, %v1443_v23  ;;  %v1642_v28 = vadd.f32 %v1605_v59, %v1472_v26  ;;  %v2638_v29 = vpop.f32.mrb[59].mxu0 }
 0x15f   : > { %v1278_v3 = vld [vmem:[%s3085_s28 + $0x48] sm:$0xff] }
 0x160   : > { %1652 = vst.msk [vmem:[%s3085_s28 + $0x8] sm:$0xff] %vm180_vm1, %v1642_v28 }
 0x161   : > { %v1417_v31 = vpop.f32.mrb[60].mxu1 }
 0x162   : > { %v1444_v32 = vadd.f32 %v1417_v31, %v1273_v30  ;;  %v2609_v33 = vpop.f32.mrb[61].mxu1 }
 0x163   : > { %v1473_v34 = vld [vmem:[%s3085_s28 + $0x10] sm:$0xff]  ;;  %v1420_v36 = vpop.f32.mrb[62].mxu1  ;;  %v1626_v37 = vpop.f32.mrb[60].mxu0 }
 0x164   : > { %1454 = vst.msk [vmem:[%s3085_s28 + $0x20] sm:$0xff] %vm180_vm1, %v1444_v32  ;;  %v1643_v38 = vadd.f32 %v1610_v5, %v1473_v34  ;;  %v1445_v39 = vadd.f32 %v1420_v36, %v1274_v35  ;;  %v2610_v40 = vpop.f32.mrb[63].mxu1  ;;  %v2641_v41 = vpop.f32.mrb[61].mxu0 }
 0x165   : > { %v1474_v42 = vld [vmem:[%s3085_s28 + $0x18] sm:$0xff]  ;;  %v1629_v43 = vpop.f32.mrb[62].mxu0  ;;  %v1672_v14 = vld [vmem:[%s3085_s28] sm:$0xff] }
 0x166   : > { %1653 = vst.msk [vmem:[%s3085_s28 + $0x10] sm:$0xff] %vm180_vm1, %v1643_v38  ;;  %1455 = vst.msk [vmem:[%s3085_s28 + $0x28] sm:$0xff] %vm180_vm1, %v1445_v39  ;;  %v1644_v44 = vadd.f32 %v1613_v11, %v1474_v42  ;;  %v2642_v45 = vpop.f32.mrb[63].mxu0 }
 0x167   : > { %v1673_v19 = vld [vmem:[%s3085_s28 + $0x8] sm:$0xff] }
 0x168   : > { %1654 = vst.msk [vmem:[%s3085_s28 + $0x18] sm:$0xff] %vm180_vm1, %v1644_v44 }
 0x169   : > { %v1425_v47 = vpop.f32.mrb[64].mxu1 }
 0x16a   : > { %v1446_v48 = vadd.f32 %v1425_v47, %v1275_v46  ;;  %v2613_v49 = vpop.f32.mrb[65].mxu1 }
 0x16b   : > { %v1475_v50 = vld [vmem:[%s3085_s28 + $0x20] sm:$0xff]  ;;  %v1428_v52 = vpop.f32.mrb[66].mxu1  ;;  %v1634_v53 = vpop.f32.mrb[64].mxu0 }
 0x16c   : > { %1456 = vst.msk [vmem:[%s3085_s28 + $0x30] sm:$0xff] %vm180_vm1, %v1446_v48  ;;  %v1645_v54 = vadd.f32 %v1618_v21, %v1475_v50  ;;  %v1447_v55 = vadd.f32 %v1428_v52, %v1276_v51  ;;  %v2614_v56 = vpop.f32.mrb[67].mxu1  ;;  %v2645_v57 = vpop.f32.mrb[65].mxu0 }
 0x16d   : > { %v1476_v58 = vld [vmem:[%s3085_s28 + $0x28] sm:$0xff]  ;;  %v1637_v59 = vpop.f32.mrb[66].mxu0  ;;  %v1674_v30 = vld [vmem:[%s3085_s28 + $0x10] sm:$0xff] }
 0x16e   : > { %1655 = vst.msk [vmem:[%s3085_s28 + $0x20] sm:$0xff] %vm180_vm1, %v1645_v54  ;;  %1457 = vst.msk [vmem:[%s3085_s28 + $0x38] sm:$0xff] %vm180_vm1, %v1447_v55  ;;  %v1646_v1 = vadd.f32 %v1621_v27, %v1476_v58  ;;  %v2646_v60 = vpop.f32.mrb[67].mxu0 }
 0x16f   : > { %v1675_v35 = vld [vmem:[%s3085_s28 + $0x18] sm:$0xff] }
 0x170   : > { %1656 = vst.msk [vmem:[%s3085_s28 + $0x28] sm:$0xff] %vm180_vm1, %v1646_v1 }
 0x171   : > { %v1433_v62 = vpop.f32.mrb[68].mxu1 }
 0x172   : > { %v1448_v63 = vadd.f32 %v1433_v62, %v1277_v61  ;;  %v2617_v0 = vpop.f32.mrb[69].mxu1 }
 0x173   : > { %v1477_v2 = vld [vmem:[%s3085_s28 + $0x30] sm:$0xff]  ;;  %v1436_v4 = vpop.f32.mrb[70].mxu1  ;;  %v2048_v5 = vpop.f32.mrb[68].mxu0 }
 0x174   : > { %1458 = vst.msk [vmem:[%s3085_s28 + $0x40] sm:$0xff] %vm180_vm1, %v1448_v63  ;;  %v1647_v6 = vadd.f32 %v1626_v37, %v1477_v2  ;;  %v1449_v7 = vadd.f32 %v1436_v4, %v1278_v3  ;;  %v2618_v8 = vpop.f32.mrb[71].mxu1  ;;  %v2685_v9 = vpop.f32.mrb[69].mxu0 }
 0x175   : > { %v1478_v10 = vld [vmem:[%s3085_s28 + $0x38] sm:$0xff]  ;;  %v2051_v11 = vpop.f32.mrb[70].mxu0  ;;  %v1676_v46 = vld [vmem:[%s3085_s28 + $0x20] sm:$0xff] }
 0x176   : > { %1657 = vst.msk [vmem:[%s3085_s28 + $0x30] sm:$0xff] %vm180_vm1, %v1647_v6  ;;  %1459 = vst.msk [vmem:[%s3085_s28 + $0x48] sm:$0xff] %vm180_vm1, %v1449_v7  ;;  %v1648_v12 = vadd.f32 %v1629_v43, %v1478_v10  ;;  %v2686_v13 = vpop.f32.mrb[71].mxu0 }
 0x177   : > { %v1677_v51 = vld [vmem:[%s3085_s28 + $0x28] sm:$0xff] }
 0x178   : > { %1658 = vst.msk [vmem:[%s3085_s28 + $0x38] sm:$0xff] %vm180_vm1, %v1648_v12 }
 0x179   : > { %v1846_v15 = vpop.f32.mrb[72].mxu1 }
 0x17a   : > { %v1885_v16 = vadd.f32 %v1846_v15, %v1672_v14  ;;  %v2657_v17 = vpop.f32.mrb[73].mxu1 }
 0x17b   : > { %v1479_v18 = vld [vmem:[%s3085_s28 + $0x40] sm:$0xff]  ;;  %v1849_v20 = vpop.f32.mrb[74].mxu1  ;;  %v2056_v21 = vpop.f32.mrb[72].mxu0 }
 0x17c   : > { %v1649_v22 = vadd.f32 %v1634_v53, %v1479_v18  ;;  %1895 = vst.msk [vmem:[%s3085_s28] sm:$0xff] %vm180_vm1, %v1885_v16  ;;  %v1886_v23 = vadd.f32 %v1849_v20, %v1673_v19  ;;  %v2658_v24 = vpop.f32.mrb[75].mxu1  ;;  %v2689_v25 = vpop.f32.mrb[73].mxu0 }
 0x17d   : > { %v1480_v26 = vld [vmem:[%s3085_s28 + $0x48] sm:$0xff]  ;;  %v2059_v27 = vpop.f32.mrb[74].mxu0  ;;  %v1678_v61 = vld [vmem:[%s3085_s28 + $0x30] sm:$0xff] }
 0x17e   : > { %1659 = vst.msk [vmem:[%s3085_s28 + $0x40] sm:$0xff] %vm180_vm1, %v1649_v22  ;;  %v1650_v28 = vadd.f32 %v1637_v59, %v1480_v26  ;;  %1896 = vst.msk [vmem:[%s3085_s28 + $0x8] sm:$0xff] %vm180_vm1, %v1886_v23  ;;  %v2690_v29 = vpop.f32.mrb[75].mxu0 }
 0x17f   : > { %v1679_v3 = vld [vmem:[%s3085_s28 + $0x38] sm:$0xff] }
 0x180   : > { %1660 = vst.msk [vmem:[%s3085_s28 + $0x48] sm:$0xff] %vm180_vm1, %v1650_v28 }
 0x181   : > { %v1854_v31 = vpop.f32.mrb[76].mxu1 }
 0x182   : > { %v1887_v32 = vadd.f32 %v1854_v31, %v1674_v30  ;;  %v2661_v33 = vpop.f32.mrb[77].mxu1 }
 0x183   : > { %v1916_v34 = vld [vmem:[%s3085_s28] sm:$0xff]  ;;  %v1857_v36 = vpop.f32.mrb[78].mxu1  ;;  %v2064_v37 = vpop.f32.mrb[76].mxu0 }
 0x184   : > { %1897 = vst.msk [vmem:[%s3085_s28 + $0x10] sm:$0xff] %vm180_vm1, %v1887_v32  ;;  %v2087_v38 = vadd.f32 %v2048_v5, %v1916_v34  ;;  %v1888_v39 = vadd.f32 %v1857_v36, %v1675_v35  ;;  %v2662_v40 = vpop.f32.mrb[79].mxu1  ;;  %v2693_v41 = vpop.f32.mrb[77].mxu0 }
 0x185   : > { %v1917_v42 = vld [vmem:[%s3085_s28 + $0x8] sm:$0xff]  ;;  %v2067_v43 = vpop.f32.mrb[78].mxu0  ;;  %v1680_v14 = vld [vmem:[%s3085_s28 + $0x40] sm:$0xff] }
 0x186   : > { %2097 = vst.msk [vmem:[%s3085_s28] sm:$0xff] %vm180_vm1, %v2087_v38  ;;  %1898 = vst.msk [vmem:[%s3085_s28 + $0x18] sm:$0xff] %vm180_vm1, %v1888_v39  ;;  %v2088_v44 = vadd.f32 %v2051_v11, %v1917_v42  ;;  %v2694_v45 = vpop.f32.mrb[79].mxu0 }
 0x187   : > { %v1681_v19 = vld [vmem:[%s3085_s28 + $0x48] sm:$0xff] }
 0x188   : > { %2098 = vst.msk [vmem:[%s3085_s28 + $0x8] sm:$0xff] %vm180_vm1, %v2088_v44 }
 0x189   : > { %v1862_v47 = vpop.f32.mrb[80].mxu1 }
 0x18a   : > { %v1889_v48 = vadd.f32 %v1862_v47, %v1676_v46  ;;  %v2665_v49 = vpop.f32.mrb[81].mxu1 }
 0x18b   : > { %v1918_v50 = vld [vmem:[%s3085_s28 + $0x10] sm:$0xff]  ;;  %v1865_v52 = vpop.f32.mrb[82].mxu1  ;;  %v2072_v53 = vpop.f32.mrb[80].mxu0 }
 0x18c   : > { %1899 = vst.msk [vmem:[%s3085_s28 + $0x20] sm:$0xff] %vm180_vm1, %v1889_v48  ;;  %v2089_v54 = vadd.f32 %v2056_v21, %v1918_v50  ;;  %v1890_v55 = vadd.f32 %v1865_v52, %v1677_v51  ;;  %v2666_v56 = vpop.f32.mrb[83].mxu1  ;;  %v2697_v57 = vpop.f32.mrb[81].mxu0 }
 0x18d   : > { %v1919_v58 = vld [vmem:[%s3085_s28 + $0x18] sm:$0xff]  ;;  %v2075_v59 = vpop.f32.mrb[82].mxu0 }
 0x18e   : > { %2099 = vst.msk [vmem:[%s3085_s28 + $0x10] sm:$0xff] %vm180_vm1, %v2089_v54  ;;  %1900 = vst.msk [vmem:[%s3085_s28 + $0x28] sm:$0xff] %vm180_vm1, %v1890_v55  ;;  %v2090_v1 = vadd.f32 %v2059_v27, %v1919_v58  ;;  %v2698_v60 = vpop.f32.mrb[83].mxu0 }
 0x190   : > { %2100 = vst.msk [vmem:[%s3085_s28 + $0x18] sm:$0xff] %vm180_vm1, %v2090_v1 }
 0x191   : > { %v1870_v62 = vpop.f32.mrb[84].mxu1 }
 0x192   : > { %v1891_v63 = vadd.f32 %v1870_v62, %v1678_v61  ;;  %v2669_v0 = vpop.f32.mrb[85].mxu1 }
 0x193   : > { %v1920_v2 = vld [vmem:[%s3085_s28 + $0x20] sm:$0xff]  ;;  %v1873_v4 = vpop.f32.mrb[86].mxu1  ;;  %v2080_v5 = vpop.f32.mrb[84].mxu0 }
 0x194   : > { %1901 = vst.msk [vmem:[%s3085_s28 + $0x30] sm:$0xff] %vm180_vm1, %v1891_v63  ;;  %v2091_v6 = vadd.f32 %v2064_v37, %v1920_v2  ;;  %v1892_v7 = vadd.f32 %v1873_v4, %v1679_v3  ;;  %v2670_v8 = vpop.f32.mrb[87].mxu1  ;;  %v2701_v9 = vpop.f32.mrb[85].mxu0 }
 0x195   : > { %v1921_v10 = vld [vmem:[%s3085_s28 + $0x28] sm:$0xff]  ;;  %v2083_v11 = vpop.f32.mrb[86].mxu0 }
 0x196   : > { %2101 = vst.msk [vmem:[%s3085_s28 + $0x20] sm:$0xff] %vm180_vm1, %v2091_v6  ;;  %1902 = vst.msk [vmem:[%s3085_s28 + $0x38] sm:$0xff] %vm180_vm1, %v1892_v7  ;;  %v2092_v12 = vadd.f32 %v2067_v43, %v1921_v10  ;;  %v2702_v13 = vpop.f32.mrb[87].mxu0 }
 0x198   : > { %2102 = vst.msk [vmem:[%s3085_s28 + $0x28] sm:$0xff] %vm180_vm1, %v2092_v12 }
 0x199   : > { %v1878_v15 = vpop.f32.mrb[88].mxu1 }
 0x19a   : > { %v1893_v16 = vadd.f32 %v1878_v15, %v1680_v14  ;;  %v2673_v17 = vpop.f32.mrb[89].mxu1 }
 0x19b   : > { %v1922_v18 = vld [vmem:[%s3085_s28 + $0x30] sm:$0xff]  ;;  %v1881_v20 = vpop.f32.mrb[90].mxu1 }
 0x19c   : > { %1903 = vst.msk [vmem:[%s3085_s28 + $0x40] sm:$0xff] %vm180_vm1, %v1893_v16  ;;  %v2093_v21 = vadd.f32 %v2072_v53, %v1922_v18  ;;  %v1894_v22 = vadd.f32 %v1881_v20, %v1681_v19  ;;  %v2674_v23 = vpop.f32.mrb[91].mxu1 }
 0x19d   : > { %v1923_v24 = vld [vmem:[%s3085_s28 + $0x38] sm:$0xff] }
 0x19e   : > { %2103 = vst.msk [vmem:[%s3085_s28 + $0x30] sm:$0xff] %vm180_vm1, %v2093_v21  ;;  %1904 = vst.msk [vmem:[%s3085_s28 + $0x48] sm:$0xff] %vm180_vm1, %v1894_v22  ;;  %v2094_v25 = vadd.f32 %v2075_v59, %v1923_v24 }
 0x1a0   : > { %2104 = vst.msk [vmem:[%s3085_s28 + $0x38] sm:$0xff] %vm180_vm1, %v2094_v25 }
 0x1a3   : > { %v1924_v26 = vld [vmem:[%s3085_s28 + $0x40] sm:$0xff] }
 0x1a4   : > { %v2095_v27 = vadd.f32 %v2080_v5, %v1924_v26 }
 0x1a5   : > { %v1925_v28 = vld [vmem:[%s3085_s28 + $0x48] sm:$0xff] }
 0x1a6   : > { %2105 = vst.msk [vmem:[%s3085_s28 + $0x40] sm:$0xff] %vm180_vm1, %v2095_v27  ;;  %v2096_v29 = vadd.f32 %v2083_v11, %v1925_v28 }
 0x1a8   : > { %2106 = vst.msk [vmem:[%s3085_s28 + $0x48] sm:$0xff] %vm180_vm1, %v2096_v29 }
 0x1a9 PF: > { %s13_s12 = sadd.s32 1, %s2818_s12  }
 0x1aa   : > { %p10_p4 = scmp.ge.s32.totalorder %s13_s12, 18  }
 0x1ac   :  { %12 = sbr.rel (!%p10_p4) target bundleno = 1 (0x1), region = 70 }

// kernel: conv_delta_forward.10
= control target key start
LH: loop header
LB: loop body
LE: loop exit
PB: predicated region body
PF: predicated region fallthrough
CT: control target
= control target key end

     0   :  { %s1688_s12 = smov 0   ;;  %s1957_s0 = inlined_call_operand.vmem [shape: bf16[16,44,64], index: 0, kind: input, shape index: {}]   ;;  %s1958_s1 = inlined_call_operand.vmem [shape: bf16[9,64,64], index: 1, kind: input, shape index: {}]   ;;  %s1959_s2 = inlined_call_operand.vmem [shape: f32[1,64], index: 2, kind: input, shape index: {}]   ;;  %s1960_s3 = inlined_call_operand.vmem [shape: f32[16,24,64], index: 3, kind: output, shape index: {}]  }
   0x1 LB: > { %s1289_s13 = sadd.s32 4294967295, %s1666_s12   ;;  %p1293_p0 = scmp.ge.s32.totalorder %s1666_s12, 1  ;;  %s1666_s12 = sphi %s1688_s12, %s13_s12  }
   0x2   : > { %p137_p1 = scmp.lt.s32.totalorder %s1666_s12, 17 }
   0x4   : > { %p138_p2 = pnand %p1293_p0, %p137_p1 }
   0x5   : > { %v1606_v0 = vld [vmem:[%s1958_s1] sm:$0xff] (!%p138_p2)   ;;  %p161_p3 = scmp.lt.s32.totalorder (!%p138_p2), %s1289_s13, 15  ;;  %v1607_v1 = vld [vmem:[%s1958_s1 + $0x8] sm:$0xff] (!%p138_p2)   ;;  %v1609_v3 = vld [vmem:[%s1958_s1 + $0x10] sm:$0xff] (!%p138_p2)   ;;  %vm180_vm0 = vcmask (!%p138_p2), 523264   ;;  %vm442_vm1 = vcmask (!%p138_p2), 1046528  }
   0x6   : > { %141 = sbr.rel (%p138_p2) target bundleno = 320 (0x140), region = 32  ;;  %1489 = vmatprep.subr.bf16.mxu0 (!%p138_p2), %v1606_v0  ;;  %v1608_v2 = vld [vmem:[%s1958_s1 + $0x20] sm:$0xff] (!%p138_p2)   ;;  %v1610_v4 = vld [vmem:[%s1958_s1 + $0x28] sm:$0xff] (!%p138_p2)   ;;  %v1613_v5 = vld [vmem:[%s1958_s1 + $0x30] sm:$0xff] (!%p138_p2)   ;;  %vm316_vm2 = vsmask.f32 (!%p138_p2), 7424 }
   0x7   : > { %1490 = vmatpush3.bf16.msra.mxu0 (!%p138_p2), %v1606_v0  ;;  %1501 = vmatprep.subr.bf16.mxu1 (!%p138_p2), %v1608_v2  ;;  %v1611_v7 = vld [vmem:[%s1958_s1 + $0x18] sm:$0xff] (!%p138_p2)   ;;  %v1615_v9 = vld [vmem:[%s1958_s1 + $0x40] sm:$0xff] (!%p138_p2)   ;;  %v1617_v13 = vld [vmem:[%s1958_s1 + $0x48] sm:$0xff] (!%p138_p2)   ;;  %vm556_vm3 = vcmask (!%p138_p2), 1044480   ;;  %vm670_vm4 = vsmask.f32 (!%p138_p2), 4352 }
   0x8   : > { %1491 = vmatprep.subr.bf16.mxu0 (!%p138_p2), %v1607_v1  ;;  %1502 = vmatpush3.bf16.msra.mxu1 (!%p138_p2), %v1608_v2  ;;  %v1616_v8 = vld [vmem:[%s1958_s1 + $0x38] sm:$0xff] (!%p138_p2)   ;;  %v1621_v18 = vld [vmem:[%s1958_s1 + $0x60] sm:$0xff] (!%p138_p2)   ;;  %v1620_v21 = vld [vmem:[%s1958_s1 + $0x50] sm:$0xff] (!%p138_p2)   ;;  %vm905_vm5 = vcmask (!%p138_p2), 1045504   ;;  %vm1019_vm6 = vsmask.f32 (!%p138_p2), 5376 }
   0x9   : > { %1503 = vmatprep.subr.bf16.mxu1 (!%p138_p2), %v1610_v4  ;;  %v1623_v27 = vld [vmem:[%s1958_s1 + $0x68] sm:$0xff] (!%p138_p2)   ;;  %v1622_v30 = vld [vmem:[%s1958_s1 + $0x58] sm:$0xff] (!%p138_p2)   ;;  %v1626_v32 = vld [vmem:[%s1958_s1 + $0x70] sm:$0xff] (!%p138_p2)  }
   0xa   : > { %v1627_v36 = vld [vmem:[%s1958_s1 + $0x80] sm:$0xff] (!%p138_p2)   ;;  %v1628_v38 = vld [vmem:[%s1958_s1 + $0x78] sm:$0xff] (!%p138_p2)   ;;  %v1629_v39 = vld [vmem:[%s1958_s1 + $0x88] sm:$0xff] (!%p138_p2)  }
   0xb   : > { %1492 = vmatpush3.bf16.msra.mxu0 (!%p138_p2), %v1607_v1  ;;  %v1633_v42 = vld [vmem:[%s1958_s1 + $0xa0] sm:$0xff] (!%p138_p2)   ;;  %v1632_v46 = vld [vmem:[%s1958_s1 + $0x90] sm:$0xff] (!%p138_p2)   ;;  %v1635_v49 = vld [vmem:[%s1958_s1 + $0xa8] sm:$0xff] (!%p138_p2)  }
   0xc   : > { %1493 = vmatprep.subr.bf16.mxu0 (!%p138_p2), %v1609_v3  ;;  %1504 = vmatpush3.bf16.msra.mxu1 (!%p138_p2), %v1610_v4  ;;  %v1634_v57 = vld [vmem:[%s1958_s1 + $0x98] sm:$0xff] (!%p138_p2)   ;;  %v1638_v59 = vld [vmem:[%s1958_s1 + $0xb0] sm:$0xff] (!%p138_p2)   ;;  %v1639_v60 = vld [vmem:[%s1958_s1 + $0xc0] sm:$0xff] (!%p138_p2)  }
   0xd   : > { %s1962_s13 = smov (!%p161_p3, %s1289_s13), 15  ;;  %1505 = vmatprep.subr.bf16.mxu1 %v1613_v5  ;;  %v1640_v63 = vld [vmem:[%s1958_s1 + $0xb8] sm:$0xff]   ;;  %v1641_v2 = vld [vmem:[%s1958_s1 + $0xc8] sm:$0xff]  }
   0xe   : > { %s1597_s24 = smul.u32 24, %s1962_s13 }
   0xf   : > { %1494 = vmatpush3.bf16.msra.mxu0 %v1609_v3 }
  0x10   : > { %s1719_s27 = scalar_lea.vmem %s1957_s0, %s1597_s24  ;;  %1495 = vmatprep.subr.bf16.mxu0 %v1611_v7  ;;  %1506 = vmatpush3.bf16.msra.mxu1 %v1613_v5  ;;  %v1645_v5 = vld [vmem:[%s1958_s1 + $0xe0] sm:$0xff]   ;;  %s1831_s5 = scalar_lea.vmem %s1960_s3, %s1597_s24 }
  0x11   : > { %v1612_v6 = vld [vmem:[%s1719_s27] sm:$0xff]   ;;  %v1614_v10 = vld [vmem:[%s1719_s27 + $0x8] ss:$0 sps:$4 sm:$0xff]   ;;  %1507 = vmatprep.subr.bf16.mxu1 %v1616_v8  ;;  %v1803_v62 = vld [vmem:[%s1719_s27 + $0xc] sm:$0x3f]  }
  0x12   : > { %1497 = vmatprep.mubr.msk.bf16.mxu0 %vm180_vm0, %v1612_v6  ;;  %v1618_v11 = vld [vmem:[%s1719_s27] sm:$0xff]   ;;  %v1619_v12 = vld [vmem:[%s1719_s27 + $0x8] sm:$0x1f]   ;;  %v907_v1 = vrot.slane %v1803_v62, 2  ;;  %v1644_v6 = vld [vmem:[%s1958_s1 + $0xd0] sm:$0xff]  }
  0x13   : > { %1496 = vmatpush3.bf16.msra.mxu0 %v1611_v7  ;;  %v318_v14 = vshrl.u32 %v1618_v11, 16  ;;  %v320_v15 = vshll.u32 %v1618_v11, 16  ;;  %v325_v16 = vshll.u32 %v1619_v12, 16  ;;  %v329_v17 = vshrl.u32 %v1619_v12, 16  ;;  %v1624_v24 = vld [vmem:[%s1719_s27] sm:$0xfe]  }
  0x14   : > { %1513 = vmatprep.subr.bf16.mxu0 %v1615_v9  ;;  %1508 = vmatpush3.bf16.msra.mxu1 %v1616_v8  ;;  %v1625_v25 = vld [vmem:[%s1719_s27 + $0x8] sm:$0x1f]   ;;  %v443_v28 = vrot.slane %v1624_v24, 1  ;;  %v1630_v33 = vld [vmem:[%s1719_s27] sm:$0xf8]  }
  0x15   : > { %v322_v19 = vrot.slane %v320_v15, 1  ;;  %v327_v20 = vrot.slane %v325_v16, 1  ;;  %1525 = vmatprep.subr.bf16.mxu1 %v1621_v18  ;;  %v444_v29 = vrot.slane %v1625_v25, 1  ;;  %v1631_v34 = vld [vmem:[%s1719_s27 + $0x8] sm:$0x7f]   ;;  %v557_v35 = vrot.slane %v1630_v33, 3 }
  0x16   : > { %1498 = vmatmul.mubr.msk.bf16.vlgmr.msra.gmra.mrb[0].mxu0 %vm180_vm0, %v1614_v10  ;;  %v558_v37 = vrot.slane %v1631_v34, 3  ;;  %v1636_v41 = vld [vmem:[%s1719_s27] sm:$0xf8]   ;;  %v1637_v43 = vld [vmem:[%s1719_s27 + $0x8] sm:$0xff]   ;;  %v1657_v33 = vld [vmem:[%s1958_s1 + $0x118] sm:$0xff]  }
  0x17   : > { %1514 = vmatpush3.bf16.msra.mxu0 %v1615_v9  ;;  %v323_v22 = vor.u32 %v322_v19, %v318_v14  ;;  %v331_v23 = vor.u32 %v329_v17, %v327_v20  ;;  %v445_v31 = vsel %vm442_vm1, %v443_v28, %v444_v29  ;;  %v672_v44 = vshrl.u32 %v1636_v41, 16  ;;  %v1642_v56 = vld [vmem:[%s1719_s27 + $0x4] sm:$0xff]   ;;  %v1643_v4 = vld [vmem:[%s1719_s27 + $0xc] ss:$0 sps:$4 sm:$0xff]   ;;  %v1646_v14 = vld [vmem:[%s1958_s1 + $0xd8] sm:$0xff]  }
  0x18   : > { %1515 = vmatprep.subr.bf16.mxu0 %v1617_v13  ;;  %1521 = vmatprep.mubr.msk.bf16.mxu0 %vm180_vm0, %v445_v31  ;;  %v559_v40 = vsel %vm556_vm3, %v557_v35, %v558_v37  ;;  %v675_v45 = vshll.u32 %v1636_v41, 16  ;;  %v680_v47 = vshrl.u32 %v1637_v43, 16  ;;  %v683_v48 = vshll.u32 %v1637_v43, 16  ;;  %v1648_v61 = vld [vmem:[%s1719_s27 + $0x4] sm:$0xfc]  }
  0x19   : > { %v328_v26 = vsel %vm316_vm2, %v323_v22, %v327_v20  ;;  %v674_v50 = vrot.slane %v672_v44, 3  ;;  %v906_v0 = vrot.slane %v1648_v61, 2  ;;  %v1654_v7 = vld [vmem:[%s1719_s27 + $0x4] sm:$0xfc]   ;;  %v1655_v9 = vld [vmem:[%s1719_s27 + $0xc] sm:$0x7f]  }
  0x1a   : > { %1509 = vmatprep.mubr.msk.bf16.mxu1 %vm180_vm0, %v328_v26  ;;  %v677_v51 = vrot.slane %v675_v45, 4  ;;  %v682_v52 = vrot.slane %v680_v47, 3  ;;  %v685_v53 = vrot.slane %v683_v48, 4  ;;  %v1647_v8 = vld [vmem:[%s1958_s1 + $0xe8] sm:$0xff]   ;;  %v1021_v10 = vshrl.u32 %v1654_v7, 16  ;;  %v1651_v26 = vld [vmem:[%s1958_s1 + $0x100] sm:$0xff]  }
  0x1b   : > { %1516 = vmatpush3.bf16.msra.mxu0 %v1617_v13  ;;  %1510 = vmatmul.mubr.msk.bf16.vlgmr.msra.gmra.mrb[0].mxu1 %vm180_vm0, %v331_v23  ;;  %v908_v3 = vsel %vm905_vm5, %v906_v0, %v907_v1  ;;  %v1024_v11 = vshll.u32 %v1654_v7, 16  ;;  %v1029_v12 = vshrl.u32 %v1655_v9, 16  ;;  %v1032_v13 = vshll.u32 %v1655_v9, 16  ;;  %v1658_v20 = vld [vmem:[%s1719_s27 + $0x4] sm:$0xf8]   ;;  %v1650_v23 = vld [vmem:[%s1958_s1 + $0xf0] sm:$0xff]  }
  0x1c   : > { %1517 = vmatprep.subr.bf16.mxu0 %v1620_v21  ;;  %1526 = vmatpush3.bf16.msra.mxu1 %v1621_v18  ;;  %v678_v54 = vor.u32 %v677_v51, %v674_v50  ;;  %v686_v55 = vor.u32 %v685_v53, %v682_v52  ;;  %v1023_v15 = vrot.slane %v1021_v10, 2  ;;  %v1296_v22 = vld [vmem:[%s1959_s2] ss:$0 sm:$0xff] }
  0x1d   : > { %1527 = vmatprep.subr.bf16.mxu1 %v1623_v27  ;;  %1533 = vmatprep.mubr.msk.bf16.mxu1 %vm180_vm0, %v559_v40  ;;  %v1026_v16 = vrot.slane %v1024_v11, 3  ;;  %v1031_v17 = vrot.slane %v1029_v12, 2  ;;  %v1034_v18 = vrot.slane %v1032_v13, 3  ;;  %183 = vst.msk [vmem:[%s1831_s5 + $0x10] sm:$0xff] %vm180_vm0, %v1296_v22  ;;  %181 = vst.msk [vmem:[%s1831_s5] sm:$0xff] %vm180_vm0, %v1296_v22 }
  0x1e   : > { %v687_v58 = vsel %vm670_vm4, %v678_v54, %v686_v55  ;;  %182 = vst.msk [vmem:[%s1831_s5 + $0x8] sm:$0xff] %vm180_vm0, %v1296_v22 }
  0x1f   : > { %1518 = vmatpush3.bf16.msra.mxu0 %v1620_v21  ;;  %v1027_v19 = vor.u32 %v1026_v16, %v1023_v15  ;;  %v1659_v21 = vld [vmem:[%s1719_s27 + $0xc] sm:$0x7f]   ;;  %v1035_v24 = vor.u32 %v1034_v18, %v1031_v17 }
  0x20   : > { %1519 = vmatprep.subr.bf16.mxu0 %v1622_v30  ;;  %1528 = vmatpush3.bf16.msra.mxu1 %v1623_v27  ;;  %v1147_v27 = vrot.slane %v1658_v20, 3  ;;  %v1148_v28 = vrot.slane %v1659_v21, 3 }
  0x21   : > { %1529 = vmatprep.subr.bf16.mxu1 %v1626_v32  ;;  %v1036_v25 = vsel %vm1019_vm6, %v1027_v19, %v1035_v24 }
  0x22   : > { %v1149_v31 = vsel %vm556_vm3, %v1147_v27, %v1148_v28 }
  0x23   : > { %1520 = vmatpush3.bf16.msra.mxu0 %v1622_v30  ;;  %v1653_v30 = vld [vmem:[%s1958_s1 + $0x108] sm:$0xff]  }
  0x24   : > { %1530 = vmatpush3.bf16.msra.mxu1 %v1626_v32  ;;  %1537 = vmatprep.subr.bf16.mxu0 %v1627_v36  ;;  %v1656_v32 = vld [vmem:[%s1958_s1 + $0x110] sm:$0xff]   ;;  %v187_v35 = vld [vmem:[%s1831_s5] sm:$0xff] }
  0x25   : > { %1531 = vmatprep.subr.bf16.mxu1 %v1628_v38  ;;  %v189_v34 = vld [vmem:[%s1831_s5 + $0x10] sm:$0xff] }
  0x26   : > { %1522 = vmatmul.mubr.msk.bf16.vlgmr.msra.gmra.mrb[4].mxu0 %vm180_vm0, %v444_v29  ;;  %v1652_v29 = vld [vmem:[%s1958_s1 + $0xf8] sm:$0xff]  }
  0x27   : > { %1538 = vmatpush3.bf16.msra.mxu0 %v1627_v36  ;;  %1545 = vmatprep.mubr.msk.bf16.mxu0 %vm180_vm0, %v687_v58 }
  0x28   : > { %1532 = vmatpush3.bf16.msra.mxu1 %v1628_v38  ;;  %1539 = vmatprep.subr.bf16.mxu0 %v1629_v39 }
  0x29   : > { %1549 = vmatprep.subr.bf16.mxu1 %v1633_v42 }
  0x2b   : > { %1540 = vmatpush3.bf16.msra.mxu0 %v1629_v39  ;;  %1534 = vmatmul.mubr.msk.bf16.vlgmr.msra.gmra.mrb[4].mxu1 %vm180_vm0, %v558_v37  ;;  %v188_v39 = vld [vmem:[%s1831_s5 + $0x8] sm:$0xff] }
  0x2c   : > { %1541 = vmatprep.subr.bf16.mxu0 %v1632_v46  ;;  %1550 = vmatpush3.bf16.msra.mxu1 %v1633_v42 }
  0x2d   : > { %1551 = vmatprep.subr.bf16.mxu1 %v1635_v49  ;;  %1557 = vmatprep.mubr.msk.bf16.mxu1 %vm180_vm0, %v1642_v56 }
  0x2f   : > { %1542 = vmatpush3.bf16.msra.mxu0 %v1632_v46 }
  0x30   : > { %1543 = vmatprep.subr.bf16.mxu0 %v1634_v57  ;;  %1552 = vmatpush3.bf16.msra.mxu1 %v1635_v49 }
  0x31   : > { %1553 = vmatprep.subr.bf16.mxu1 %v1638_v59 }
  0x33   : > { %1544 = vmatpush3.bf16.msra.mxu0 %v1634_v57 }
  0x34   : > { %1554 = vmatpush3.bf16.msra.mxu1 %v1638_v59  ;;  %1561 = vmatprep.subr.bf16.mxu0 %v1639_v60 }
  0x35   : > { %1555 = vmatprep.subr.bf16.mxu1 %v1640_v63 }
  0x36   : > { %1546 = vmatmul.mubr.msk.bf16.vlgmr.msra.gmra.mrb[8].mxu0 %vm180_vm0, %v686_v55 }
  0x37   : > { %1562 = vmatpush3.bf16.msra.mxu0 %v1639_v60  ;;  %1569 = vmatprep.mubr.msk.bf16.mxu0 %vm180_vm0, %v908_v3 }
  0x38   : > { %1556 = vmatpush3.bf16.msra.mxu1 %v1640_v63  ;;  %1563 = vmatprep.subr.bf16.mxu0 %v1641_v2 }
  0x39   : > { %1573 = vmatprep.subr.bf16.mxu1 %v1645_v5 }
  0x3b   : > { %1564 = vmatpush3.bf16.msra.mxu0 %v1641_v2  ;;  %1558 = vmatmul.mubr.msk.bf16.vlgmr.msra.gmra.mrb[8].mxu1 %vm180_vm0, %v1643_v4 }
  0x3c   : > { %1565 = vmatprep.subr.bf16.mxu0 %v1644_v6  ;;  %1574 = vmatpush3.bf16.msra.mxu1 %v1645_v5 }
  0x3d   : > { %1575 = vmatprep.subr.bf16.mxu1 %v1647_v8  ;;  %1581 = vmatprep.mubr.msk.bf16.mxu1 %vm180_vm0, %v1036_v25 }
  0x3f   : > { %1566 = vmatpush3.bf16.msra.mxu0 %v1644_v6 }
  0x40   : > { %1567 = vmatprep.subr.bf16.mxu0 %v1646_v14  ;;  %1576 = vmatpush3.bf16.msra.mxu1 %v1647_v8 }
  0x41   : > { %1577 = vmatprep.subr.bf16.mxu1 %v1650_v23 }
  0x43   : > { %1568 = vmatpush3.bf16.msra.mxu0 %v1646_v14 }
  0x44   : > { %1578 = vmatpush3.bf16.msra.mxu1 %v1650_v23  ;;  %1585 = vmatprep.subr.bf16.mxu0 %v1651_v26 }
  0x45   : > { %1579 = vmatprep.subr.bf16.mxu1 %v1652_v29 }
  0x46   : > { %1570 = vmatmul.mubr.msk.bf16.vlgmr.msra.gmra.mrb[12].mxu0 %vm180_vm0, %v907_v1 }
  0x47   : > { %1586 = vmatpush3.bf16.msra.mxu0 %v1651_v26  ;;  %1593 = vmatprep.mubr.msk.bf16.mxu0 %vm180_vm0, %v1149_v31 }
  0x48   : > { %1580 = vmatpush3.bf16.msra.mxu1 %v1652_v29  ;;  %1587 = vmatprep.subr.bf16.mxu0 %v1653_v30 }
  0x4b   : > { %1588 = vmatpush3.bf16.msra.mxu0 %v1653_v30  ;;  %1582 = vmatmul.mubr.msk.bf16.vlgmr.msra.gmra.mrb[12].mxu1 %vm180_vm0, %v1035_v24 }
  0x4c   : > { %1589 = vmatprep.subr.bf16.mxu0 %v1656_v32 }
  0x4f   : > { %1590 = vmatpush3.bf16.msra.mxu0 %v1656_v32 }
  0x50   : > { %1591 = vmatprep.subr.bf16.mxu0 %v1657_v33 }
  0x53   : > { %1592 = vmatpush3.bf16.msra.mxu0 %v1657_v33 }
  0x56   : > { %1594 = vmatmul.mubr.msk.bf16.vlgmr.msra.gmra.mrb[16].mxu0 %vm180_vm0, %v1148_v28 }
  0xe9   : > { %v1499_v36 = vpop.f32.mrb[0].mxu0 }
  0xea   : > { %v286_v37 = vadd.f32 %v1499_v36, %v189_v34  ;;  %v270_v38 = vpop.f32.mrb[1].mxu0 }
  0xeb   : > { %v284_v40 = vadd.f32 %v270_v38, %v187_v35  ;;  %v1500_v41 = vpop.f32.mrb[2].mxu0 }
  0xec   : > { %289 = vst.msk [vmem:[%s1831_s5 + $0x10] sm:$0xff] %vm180_vm0, %v286_v37  ;;  %v273_v42 = vpop.f32.mrb[3].mxu0 }
  0xed   : > { %287 = vst.msk [vmem:[%s1831_s5] sm:$0xff] %vm180_vm0, %v284_v40  ;;  %v285_v43 = vadd.f32 %v273_v42, %v188_v39 }
  0xee   : > { %v1511_v44 = vpop.f32.mrb[0].mxu1 }
  0xef   : > { %288 = vst.msk [vmem:[%s1831_s5 + $0x8] sm:$0xff] %vm180_vm0, %v285_v43  ;;  %v396_v45 = vpop.f32.mrb[1].mxu1 }
  0xf0   : > { %v1512_v46 = vpop.f32.mrb[2].mxu1 }
  0xf1   : > { %v399_v47 = vpop.f32.mrb[3].mxu1 }
  0xf3   : > { %v296_v48 = vld [vmem:[%s1831_s5 + $0x10] sm:$0xff] }
  0xf4   : > { %v412_v49 = vadd.f32 %v1511_v44, %v296_v48  ;;  %v294_v50 = vld [vmem:[%s1831_s5] sm:$0xff] }
  0xf5   : > { %v410_v51 = vadd.f32 %v396_v45, %v294_v50 }
  0xf6   : > { %415 = vst.msk [vmem:[%s1831_s5 + $0x10] sm:$0xff] %vm180_vm0, %v412_v49  ;;  %v295_v52 = vld [vmem:[%s1831_s5 + $0x8] sm:$0xff] }
  0xf7   : > { %413 = vst.msk [vmem:[%s1831_s5] sm:$0xff] %vm180_vm0, %v410_v51  ;;  %v411_v53 = vadd.f32 %v399_v47, %v295_v52 }
  0xf9   : > { %414 = vst.msk [vmem:[%s1831_s5 + $0x8] sm:$0xff] %vm180_vm0, %v411_v53  ;;  %v1523_v54 = vpop.f32.mrb[4].mxu0 }
  0xfa   : > { %v510_v55 = vpop.f32.mrb[5].mxu0 }
  0xfb   : > { %v1524_v56 = vpop.f32.mrb[6].mxu0 }
  0xfc   : > { %v513_v57 = vpop.f32.mrb[7].mxu0 }
  0xfd   : > { %v422_v58 = vld [vmem:[%s1831_s5 + $0x10] sm:$0xff] }
  0xfe   : > { %v526_v59 = vadd.f32 %v1523_v54, %v422_v58  ;;  %v420_v60 = vld [vmem:[%s1831_s5] sm:$0xff]  ;;  %v1535_v61 = vpop.f32.mrb[4].mxu1 }
  0xff   : > { %v524_v62 = vadd.f32 %v510_v55, %v420_v60  ;;  %v624_v63 = vpop.f32.mrb[5].mxu1 }
 0x100   : > { %529 = vst.msk [vmem:[%s1831_s5 + $0x10] sm:$0xff] %vm180_vm0, %v526_v59  ;;  %v421_v0 = vld [vmem:[%s1831_s5 + $0x8] sm:$0xff]  ;;  %v1536_v1 = vpop.f32.mrb[6].mxu1 }
 0x101   : > { %527 = vst.msk [vmem:[%s1831_s5] sm:$0xff] %vm180_vm0, %v524_v62  ;;  %v525_v2 = vadd.f32 %v513_v57, %v421_v0  ;;  %v627_v3 = vpop.f32.mrb[7].mxu1 }
 0x103   : > { %528 = vst.msk [vmem:[%s1831_s5 + $0x8] sm:$0xff] %vm180_vm0, %v525_v2 }
 0x107   : > { %v536_v4 = vld [vmem:[%s1831_s5 + $0x10] sm:$0xff] }
 0x108   : > { %v640_v5 = vadd.f32 %v1535_v61, %v536_v4  ;;  %v534_v6 = vld [vmem:[%s1831_s5] sm:$0xff] }
 0x109   : > { %v638_v7 = vadd.f32 %v624_v63, %v534_v6  ;;  %v1547_v8 = vpop.f32.mrb[8].mxu0 }
 0x10a   : > { %643 = vst.msk [vmem:[%s1831_s5 + $0x10] sm:$0xff] %vm180_vm0, %v640_v5  ;;  %v535_v9 = vld [vmem:[%s1831_s5 + $0x8] sm:$0xff]  ;;  %v752_v10 = vpop.f32.mrb[9].mxu0 }
 0x10b   : > { %641 = vst.msk [vmem:[%s1831_s5] sm:$0xff] %vm180_vm0, %v638_v7  ;;  %v639_v11 = vadd.f32 %v627_v3, %v535_v9  ;;  %v1548_v12 = vpop.f32.mrb[10].mxu0 }
 0x10c   : > { %v755_v13 = vpop.f32.mrb[11].mxu0 }
 0x10d   : > { %642 = vst.msk [vmem:[%s1831_s5 + $0x8] sm:$0xff] %vm180_vm0, %v639_v11 }
 0x10e   : > { %v1559_v14 = vpop.f32.mrb[8].mxu1 }
 0x10f   : > { %v859_v15 = vpop.f32.mrb[9].mxu1 }
 0x110   : > { %v1560_v16 = vpop.f32.mrb[10].mxu1 }
 0x111   : > { %v650_v17 = vld [vmem:[%s1831_s5 + $0x10] sm:$0xff]  ;;  %v862_v18 = vpop.f32.mrb[11].mxu1 }
 0x112   : > { %v768_v19 = vadd.f32 %v1547_v8, %v650_v17  ;;  %v648_v20 = vld [vmem:[%s1831_s5] sm:$0xff] }
 0x113   : > { %v766_v21 = vadd.f32 %v752_v10, %v648_v20 }
 0x114   : > { %771 = vst.msk [vmem:[%s1831_s5 + $0x10] sm:$0xff] %vm180_vm0, %v768_v19  ;;  %v649_v22 = vld [vmem:[%s1831_s5 + $0x8] sm:$0xff] }
 0x115   : > { %769 = vst.msk [vmem:[%s1831_s5] sm:$0xff] %vm180_vm0, %v766_v21  ;;  %v767_v23 = vadd.f32 %v755_v13, %v649_v22 }
 0x117   : > { %770 = vst.msk [vmem:[%s1831_s5 + $0x8] sm:$0xff] %vm180_vm0, %v767_v23 }
 0x119   : > { %v1571_v24 = vpop.f32.mrb[12].mxu0 }
 0x11a   : > { %v973_v25 = vpop.f32.mrb[13].mxu0 }
 0x11b   : > { %v777_v26 = vld [vmem:[%s1831_s5 + $0x10] sm:$0xff]  ;;  %v1572_v27 = vpop.f32.mrb[14].mxu0 }
 0x11c   : > { %v875_v28 = vadd.f32 %v1559_v14, %v777_v26  ;;  %v775_v29 = vld [vmem:[%s1831_s5] sm:$0xff]  ;;  %v976_v30 = vpop.f32.mrb[15].mxu0 }
 0x11d   : > { %v873_v31 = vadd.f32 %v859_v15, %v775_v29 }
 0x11e   : > { %878 = vst.msk [vmem:[%s1831_s5 + $0x10] sm:$0xff] %vm180_vm0, %v875_v28  ;;  %v776_v32 = vld [vmem:[%s1831_s5 + $0x8] sm:$0xff]  ;;  %v1583_v33 = vpop.f32.mrb[12].mxu1 }
 0x11f   : > { %876 = vst.msk [vmem:[%s1831_s5] sm:$0xff] %vm180_vm0, %v873_v31  ;;  %v874_v34 = vadd.f32 %v862_v18, %v776_v32  ;;  %v1101_v35 = vpop.f32.mrb[13].mxu1 }
 0x120   : > { %v1584_v36 = vpop.f32.mrb[14].mxu1 }
 0x121   : > { %877 = vst.msk [vmem:[%s1831_s5 + $0x8] sm:$0xff] %vm180_vm0, %v874_v34  ;;  %v1104_v37 = vpop.f32.mrb[15].mxu1 }
 0x125   : > { %v885_v38 = vld [vmem:[%s1831_s5 + $0x10] sm:$0xff] }
 0x126   : > { %v989_v39 = vadd.f32 %v1571_v24, %v885_v38  ;;  %v883_v40 = vld [vmem:[%s1831_s5] sm:$0xff] }
 0x127   : > { %v987_v41 = vadd.f32 %v973_v25, %v883_v40 }
 0x128   : > { %992 = vst.msk [vmem:[%s1831_s5 + $0x10] sm:$0xff] %vm180_vm0, %v989_v39  ;;  %v884_v42 = vld [vmem:[%s1831_s5 + $0x8] sm:$0xff] }
 0x129   : > { %990 = vst.msk [vmem:[%s1831_s5] sm:$0xff] %vm180_vm0, %v987_v41  ;;  %v988_v43 = vadd.f32 %v976_v30, %v884_v42  ;;  %v1595_v44 = vpop.f32.mrb[16].mxu0 }
 0x12a   : > { %v1214_v45 = vpop.f32.mrb[17].mxu0 }
 0x12b   : > { %991 = vst.msk [vmem:[%s1831_s5 + $0x8] sm:$0xff] %vm180_vm0, %v988_v43  ;;  %v1596_v46 = vpop.f32.mrb[18].mxu0 }
 0x12c   : > { %v1217_v47 = vpop.f32.mrb[19].mxu0 }
 0x12f   : > { %v999_v48 = vld [vmem:[%s1831_s5 + $0x10] sm:$0xff] }
 0x130   : > { %v1117_v49 = vadd.f32 %v1583_v33, %v999_v48  ;;  %v997_v50 = vld [vmem:[%s1831_s5] sm:$0xff] }
 0x131   : > { %v1115_v51 = vadd.f32 %v1101_v35, %v997_v50 }
 0x132   : > { %1120 = vst.msk [vmem:[%s1831_s5 + $0x10] sm:$0xff] %vm180_vm0, %v1117_v49  ;;  %v998_v52 = vld [vmem:[%s1831_s5 + $0x8] sm:$0xff] }
 0x133   : > { %1118 = vst.msk [vmem:[%s1831_s5] sm:$0xff] %vm180_vm0, %v1115_v51  ;;  %v1116_v53 = vadd.f32 %v1104_v37, %v998_v52 }
 0x135   : > { %1119 = vst.msk [vmem:[%s1831_s5 + $0x8] sm:$0xff] %vm180_vm0, %v1116_v53 }
 0x139   : > { %v1127_v54 = vld [vmem:[%s1831_s5 + $0x10] sm:$0xff] }
 0x13a   : > { %v1230_v55 = vadd.f32 %v1595_v44, %v1127_v54  ;;  %v1125_v56 = vld [vmem:[%s1831_s5] sm:$0xff] }
 0x13b   : > { %v1228_v57 = vadd.f32 %v1214_v45, %v1125_v56 }
 0x13c   : > { %1233 = vst.msk [vmem:[%s1831_s5 + $0x10] sm:$0xff] %vm180_vm0, %v1230_v55  ;;  %v1126_v58 = vld [vmem:[%s1831_s5 + $0x8] sm:$0xff] }
 0x13d   : > { %1231 = vst.msk [vmem:[%s1831_s5] sm:$0xff] %vm180_vm0, %v1228_v57  ;;  %v1229_v59 = vadd.f32 %v1217_v47, %v1126_v58 }
 0x13f   : > { %1232 = vst.msk [vmem:[%s1831_s5 + $0x8] sm:$0xff] %vm180_vm0, %v1229_v59 }
 0x140 PF: > { %s13_s12 = sadd.s32 1, %s1666_s12  }
 0x141   : > { %p10_p4 = scmp.ge.s32.totalorder %s13_s12, 18  }
 0x143   :  { %12 = sbr.rel (!%p10_p4) target bundleno = 1 (0x1), region = 70 }

// kernel: conv_delta_forward.11
= control target key start
LH: loop header
LB: loop body
LE: loop exit
PB: predicated region body
PF: predicated region fallthrough
CT: control target
= control target key end

     0   :  { %s1383_s12 = smov 0   ;;  %s1620_s0 = inlined_call_operand.vmem [shape: bf16[16,24,64], index: 0, kind: input, shape index: {}]   ;;  %s1621_s1 = inlined_call_operand.vmem [shape: bf16[9,64,64], index: 1, kind: input, shape index: {}]   ;;  %s1622_s2 = inlined_call_operand.vmem [shape: f32[1,64], index: 2, kind: input, shape index: {}]   ;;  %s1623_s3 = inlined_call_operand.vmem [shape: f32[16,8,64], index: 3, kind: output, shape index: {}]  }
   0x1 LB: > { %s1020_s13 = sadd.s32 4294967295, %s1359_s12   ;;  %p1024_p0 = scmp.ge.s32.totalorder %s1359_s12, 1  ;;  %s1359_s12 = sphi %s1383_s12, %s13_s12  }
   0x2   : > { %p137_p1 = scmp.lt.s32.totalorder %s1359_s12, 17 }
   0x4   : > { %p138_p2 = pnand %p1024_p0, %p137_p1 }
   0x5   : > { %v1310_v0 = vld [vmem:[%s1621_s1] sm:$0xff] (!%p138_p2)   ;;  %v1361_v1 = vmov (!%p138_p2), 0.0   ;;  %v1311_v2 = vld [vmem:[%s1621_s1 + $0x8] sm:$0xff] (!%p138_p2)   ;;  %vm1362_vm0 = vmmov (!%p138_p2), 0   ;;  %p160_p3 = scmp.lt.s32.totalorder (!%p138_p2), %s1020_s13, 15  ;;  %v1313_v5 = vld [vmem:[%s1621_s1 + $0x10] sm:$0xff] (!%p138_p2)  }
   0x6   : > { %141 = sbr.rel (%p138_p2) target bundleno = 317 (0x13d), region = 32  ;;  %1191 = vmatprep.subr.bf16.mxu0 (!%p138_p2), %v1361_v1  ;;  %1203 = vmatprep.subr.bf16.mxu1 (!%p138_p2), %v1361_v1  ;;  %v1312_v3 = vld [vmem:[%s1621_s1 + $0x20] sm:$0xff] (!%p138_p2)   ;;  %v1314_v4 = vld [vmem:[%s1621_s1 + $0x28] sm:$0xff] (!%p138_p2)   ;;  %v1316_v6 = vld [vmem:[%s1621_s1 + $0x30] sm:$0xff] (!%p138_p2)   ;;  %vm178_vm1 = vcmask (!%p138_p2), 523264  }
   0x7   : > { %1192 = vmatpush3.bf16.msra.mxu0 (!%p138_p2), %v1310_v0  ;;  %1199 = vmatprep.mubr.msk.bf16.mxu0 (!%p138_p2), %vm1362_vm0, %v1361_v1  ;;  %v1315_v7 = vld [vmem:[%s1621_s1 + $0x18] sm:$0xff] (!%p138_p2)   ;;  %v1317_v9 = vld [vmem:[%s1621_s1 + $0x40] sm:$0xff] (!%p138_p2)   ;;  %v1319_v17 = vld [vmem:[%s1621_s1 + $0x48] sm:$0xff] (!%p138_p2)  }
   0x8   : > { %1193 = vmatprep.subr.bf16.mxu0 (!%p138_p2), %v1361_v1  ;;  %1211 = vmatprep.mubr.msk.bf16.mxu1 (!%p138_p2), %vm1362_vm0, %v1361_v1  ;;  %v1318_v10 = vld [vmem:[%s1621_s1 + $0x38] sm:$0xff] (!%p138_p2)   ;;  %v1322_v15 = vld [vmem:[%s1621_s1 + $0x60] sm:$0xff] (!%p138_p2)   ;;  %v1324_v18 = vld [vmem:[%s1621_s1 + $0x68] sm:$0xff] (!%p138_p2)  }
   0x9   : > { %1204 = vmatpush3.bf16.msra.mxu1 (!%p138_p2), %v1312_v3  ;;  %v1321_v19 = vld [vmem:[%s1621_s1 + $0x50] sm:$0xff] (!%p138_p2)   ;;  %v1323_v22 = vld [vmem:[%s1621_s1 + $0x58] sm:$0xff] (!%p138_p2)   ;;  %v1327_v26 = vld [vmem:[%s1621_s1 + $0x80] sm:$0xff] (!%p138_p2)  }
   0xa   : > { %1205 = vmatprep.subr.bf16.mxu1 (!%p138_p2), %v1361_v1  ;;  %v1326_v21 = vld [vmem:[%s1621_s1 + $0x70] sm:$0xff] (!%p138_p2)   ;;  %v1328_v25 = vld [vmem:[%s1621_s1 + $0x78] sm:$0xff] (!%p138_p2)   ;;  %v1332_v28 = vld [vmem:[%s1621_s1 + $0xa0] sm:$0xff] (!%p138_p2)  }
   0xb   : > { %1194 = vmatpush3.bf16.msra.mxu0 (!%p138_p2), %v1311_v2  ;;  %v1329_v30 = vld [vmem:[%s1621_s1 + $0x88] sm:$0xff] (!%p138_p2)   ;;  %v1331_v34 = vld [vmem:[%s1621_s1 + $0x90] sm:$0xff] (!%p138_p2)   ;;  %v1333_v38 = vld [vmem:[%s1621_s1 + $0x98] sm:$0xff] (!%p138_p2)  }
   0xc   : > { %1195 = vmatprep.subr.bf16.mxu0 (!%p138_p2), %v1361_v1  ;;  %v1334_v31 = vld [vmem:[%s1621_s1 + $0xa8] sm:$0xff] (!%p138_p2)   ;;  %v1336_v35 = vld [vmem:[%s1621_s1 + $0xb0] sm:$0xff] (!%p138_p2)   ;;  %v1338_v40 = vld [vmem:[%s1621_s1 + $0xb8] sm:$0xff] (!%p138_p2)  }
   0xd   : > { %s1625_s13 = smov (!%p160_p3, %s1020_s13), 15  ;;  %1206 = vmatpush3.bf16.msra.mxu1 %v1314_v4  ;;  %v1027_v41 = vld [vmem:[%s1622_s2] ss:$0 sm:$0xff]  ;;  %v1339_v46 = vld [vmem:[%s1621_s1 + $0xc8] sm:$0xff]   ;;  %v1341_v49 = vld [vmem:[%s1621_s1 + $0xd0] sm:$0xff]  }
   0xe   : > { %s1299_s24 = smul.u32 12, %s1625_s13  ;;  %1207 = vmatprep.subr.bf16.mxu1 %v1361_v1  ;;  %s1026_s9 = sshll.u32 %s1625_s13, 3  ;;  %v1337_v43 = vld [vmem:[%s1621_s1 + $0xc0] sm:$0xff]   ;;  %v1344_v48 = vld [vmem:[%s1621_s1 + $0xe8] sm:$0xff]   ;;  %v1345_v51 = vld [vmem:[%s1621_s1 + $0xf0] sm:$0xff]  }
   0xf   : > { %1196 = vmatpush3.bf16.msra.mxu0 %v1313_v5  ;;  %s1512_s16 = scalar_lea.vmem %s1623_s3, %s1026_s9  ;;  %v1342_v45 = vld [vmem:[%s1621_s1 + $0xe0] sm:$0xff]   ;;  %v1343_v52 = vld [vmem:[%s1621_s1 + $0xd8] sm:$0xff]   ;;  %v1348_v59 = vld [vmem:[%s1621_s1 + $0x108] sm:$0xff]  }
  0x10   : > { %s1421_s27 = scalar_lea.vmem %s1620_s0, %s1299_s24  ;;  %1197 = vmatprep.subr.bf16.mxu0 %v1361_v1  ;;  %179 = vst.msk [vmem:[%s1512_s16] sm:$0xff] %vm178_vm1, %v1027_v41  ;;  %v1347_v55 = vld [vmem:[%s1621_s1 + $0xf8] sm:$0xff]   ;;  %v1346_v57 = vld [vmem:[%s1621_s1 + $0x100] sm:$0xff]   ;;  %v1350_v60 = vld [vmem:[%s1621_s1 + $0x110] sm:$0xff]  }
  0x11   : > { %v1320_v8 = vld [vmem:[%s1421_s27] sm:$0x1f]   ;;  %1208 = vmatpush3.bf16.msra.mxu1 %v1316_v6  ;;  %v1352_v61 = vld [vmem:[%s1421_s27 + $0x4] sm:$0x1e]   ;;  %v1351_v62 = vld [vmem:[%s1621_s1 + $0x118] sm:$0xff]  }
  0x12   : > { %v180_v11 = vld [vmem:[%s1421_s27] sm:$0xf]  ;;  %1209 = vmatprep.subr.bf16.mxu1 %v1361_v1  ;;  %v277_v12 = vshrl.u32 %v1320_v8, 16  ;;  %v279_v13 = vshll.u32 %v1320_v8, 16  ;;  %v1349_v47 = vld [vmem:[%s1421_s27 + $0x4] sm:$0x1f]  }
  0x13   : > { %1198 = vmatpush3.bf16.msra.mxu0 %v1315_v7  ;;  %v1325_v20 = vld [vmem:[%s1421_s27] sm:$0x1e]   ;;  %v807_v50 = vshll.u32 %v1349_v47, 16  ;;  %v805_v53 = vshrl.u32 %v1349_v47, 16  ;;  %v897_v63 = vrot.slane %v1352_v61, 1 }
  0x14   : > { %1215 = vmatprep.subr.bf16.mxu0 %v1361_v1  ;;  %v281_v14 = vrot.slane %v279_v13, 1  ;;  %v1330_v23 = vld [vmem:[%s1421_s27] sm:$0x3c]   ;;  %v369_v24 = vrot.slane %v1325_v20, 1 }
  0x15   : > { %1210 = vmatpush3.bf16.msra.mxu1 %v1318_v10  ;;  %v456_v27 = vrot.slane %v1330_v23, 2  ;;  %v1335_v29 = vld [vmem:[%s1421_s27] sm:$0x7c]   ;;  %v809_v54 = vrot.slane %v807_v50, 1 }
  0x16   : > { %1200 = vmatmul.mubr.msk.bf16.vlgmr.msra.gmra.mrb[0].mxu0 %vm178_vm1, %v180_v11  ;;  %v282_v16 = vor.u32 %v281_v14, %v277_v12  ;;  %1227 = vmatprep.subr.bf16.mxu1 %v1361_v1  ;;  %v544_v32 = vshrl.u32 %v1335_v29, 16  ;;  %v547_v33 = vshll.u32 %v1335_v29, 16  ;;  %v1340_v39 = vld [vmem:[%s1421_s27] sm:$0x78]  }
  0x17   : > { %1216 = vmatpush3.bf16.msra.mxu0 %v1317_v9  ;;  %1223 = vmatprep.mubr.msk.bf16.mxu0 %vm1362_vm0, %v1361_v1  ;;  %v637_v44 = vrot.slane %v1340_v39, 3  ;;  %v707_v56 = vld [vmem:[%s1421_s27 + $0x4] sm:$0xf]  ;;  %v810_v58 = vor.u32 %v809_v54, %v805_v53 }
  0x18   : > { %1217 = vmatprep.subr.bf16.mxu0 %v1361_v1  ;;  %1212 = vmatmul.mubr.msk.bf16.vlgmr.msra.gmra.mrb[0].mxu1 %vm178_vm1, %v282_v16  ;;  %v546_v36 = vrot.slane %v544_v32, 2  ;;  %v549_v37 = vrot.slane %v547_v33, 3  ;;  %v181_v0 = vld [vmem:[%s1512_s16] sm:$0xff] }
  0x19   : > { %1228 = vmatpush3.bf16.msra.mxu1 %v1322_v15  ;;  %1235 = vmatprep.mubr.msk.bf16.mxu1 %vm1362_vm0, %v1361_v1 }
  0x1a   : > { %1229 = vmatprep.subr.bf16.mxu1 %v1361_v1  ;;  %v550_v42 = vor.u32 %v549_v37, %v546_v36 }
  0x1b   : > { %1218 = vmatpush3.bf16.msra.mxu0 %v1319_v17 }
  0x1c   : > { %1219 = vmatprep.subr.bf16.mxu0 %v1361_v1 }
  0x1d   : > { %1230 = vmatpush3.bf16.msra.mxu1 %v1324_v18 }
  0x1e   : > { %1231 = vmatprep.subr.bf16.mxu1 %v1361_v1 }
  0x1f   : > { %1220 = vmatpush3.bf16.msra.mxu0 %v1321_v19 }
  0x20   : > { %1221 = vmatprep.subr.bf16.mxu0 %v1361_v1 }
  0x21   : > { %1232 = vmatpush3.bf16.msra.mxu1 %v1326_v21 }
  0x22   : > { %1233 = vmatprep.subr.bf16.mxu1 %v1361_v1 }
  0x23   : > { %1222 = vmatpush3.bf16.msra.mxu0 %v1323_v22 }
  0x24   : > { %1239 = vmatprep.subr.bf16.mxu0 %v1361_v1 }
  0x25   : > { %1234 = vmatpush3.bf16.msra.mxu1 %v1328_v25 }
  0x26   : > { %1224 = vmatmul.mubr.msk.bf16.vlgmr.msra.gmra.mrb[4].mxu0 %vm178_vm1, %v369_v24  ;;  %1251 = vmatprep.subr.bf16.mxu1 %v1361_v1 }
  0x27   : > { %1240 = vmatpush3.bf16.msra.mxu0 %v1327_v26  ;;  %1247 = vmatprep.mubr.msk.bf16.mxu0 %vm1362_vm0, %v1361_v1 }
  0x28   : > { %1241 = vmatprep.subr.bf16.mxu0 %v1361_v1  ;;  %1236 = vmatmul.mubr.msk.bf16.vlgmr.msra.gmra.mrb[4].mxu1 %vm178_vm1, %v456_v27 }
  0x29   : > { %1252 = vmatpush3.bf16.msra.mxu1 %v1332_v28  ;;  %1259 = vmatprep.mubr.msk.bf16.mxu1 %vm1362_vm0, %v1361_v1 }
  0x2a   : > { %1253 = vmatprep.subr.bf16.mxu1 %v1361_v1 }
  0x2b   : > { %1242 = vmatpush3.bf16.msra.mxu0 %v1329_v30 }
  0x2c   : > { %1243 = vmatprep.subr.bf16.mxu0 %v1361_v1 }
  0x2d   : > { %1254 = vmatpush3.bf16.msra.mxu1 %v1334_v31 }
  0x2e   : > { %1255 = vmatprep.subr.bf16.mxu1 %v1361_v1 }
  0x2f   : > { %1244 = vmatpush3.bf16.msra.mxu0 %v1331_v34 }
  0x30   : > { %1245 = vmatprep.subr.bf16.mxu0 %v1361_v1 }
  0x31   : > { %1256 = vmatpush3.bf16.msra.mxu1 %v1336_v35 }
  0x32   : > { %1257 = vmatprep.subr.bf16.mxu1 %v1361_v1 }
  0x33   : > { %1246 = vmatpush3.bf16.msra.mxu0 %v1333_v38 }
  0x34   : > { %1263 = vmatprep.subr.bf16.mxu0 %v1361_v1 }
  0x35   : > { %1258 = vmatpush3.bf16.msra.mxu1 %v1338_v40 }
  0x36   : > { %1248 = vmatmul.mubr.msk.bf16.vlgmr.msra.gmra.mrb[8].mxu0 %vm178_vm1, %v550_v42  ;;  %1275 = vmatprep.subr.bf16.mxu1 %v1361_v1 }
  0x37   : > { %1264 = vmatpush3.bf16.msra.mxu0 %v1337_v43  ;;  %1271 = vmatprep.mubr.msk.bf16.mxu0 %vm1362_vm0, %v1361_v1 }
  0x38   : > { %1265 = vmatprep.subr.bf16.mxu0 %v1361_v1  ;;  %1260 = vmatmul.mubr.msk.bf16.vlgmr.msra.gmra.mrb[8].mxu1 %vm178_vm1, %v637_v44 }
  0x39   : > { %1276 = vmatpush3.bf16.msra.mxu1 %v1342_v45  ;;  %1283 = vmatprep.mubr.msk.bf16.mxu1 %vm1362_vm0, %v1361_v1 }
  0x3a   : > { %1277 = vmatprep.subr.bf16.mxu1 %v1361_v1 }
  0x3b   : > { %1266 = vmatpush3.bf16.msra.mxu0 %v1339_v46 }
  0x3c   : > { %1267 = vmatprep.subr.bf16.mxu0 %v1361_v1 }
  0x3d   : > { %1278 = vmatpush3.bf16.msra.mxu1 %v1344_v48 }
  0x3e   : > { %1279 = vmatprep.subr.bf16.mxu1 %v1361_v1 }
  0x3f   : > { %1268 = vmatpush3.bf16.msra.mxu0 %v1341_v49 }
  0x40   : > { %1269 = vmatprep.subr.bf16.mxu0 %v1361_v1 }
  0x41   : > { %1280 = vmatpush3.bf16.msra.mxu1 %v1345_v51 }
  0x42   : > { %1281 = vmatprep.subr.bf16.mxu1 %v1361_v1 }
  0x43   : > { %1270 = vmatpush3.bf16.msra.mxu0 %v1343_v52 }
  0x44   : > { %1287 = vmatprep.subr.bf16.mxu0 %v1361_v1 }
  0x45   : > { %1282 = vmatpush3.bf16.msra.mxu1 %v1347_v55 }
  0x46   : > { %1272 = vmatmul.mubr.msk.bf16.vlgmr.msra.gmra.mrb[12].mxu0 %vm178_vm1, %v707_v56 }
  0x47   : > { %1288 = vmatpush3.bf16.msra.mxu0 %v1346_v57  ;;  %1295 = vmatprep.mubr.msk.bf16.mxu0 %vm1362_vm0, %v1361_v1 }
  0x48   : > { %1289 = vmatprep.subr.bf16.mxu0 %v1361_v1  ;;  %1284 = vmatmul.mubr.msk.bf16.vlgmr.msra.gmra.mrb[12].mxu1 %vm178_vm1, %v810_v58 }
  0x4b   : > { %1290 = vmatpush3.bf16.msra.mxu0 %v1348_v59 }
  0x4c   : > { %1291 = vmatprep.subr.bf16.mxu0 %v1361_v1 }
  0x4f   : > { %1292 = vmatpush3.bf16.msra.mxu0 %v1350_v60 }
  0x50   : > { %1293 = vmatprep.subr.bf16.mxu0 %v1361_v1 }
  0x53   : > { %1294 = vmatpush3.bf16.msra.mxu0 %v1351_v62 }
  0x56   : > { %1296 = vmatmul.mubr.msk.bf16.vlgmr.msra.gmra.mrb[16].mxu0 %vm178_vm1, %v897_v63 }
  0xe9   : > { %v251_v2 = vpop.f32.mrb[0].mxu0 }
  0xea   : > { %v257_v3 = vadd.f32 %v251_v2, %v181_v0  ;;  %v1201_v4 = vpop.f32.mrb[1].mxu0 }
  0xeb   : > { %v254_v5 = vpop.f32.mrb[2].mxu0  ;;  %v344_v6 = vpop.f32.mrb[0].mxu1 }
  0xec   : > { %258 = vst.msk [vmem:[%s1512_s16] sm:$0xff] %vm178_vm1, %v257_v3  ;;  %v1202_v7 = vpop.f32.mrb[3].mxu0  ;;  %v1213_v8 = vpop.f32.mrb[1].mxu1 }
  0xed   : > { %v347_v9 = vpop.f32.mrb[2].mxu1 }
  0xee   : > { %v1214_v1 = vpop.f32.mrb[3].mxu1 }
  0xf3   : > { %v261_v10 = vld [vmem:[%s1512_s16] sm:$0xff] }
  0xf4   : > { %v350_v11 = vadd.f32 %v344_v6, %v261_v10 }
  0xf6   : > { %351 = vst.msk [vmem:[%s1512_s16] sm:$0xff] %vm178_vm1, %v350_v11 }
  0xf9   : > { %v431_v12 = vpop.f32.mrb[4].mxu0 }
  0xfa   : > { %v1225_v13 = vpop.f32.mrb[5].mxu0 }
  0xfb   : > { %v434_v14 = vpop.f32.mrb[6].mxu0  ;;  %v518_v15 = vpop.f32.mrb[4].mxu1 }
  0xfc   : > { %v1226_v16 = vpop.f32.mrb[7].mxu0  ;;  %v1237_v17 = vpop.f32.mrb[5].mxu1 }
  0xfd   : > { %v354_v18 = vld [vmem:[%s1512_s16] sm:$0xff]  ;;  %v521_v19 = vpop.f32.mrb[6].mxu1 }
  0xfe   : > { %v437_v20 = vadd.f32 %v431_v12, %v354_v18  ;;  %v1238_v21 = vpop.f32.mrb[7].mxu1 }
 0x100   : > { %438 = vst.msk [vmem:[%s1512_s16] sm:$0xff] %vm178_vm1, %v437_v20 }
 0x107   : > { %v441_v22 = vld [vmem:[%s1512_s16] sm:$0xff] }
 0x108   : > { %v524_v23 = vadd.f32 %v518_v15, %v441_v22 }
 0x109   : > { %v612_v24 = vpop.f32.mrb[8].mxu0 }
 0x10a   : > { %525 = vst.msk [vmem:[%s1512_s16] sm:$0xff] %vm178_vm1, %v524_v23  ;;  %v1249_v25 = vpop.f32.mrb[9].mxu0 }
 0x10b   : > { %v615_v26 = vpop.f32.mrb[10].mxu0  ;;  %v699_v27 = vpop.f32.mrb[8].mxu1 }
 0x10c   : > { %v1250_v28 = vpop.f32.mrb[11].mxu0  ;;  %v1261_v29 = vpop.f32.mrb[9].mxu1 }
 0x10d   : > { %v702_v30 = vpop.f32.mrb[10].mxu1 }
 0x10e   : > { %v1262_v31 = vpop.f32.mrb[11].mxu1 }
 0x111   : > { %v528_v32 = vld [vmem:[%s1512_s16] sm:$0xff] }
 0x112   : > { %v618_v33 = vadd.f32 %v612_v24, %v528_v32 }
 0x114   : > { %619 = vst.msk [vmem:[%s1512_s16] sm:$0xff] %vm178_vm1, %v618_v33 }
 0x119   : > { %v779_v34 = vpop.f32.mrb[12].mxu0 }
 0x11a   : > { %v1273_v35 = vpop.f32.mrb[13].mxu0 }
 0x11b   : > { %v622_v36 = vld [vmem:[%s1512_s16] sm:$0xff]  ;;  %v782_v37 = vpop.f32.mrb[14].mxu0  ;;  %v872_v38 = vpop.f32.mrb[12].mxu1 }
 0x11c   : > { %v705_v39 = vadd.f32 %v699_v27, %v622_v36  ;;  %v1274_v40 = vpop.f32.mrb[15].mxu0  ;;  %v1285_v41 = vpop.f32.mrb[13].mxu1 }
 0x11d   : > { %v875_v42 = vpop.f32.mrb[14].mxu1 }
 0x11e   : > { %706 = vst.msk [vmem:[%s1512_s16] sm:$0xff] %vm178_vm1, %v705_v39  ;;  %v1286_v43 = vpop.f32.mrb[15].mxu1 }
 0x125   : > { %v708_v44 = vld [vmem:[%s1512_s16] sm:$0xff] }
 0x126   : > { %v785_v45 = vadd.f32 %v779_v34, %v708_v44 }
 0x128   : > { %786 = vst.msk [vmem:[%s1512_s16] sm:$0xff] %vm178_vm1, %v785_v45 }
 0x129   : > { %v959_v46 = vpop.f32.mrb[16].mxu0 }
 0x12a   : > { %v1297_v47 = vpop.f32.mrb[17].mxu0 }
 0x12b   : > { %v962_v48 = vpop.f32.mrb[18].mxu0 }
 0x12c   : > { %v1298_v49 = vpop.f32.mrb[19].mxu0 }
 0x12f   : > { %v789_v50 = vld [vmem:[%s1512_s16] sm:$0xff] }
 0x130   : > { %v878_v51 = vadd.f32 %v872_v38, %v789_v50 }
 0x132   : > { %879 = vst.msk [vmem:[%s1512_s16] sm:$0xff] %vm178_vm1, %v878_v51 }
 0x139   : > { %v882_v52 = vld [vmem:[%s1512_s16] sm:$0xff] }
 0x13a   : > { %v965_v53 = vadd.f32 %v959_v46, %v882_v52 }
 0x13c   : > { %966 = vst.msk [vmem:[%s1512_s16] sm:$0xff] %vm178_vm1, %v965_v53 }
 0x13d PF: > { %s13_s12 = sadd.s32 1, %s1359_s12  }
 0x13e   : > { %p10_p4 = scmp.ge.s32.totalorder %s13_s12, 18  }
 0x140   :  { %12 = sbr.rel (!%p10_p4) target bundleno = 1 (0x1), region = 70 }

// kernel: conv_delta_forward.12
= control target key start
LH: loop header
LB: loop body
LE: loop exit
PB: predicated region body
PF: predicated region fallthrough
CT: control target
= control target key end

     0   :  { %v161_v0 = vmov 0.0   ;;  %vm162_vm0 = vmmov 0   ;;  %vm69_vm1 = vcmask 1041408   ;;  %vm70_vm2 = vcmask 1042432   ;;  %s211_s1 = inlined_call_operand.vmem [shape: bf16[69,32], index: 1, kind: input, shape index: {}]   ;;  %s212_s0 = inlined_call_operand.vmem [shape: bf16[16,69], index: 0, kind: input, shape index: {}]   ;;  %s213_s2 = inlined_call_operand.vmem [shape: f32[1,32], index: 2, kind: input, shape index: {}]   ;;  %s214_s3 = inlined_call_operand.vmem [shape: f32[16,32], index: 3, kind: output, shape index: {}]  }
   0x1   :  { %138 = vmatprep.subr.bf16.mxu0 %v161_v0  ;;  %v155_v1 = vld [vmem:[%s211_s1] sm:$0xff]   ;;  %v156_v2 = vld [vmem:[%s211_s1 + $0x8] sm:$0xff]   ;;  %148 = vmatprep.mubr.msk.bf16.mxu0 %vm162_vm0, %v161_v0  ;;  %v157_v3 = vld [vmem:[%s211_s1 + $0x10] sm:$0xff]   ;;  %v163_v4 = vmov 65535   ;;  %vm65_vm3 = vcmask 564224   ;;  %vm117_vm4 = vcmask 261120  }
   0x2   :  { %139 = vmatpush3.bf16.msra.mxu0 %v155_v1  ;;  %v71_v5 = vsel %vm69_vm1, 4294967295, %v163_v4  ;;  %v158_v6 = vld [vmem:[%s211_s1 + $0x18] sm:$0xff]   ;;  %v159_v7 = vld [vmem:[%s211_s1 + $0x20] ss:$0 sps:$4 sm:$0x77]  }
   0x3   :  { %140 = vmatprep.subr.bf16.mxu0 %v161_v0  ;;  %v72_v8 = vsel %vm70_vm2, %v71_v5, 0  ;;  %v160_v10 = vld [vmem:[%s212_s0] sm:$0xff]  }
   0x4   :  { %v74_v9 = vand.u32 %v159_v7, %v72_v8  ;;  %v124_v11 = vld [vmem:[%s213_s2] ss:$0 sm:$0xff] }
   0x6   :  { %141 = vmatpush3.bf16.msra.mxu0 %v156_v2 }
   0x7   :  { %142 = vmatprep.subr.bf16.mxu0 %v161_v0 }
   0xa   :  { %143 = vmatpush3.bf16.msra.mxu0 %v157_v3 }
   0xb   :  { %144 = vmatprep.subr.bf16.mxu0 %v161_v0 }
   0xe   :  { %145 = vmatpush3.bf16.msra.mxu0 %v158_v6 }
   0xf   :  { %146 = vmatprep.subr.bf16.mxu0 %v161_v0 }
  0x12   :  { %147 = vmatpush3.bf16.msra.mxu0 %v74_v9 }
  0x15   :  { %149 = vmatmul.mubr.msk.bf16.vlgmr.msra.gmra.mrb[0].mxu0 %vm65_vm3, %v160_v10 }
  0xe8   :  { %v110_v12 = vpop.f32.mrb[0].mxu0 }
  0xe9   :  { %v111_v13 = vadd.f32 %v124_v11, %v110_v12  ;;  %v150_v14 = vpop.f32.mrb[1].mxu0 }
  0xea   :  { %v113_v15 = vpop.f32.mrb[2].mxu0 }
  0xeb   :  { %118 = vst.msk [vmem:[%s214_s3] sm:$0xff] %vm117_vm4, %v111_v13  ;;  %v114_v16 = vadd.f32 %v124_v11, %v113_v15  ;;  %v151_v17 = vpop.f32.mrb[3].mxu0 }
  0xed   :  { %119 = vst.msk [vmem:[%s214_s3 + $0x8] sm:$0xff] %vm117_vm4, %v114_v16 }

// kernel: conv_delta_forward.14
= control target key start
LH: loop header
LB: loop body
LE: loop exit
PB: predicated region body
PF: predicated region fallthrough
CT: control target
= control target key end

     0   :  { %s677_s24 = smov 0   ;;  %s758_s0 = inlined_call_operand.vmem [shape: f32[2,8,32], index: 0, kind: input, shape index: {}]   ;;  %s759_s1 = inlined_call_operand.vmem [shape: f32[1,32], index: 1, kind: input, shape index: {}]   ;;  %s760_s2 = inlined_call_operand.vmem [shape: f32[1,32], index: 2, kind: input, shape index: {}]   ;;  %s761_s3 = inlined_call_operand.vmem [shape: f32[32,64], index: 3, kind: input, shape index: {}]   ;;  %s762_s4 = inlined_call_operand.vmem [shape: f32[1,64], index: 4, kind: input, shape index: {}]   ;;  %s763_s5 = inlined_call_operand.vmem [shape: f32[64,32], index: 5, kind: input, shape index: {}]   ;;  %s764_s6 = inlined_call_operand.vmem [shape: f32[1,32], index: 6, kind: input, shape index: {}]   ;;  %s765_s7 = inlined_call_operand.vmem [shape: f32[2,8,32], index: 7, kind: output, shape index: {}]  }
   0x1 LB: > { %s536_s25 = sadd.s32 4294967295, %s632_s24   ;;  %p540_p0 = scmp.ge.s32.totalorder %s632_s24, 1  ;;  %s632_s24 = sphi %s677_s24, %s17_s24  }
   0x2   : > { %p236_p1 = scmp.lt.s32.totalorder %s632_s24, 3 }
   0x4   : > { %p237_p2 = pnand %p540_p0, %p236_p1 }
   0x5   : > { %p266_p3 = scmp.lt.s32.totalorder (!%p237_p2), %s536_s25, 1  ;;  %vm275_vm0 = vcmask (!%p237_p2), 261120   ;;  %v306_v7 = vld [vmem:[%s761_s3] sm:$0xff] (!%p237_p2)  ;;  %v307_v8 = vld [vmem:[%s761_s3 + $0x8] sm:$0xff] (!%p237_p2)  ;;  %v308_v9 = vld [vmem:[%s761_s3 + $0x10] sm:$0xff] (!%p237_p2)  ;;  %v634_v10 = vmov (!%p237_p2), 0.0|0.0  }
   0x6   : > { %240 = sbr.rel (%p237_p2) target bundleno = 763 (0x2fb), region = 48  ;;  %595 = vmatprep.subr.bf16.mxu0 (!%p237_p2), %v634_v10  ;;  %v596_v11 = vpack.c.bf16 (!%p237_p2), %v307_v8, %v306_v7  ;;  %v309_v12 = vld [vmem:[%s761_s3 + $0x18] sm:$0xff] (!%p237_p2)  ;;  %vm635_vm1 = vmmov (!%p237_p2), 0   ;;  %v636_v13 = vmov (!%p237_p2), 0.0   ;;  %601 = vmatprep.subr.bf16.mxu1 (!%p237_p2), %v634_v10  ;;  %v391_v15 = vld [vmem:[%s763_s5] sm:$0xff] (!%p237_p2)  ;;  %v392_v16 = vld [vmem:[%s763_s5 + $0x8] sm:$0xff] (!%p237_p2) }
   0x7   : > { %573 = vmatprep.mubr.msk.f32.mxu0 (!%p237_p2), %vm635_vm1, %v636_v13  ;;  %592 = vmatprep.mubr.msk.f32.mxu1 (!%p237_p2), %vm635_vm1, %v636_v13  ;;  %v599_v14 = vpack.c.bf16 (!%p237_p2), %v309_v12, %v308_v9  ;;  %v393_v17 = vld [vmem:[%s763_s5 + $0x10] sm:$0xff] (!%p237_p2)  ;;  %v602_v18 = vpack.c.bf16 (!%p237_p2), %v392_v16, %v391_v15  ;;  %v394_v19 = vld [vmem:[%s763_s5 + $0x18] sm:$0xff] (!%p237_p2)  ;;  %v395_v21 = vld [vmem:[%s763_s5 + $0x20] sm:$0xff] (!%p237_p2)  ;;  %vm399_vm2 = vcmask (!%p237_p2), 523264  }
   0x8   : > { %597 = vmatpush3.bf16.msra.mxu0 (!%p237_p2), %v596_v11  ;;  %v605_v20 = vpack.c.bf16 (!%p237_p2), %v394_v19, %v393_v17  ;;  %v396_v22 = vld [vmem:[%s763_s5 + $0x28] sm:$0xff] (!%p237_p2)  ;;  %v543_v28 = vld [vmem:[%s759_s1] ss:$0 sm:$0xff] (!%p237_p2)  ;;  %v397_v33 = vld [vmem:[%s763_s5 + $0x30] sm:$0xff] (!%p237_p2) }
   0x9   : > { %598 = vmatprep.subr.bf16.mxu0 (!%p237_p2), %v634_v10  ;;  %603 = vmatpush3.bf16.msra.mxu1 (!%p237_p2), %v602_v18  ;;  %v608_v23 = vpack.c.bf16 (!%p237_p2), %v396_v22, %v395_v21  ;;  %v544_v30 = vld [vmem:[%s760_s2] ss:$0 sm:$0xff] (!%p237_p2)  ;;  %v398_v34 = vld [vmem:[%s763_s5 + $0x38] sm:$0xff] (!%p237_p2) }
   0xa   : > { %604 = vmatprep.subr.bf16.mxu1 (!%p237_p2), %v634_v10  ;;  %v611_v35 = vpack.c.bf16 (!%p237_p2), %v398_v34, %v397_v33  ;;  %v545_v36 = vld [vmem:[%s762_s4] ss:$0 sm:$0xff] (!%p237_p2) }
   0xb   : > { %v548_v42 = vld [vmem:[%s764_s6] ss:$0 sm:$0xff] (!%p237_p2) }
   0xc   : > { %600 = vmatpush3.bf16.msra.mxu0 (!%p237_p2), %v599_v14 }
   0xd   : > { %s767_s25 = smov (!%p266_p3, %s536_s25), 1  ;;  %606 = vmatpush3.bf16.msra.mxu1 %v605_v20 }
   0xe   : > { %s541_s26 = sshll.u32 %s767_s25, 3  ;;  %607 = vmatprep.subr.bf16.mxu1 %v634_v10 }
   0xf   : > { %s269_s29 = scalar_lea.vmem %s758_s0, %s541_s26  ;;  %s273_s21 = scalar_lea.vmem %s765_s7, %s541_s26 }
  0x10   : > { %v693_v0 = vld [vmem:[%s269_s29] sm:$0xff] }
  0x11   : > { %v276_v1 = vsel %vm275_vm0, %v693_v0, 0.0  ;;  %609 = vmatpush3.bf16.msra.mxu1 %v608_v23 }
  0x12   : > { %277 = vadd.xlane.f32.xlu0 %v276_v1  ;;  %610 = vmatprep.subr.bf16.mxu1 %v634_v10 }
  0x15   : > { %612 = vmatpush3.bf16.msra.mxu1 %v611_v35 }
  0x9f   : > { %v278_v2 = vpop.xlane.xlu0 %277 }
  0xa0   : > { %v280_v3 = vmul.f32 0.03125, %v278_v2 }
  0xa2   : > { %v281_v4 = vsub.f32 %v693_v0, %v280_v3 }
  0xa4   : > { %v282_v5 = vmul.f32 %v281_v4, %v281_v4 }
  0xa6   : > { %v283_v6 = vsel %vm275_vm0, %v282_v5, 0.0 }
  0xa7   : > { %284 = vadd.xlane.f32.xlu0 %v283_v6 }
 0x134   : > { %v285_v24 = vpop.xlane.xlu0 %284 }
 0x135   : > { %v286_v25 = vmul.f32 0.03125, %v285_v24 }
 0x137   : > { %v287_v26 = vadd.f32 1e-05, %v286_v25 }
 0x139   : > { %624 = vrsqrt.f32 %v287_v26 }
 0x143   : > { %v625_v27 = vpop.eup %624 }
 0x144   : > { %v289_v29 = vmul.f32 %v625_v27, %v281_v4 }
 0x146   : > { %v297_v31 = vmul.f32 %v543_v28, %v289_v29 }
 0x148   : > { %v305_v32 = vadd.f32 %v544_v30, %v297_v31 }
 0x14a   : > { %574 = vmatmul.mubr.msk.f32.vlgmr.msra.gmra.mrb[0].mxu0 %vm275_vm0, %v305_v32 }
 0x21d   : > { %v386_v37 = vpop.f32.mrb[0].mxu0 }
 0x21e   : > { %v387_v38 = vadd.f32 %v545_v36, %v386_v37  ;;  %v575_v39 = vpop.f32.mrb[1].mxu0 }
 0x220   : > { %v390_v40 = vmax.f32 %v387_v38, 0.0 }
 0x222   : > { %593 = vmatmul.mubr.msk.f32.vlgmr.msra.gmra.mrb[0].mxu1 %vm399_vm2, %v390_v40 }
 0x2f5   : > { %v469_v41 = vpop.f32.mrb[0].mxu1 }
 0x2f6   : > { %v473_v43 = vadd.f32 %v469_v41, %v693_v0  ;;  %v594_v44 = vpop.f32.mrb[1].mxu1 }
 0x2f8   : > { %v481_v45 = vadd.f32 %v548_v42, %v473_v43 }
 0x2fa   : > { %482 = vst.msk [vmem:[%s273_s21] sm:$0xff] %vm275_vm0, %v481_v45 }
 0x2fb PF: > { %s17_s24 = sadd.s32 1, %s632_s24  }
 0x2fc   : > { %p14_p4 = scmp.ge.s32.totalorder %s17_s24, 4  }
 0x2fe   :  { %16 = sbr.rel (!%p14_p4) target bundleno = 1 (0x1), region = 78 }

// kernel: conv_delta_forward.15
= control target key start
LH: loop header
LB: loop body
LE: loop exit
PB: predicated region body
PF: predicated region fallthrough
CT: control target
= control target key end

     0   :  { %v117_v0 = vmov 0.0   ;;  %vm118_vm0 = vmmov 0   ;;  %vm45_vm1 = vcmask 261120   ;;  %s157_s1 = inlined_call_operand.vmem [shape: bf16[32,128], index: 1, kind: input, shape index: {}]   ;;  %s158_s0 = inlined_call_operand.vmem [shape: bf16[16,32], index: 0, kind: input, shape index: {}]   ;;  %s159_s2 = inlined_call_operand.vmem [shape: f32[1,128], index: 2, kind: input, shape index: {}]   ;;  %s160_s3 = inlined_call_operand.vmem [shape: f32[16,128], index: 3, kind: output, shape index: {}]  }
   0x1   :  { %104 = vmatprep.subr.bf16.mxu0 %v117_v0  ;;  %v114_v1 = vld [vmem:[%s157_s1] sm:$0xff]   ;;  %108 = vmatprep.mubr.msk.bf16.mxu0 %vm118_vm0, %v117_v0  ;;  %v115_v2 = vld [vmem:[%s157_s1 + $0x8] sm:$0xff]  }
   0x2   :  { %105 = vmatpush3.bf16.msra.mxu0 %v114_v1  ;;  %v116_v3 = vld [vmem:[%s158_s0] sm:$0xff]  }
   0x3   :  { %106 = vmatprep.subr.bf16.mxu0 %v117_v0  ;;  %v96_v4 = vld [vmem:[%s159_s2] ss:$0 sm:$0xff] }
   0x6   :  { %107 = vmatpush3.bf16.msra.mxu0 %v115_v2 }
   0x9   :  { %109 = vmatmul.mubr.msk.bf16.vlgmr.msra.gmra.mrb[0].mxu0 %vm45_vm1, %v116_v3 }
  0xdc   :  { %v83_v5 = vpop.f32.mrb[0].mxu0 }
  0xdd   :  { %v84_v6 = vadd.f32 %v96_v4, %v83_v5  ;;  %v110_v7 = vpop.f32.mrb[1].mxu0 }
  0xde   :  { %v86_v8 = vpop.f32.mrb[2].mxu0 }
  0xdf   :  { %90 = vst [vmem:[%s160_s3] sm:$0xff] %v84_v6  ;;  %v87_v9 = vadd.f32 %v96_v4, %v86_v8  ;;  %v111_v10 = vpop.f32.mrb[3].mxu0 }
  0xe1   :  { %91 = vst [vmem:[%s160_s3 + $0x8] sm:$0xff] %v87_v9 }

// kernel: conv_delta_forward.13
= control target key start
LH: loop header
LB: loop body
LE: loop exit
PB: predicated region body
PF: predicated region fallthrough
CT: control target
= control target key end

     0   :  { %s2904_s25 = smov 0   ;;  %s3282_s0 = inlined_call_operand.vmem [shape: f32[2,8,32], index: 0, kind: input, shape index: {}]   ;;  %s3283_s1 = inlined_call_operand.vmem [shape: f32[2,32,8], index: 1, kind: input, shape index: {}]   ;;  %s3284_s2 = inlined_call_operand.vmem [shape: f32[1,32], index: 2, kind: input, shape index: {}]   ;;  %s3285_s3 = inlined_call_operand.vmem [shape: f32[1,32], index: 3, kind: input, shape index: {}]   ;;  %s3286_s4 = inlined_call_operand.vmem [shape: f32[32,1], index: 4, kind: input, shape index: {}]   ;;  %s3287_s5 = inlined_call_operand.vmem [shape: f32[32,1], index: 5, kind: input, shape index: {}]   ;;  %s3288_s6 = inlined_call_operand.vmem [shape: f32[32,32], index: 6, kind: input, shape index: {}]   ;;  %s3289_s7 = inlined_call_operand.vmem [shape: f32[32,32], index: 7, kind: input, shape index: {}]   ;;  %s3290_s8 = inlined_call_operand.vmem [shape: f32[32,32], index: 8, kind: input, shape index: {}]   ;;  %s3291_s9 = inlined_call_operand.vmem [shape: f32[32,2], index: 9, kind: input, shape index: {}]   ;;  %s3292_s10 = inlined_call_operand.vmem [shape: f32[2,32], index: 10, kind: input, shape index: {}]   ;;  %s3293_s11 = inlined_call_operand.vmem [shape: f32[32,32], index: 11, kind: input, shape index: {}]   ;;  %s3294_s12 = inlined_call_operand.vmem [shape: f32[32,32], index: 12, kind: input, shape index: {}]   ;;  %s3295_s13 = inlined_call_operand.vmem [shape: f32[2,8,32], index: 13, kind: output, shape index: {}]  }
   0x1 LB: > { %s2357_s26 = sadd.s32 4294967295, %s2821_s25   ;;  %p2361_p0 = scmp.ge.s32.totalorder %s2821_s25, 1  ;;  %s2821_s25 = sphi %s2904_s25, %s23_s25  }
   0x2   : > { %p396_p1 = scmp.lt.s32.totalorder %s2821_s25, 3 }
   0x4   : > { %p397_p2 = pnand %p2361_p0, %p396_p1 }
   0x5   : > { %p443_p3 = scmp.lt.s32.totalorder (!%p397_p2), %s2357_s26, 1  ;;  %vm457_vm0 = vcmask (!%p397_p2), 261120   ;;  %v595_v7 = vld [vmem:[%s3288_s6] sm:$0xff] (!%p397_p2)  ;;  %v596_v8 = vld [vmem:[%s3288_s6 + $0x8] sm:$0xff] (!%p397_p2)  ;;  %v2823_v10 = vmov (!%p397_p2), 0.0|0.0   ;;  %v597_v13 = vld [vmem:[%s3288_s6 + $0x10] sm:$0xff] (!%p397_p2) }
   0x6   : > { %400 = sbr.rel (%p397_p2) target bundleno = 1889 (0x761), region = 72  ;;  %v672_v9 = vld [vmem:[%s3290_s8] sm:$0xff] (!%p397_p2)  ;;  %2653 = vmatprep.subr.bf16.mxu0 (!%p397_p2), %v2823_v10  ;;  %v2654_v11 = vpack.c.bf16 (!%p397_p2), %v596_v8, %v595_v7  ;;  %2659 = vmatprep.subr.bf16.mxu1 (!%p397_p2), %v2823_v10  ;;  %v673_v12 = vld [vmem:[%s3290_s8 + $0x8] sm:$0xff] (!%p397_p2)  ;;  %v598_v14 = vld [vmem:[%s3288_s6 + $0x18] sm:$0xff] (!%p397_p2)  ;;  %vm2824_vm1 = vmmov (!%p397_p2), 0   ;;  %v2825_v18 = vmov (!%p397_p2), 0.0  }
   0x7   : > { %v2660_v15 = vpack.c.bf16 (!%p397_p2), %v673_v12, %v672_v9  ;;  %v674_v16 = vld [vmem:[%s3290_s8 + $0x10] sm:$0xff] (!%p397_p2)  ;;  %v675_v17 = vld [vmem:[%s3290_s8 + $0x18] sm:$0xff] (!%p397_p2)  ;;  %2485 = vmatprep.mubr.msk.f32.mxu0 (!%p397_p2), %vm2824_vm1, %v2825_v18  ;;  %2496 = vmatprep.mubr.msk.f32.mxu1 (!%p397_p2), %vm2824_vm1, %v2825_v18  ;;  %v2657_v19 = vpack.c.bf16 (!%p397_p2), %v598_v14, %v597_v13  ;;  %v535_v21 = vld [vmem:[%s3286_s4] sm:$0xff] (!%p397_p2)  ;;  %v2826_v22 = vmov (!%p397_p2), 0   ;;  %vm492_vm2 = vcmask (!%p397_p2), 64512  }
   0x8   : > { %2655 = vmatpush3.bf16.msra.mxu0 (!%p397_p2), %v2654_v11  ;;  %v2663_v20 = vpack.c.bf16 (!%p397_p2), %v675_v17, %v674_v16  ;;  %2766 = vset.pattern.permute.xlu1 (!%p397_p2), %v2826_v22  ;;  %v563_v23 = vld [vmem:[%s3287_s5] sm:$0xff] (!%p397_p2)  ;;  %v536_v24 = vld [vmem:[%s3286_s4 + $0x8] sm:$0xff] (!%p397_p2)  ;;  %v537_v26 = vld [vmem:[%s3286_s4 + $0x10] sm:$0xff] (!%p397_p2)  ;;  %vm831_vm3 = vcmask (!%p397_p2), 1041408   ;;  %vm827_vm5 = vcmask (!%p397_p2), 15360   ;;  %vm1335_vm10 = vcmask (!%p397_p2), 253952  }
   0x9   : > { %2661 = vmatpush3.bf16.msra.mxu1 (!%p397_p2), %v2660_v15  ;;  %2656 = vmatprep.subr.bf16.mxu0 (!%p397_p2), %v2823_v10  ;;  %v564_v25 = vld [vmem:[%s3287_s5 + $0x8] sm:$0xff] (!%p397_p2)  ;;  %v538_v27 = vld [vmem:[%s3286_s4 + $0x18] sm:$0xff] (!%p397_p2)  ;;  %v565_v28 = vld [vmem:[%s3287_s5 + $0x10] sm:$0xff] (!%p397_p2) }
   0xa   : > { %2662 = vmatprep.subr.bf16.mxu1 (!%p397_p2), %v2823_v10  ;;  %2767 = vset.pattern.permute.xlu0 (!%p397_p2), %v2826_v22  ;;  %v566_v29 = vld [vmem:[%s3287_s5 + $0x18] sm:$0xff] (!%p397_p2)  ;;  %v2366_v46 = vld [vmem:[%s3284_s2] ss:$0 sm:$0xff] (!%p397_p2)  ;;  %v747_v50 = vld [vmem:[%s3291_s9 + $0x8] sm:$0xff] (!%p397_p2) }
   0xb   : > { %541 = vperm.xlu1 (!%p397_p2), %2766, %v535_v21   ;;  %v746_v49 = vld [vmem:[%s3291_s9] sm:$0xff] (!%p397_p2)  ;;  %v748_v56 = vld [vmem:[%s3291_s9 + $0x10] sm:$0xff] (!%p397_p2)  ;;  %v749_v57 = vld [vmem:[%s3291_s9 + $0x18] sm:$0xff] (!%p397_p2) }
   0xc   : > { %2658 = vmatpush3.bf16.msra.mxu0 (!%p397_p2), %v2657_v19  ;;  %v2367_v51 = vld [vmem:[%s3285_s3] ss:$0 sm:$0xff] (!%p397_p2)  ;;  %v2666_v53 = vpack.c.bf16 (!%p397_p2), %v747_v50, %v746_v49  ;;  %v2669_v58 = vpack.c.bf16 (!%p397_p2), %v749_v57, %v748_v56 }
   0xd   : > { %s3297_s26 = smov (!%p443_p3, %s2357_s26), 1  ;;  %2664 = vmatpush3.bf16.msra.mxu1 %v2663_v20  ;;  %2665 = vmatprep.subr.bf16.mxu0 %v2823_v10 }
   0xe   : > { %s2362_s27 = sshll.u32 %s3297_s26, 3  ;;  %2510 = vmatprep.subr.mxu1 %v2825_v18  ;;  %s2393_s20 = sshll.u32 %s3297_s26, 5 }
   0xf   : > { %s2920_s30 = scalar_lea.vmem %s3282_s0, %s2362_s27  ;;  %546 = vperm.xlu1 %2766, %v536_v24   ;;  %s451_s23 = scalar_lea.vmem %s3283_s1, %s2393_s20 }
  0x10   : > { %v456_v0 = vld [vmem:[%s2920_s30] sm:$0xff]  ;;  %v489_v30 = vld [vmem:[%s451_s23 + $0x8] sm:$0xff]  ;;  %v490_v34 = vld [vmem:[%s451_s23 + $0x10] sm:$0xff]  ;;  %s455_s20 = scalar_lea.vmem %s3295_s13, %s2362_s27 }
  0x11   : > { %v458_v1 = vsel %vm457_vm0, %v456_v0, 0.0  ;;  %v488_v31 = vld [vmem:[%s451_s23] sm:$0xff]  ;;  %v494_v33 = vsel %vm492_vm2, %v489_v30, 0.0  ;;  %v496_v37 = vsel %vm492_vm2, %v490_v34, 0.0  ;;  %v491_v38 = vld [vmem:[%s451_s23 + $0x18] sm:$0xff] }
  0x12   : > { %459 = vadd.xlane.f32.xlu0 %v458_v1  ;;  %v493_v32 = vsel %vm492_vm2, %v488_v31, 0.0  ;;  %v498_v42 = vsel %vm492_vm2, %v491_v38, 0.0 }
  0x13   : > { %574 = vperm.xlu1 %2766, %v564_v25   ;;  %v495_v35 = vadd.f32 %v494_v33, %v493_v32 }
  0x15   : > { %v497_v41 = vadd.f32 %v496_v37, %v495_v35  ;;  %v3058_v37 = vld [vmem:[%s3293_s11 + $0x18] sm:$0xff] }
  0x17   : > { %551 = vperm.xlu1 %2766, %v537_v26   ;;  %v499_v43 = vadd.f32 %v498_v42, %v497_v41  ;;  %v826_v42 = vld [vmem:[%s3292_s10] sm:$0x3] }
  0x19   : > { %v500_v44 = vrot.slane %v499_v43, 4 }
  0x1b   : > { %556 = vperm.xlu1 %2766, %v538_v27   ;;  %v501_v47 = vadd.f32 %v500_v44, %v499_v43 }
  0x1d   : > { %v502_v54 = vrot.slane %v501_v47, 2 }
  0x1f   : > { %579 = vperm.xlu1 %2766, %v565_v28   ;;  %v503_v59 = vadd.f32 %v502_v54, %v501_v47 }
  0x21   : > { %v504_v60 = vrot.slane %v503_v59, 1 }
  0x23   : > { %584 = vperm.xlu1 %2766, %v566_v29   ;;  %v505_v61 = vadd.f32 %v504_v60, %v503_v59 }
  0x25   : > { %v506_v62 = vmul.f32 0.03125, %v505_v61 }
  0x27   : > { %v507_v63 = vsub.f32 %v488_v31, %v506_v62  ;;  %v3025_v1 = vsub.f32 %v490_v34, %v506_v62  ;;  %v3045_v31 = vld [vmem:[%s3293_s11 + $0x8] sm:$0xff] }
  0x8a   : > { %v542_v24 = vpop.permute.xlu1 %541 }
  0x8e   : > { %v547_v27 = vpop.permute.xlu1 %546 }
  0x92   : > { %v575_v34 = vpop.permute.xlu1 %574 }
  0x9f   : > { %v460_v2 = vpop.xlane.xlu0 %459 }
  0xa0   : > { %v462_v3 = vmul.f32 0.03125, %v460_v2  ;;  %v511_v2 = vmul.f32 %v507_v63, %v507_v63 }
  0xa2   : > { %v2924_v4 = vsub.f32 %v456_v0, %v462_v3  ;;  %v508_v0 = vsub.f32 %v489_v30, %v506_v62  ;;  %v3040_v30 = vld [vmem:[%s3293_s11] sm:$0xff] }
  0xa3   : > { %v2680_v32 = vpack.c.bf16 %v3045_v31, %v3040_v30 }
  0xa4   : > { %v464_v5 = vmul.f32 %v2924_v4, %v2924_v4  ;;  %v512_v3 = vmul.f32 %v508_v0, %v508_v0 }
  0xa6   : > { %v465_v6 = vsel %vm457_vm0, %v464_v5, 0.0  ;;  %v513_v5 = vmul.f32 %v3025_v1, %v3025_v1  ;;  %v516_v7 = vsel %vm492_vm2, %v512_v3, 0.0 }
  0xa7   : > { %466 = vadd.xlane.f32.xlu0 %v465_v6  ;;  %v515_v6 = vsel %vm492_vm2, %v511_v2, 0.0 }
  0xa8   : > { %v517_v8 = vadd.f32 %v516_v7, %v515_v6  ;;  %v518_v11 = vsel %vm492_vm2, %v513_v5, 0.0  ;;  %v905_v5 = vld [vmem:[%s3289_s7] sm:$0xff] }
  0xaa   : > { %v519_v12 = vadd.f32 %v518_v11, %v517_v8  ;;  %v908_v8 = vld [vmem:[%s3289_s7 + $0x18] sm:$0xff] }
  0xbd   : > { %569 = vperm.xlu0 %2767, %v563_v23  }
 0x134   : > { %v467_v36 = vpop.xlane.xlu0 %466 }
 0x135   : > { %v468_v39 = vmul.f32 0.03125, %v467_v36  ;;  %v3053_v36 = vld [vmem:[%s3293_s11 + $0x10] sm:$0xff] }
 0x137   : > { %v469_v40 = vadd.f32 1e-05, %v468_v39  ;;  %v2683_v39 = vpack.c.bf16 %v3058_v37, %v3053_v36 }
 0x139   : > { %2782 = vrsqrt.f32 %v469_v40 }
 0x143   : > { %v2783_v45 = vpop.eup %2782 }
 0x144   : > { %v471_v48 = vmul.f32 %v2783_v45, %v2924_v4  ;;  %v3027_v4 = vsub.f32 %v491_v38, %v506_v62  ;;  %v570_v38 = vpop.permute.xlu0 %569 }
 0x146   : > { %v479_v52 = vmul.f32 %v2366_v46, %v471_v48  ;;  %v514_v9 = vmul.f32 %v3027_v4, %v3027_v4 }
 0x148   : > { %v487_v55 = vadd.f32 %v2367_v51, %v479_v52  ;;  %v520_v13 = vsel %vm492_vm2, %v514_v9, 0.0  ;;  %v552_v52 = vpop.permute.xlu1 %551 }
 0x149   : > { %v521_v14 = vadd.f32 %v520_v13, %v519_v12 }
 0x14a   : > { %2486 = vmatmul.mubr.msk.f32.vlgmr.msra.gmra.mrb[0].mxu0 %vm457_vm0, %v487_v55  ;;  %2497 = vmatmul.mubr.msk.f32.vlgmr.msra.gmra.mrb[0].mxu1 %vm457_vm0, %v487_v55 }
 0x14b   : > { %2667 = vmatpush3.bf16.msra.mxu0 %v2666_v53  ;;  %2507 = vmatprep.mubr.msk.f32.mxu0 %vm2824_vm1, %v2825_v18  ;;  %v522_v15 = vrot.slane %v521_v14, 4 }
 0x14c   : > { %2668 = vmatprep.subr.bf16.mxu0 %v2823_v10  ;;  %2512 = vmatprep.mubr.msk.f32.mxu1 %vm2824_vm1, %v2825_v18  ;;  %v557_v56 = vpop.permute.xlu1 %556 }
 0x14d   : > { %v523_v16 = vadd.f32 %v522_v15, %v521_v14  ;;  %2511 = vmatpush3.msk.msra.mxu1 %vm831_vm3, %v826_v42 }
 0x14f   : > { %2670 = vmatpush3.bf16.msra.mxu0 %v2669_v58  ;;  %v524_v17 = vrot.slane %v523_v16, 2 }
 0x150   : > { %2679 = vmatprep.subr.bf16.mxu0 %v2823_v10  ;;  %v580_v58 = vpop.permute.xlu1 %579 }
 0x151   : > { %v525_v19 = vadd.f32 %v524_v17, %v523_v16 }
 0x152   : > { %2508 = vmatmul.mubr.msk.f32.vlgmr.msra.gmra.mrb[2].mxu0 %vm457_vm0, %v487_v55 }
 0x153   : > { %2537 = vmatprep.mubr.msk.f32.mxu0 %vm2824_vm1, %v2825_v18  ;;  %v526_v20 = vrot.slane %v525_v19, 1  ;;  %2681 = vmatpush3.bf16.msra.mxu0 %v2680_v32 }
 0x154   : > { %2682 = vmatprep.subr.bf16.mxu0 %v2823_v10 }
 0x155   : > { %v527_v21 = vadd.f32 %v526_v20, %v525_v19 }
 0x157   : > { %v528_v22 = vmul.f32 0.03125, %v527_v21  ;;  %2684 = vmatpush3.bf16.msra.mxu0 %v2683_v39 }
 0x158   : > { %2693 = vmatprep.subr.bf16.mxu0 %v2823_v10 }
 0x159   : > { %v529_v23 = vadd.f32 1e-05, %v528_v22 }
 0x15b   : > { %2784 = vrsqrt.f32 %v529_v23 }
 0x165   : > { %v2785_v25 = vpop.eup %2784 }
 0x166   : > { %v532_v26 = vmul.f32 %v2785_v25, %v508_v0  ;;  %v531_v28 = vmul.f32 %v2785_v25, %v507_v63  ;;  %v533_v60 = vmul.f32 %v2785_v25, %v3025_v1  ;;  %v534_v61 = vmul.f32 %v2785_v25, %v3027_v4  ;;  %v585_v0 = vpop.permute.xlu1 %584  ;;  %v906_v1 = vld [vmem:[%s3289_s7 + $0x8] sm:$0xff]  ;;  %v907_v4 = vld [vmem:[%s3289_s7 + $0x10] sm:$0xff] }
 0x168   : > { %v560_v29 = vmul.f32 %v547_v27, %v532_v26  ;;  %v559_v33 = vmul.f32 %v542_v24, %v531_v28  ;;  %v561_v62 = vmul.f32 %v552_v52, %v533_v60  ;;  %v562_v63 = vmul.f32 %v557_v56, %v534_v61 }
 0x169   : > { %v2832_v60 = vmov 6   ;;  %v2833_v61 = vmov 7  }
 0x16a   : > { %v588_v35 = vadd.f32 %v575_v34, %v560_v29  ;;  %v587_v40 = vadd.f32 %v570_v38, %v559_v33  ;;  %v589_v2 = vadd.f32 %v580_v58, %v561_v62  ;;  %v590_v3 = vadd.f32 %v585_v0, %v562_v63 }
 0x16b   : > { %v2830_v58 = vmov 4  }
 0x16c   : > { %v2671_v41 = vpack.c.bf16 %v588_v35, %v587_v40  ;;  %v2675_v7 = vpack.c.bf16 %v590_v3, %v589_v2 }
 0x16e   : > { %2672 = vmatprep.subr.bf16.mxu1 %v2671_v41 }
 0x21d   : > { %v668_v43 = vpop.f32.mrb[0].mxu0  ;;  %v3066_v44 = vpop.f32.mrb[0].mxu1 }
 0x21e   : > { %v1008_v45 = vmul.f32 1.442695, %v668_v43  ;;  %v2487_v46 = vpop.f32.mrb[1].mxu0  ;;  %v2498_v47 = vpop.f32.mrb[1].mxu1  ;;  %v1007_v53 = vadd.f32 1.0, %v668_v43  ;;  %vm1006_vm4 = vcmp.gt.f32.partialorder %v668_v43, 0.0 }
 0x220   : > { %2786 = vpow2.f32 %v1008_v45 }
 0x225   : > { %v816_v48 = vpop.f32.mrb[2].mxu0 }
 0x226   : > { %v820_v49 = vsub.f32 0.0, %v816_v48  ;;  %v2509_v50 = vpop.f32.mrb[3].mxu0 }
 0x228   : > { %v821_v51 = vmul.f32 1.442695, %v820_v49 }
 0x22a   : > { %v2787_v54 = vpop.eup %2786  ;;  %2788 = vpow2.f32 %v821_v51 }
 0x22b   : > { %v3068_v55 = vsel %vm1006_vm4, %v1007_v53, %v2787_v54  ;;  %v2828_v54 = vmov 2  }
 0x22c   : > { %2538 = vmatmul.mubr.msk.f32.vlgmr.msra.gmra.mrb[4].mxu0 %vm457_vm0, %v3068_v55 }
 0x22d   : > { %2562 = vmatprep.mubr.msk.f32.mxu0 %vm2824_vm1, %v2825_v18 }
 0x234   : > { %v2789_v57 = vpop.eup %2788 }
 0x235   : > { %v823_v59 = vadd.f32 1.0, %v2789_v57  ;;  %v2829_v57 = vmov 3  }
 0x237   : > { %2790 = vrcp.f32 %v823_v59  ;;  %v2831_v59 = vmov 5  }
 0x241   : > { %v2791_v6 = vpop.eup %2790 }
 0x242   : > { %2513 = vmatmul.mubr.msk.f32.vlgmr.msra.gmra.mrb[2].mxu1 %vm827_vm5, %v2791_v6 }
 0x243   : > { %2674 = vmatpush3.bf16.msra.mxu1 %v2671_v41  ;;  %2523 = vmatprep.mubr.msk.f32.mxu1 %vm457_vm0, %v905_v5  ;;  %v2827_v41 = vmov 1  }
 0x244   : > { %2676 = vmatprep.subr.bf16.mxu1 %v2675_v7  ;;  %2769 = vset.pattern.permute.xlu0 %v2827_v41 }
 0x247   : > { %2678 = vmatpush3.bf16.msra.mxu1 %v2675_v7 }
 0x24a   : > { %2524 = vmatmul.mubr.msk.f32.vlgmr.msra.gmra.mrb[4].mxu1 %vm457_vm0, %v906_v1 }
 0x24b   : > { %2526 = vmatprep.mubr.msk.f32.mxu1 %vm457_vm0, %v907_v4 }
 0x24e   : > { %2527 = vmatmul.mubr.msk.f32.gmra.mrb[6].mxu1 %vm457_vm0, %v908_v8 }
 0x24f   : > { %2548 = vmatprep.mubr.msk.f32.mxu1 %vm457_vm0, %v3040_v30 }
 0x2ff   : > { %v3094_v9 = vpop.f32.mrb[4].mxu0 }
 0x300   : > { %v2539_v11 = vpop.f32.mrb[5].mxu0 }
 0x315   : > { %v3096_v12 = vpop.f32.mrb[2].mxu1 }
 0x316   : > { %v2514_v13 = vpop.f32.mrb[3].mxu1 }
 0x31d   : > { %v2525_v14 = vpop.f32.mrb[4].mxu1 }
 0x31e   : > { %v1096_v15 = vmul.f32 1.442695, %v2525_v14  ;;  %v987_v16 = vpop.f32.mrb[5].mxu1  ;;  %v1091_v23 = vadd.f32 1.0, %v2525_v14  ;;  %vm1087_vm6 = vcmp.gt.f32.partialorder %v2525_v14, 0.0  ;;  %v1246_v14 = vlaneseq }
 0x31f   : > { %v1094_v17 = vmul.f32 1.442695, %v987_v16  ;;  %v1090_v25 = vadd.f32 1.0, %v987_v16  ;;  %vm1086_vm7 = vcmp.gt.f32.partialorder %v987_v16, 0.0 }
 0x320   : > { %2792 = vpow2.f32 %v1096_v15 }
 0x321   : > { %2794 = vpow2.f32 %v1094_v17  ;;  %v2528_v19 = vpop.f32.mrb[6].mxu1  ;;  %v3107_v17 = vshrl.u32 %v1246_v14, 7 }
 0x322   : > { %v1100_v20 = vmul.f32 1.442695, %v2528_v19  ;;  %v997_v21 = vpop.f32.mrb[7].mxu1  ;;  %v1093_v29 = vadd.f32 1.0, %v2528_v19  ;;  %vm1089_vm8 = vcmp.gt.f32.partialorder %v2528_v19, 0.0 }
 0x323   : > { %v1098_v22 = vmul.f32 1.442695, %v997_v21  ;;  %v1092_v34 = vadd.f32 1.0, %v997_v21  ;;  %vm1088_vm9 = vcmp.gt.f32.partialorder %v997_v21, 0.0 }
 0x324   : > { %2796 = vpow2.f32 %v1100_v20 }
 0x325   : > { %2798 = vpow2.f32 %v1098_v22  ;;  %v1248_v22 = vsub.s32 0, %v3107_v17 }
 0x32a   : > { %v2793_v24 = vpop.eup %2792 }
 0x32b   : > { %v2795_v26 = vpop.eup %2794  ;;  %v1103_v27 = vsel %vm1087_vm6, %v1091_v23, %v2793_v24 }
 0x32c   : > { %v1102_v28 = vsel %vm1086_vm7, %v1090_v25, %v2795_v26 }
 0x32d   : > { %v2685_v32 = vpack.c.bf16 %v1103_v27, %v1102_v28 }
 0x32e   : > { %v2797_v33 = vpop.eup %2796 }
 0x32f   : > { %v2799_v35 = vpop.eup %2798  ;;  %2686 = vmatprep.subr.bf16.mxu1 %v2685_v32  ;;  %v1105_v38 = vsel %vm1089_vm8, %v1093_v29, %v2797_v33 }
 0x330   : > { %2688 = vmatpush3.bf16.msra.mxu1 %v2685_v32  ;;  %v1104_v39 = vsel %vm1088_vm9, %v1092_v34, %v2799_v35 }
 0x331   : > { %v2689_v40 = vpack.c.bf16 %v1105_v38, %v1104_v39 }
 0x333   : > { %2690 = vmatprep.subr.bf16.mxu1 %v2689_v40 }
 0x334   : > { %2692 = vmatpush3.bf16.msra.mxu1 %v2689_v40 }
 0x335   : > { %2699 = vmatprep.subr.bf16.mxu1 %v2823_v10 }
 0x337   : > { %2549 = vmatmul.mubr.msk.f32.vlgmr.msra.gmra.mrb[8].mxu1 %vm457_vm0, %v3045_v31 }
 0x338   : > { %2551 = vmatprep.mubr.msk.f32.mxu1 %vm457_vm0, %v3053_v36 }
 0x33b   : > { %2552 = vmatmul.mubr.msk.f32.gmra.mrb[10].mxu1 %vm457_vm0, %v3058_v37 }
 0x33c   : > { %2573 = vmatprep.mubr.msk.f32.mxu1 %vm2824_vm1, %v2825_v18 }
 0x40a   : > { %v2550_v42 = vpop.f32.mrb[8].mxu1 }
 0x40b   : > { %2800 = vrcp.f32 %v2550_v42  ;;  %v1184_v43 = vpop.f32.mrb[9].mxu1 }
 0x40c   : > { %2802 = vrcp.f32 %v1184_v43 }
 0x40e   : > { %v2553_v45 = vpop.f32.mrb[10].mxu1 }
 0x40f   : > { %v1194_v46 = vpop.f32.mrb[11].mxu1 }
 0x410   : > { %2804 = vrcp.f32 %v1194_v46 }
 0x411   : > { %2806 = vrcp.f32 %v2553_v45 }
 0x412   : > { %2808 = vrcp.f32 %v3094_v9 }
 0x415   : > { %v2801_v47 = vpop.eup %2800 }
 0x416   : > { %v1206_v48 = vmul.f32 %v2801_v47, %v1103_v27  ;;  %v2803_v49 = vpop.eup %2802 }
 0x417   : > { %v1204_v51 = vmul.f32 %v2803_v49, %v1102_v28 }
 0x418   : > { %1218 = vperm.xlu1 %2766, %v1206_v48  }
 0x41a   : > { %v2805_v50 = vpop.eup %2804 }
 0x41b   : > { %v1208_v52 = vmul.f32 %v2805_v50, %v1104_v39  ;;  %v2807_v53 = vpop.eup %2806 }
 0x41c   : > { %1213 = vperm.xlu1 %2766, %v1204_v51   ;;  %v1210_v56 = vmul.f32 %v2807_v53, %v1105_v38  ;;  %v2809_v50 = vpop.eup %2808 }
 0x41d   : > { %1346 = vperm.xlu0 %2769, %v1208_v52  }
 0x420   : > { %1223 = vperm.xlu1 %2766, %v1208_v52  }
 0x421   : > { %2771 = vset.pattern.permute.xlu0 %v2828_v54 }
 0x422   : > { %1467 = vperm.xlu0 %2771, %v1206_v48  }
 0x424   : > { %1228 = vperm.xlu1 %2766, %v1210_v56  }
 0x426   : > { %2772 = vset.pattern.permute.xlu0 %v2829_v57 }
 0x427   : > { %1588 = vperm.xlu0 %2772, %v1204_v51  }
 0x428   : > { %2768 = vset.pattern.permute.xlu1 %v2827_v41 }
 0x429   : > { %1338 = vperm.xlu1 %2768, %v1204_v51  }
 0x42b   : > { %1600 = vperm.xlu0 %2772, %v1210_v56  }
 0x42d   : > { %1342 = vperm.xlu1 %2768, %v1206_v48  }
 0x42f   : > { %2775 = vset.pattern.permute.xlu0 %v2830_v58 }
 0x430   : > { %1717 = vperm.xlu0 %2775, %v1206_v48  }
 0x431   : > { %1350 = vperm.xlu1 %2768, %v1210_v56  }
 0x434   : > { %2776 = vset.pattern.permute.xlu0 %v2831_v59 }
 0x435   : > { %1838 = vperm.xlu0 %2776, %v1204_v51   ;;  %2770 = vset.pattern.permute.xlu1 %v2828_v54 }
 0x436   : > { %1463 = vperm.xlu1 %2770, %v1204_v51  }
 0x439   : > { %1850 = vperm.xlu0 %2776, %v1210_v56  }
 0x43a   : > { %1471 = vperm.xlu1 %2770, %v1208_v52  }
 0x43d   : > { %2779 = vset.pattern.permute.xlu0 %v2832_v60 }
 0x43e   : > { %1967 = vperm.xlu0 %2779, %v1206_v48   ;;  %1475 = vperm.xlu1 %2770, %v1210_v56  }
 0x442   : > { %2780 = vset.pattern.permute.xlu0 %v2833_v61  ;;  %2773 = vset.pattern.permute.xlu1 %v2829_v57 }
 0x443   : > { %2088 = vperm.xlu0 %2780, %v1204_v51   ;;  %1592 = vperm.xlu1 %2773, %v1206_v48  }
 0x447   : > { %2100 = vperm.xlu0 %2780, %v1210_v56   ;;  %1596 = vperm.xlu1 %2773, %v1208_v52  }
 0x44b   : > { %2774 = vset.pattern.permute.xlu1 %v2830_v58 }
 0x44c   : > { %1713 = vperm.xlu1 %2774, %v1204_v51  }
 0x450   : > { %1721 = vperm.xlu1 %2774, %v1208_v52  }
 0x454   : > { %1725 = vperm.xlu1 %2774, %v1210_v56  }
 0x458   : > { %2777 = vset.pattern.permute.xlu1 %v2831_v59 }
 0x459   : > { %1842 = vperm.xlu1 %2777, %v1206_v48  }
 0x45d   : > { %1846 = vperm.xlu1 %2777, %v1208_v52  }
 0x461   : > { %2778 = vset.pattern.permute.xlu1 %v2832_v60 }
 0x462   : > { %1963 = vperm.xlu1 %2778, %v1204_v51  }
 0x466   : > { %1971 = vperm.xlu1 %2778, %v1208_v52  }
 0x46a   : > { %1975 = vperm.xlu1 %2778, %v1210_v56   ;;  %v3123_v56 = vmul.f32 %v2809_v50, %v3068_v55 }
 0x46e   : > { %2781 = vset.pattern.permute.xlu1 %v2833_v61 }
 0x46f   : > { %2092 = vperm.xlu1 %2781, %v1206_v48  }
 0x473   : > { %2096 = vperm.xlu1 %2781, %v1208_v52  }
 0x497   : > { %v1219_v62 = vpop.permute.xlu1 %1218 }
 0x498   : > { %v1232_v3 = vmul.f32 0.0, %v1219_v62 }
 0x49b   : > { %v1214_v63 = vpop.permute.xlu1 %1213 }
 0x49c   : > { %v1231_v0 = vmul.f32 0.0, %v1214_v63  ;;  %v1347_v39 = vpop.permute.xlu0 %1346 }
 0x49e   : > { %v1235_v6 = vadd.f32 %v1232_v3, %v1231_v0 }
 0x49f   : > { %v1224_v2 = vpop.permute.xlu1 %1223 }
 0x4a0   : > { %v1233_v5 = vmul.f32 0.0, %v1224_v2 }
 0x4a2   : > { %v1236_v1 = vadd.f32 %v1235_v6, %v1233_v5 }
 0x4a3   : > { %v1229_v7 = vpop.permute.xlu1 %1228 }
 0x4a4   : > { %v1234_v4 = vmul.f32 0.0, %v1229_v7 }
 0x4a6   : > { %v1237_v8 = vadd.f32 %v1236_v1, %v1234_v4 }
 0x4a8   : > { %v1238_v11 = vrot.slane %v1237_v8, 4  ;;  %v1339_v21 = vpop.permute.xlu1 %1338 }
 0x4aa   : > { %v1239_v13 = vadd.f32 %v1238_v11, %v1237_v8 }
 0x4ac   : > { %v1240_v15 = vrot.slane %v1239_v13, 2  ;;  %v1343_v26 = vpop.permute.xlu1 %1342 }
 0x4ae   : > { %v1241_v16 = vadd.f32 %v1240_v15, %v1239_v13 }
 0x4b0   : > { %v1242_v19 = vrot.slane %v1241_v16, 1  ;;  %v1351_v43 = vpop.permute.xlu1 %1350 }
 0x4b2   : > { %v1243_v20 = vadd.f32 %v1242_v19, %v1241_v16 }
 0x4b4   : > { %v1244_v23 = vsub.f32 %v3066_v44, %v1243_v20 }
 0x4b5   : > { %v1464_v55 = vpop.permute.xlu1 %1463 }
 0x4b6   : > { %v1245_v24 = vmul.f32 %v1244_v23, %v3096_v12 }
 0x4b8   : > { %v1249_v25 = vrot.slane %v1245_v24, %v1248_v22  ;;  %v1468_v22 = vpop.permute.xlu0 %1467 }
 0x4b9   : > { %v1472_v4 = vpop.permute.xlu1 %1471 }
 0x4ba   : > { %v1253_v27 = vmul.f32 %v1249_v25, %v1229_v7  ;;  %v1250_v28 = vmul.f32 %v1249_v25, %v1214_v63  ;;  %v1251_v29 = vmul.f32 %v1249_v25, %v1219_v62  ;;  %v1252_v32 = vmul.f32 %v1249_v25, %v1224_v2 }
 0x4bb   : > { %v1374_v63 = vsub.s32 1, %v3107_v17 }
 0x4bc   : > { %v1257_v33 = vmul.f32 %v1253_v27, %v3058_v37  ;;  %v1254_v34 = vmul.f32 %v1250_v28, %v3040_v30  ;;  %v1255_v35 = vmul.f32 %v1251_v29, %v3045_v31  ;;  %v1256_v38 = vmul.f32 %v1252_v32, %v3053_v36 }
 0x4be   : > { %v1353_v40 = vmul.f32 %v1339_v21, %v1254_v34  ;;  %v1354_v41 = vmul.f32 %v1343_v26, %v1255_v35  ;;  %v1355_v42 = vmul.f32 %v1347_v39, %v1256_v38  ;;  %v2694_v45 = vpack.c.bf16 %v1255_v35, %v1254_v34 }
 0x4bf   : > { %v1356_v47 = vmul.f32 %v1351_v43, %v1257_v33  ;;  %v2697_v52 = vpack.c.bf16 %v1257_v33, %v1256_v38 }
 0x4c0   : > { %v1357_v9 = vsel %vm457_vm0, %v1353_v40, 0.0  ;;  %v1358_v46 = vsel %vm457_vm0, %v1354_v41, 0.0  ;;  %2695 = vmatpush3.bf16.msra.mxu0 %v2694_v45  ;;  %v1360_v49 = vsel %vm457_vm0, %v1355_v42, 0.0 }
 0x4c1   : > { %v1359_v48 = vadd.f32 %v1358_v46, %v1357_v9  ;;  %2696 = vmatprep.subr.bf16.mxu0 %v2823_v10  ;;  %v1362_v53 = vsel %vm457_vm0, %v1356_v47, 0.0  ;;  %v1499_v47 = vsub.s32 2, %v3107_v17 }
 0x4c3   : > { %v1361_v51 = vadd.f32 %v1360_v49, %v1359_v48 }
 0x4c4   : > { %2698 = vmatpush3.bf16.msra.mxu0 %v2697_v52 }
 0x4c5   : > { %v1363_v54 = vadd.f32 %v1362_v53, %v1361_v51  ;;  %2705 = vmatprep.subr.bf16.mxu0 %v2823_v10 }
 0x4c7   : > { %v1364_v57 = vrot.slane %v1363_v54, 4  ;;  %2563 = vmatmul.mubr.msk.f32.vlgmr.msra.gmra.mrb[6].mxu0 %vm457_vm0, %v3123_v56 }
 0x4c8   : > { %2584 = vmatprep.mubr.msk.f32.mxu0 %vm2824_vm1, %v2825_v18 }
 0x4c9   : > { %v1365_v58 = vadd.f32 %v1364_v57, %v1363_v54 }
 0x4cb   : > { %v1366_v59 = vrot.slane %v1365_v58, 2 }
 0x4cd   : > { %v1367_v60 = vadd.f32 %v1366_v59, %v1365_v58  ;;  %v1589_v58 = vpop.permute.xlu0 %1588 }
 0x4cf   : > { %v1368_v61 = vrot.slane %v1367_v60, 1 }
 0x4d1   : > { %v1369_v62 = vadd.f32 %v1368_v61, %v1367_v60 }
 0x4d3   : > { %v1370_v0 = vsub.f32 %v3066_v44, %v1369_v62 }
 0x4d5   : > { %v1371_v2 = vmul.f32 %v1370_v0, %v3096_v12 }
 0x4d7   : > { %v1375_v3 = vrot.slane %v1371_v2, %v1374_v63 }
 0x4d9   : > { %v1379_v5 = vmul.f32 %v1375_v3, %v1351_v43  ;;  %v1376_v6 = vmul.f32 %v1375_v3, %v1339_v21  ;;  %v1377_v7 = vmul.f32 %v1375_v3, %v1343_v26  ;;  %v1378_v1 = vmul.f32 %v1375_v3, %v1347_v39  ;;  %v1476_v21 = vpop.permute.xlu1 %1475 }
 0x4db   : > { %v1383_v8 = vmul.f32 %v1379_v5, %v3058_v37  ;;  %v1380_v11 = vmul.f32 %v1376_v6, %v3040_v30  ;;  %v1381_v13 = vmul.f32 %v1377_v7, %v3045_v31  ;;  %v1382_v14 = vmul.f32 %v1378_v1, %v3053_v36 }
 0x4dd   : > { %v1387_v15 = vadd.f32 %v1383_v8, %v1257_v33  ;;  %v1384_v16 = vadd.f32 %v1380_v11, %v1254_v34  ;;  %v1385_v19 = vadd.f32 %v1381_v13, %v1255_v35  ;;  %v1386_v20 = vadd.f32 %v1382_v14, %v1256_v38  ;;  %v1593_v51 = vpop.permute.xlu1 %1592 }
 0x4de   : > { %v1388_v38 = vrot.slane %v3123_v56, 1 }
 0x4df   : > { %v1479_v23 = vmul.f32 %v1468_v22, %v1385_v19  ;;  %v1478_v24 = vmul.f32 %v1464_v55, %v1384_v16  ;;  %v1480_v25 = vmul.f32 %v1472_v4, %v1386_v20  ;;  %v2700_v26 = vpack.c.bf16 %v1385_v19, %v1384_v16 }
 0x4e0   : > { %v2703_v27 = vpack.c.bf16 %v1387_v15, %v1386_v20  ;;  %v1481_v32 = vmul.f32 %v1476_v21, %v1387_v15 }
 0x4e1   : > { %v1483_v28 = vsel %vm457_vm0, %v1479_v23, 0.0  ;;  %v1482_v29 = vsel %vm457_vm0, %v1478_v24, 0.0  ;;  %2701 = vmatpush3.bf16.msra.mxu1 %v2700_v26  ;;  %v1485_v40 = vsel %vm457_vm0, %v1480_v25, 0.0  ;;  %v1597_v5 = vpop.permute.xlu1 %1596 }
 0x4e2   : > { %v1484_v39 = vadd.f32 %v1483_v28, %v1482_v29  ;;  %2702 = vmatprep.subr.bf16.mxu1 %v2823_v10  ;;  %v1487_v34 = vsel %vm457_vm0, %v1481_v32, 0.0  ;;  %v1624_v29 = vsub.s32 3, %v3107_v17 }
 0x4e4   : > { %v1486_v33 = vadd.f32 %v1485_v40, %v1484_v39 }
 0x4e5   : > { %2704 = vmatpush3.bf16.msra.mxu1 %v2703_v27  ;;  %v1714_v39 = vpop.permute.xlu1 %1713 }
 0x4e6   : > { %v1488_v35 = vadd.f32 %v1487_v34, %v1486_v33  ;;  %2711 = vmatprep.subr.bf16.mxu1 %v2823_v10 }
 0x4e8   : > { %v1489_v41 = vrot.slane %v1488_v35, 4  ;;  %2574 = vmatmul.mubr.msk.f32.vlgmr.msra.gmra.mrb[12].mxu1 %vm457_vm0, %v1388_v38 }
 0x4e9   : > { %2595 = vmatprep.mubr.msk.f32.mxu1 %vm2824_vm1, %v2825_v18 }
 0x4ea   : > { %v1490_v42 = vadd.f32 %v1489_v41, %v1488_v35 }
 0x4ec   : > { %v1491_v43 = vrot.slane %v1490_v42, 2 }
 0x4ee   : > { %v1492_v45 = vadd.f32 %v1491_v43, %v1490_v42  ;;  %v1722_v42 = vpop.permute.xlu1 %1721 }
 0x4f0   : > { %v1493_v9 = vrot.slane %v1492_v45, 1 }
 0x4f2   : > { %v1494_v46 = vadd.f32 %v1493_v9, %v1492_v45 }
 0x4f4   : > { %v1495_v48 = vsub.f32 %v3066_v44, %v1494_v46 }
 0x4f6   : > { %v1496_v49 = vmul.f32 %v1495_v48, %v3096_v12 }
 0x4f8   : > { %v1500_v50 = vrot.slane %v1496_v49, %v1499_v47 }
 0x4fa   : > { %v1504_v52 = vmul.f32 %v1500_v50, %v1476_v21  ;;  %v1501_v53 = vmul.f32 %v1500_v50, %v1464_v55  ;;  %v1502_v54 = vmul.f32 %v1500_v50, %v1468_v22  ;;  %v1503_v57 = vmul.f32 %v1500_v50, %v1472_v4  ;;  %v1601_v55 = vpop.permute.xlu0 %1600 }
 0x4fc   : > { %v1508_v59 = vmul.f32 %v1504_v52, %v3058_v37  ;;  %v1505_v60 = vmul.f32 %v1501_v53, %v3040_v30  ;;  %v1506_v61 = vmul.f32 %v1502_v54, %v3045_v31  ;;  %v1507_v62 = vmul.f32 %v1503_v57, %v3053_v36 }
 0x4fe   : > { %v1512_v63 = vadd.f32 %v1508_v59, %v1387_v15  ;;  %v1509_v0 = vadd.f32 %v1505_v60, %v1384_v16  ;;  %v1510_v2 = vadd.f32 %v1506_v61, %v1385_v19  ;;  %v1511_v3 = vadd.f32 %v1507_v62, %v1386_v20  ;;  %v1718_v52 = vpop.permute.xlu0 %1717 }
 0x4ff   : > { %v1513_v20 = vrot.slane %v3123_v56, 2 }
 0x500   : > { %v1603_v6 = vmul.f32 %v1589_v58, %v1509_v0  ;;  %v1604_v7 = vmul.f32 %v1593_v51, %v1510_v2  ;;  %v1605_v1 = vmul.f32 %v1597_v5, %v1511_v3  ;;  %v2706_v8 = vpack.c.bf16 %v1510_v2, %v1509_v0 }
 0x501   : > { %v2709_v4 = vpack.c.bf16 %v1512_v63, %v1511_v3  ;;  %v1606_v14 = vmul.f32 %v1601_v55, %v1512_v63 }
 0x502   : > { %v1607_v11 = vsel %vm457_vm0, %v1603_v6, 0.0  ;;  %v1608_v13 = vsel %vm457_vm0, %v1604_v7, 0.0  ;;  %2707 = vmatpush3.bf16.msra.mxu0 %v2706_v8  ;;  %v1610_v23 = vsel %vm457_vm0, %v1605_v1, 0.0 }
 0x503   : > { %v1609_v22 = vadd.f32 %v1608_v13, %v1607_v11  ;;  %2708 = vmatprep.subr.bf16.mxu0 %v2823_v10  ;;  %v1612_v16 = vsel %vm457_vm0, %v1606_v14, 0.0  ;;  %v1749_v13 = vsub.s32 4, %v3107_v17 }
 0x505   : > { %v1611_v15 = vadd.f32 %v1610_v23, %v1609_v22 }
 0x506   : > { %2710 = vmatpush3.bf16.msra.mxu0 %v2709_v4 }
 0x507   : > { %v1613_v19 = vadd.f32 %v1612_v16, %v1611_v15  ;;  %2717 = vmatprep.subr.bf16.mxu0 %v2823_v10 }
 0x509   : > { %v1614_v24 = vrot.slane %v1613_v19, 4  ;;  %2585 = vmatmul.mubr.msk.f32.vlgmr.msra.gmra.mrb[8].mxu0 %vm457_vm0, %v1513_v20 }
 0x50a   : > { %2606 = vmatprep.mubr.msk.f32.mxu0 %vm2824_vm1, %v2825_v18 }
 0x50b   : > { %v1615_v25 = vadd.f32 %v1614_v24, %v1613_v19 }
 0x50d   : > { %v1616_v21 = vrot.slane %v1615_v25, 2 }
 0x50f   : > { %v1617_v26 = vadd.f32 %v1616_v21, %v1615_v25  ;;  %v1839_v25 = vpop.permute.xlu0 %1838 }
 0x511   : > { %v1618_v27 = vrot.slane %v1617_v26, 1 }
 0x513   : > { %v1619_v28 = vadd.f32 %v1618_v27, %v1617_v26 }
 0x515   : > { %v1620_v32 = vsub.f32 %v3066_v44, %v1619_v28 }
 0x517   : > { %v1621_v40 = vmul.f32 %v1620_v32, %v3096_v12 }
 0x519   : > { %v1625_v33 = vrot.slane %v1621_v40, %v1624_v29 }
 0x51b   : > { %v1628_v34 = vmul.f32 %v1625_v33, %v1597_v5  ;;  %v1626_v35 = vmul.f32 %v1625_v33, %v1589_v58  ;;  %v1627_v38 = vmul.f32 %v1625_v33, %v1593_v51  ;;  %v1629_v41 = vmul.f32 %v1625_v33, %v1601_v55  ;;  %v1726_v58 = vpop.permute.xlu1 %1725 }
 0x51d   : > { %v1632_v43 = vmul.f32 %v1628_v34, %v3053_v36  ;;  %v1630_v45 = vmul.f32 %v1626_v35, %v3040_v30  ;;  %v1631_v9 = vmul.f32 %v1627_v38, %v3045_v31  ;;  %v1633_v46 = vmul.f32 %v1629_v41, %v3058_v37 }
 0x51f   : > { %v1636_v47 = vadd.f32 %v1632_v43, %v1511_v3  ;;  %v1634_v48 = vadd.f32 %v1630_v45, %v1509_v0  ;;  %v1635_v49 = vadd.f32 %v1631_v9, %v1510_v2  ;;  %v1637_v50 = vadd.f32 %v1633_v46, %v1512_v63  ;;  %v1843_v15 = vpop.permute.xlu1 %1842 }
 0x520   : > { %v1638_v3 = vrot.slane %v3123_v56, 3 }
 0x521   : > { %v1729_v53 = vmul.f32 %v1718_v52, %v1635_v49  ;;  %v1728_v54 = vmul.f32 %v1714_v39, %v1634_v48  ;;  %v1730_v57 = vmul.f32 %v1722_v42, %v1636_v47  ;;  %v2712_v51 = vpack.c.bf16 %v1635_v49, %v1634_v48 }
 0x522   : > { %v2715_v59 = vpack.c.bf16 %v1637_v50, %v1636_v47  ;;  %v1731_v62 = vmul.f32 %v1726_v58, %v1637_v50 }
 0x523   : > { %v1733_v60 = vsel %vm457_vm0, %v1729_v53, 0.0  ;;  %v1732_v61 = vsel %vm457_vm0, %v1728_v54, 0.0  ;;  %2713 = vmatpush3.bf16.msra.mxu1 %v2712_v51  ;;  %v1735_v6 = vsel %vm457_vm0, %v1730_v57, 0.0  ;;  %v1847_v34 = vpop.permute.xlu1 %1846 }
 0x524   : > { %v1734_v5 = vadd.f32 %v1733_v60, %v1732_v61  ;;  %2714 = vmatprep.subr.bf16.mxu1 %v2823_v10  ;;  %v1737_v63 = vsel %vm457_vm0, %v1731_v62, 0.0  ;;  %v1874_v61 = vsub.s32 5, %v3107_v17 }
 0x526   : > { %v1736_v0 = vadd.f32 %v1735_v6, %v1734_v5 }
 0x527   : > { %2716 = vmatpush3.bf16.msra.mxu1 %v2715_v59  ;;  %v1964_v5 = vpop.permute.xlu1 %1963 }
 0x528   : > { %v1738_v2 = vadd.f32 %v1737_v63, %v1736_v0  ;;  %2723 = vmatprep.subr.bf16.mxu1 %v2823_v10 }
 0x52a   : > { %v1739_v7 = vrot.slane %v1738_v2, 4  ;;  %2596 = vmatmul.mubr.msk.f32.vlgmr.msra.gmra.mrb[14].mxu1 %vm457_vm0, %v1638_v3 }
 0x52b   : > { %2617 = vmatprep.mubr.msk.f32.mxu1 %vm2824_vm1, %v2825_v18 }
 0x52c   : > { %v1740_v1 = vadd.f32 %v1739_v7, %v1738_v2 }
 0x52e   : > { %v1741_v55 = vrot.slane %v1740_v1, 2 }
 0x530   : > { %v1742_v8 = vadd.f32 %v1741_v55, %v1740_v1  ;;  %v1972_v1 = vpop.permute.xlu1 %1971 }
 0x532   : > { %v1743_v4 = vrot.slane %v1742_v8, 1 }
 0x534   : > { %v1744_v11 = vadd.f32 %v1743_v4, %v1742_v8 }
 0x536   : > { %v1745_v14 = vsub.f32 %v3066_v44, %v1744_v11 }
 0x538   : > { %v1746_v22 = vmul.f32 %v1745_v14, %v3096_v12 }
 0x53a   : > { %v1750_v23 = vrot.slane %v1746_v22, %v1749_v13 }
 0x53c   : > { %v1754_v16 = vmul.f32 %v1750_v23, %v1726_v58  ;;  %v1751_v19 = vmul.f32 %v1750_v23, %v1714_v39  ;;  %v1752_v20 = vmul.f32 %v1750_v23, %v1718_v52  ;;  %v1753_v24 = vmul.f32 %v1750_v23, %v1722_v42  ;;  %v1851_v39 = vpop.permute.xlu0 %1850 }
 0x53e   : > { %v1758_v21 = vmul.f32 %v1754_v16, %v3058_v37  ;;  %v1755_v26 = vmul.f32 %v1751_v19, %v3040_v30  ;;  %v1756_v27 = vmul.f32 %v1752_v20, %v3045_v31  ;;  %v1757_v28 = vmul.f32 %v1753_v24, %v3053_v36 }
 0x540   : > { %v1762_v29 = vadd.f32 %v1758_v21, %v1637_v50  ;;  %v1759_v32 = vadd.f32 %v1755_v26, %v1634_v48  ;;  %v1760_v40 = vadd.f32 %v1756_v27, %v1635_v49  ;;  %v1761_v33 = vadd.f32 %v1757_v28, %v1636_v47  ;;  %v1968_v16 = vpop.permute.xlu0 %1967 }
 0x541   : > { %v1763_v50 = vrot.slane %v3123_v56, 4 }
 0x542   : > { %v1853_v35 = vmul.f32 %v1839_v25, %v1759_v32  ;;  %v1854_v38 = vmul.f32 %v1843_v15, %v1760_v40  ;;  %v1855_v41 = vmul.f32 %v1847_v34, %v1761_v33  ;;  %v2718_v43 = vpack.c.bf16 %v1760_v40, %v1759_v32 }
 0x543   : > { %v2721_v42 = vpack.c.bf16 %v1762_v29, %v1761_v33  ;;  %v1856_v46 = vmul.f32 %v1851_v39, %v1762_v29 }
 0x544   : > { %v1857_v45 = vsel %vm457_vm0, %v1853_v35, 0.0  ;;  %v1858_v9 = vsel %vm457_vm0, %v1854_v38, 0.0  ;;  %2719 = vmatpush3.bf16.msra.mxu0 %v2718_v43  ;;  %v1860_v53 = vsel %vm457_vm0, %v1855_v41, 0.0 }
 0x545   : > { %v1859_v52 = vadd.f32 %v1858_v9, %v1857_v45  ;;  %2720 = vmatprep.subr.bf16.mxu0 %v2823_v10  ;;  %v1862_v47 = vsel %vm457_vm0, %v1856_v46, 0.0  ;;  %v1999_v9 = vsub.s32 6, %v3107_v17 }
 0x547   : > { %v1861_v48 = vadd.f32 %v1860_v53, %v1859_v52 }
 0x548   : > { %2722 = vmatpush3.bf16.msra.mxu0 %v2721_v42 }
 0x549   : > { %v1863_v49 = vadd.f32 %v1862_v47, %v1861_v48  ;;  %2729 = vmatprep.subr.bf16.mxu0 %v2823_v10 }
 0x54b   : > { %v1864_v54 = vrot.slane %v1863_v49, 4  ;;  %2607 = vmatmul.mubr.msk.f32.vlgmr.msra.gmra.mrb[10].mxu0 %vm457_vm0, %v1763_v50 }
 0x54c   : > { %2628 = vmatprep.mubr.msk.f32.mxu0 %vm2824_vm1, %v2825_v18 }
 0x54d   : > { %v1865_v57 = vadd.f32 %v1864_v54, %v1863_v49 }
 0x54f   : > { %v1866_v58 = vrot.slane %v1865_v57, 2 }
 0x551   : > { %v1867_v51 = vadd.f32 %v1866_v58, %v1865_v57  ;;  %v2089_v57 = vpop.permute.xlu0 %2088 }
 0x553   : > { %v1868_v59 = vrot.slane %v1867_v51, 1 }
 0x555   : > { %v1869_v60 = vadd.f32 %v1868_v59, %v1867_v51 }
 0x557   : > { %v1870_v62 = vsub.f32 %v3066_v44, %v1869_v60 }
 0x559   : > { %v1871_v6 = vmul.f32 %v1870_v62, %v3096_v12 }
 0x55b   : > { %v1875_v0 = vrot.slane %v1871_v6, %v1874_v61 }
 0x55d   : > { %v1878_v63 = vmul.f32 %v1875_v0, %v1847_v34  ;;  %v1876_v2 = vmul.f32 %v1875_v0, %v1839_v25  ;;  %v1877_v3 = vmul.f32 %v1875_v0, %v1843_v15  ;;  %v1879_v7 = vmul.f32 %v1875_v0, %v1851_v39  ;;  %v1976_v25 = vpop.permute.xlu1 %1975 }
 0x55f   : > { %v1882_v55 = vmul.f32 %v1878_v63, %v3053_v36  ;;  %v1880_v8 = vmul.f32 %v1876_v2, %v3040_v30  ;;  %v1881_v4 = vmul.f32 %v1877_v3, %v3045_v31  ;;  %v1883_v11 = vmul.f32 %v1879_v7, %v3058_v37 }
 0x561   : > { %v1886_v13 = vadd.f32 %v1882_v55, %v1761_v33  ;;  %v1884_v14 = vadd.f32 %v1880_v8, %v1759_v32  ;;  %v1885_v22 = vadd.f32 %v1881_v4, %v1760_v40  ;;  %v1887_v23 = vadd.f32 %v1883_v11, %v1762_v29  ;;  %v2093_v48 = vpop.permute.xlu1 %2092 }
 0x562   : > { %v1888_v33 = vrot.slane %v3123_v56, 5 }
 0x563   : > { %v1979_v19 = vmul.f32 %v1968_v16, %v1885_v22  ;;  %v1978_v20 = vmul.f32 %v1964_v5, %v1884_v14  ;;  %v1980_v24 = vmul.f32 %v1972_v1, %v1886_v13  ;;  %v2724_v15 = vpack.c.bf16 %v1885_v22, %v1884_v14 }
 0x564   : > { %v2727_v21 = vpack.c.bf16 %v1887_v23, %v1886_v13  ;;  %v1981_v28 = vmul.f32 %v1976_v25, %v1887_v23 }
 0x565   : > { %v1983_v26 = vsel %vm457_vm0, %v1979_v19, 0.0  ;;  %v1982_v27 = vsel %vm457_vm0, %v1978_v20, 0.0  ;;  %2725 = vmatpush3.bf16.msra.mxu1 %v2724_v15  ;;  %v1985_v35 = vsel %vm457_vm0, %v1980_v24, 0.0  ;;  %v2097_v63 = vpop.permute.xlu1 %2096 }
 0x566   : > { %v1984_v34 = vadd.f32 %v1983_v26, %v1982_v27  ;;  %2726 = vmatprep.subr.bf16.mxu1 %v2823_v10  ;;  %v1987_v29 = vsel %vm457_vm0, %v1981_v28, 0.0 }
 0x568   : > { %v1986_v32 = vadd.f32 %v1985_v35, %v1984_v34 }
 0x569   : > { %2728 = vmatpush3.bf16.msra.mxu1 %v2727_v21 }
 0x56a   : > { %v1988_v40 = vadd.f32 %v1987_v29, %v1986_v32  ;;  %2735 = vmatprep.subr.bf16.mxu1 %v2823_v10  ;;  %v2810_v29 = vld [vmem:[%s3293_s11 + $0x10] sm:$0xff] }
 0x56c   : > { %v1989_v38 = vrot.slane %v1988_v40, 4  ;;  %2618 = vmatmul.mubr.msk.f32.vlgmr.msra.gmra.mrb[16].mxu1 %vm457_vm0, %v1888_v33 }
 0x56d   : > { %2639 = vmatprep.mubr.msk.f32.mxu1 %vm2824_vm1, %v2825_v18 }
 0x56e   : > { %v1990_v41 = vadd.f32 %v1989_v38, %v1988_v40  ;;  %v2813_v38 = vld [vmem:[%s3293_s11 + $0x8] sm:$0xff] }
 0x570   : > { %v1991_v39 = vrot.slane %v1990_v41, 2 }
 0x572   : > { %v1992_v43 = vadd.f32 %v1991_v39, %v1990_v41 }
 0x574   : > { %v1993_v42 = vrot.slane %v1992_v43, 1 }
 0x576   : > { %v1994_v45 = vadd.f32 %v1993_v42, %v1992_v43 }
 0x578   : > { %v1995_v46 = vsub.f32 %v3066_v44, %v1994_v45 }
 0x57a   : > { %v1996_v52 = vmul.f32 %v1995_v46, %v3096_v12 }
 0x57c   : > { %v2000_v53 = vrot.slane %v1996_v52, %v1999_v9  ;;  %v2138_v52 = vrot.slane %v3123_v56, 7 }
 0x57e   : > { %v2004_v47 = vmul.f32 %v2000_v53, %v1976_v25  ;;  %v2001_v49 = vmul.f32 %v2000_v53, %v1964_v5  ;;  %v2002_v50 = vmul.f32 %v2000_v53, %v1968_v16  ;;  %v2003_v54 = vmul.f32 %v2000_v53, %v1972_v1  ;;  %v2101_v5 = vpop.permute.xlu0 %2100 }
 0x57f   : > { %v2124_v25 = vsub.s32 7, %v3107_v17 }
 0x580   : > { %v2008_v58 = vmul.f32 %v2004_v47, %v3058_v37  ;;  %v2005_v51 = vmul.f32 %v2001_v49, %v3040_v30  ;;  %v2006_v59 = vmul.f32 %v2002_v50, %v3045_v31  ;;  %v2007_v60 = vmul.f32 %v2003_v54, %v3053_v36 }
 0x582   : > { %v2012_v61 = vadd.f32 %v2008_v58, %v1887_v23  ;;  %v2009_v62 = vadd.f32 %v2005_v51, %v1884_v14  ;;  %v2010_v6 = vadd.f32 %v2006_v59, %v1885_v22  ;;  %v2011_v0 = vadd.f32 %v2007_v60, %v1886_v13  ;;  %v2215_v51 = vld [vmem:[%s3294_s12 + $0x10] sm:$0xff]  ;;  %v2216_v59 = vld [vmem:[%s3294_s12 + $0x18] sm:$0xff] }
 0x583   : > { %v2013_v14 = vrot.slane %v3123_v56, 6  ;;  %v2214_v56 = vld [vmem:[%s3294_s12 + $0x8] sm:$0xff]  ;;  %v2745_v60 = vpack.c.bf16 %v2216_v59, %v2215_v51 }
 0x584   : > { %v2103_v2 = vmul.f32 %v2089_v57, %v2009_v62  ;;  %v2104_v3 = vmul.f32 %v2093_v48, %v2010_v6  ;;  %v2105_v7 = vmul.f32 %v2097_v63, %v2011_v0  ;;  %v2730_v55 = vpack.c.bf16 %v2010_v6, %v2009_v62 }
 0x585   : > { %v2733_v1 = vpack.c.bf16 %v2012_v61, %v2011_v0  ;;  %v2106_v30 = vmul.f32 %v2101_v5, %v2012_v61 }
 0x586   : > { %v2107_v8 = vsel %vm457_vm0, %v2103_v2, 0.0  ;;  %v2108_v37 = vsel %vm457_vm0, %v2104_v3, 0.0  ;;  %2731 = vmatpush3.bf16.msra.mxu0 %v2730_v55  ;;  %v2110_v31 = vsel %vm457_vm0, %v2105_v7, 0.0  ;;  %v2814_v55 = vld [vmem:[%s2920_s30] sm:$0xff] }
 0x587   : > { %v2109_v4 = vadd.f32 %v2108_v37, %v2107_v8  ;;  %2732 = vmatprep.subr.bf16.mxu0 %v2823_v10  ;;  %v2112_v11 = vsel %vm457_vm0, %v2106_v30, 0.0 }
 0x589   : > { %v2111_v36 = vadd.f32 %v2110_v31, %v2109_v4 }
 0x58a   : > { %2734 = vmatpush3.bf16.msra.mxu0 %v2733_v1 }
 0x58b   : > { %v2113_v13 = vadd.f32 %v2112_v11, %v2111_v36  ;;  %2741 = vmatprep.subr.bf16.mxu0 %v2823_v10 }
 0x58d   : > { %v2114_v22 = vrot.slane %v2113_v13, 4  ;;  %2629 = vmatmul.mubr.msk.f32.vlgmr.msra.gmra.mrb[12].mxu0 %vm457_vm0, %v2013_v14 }
 0x58e   : > { %2650 = vmatprep.mubr.msk.f32.mxu0 %vm2824_vm1, %v2825_v18 }
 0x58f   : > { %v2115_v23 = vadd.f32 %v2114_v22, %v2113_v13 }
 0x591   : > { %v2116_v16 = vrot.slane %v2115_v23, 2 }
 0x593   : > { %v2117_v19 = vadd.f32 %v2116_v16, %v2115_v23 }
 0x595   : > { %v2118_v20 = vrot.slane %v2117_v19, 1 }
 0x597   : > { %v2119_v24 = vadd.f32 %v2118_v20, %v2117_v19 }
 0x599   : > { %v2120_v15 = vsub.f32 %v3066_v44, %v2119_v24  ;;  %v2811_v44 = vld [vmem:[%s3293_s11 + $0x18] sm:$0xff] }
 0x59a   : > { %v1331_v26 = vpop.f32.mrb[6].mxu0 }
 0x59b   : > { %v2121_v21 = vmul.f32 %v2120_v15, %v3096_v12  ;;  %1336 = vst.msk [vmem:[#allocation2] sm:$0x1] %vm1335_vm10, %v1331_v26  ;;  %v2564_v27 = vpop.f32.mrb[7].mxu0  ;;  %v2812_v12 = vld [vmem:[%s3293_s11] sm:$0xff] }
 0x59d   : > { %v2125_v28 = vrot.slane %v2121_v21, %v2124_v25 }
 0x59f   : > { %v2128_v34 = vmul.f32 %v2125_v28, %v2097_v63  ;;  %v2129_v35 = vmul.f32 %v2125_v28, %v2101_v5  ;;  %v2126_v32 = vmul.f32 %v2125_v28, %v2089_v57  ;;  %v2127_v18 = vmul.f32 %v2125_v28, %v2093_v48  ;;  %v2213_v57 = vld [vmem:[%s3294_s12] sm:$0xff] }
 0x5a0   : > { %v2742_v58 = vpack.c.bf16 %v2214_v56, %v2213_v57 }
 0x5a1   : > { %v2132_v40 = vmul.f32 %v2810_v29, %v2128_v34  ;;  %v2133_v17 = vmul.f32 %v2811_v44, %v2129_v35  ;;  %v2130_v33 = vmul.f32 %v2812_v12, %v2126_v32  ;;  %v2131_v41 = vmul.f32 %v2813_v38, %v2127_v18 }
 0x5a2   : > { %2743 = vmatpush3.bf16.msra.mxu0 %v2742_v58 }
 0x5a3   : > { %v2136_v39 = vadd.f32 %v2132_v40, %v2011_v0  ;;  %v2137_v43 = vadd.f32 %v2133_v17, %v2012_v61  ;;  %v2134_v42 = vadd.f32 %v2130_v33, %v2009_v62  ;;  %v2135_v45 = vadd.f32 %v2131_v41, %v2010_v6  ;;  %2744 = vmatprep.subr.bf16.mxu0 %v2823_v10 }
 0x5a5   : > { %v2739_v9 = vpack.c.bf16 %v2137_v43, %v2136_v39  ;;  %v2736_v46 = vpack.c.bf16 %v2135_v45, %v2134_v42 }
 0x5a6   : > { %2746 = vmatpush3.bf16.msra.mxu0 %v2745_v60 }
 0x5a7   : > { %2737 = vmatpush3.bf16.msra.mxu1 %v2736_v46 }
 0x5a8   : > { %2738 = vmatprep.subr.bf16.mxu1 %v2823_v10 }
 0x5ab   : > { %2740 = vmatpush3.bf16.msra.mxu1 %v2739_v9 }
 0x5ae   : > { %2640 = vmatmul.mubr.msk.f32.vlgmr.msra.gmra.mrb[18].mxu1 %vm457_vm0, %v2138_v52 }
 0x5bb   : > { %v1457_v53 = vpop.f32.mrb[12].mxu1 }
 0x5bc   : > { %1461 = vst.msk [vmem:[#allocation2 + $0x1] sm:$0x1] %vm1335_vm10, %v1457_v53  ;;  %v2575_v48 = vpop.f32.mrb[13].mxu1 }
 0x5dc   : > { %v1582_v47 = vpop.f32.mrb[8].mxu0 }
 0x5dd   : > { %1586 = vst.msk [vmem:[#allocation2 + $0x2] sm:$0x1] %vm1335_vm10, %v1582_v47  ;;  %v2586_v49 = vpop.f32.mrb[9].mxu0 }
 0x5fd   : > { %v1707_v50 = vpop.f32.mrb[14].mxu1 }
 0x5fe   : > { %1711 = vst.msk [vmem:[#allocation2 + $0x3] sm:$0x1] %vm1335_vm10, %v1707_v50  ;;  %v2597_v54 = vpop.f32.mrb[15].mxu1 }
 0x61e   : > { %v1832_v61 = vpop.f32.mrb[10].mxu0 }
 0x61f   : > { %1836 = vst.msk [vmem:[#allocation2 + $0x4] sm:$0x1] %vm1335_vm10, %v1832_v61  ;;  %v2608_v62 = vpop.f32.mrb[11].mxu0 }
 0x63f   : > { %v1957_v6 = vpop.f32.mrb[16].mxu1 }
 0x640   : > { %1961 = vst.msk [vmem:[#allocation2 + $0x5] sm:$0x1] %vm1335_vm10, %v1957_v6  ;;  %v2619_v0 = vpop.f32.mrb[17].mxu1 }
 0x660   : > { %v2082_v63 = vpop.f32.mrb[12].mxu0 }
 0x661   : > { %2086 = vst.msk [vmem:[#allocation2 + $0x6] sm:$0x1] %vm1335_vm10, %v2082_v63  ;;  %v2630_v2 = vpop.f32.mrb[13].mxu0 }
 0x681   : > { %v2207_v3 = vpop.f32.mrb[18].mxu1 }
 0x682   : > { %2211 = vst.msk [vmem:[#allocation2 + $0x7] sm:$0x1] %vm1335_vm10, %v2207_v3  ;;  %v2641_v7 = vpop.f32.mrb[19].mxu1 }
 0x689   : > { %v2212_v10 = vld [vmem:[#allocation2] sm:$0xff] }
 0x68a   : > { %2651 = vmatmul.mubr.msk.f32.vlgmr.msra.gmra.mrb[14].mxu0 %vm457_vm0, %v2212_v10 }
 0x75d   : > { %v2286_v5 = vpop.f32.mrb[14].mxu0 }
 0x75e   : > { %v2290_v1 = vadd.f32 %v2814_v55, %v2286_v5  ;;  %v2652_v8 = vpop.f32.mrb[15].mxu0 }
 0x760   : > { %2291 = vst.msk [vmem:[%s455_s20] sm:$0xff] %vm457_vm0, %v2290_v1 }
 0x761 PF: > { %s23_s25 = sadd.s32 1, %s2821_s25  }
 0x762   : > { %p20_p4 = scmp.ge.s32.totalorder %s23_s25, 4  }
 0x764   :  { %22 = sbr.rel (!%p20_p4) target bundleno = 1 (0x1), region = 105 }

</bundles_post_ra>
